<compile_context>
chip_gen: v7x
topology: tpu7x:2x2x1
jax: 0.10.0
libtpu: 0.0.40
codegen_flags: <defaults>
</compile_context>

<pallas_src>
import functools
import math

import jax
import jax.numpy as jnp
from jax.experimental import pallas as pl
from jax.experimental.pallas import tpu as pltpu


# ----------------------------------------------------------------------------
# Helpers
# ----------------------------------------------------------------------------

def _pick_tile_m(M):
    """Pick a row-tile size: split M across >=2 programs (v7x megacore) when
    cleanly divisible, keep tiles a multiple of 8 sublanes, cap at 256 rows."""
    if M % 16 == 0:
        t = M // 2
        while t > 256 and t % 2 == 0 and M % (t // 2) == 0:
            t //= 2
        if t % 8 == 0 and M % t == 0:
            return t
    return M


# ----------------------------------------------------------------------------
# Pallas kernels
# ----------------------------------------------------------------------------

def _attn_block_kernel(*refs, n_heads, scale, mask_fill, masked):
    """Fused MHA sub-layer for one batch element:
       LN( xq + Wo @ MHA(xq Wq, xkv Wkv) )    (per-head attention inside)."""
    if masked:
        (xq_ref, xkv_ref, wq_ref, bq_ref, wkv_ref, bkv_ref,
         wo_ref, bo_ref, g_ref, beta_ref, mask_ref, o_ref) = refs
    else:
        (xq_ref, xkv_ref, wq_ref, bq_ref, wkv_ref, bkv_ref,
         wo_ref, bo_ref, g_ref, beta_ref, o_ref) = refs
        mask_ref = None

    xq = xq_ref[0]                     # (Sq, D)
    xkv = xkv_ref[0]                   # (Sk, D)
    Sq, D = xq.shape
    hd = D // n_heads

    # Projections (weights stay resident across the batch grid).
    q = jnp.dot(xq, wq_ref[...], preferred_element_type=jnp.float32) + bq_ref[...]
    kv = jnp.dot(xkv, wkv_ref[...], preferred_element_type=jnp.float32) + bkv_ref[...]
    k = kv[:, :D]
    v = kv[:, D:]

    if masked:
        mask = mask_ref[...]

    # Per-head scores: contract over hd via dot_general (no k.T materialized).
    dn = (((1,), (1,)), ((), ()))
    scores = []
    for h in range(n_heads):
        sl = slice(h * hd, (h + 1) * hd)
        s = jax.lax.dot_general(q[:, sl], k[:, sl], dn,
                                preferred_element_type=jnp.float32) * scale
        if masked:
            # Original: fill -1e9 BEFORE the second 1/sqrt(key_len) scale, so
            # the post-scale masked logit is -1e9/sqrt(key_len).
            s = jnp.where(mask != 0, mask_fill, s)
        scores.append(s)

    # Stack heads along sublanes -> one softmax pass for all heads.
    s_all = jnp.concatenate(scores, axis=0)                  # (H*Sq, Sk)
    s_all = s_all - jnp.max(s_all, axis=-1, keepdims=True)
    p = jnp.exp(s_all)
    attn = p / jnp.sum(p, axis=-1, keepdims=True)

    # Weighted sum per head, merged head-major into a lane-dense (Sq, D) slab.
    outs = []
    for h in range(n_heads):
        a_h = attn[h * Sq:(h + 1) * Sq]                      # (Sq, Sk)
        v_h = v[:, h * hd:(h + 1) * hd]                      # (Sk, hd)
        outs.append(jnp.dot(a_h, v_h, preferred_element_type=jnp.float32))
    ctx = jnp.concatenate(outs, axis=-1)                     # (Sq, D)

    # Output projection + residual + LayerNorm (eps=1e-5, biased variance).
    y = jnp.dot(ctx, wo_ref[...], preferred_element_type=jnp.float32) + bo_ref[...]
    z = xq + y
    mean = jnp.mean(z, axis=-1, keepdims=True)
    zc = z - mean
    var = jnp.mean(zc * zc, axis=-1, keepdims=True)
    inv = jax.lax.rsqrt(var + 1e-5)
    o_ref[0] = (zc * inv * g_ref[...] + beta_ref[...]).astype(o_ref.dtype)


def _ffn_block_kernel(x_ref, w1_ref, b1_ref, w2_ref, b2_ref, g_ref, beta_ref, o_ref):
    """Fused feed-forward sub-layer: LN( x + W2 relu(W1 x + b1) + b2 ).
       The (tile_m, d_ff) intermediate stays on-chip."""
    x = x_ref[...]
    h = jnp.dot(x, w1_ref[...], preferred_element_type=jnp.float32) + b1_ref[...]
    h = jnp.maximum(h, 0.0)
    y = jnp.dot(h, w2_ref[...], preferred_element_type=jnp.float32) + b2_ref[...]
    z = x + y
    mean = jnp.mean(z, axis=-1, keepdims=True)
    zc = z - mean
    var = jnp.mean(zc * zc, axis=-1, keepdims=True)
    inv = jax.lax.rsqrt(var + 1e-5)
    o_ref[...] = (zc * inv * g_ref[...] + beta_ref[...]).astype(o_ref.dtype)


def _linear_kernel(x_ref, w_ref, b_ref, o_ref):
    o_ref[...] = (jnp.dot(x_ref[...], w_ref[...], preferred_element_type=jnp.float32)
                  + b_ref[...]).astype(o_ref.dtype)


# ----------------------------------------------------------------------------
# pallas_call wrappers
# ----------------------------------------------------------------------------

def attention_block(xq, xkv, p_attn, ln_g, ln_b, mask, n_heads):
    """xq: (B, Sq, D), xkv: (B, Sk, D) -> LN(xq + MHA(xq, xkv, xkv))  (B, Sq, D)."""
    B, Sq, D = xq.shape
    Sk = xkv.shape[1]
    hd = D // n_heads
    scale = 1.0 / (math.sqrt(hd) * math.sqrt(Sk))   # folded double scaling
    mask_fill = -1e9 / math.sqrt(Sk)
    masked = mask is not None

    kernel = functools.partial(_attn_block_kernel, n_heads=n_heads, scale=scale,
                               mask_fill=mask_fill, masked=masked)

    in_specs = [
        pl.BlockSpec((1, Sq, D), lambda b: (b, 0, 0)),
        pl.BlockSpec((1, Sk, D), lambda b: (b, 0, 0)),
        pl.BlockSpec((D, D), lambda b: (0, 0)),
        pl.BlockSpec((1, D), lambda b: (0, 0)),
        pl.BlockSpec((D, 2 * D), lambda b: (0, 0)),
        pl.BlockSpec((1, 2 * D), lambda b: (0, 0)),
        pl.BlockSpec((D, D), lambda b: (0, 0)),
        pl.BlockSpec((1, D), lambda b: (0, 0)),
        pl.BlockSpec((1, D), lambda b: (0, 0)),
        pl.BlockSpec((1, D), lambda b: (0, 0)),
    ]
    args = [xq, xkv,
            p_attn['wq'], p_attn['bq'].reshape(1, D),
            p_attn['wkv'], p_attn['bkv'].reshape(1, 2 * D),
            p_attn['wo'], p_attn['bo'].reshape(1, D),
            ln_g.reshape(1, D), ln_b.reshape(1, D)]
    if masked:
        in_specs.append(pl.BlockSpec((Sq, Sk), lambda b: (0, 0)))
        args.append(mask)

    return pl.pallas_call(
        kernel,
        out_shape=jax.ShapeDtypeStruct((B, Sq, D), jnp.float32),
        grid=(B,),
        in_specs=in_specs,
        out_specs=pl.BlockSpec((1, Sq, D), lambda b: (b, 0, 0)),
        compiler_params=pltpu.CompilerParams(dimension_semantics=("parallel",)),
    )(*args)


def ffn_block(x, p_ff1, p_ff2, ln_g, ln_b):
    """x: (M, D) -> LN(x + FF(x))  (M, D). Row-tiled, weights resident."""
    M, D = x.shape
    d_ff = p_ff1['w'].shape[1]
    tm = _pick_tile_m(M)
    return pl.pallas_call(
        _ffn_block_kernel,
        out_shape=jax.ShapeDtypeStruct((M, D), jnp.float32),
        grid=(M // tm,),
        in_specs=[
            pl.BlockSpec((tm, D), lambda i: (i, 0)),
            pl.BlockSpec((D, d_ff), lambda i: (0, 0)),
            pl.BlockSpec((1, d_ff), lambda i: (0, 0)),
            pl.BlockSpec((d_ff, D), lambda i: (0, 0)),
            pl.BlockSpec((1, D), lambda i: (0, 0)),
            pl.BlockSpec((1, D), lambda i: (0, 0)),
            pl.BlockSpec((1, D), lambda i: (0, 0)),
        ],
        out_specs=pl.BlockSpec((tm, D), lambda i: (i, 0)),
        compiler_params=pltpu.CompilerParams(dimension_semantics=("parallel",)),
    )(x, p_ff1['w'], p_ff1['b'].reshape(1, d_ff), p_ff2['w'],
      p_ff2['b'].reshape(1, D), ln_g.reshape(1, D), ln_b.reshape(1, D))


def linear(x, w, b):
    """x: (M, K) @ w: (K, N) + b: (N,), row-tiled with 'parallel' semantics."""
    M, K = x.shape
    N = w.shape[1]
    tm = _pick_tile_m(M)
    return pl.pallas_call(
        _linear_kernel,
        out_shape=jax.ShapeDtypeStruct((M, N), jnp.float32),
        grid=(M // tm,),
        in_specs=[
            pl.BlockSpec((tm, K), lambda i: (i, 0)),
            pl.BlockSpec((K, N), lambda i: (0, 0)),
            pl.BlockSpec((1, N), lambda i: (0, 0)),
        ],
        out_specs=pl.BlockSpec((tm, N), lambda i: (i, 0)),
        compiler_params=pltpu.CompilerParams(dimension_semantics=("parallel",)),
    )(x, w, b.reshape(1, N))


# ----------------------------------------------------------------------------
# Model (plain-JAX glue calling the fused Pallas kernels)
# ----------------------------------------------------------------------------

def encoder_layer(p, src, n_heads):
    B, S, D = src.shape
    src = attention_block(src, src, p['self_attn'], p['ln1']['g'], p['ln1']['b'],
                          None, n_heads)
    out = ffn_block(src.reshape(B * S, D), p['ff1'], p['ff2'],
                    p['ln2']['g'], p['ln2']['b'])
    return out.reshape(B, S, D)


def decoder_layer(p, tgt, mem, tgt_mask, n_heads):
    B, St, D = tgt.shape
    tgt = attention_block(tgt, tgt, p['self_attn'], p['ln1']['g'], p['ln1']['b'],
                          tgt_mask, n_heads)
    tgt = attention_block(tgt, mem, p['src_attn'], p['ln2']['g'], p['ln2']['b'],
                          None, n_heads)
    out = ffn_block(tgt.reshape(B * St, D), p['ff1'], p['ff2'],
                    p['ln3']['g'], p['ln3']['b'])
    return out.reshape(B, St, D)


def positional_encoding_table(max_len, d_model):
    pos = jnp.arange(max_len, dtype=jnp.float32)[:, None]
    div = jnp.exp(jnp.arange(0, d_model, 2, dtype=jnp.float32)
                  * (-math.log(10000.0) / d_model))
    pe_sin = jnp.sin(pos * div)
    pe_cos = jnp.cos(pos * div)
    return jnp.stack([pe_sin, pe_cos], axis=-1).reshape(max_len, d_model)


def generate_square_subsequent_mask(sz):
    tri = jnp.tril(jnp.ones((sz, sz), jnp.float32))
    return jnp.where(tri == 0, jnp.float32(-1e9), jnp.float32(0.0))


@functools.partial(jax.jit, static_argnames=('d_model', 'n_heads'))
def transformer_forward(params, src_ids, tgt_ids, *, d_model, n_heads):
    B, Ss = src_ids.shape
    _, St = tgt_ids.shape

    tgt_mask = generate_square_subsequent_mask(St)

    scale = math.sqrt(d_model)
    # Embedding gather stays in plain JAX (no clean tiny-Pallas equivalent).
    src = jnp.take(params['src_embed'], src_ids, axis=0) * scale    # (B, Ss, D)
    tgt = jnp.take(params['tgt_embed'], tgt_ids, axis=0) * scale    # (B, St, D)

    # PositionalEncoding: x + pe[:x.size(0)] -> indexed by BATCH, broadcast over seq
    # (reproduces the original module's quirk).
    pe = params['pe']
    src = src + pe[:B][:, None, :]
    tgt = tgt + pe[:B][:, None, :]
    # TODO(synk): nn.Dropout(p=0.1) treated as identity (eval mode).

    for lp in params['enc']:
        src = encoder_layer(lp, src, n_heads)
    for lp in params['dec']:
        tgt = decoder_layer(lp, tgt, src, tgt_mask, n_heads)

    # Final projection: pad output dim to a lane-dense multiple of 128, slice back.
    fc_w, fc_b = params['fc']['w'], params['fc']['b']
    n_out = fc_w.shape[1]
    pad = (-n_out) % 128
    if pad:
        fc_w = jnp.pad(fc_w, ((0, 0), (0, pad)))
        fc_b = jnp.pad(fc_b, (0, pad))
    out = linear(tgt.reshape(B * St, d_model), fc_w, fc_b)
    return out[:, :n_out].reshape(B, St, n_out)


# ----------------------------------------------------------------------------
# Deterministic parameter init
# ----------------------------------------------------------------------------

def init_params(key, input_size, output_size, d_model, num_layers, d_ff, max_len):
    keys = iter(jax.random.split(key, 512))

    def lin(din, dout):
        return {'w': jax.random.normal(next(keys), (din, dout), jnp.float32) * 0.02,
                'b': jnp.zeros((dout,), jnp.float32)}

    def mha():
        # K/V weights packed into one (D, 2D) matrix (single fused projection).
        return {'wq': jax.random.normal(next(keys), (d_model, d_model), jnp.float32) * 0.02,
                'bq': jnp.zeros((d_model,), jnp.float32),
                'wkv': jax.random.normal(next(keys), (d_model, 2 * d_model), jnp.float32) * 0.02,
                'bkv': jnp.zeros((2 * d_model,), jnp.float32),
                'wo': jax.random.normal(next(keys), (d_model, d_model), jnp.float32) * 0.02,
                'bo': jnp.zeros((d_model,), jnp.float32)}

    def ln():
        return {'g': jnp.ones((d_model,), jnp.float32),
                'b': jnp.zeros((d_model,), jnp.float32)}

    enc = [{'self_attn': mha(), 'ff1': lin(d_model, d_ff), 'ff2': lin(d_ff, d_model),
            'ln1': ln(), 'ln2': ln()} for _ in range(num_layers)]
    dec = [{'self_attn': mha(), 'src_attn': mha(), 'ff1': lin(d_model, d_ff),
            'ff2': lin(d_ff, d_model), 'ln1': ln(), 'ln2': ln(), 'ln3': ln()}
           for _ in range(num_layers)]

    return {
        'enc': enc,
        'dec': dec,
        'fc': lin(d_model, output_size),
        'src_embed': jax.random.normal(next(keys), (input_size, d_model), jnp.float32),
        'tgt_embed': jax.random.normal(next(keys), (output_size, d_model), jnp.float32),
        'pe': positional_encoding_table(max_len, d_model),
    }


# ----------------------------------------------------------------------------
# Main
# ----------------------------------------------------------------------------

if __name__ == "__main__":
    INPUT_SIZE = 50      # src vocab
    OUTPUT_SIZE = 40     # tgt vocab / output dim
    D_MODEL = 128
    N_HEADS = 8
    NUM_LAYERS = 2
    D_FF = 2048          # hardcoded in the PyTorch feed_forward
    MAX_LEN = 64

    B, SRC_LEN, TGT_LEN = 2, 8, 8

    key = jax.random.PRNGKey(0)
    pkey, skey, tkey = jax.random.split(key, 3)

    params = init_params(pkey, INPUT_SIZE, OUTPUT_SIZE, D_MODEL, NUM_LAYERS, D_FF, MAX_LEN)

    src_ids = jax.random.randint(skey, (B, SRC_LEN), 0, INPUT_SIZE, dtype=jnp.int32)
    tgt_ids = jax.random.randint(tkey, (B, TGT_LEN), 0, OUTPUT_SIZE, dtype=jnp.int32)

    out = transformer_forward(params, src_ids, tgt_ids, d_model=D_MODEL, n_heads=N_HEADS)
    out = jax.block_until_ready(out)

    assert out.shape == (B, TGT_LEN, OUTPUT_SIZE), out.shape
    assert bool(jnp.all(jnp.isfinite(out)))
    print("KERNEL_OK")
</pallas_src>

<mosaic_0001>
module attributes {stable_mosaic.version = 11 : i64} {
  func.func @_ffn_block_kernel(%arg0: i32, %arg1: memref<8x128xf32, #tpu.memory_space<vmem>>, %arg2: memref<128x2048xf32, #tpu.memory_space<vmem>>, %arg3: memref<1x2048xf32, #tpu.memory_space<vmem>>, %arg4: memref<2048x128xf32, #tpu.memory_space<vmem>>, %arg5: memref<1x128xf32, #tpu.memory_space<vmem>>, %arg6: memref<1x128xf32, #tpu.memory_space<vmem>>, %arg7: memref<1x128xf32, #tpu.memory_space<vmem>>, %arg8: memref<8x128xf32, #tpu.memory_space<vmem>>) attributes {dimension_semantics = [#tpu.dimension_semantics<parallel>], iteration_bounds = array<i64: 2>, scalar_prefetch = 0 : i64, scratch_operands = 0 : i64, tpu.core_type = #tpu.core_type<tc>, window_params = [{transform_indices = @transform_0, window_bounds = array<i64: 8, 128>}, {pipeline_mode = #tpu.pipeline_mode<synchronous>, transform_indices = @transform_1, window_bounds = array<i64: 128, 2048>}, {pipeline_mode = #tpu.pipeline_mode<synchronous>, transform_indices = @transform_2, window_bounds = array<i64: 1, 2048>}, {pipeline_mode = #tpu.pipeline_mode<synchronous>, transform_indices = @transform_3, window_bounds = array<i64: 2048, 128>}, {pipeline_mode = #tpu.pipeline_mode<synchronous>, transform_indices = @transform_4, window_bounds = array<i64: 1, 128>}, {pipeline_mode = #tpu.pipeline_mode<synchronous>, transform_indices = @transform_5, window_bounds = array<i64: 1, 128>}, {pipeline_mode = #tpu.pipeline_mode<synchronous>, transform_indices = @transform_6, window_bounds = array<i64: 1, 128>}, {transform_indices = @transform_7, window_bounds = array<i64: 8, 128>}]} {
    %c0 = arith.constant 0 : index
    %c0_0 = arith.constant 0 : index
    %0 = vector.load %arg1[%c0, %c0_0] : memref<8x128xf32, #tpu.memory_space<vmem>>, vector<8x128xf32>
    %c0_1 = arith.constant 0 : index
    %c0_2 = arith.constant 0 : index
    %1 = vector.load %arg2[%c0_1, %c0_2] : memref<128x2048xf32, #tpu.memory_space<vmem>>, vector<128x2048xf32>
    %cst = arith.constant dense<0.000000e+00> : vector<8x2048xf32>
    %2 = tpu.matmul %0, %1, %cst {dimension_numbers = #tpu.dot_dimension_numbers<[1], [0], [0], [1], [0, 0, 1, 1], [], []>} : vector<8x128xf32>, vector<128x2048xf32>, vector<8x2048xf32> -> vector<8x2048xf32>
    %c0_3 = arith.constant 0 : index
    %c0_4 = arith.constant 0 : index
    %3 = vector.load %arg3[%c0_3, %c0_4] : memref<1x2048xf32, #tpu.memory_space<vmem>>, vector<1x2048xf32>
    %4 = vector.broadcast %3 : vector<1x2048xf32> to vector<8x2048xf32>
    %5 = arith.addf %2, %4 : vector<8x2048xf32>
    %cst_5 = arith.constant 0.000000e+00 : f32
    %6 = vector.broadcast %cst_5 : f32 to vector<8x2048xf32>
    %7 = arith.maximumf %5, %6 : vector<8x2048xf32>
    %c0_6 = arith.constant 0 : index
    %c0_7 = arith.constant 0 : index
    %8 = vector.load %arg4[%c0_6, %c0_7] : memref<2048x128xf32, #tpu.memory_space<vmem>>, vector<2048x128xf32>
    %cst_8 = arith.constant dense<0.000000e+00> : vector<8x128xf32>
    %9 = tpu.matmul %7, %8, %cst_8 {dimension_numbers = #tpu.dot_dimension_numbers<[1], [0], [0], [1], [0, 0, 1, 1], [], []>} : vector<8x2048xf32>, vector<2048x128xf32>, vector<8x128xf32> -> vector<8x128xf32>
    %c0_9 = arith.constant 0 : index
    %c0_10 = arith.constant 0 : index
    %10 = vector.load %arg5[%c0_9, %c0_10] : memref<1x128xf32, #tpu.memory_space<vmem>>, vector<1x128xf32>
    %11 = vector.broadcast %10 : vector<1x128xf32> to vector<8x128xf32>
    %12 = arith.addf %9, %11 : vector<8x128xf32>
    %13 = arith.addf %0, %12 : vector<8x128xf32>
    %cst_11 = arith.constant dense<0.000000e+00> : vector<8xf32>
    %14 = vector.multi_reduction <add>, %13, %cst_11 [1] : vector<8x128xf32> to vector<8xf32>
    %15 = vector.shape_cast %14 : vector<8xf32> to vector<8x1xf32>
    %cst_12 = arith.constant 1.280000e+02 : f32
    %16 = vector.broadcast %cst_12 : f32 to vector<8x1xf32>
    %17 = arith.divf %15, %16 : vector<8x1xf32>
    %18 = vector.broadcast %17 : vector<8x1xf32> to vector<8x128xf32>
    %19 = arith.subf %13, %18 : vector<8x128xf32>
    %20 = arith.mulf %19, %19 : vector<8x128xf32>
    %cst_13 = arith.constant dense<0.000000e+00> : vector<8xf32>
    %21 = vector.multi_reduction <add>, %20, %cst_13 [1] : vector<8x128xf32> to vector<8xf32>
    %22 = vector.shape_cast %21 : vector<8xf32> to vector<8x1xf32>
    %cst_14 = arith.constant 1.280000e+02 : f32
    %23 = vector.broadcast %cst_14 : f32 to vector<8x1xf32>
    %24 = arith.divf %22, %23 : vector<8x1xf32>
    %cst_15 = arith.constant 9.99999974E-6 : f32
    %25 = vector.broadcast %cst_15 : f32 to vector<8x1xf32>
    %26 = arith.addf %24, %25 : vector<8x1xf32>
    %27 = math.rsqrt %26 : vector<8x1xf32>
    %28 = vector.broadcast %27 : vector<8x1xf32> to vector<8x128xf32>
    %29 = arith.mulf %19, %28 : vector<8x128xf32>
    %c0_16 = arith.constant 0 : index
    %c0_17 = arith.constant 0 : index
    %30 = vector.load %arg6[%c0_16, %c0_17] : memref<1x128xf32, #tpu.memory_space<vmem>>, vector<1x128xf32>
    %31 = vector.broadcast %30 : vector<1x128xf32> to vector<8x128xf32>
    %32 = arith.mulf %29, %31 : vector<8x128xf32>
    %c0_18 = arith.constant 0 : index
    %c0_19 = arith.constant 0 : index
    %33 = vector.load %arg7[%c0_18, %c0_19] : memref<1x128xf32, #tpu.memory_space<vmem>>, vector<1x128xf32>
    %34 = vector.broadcast %33 : vector<1x128xf32> to vector<8x128xf32>
    %35 = arith.addf %32, %34 : vector<8x128xf32>
    %c0_20 = arith.constant 0 : index
    %c0_21 = arith.constant 0 : index
    %36 = vector.load %arg8[%c0_20, %c0_21] : memref<8x128xf32, #tpu.memory_space<vmem>>, vector<8x128xf32>
    tpu.vector_store %arg8[%c0_20, %c0_21], %35 {strides = array<i32>} : memref<8x128xf32, #tpu.memory_space<vmem>>, vector<8x128xf32>,
    return
  }
  func.func @transform_0(%arg0: i32) -> (i32, i32) {
    %c0_i32 = arith.constant 0 : i32
    %c0_i32_0 = arith.constant 0 : i32
    return %arg0, %c0_i32 : i32, i32
  }
  func.func @transform_1(%arg0: i32) -> (i32, i32) {
    %c0_i32 = arith.constant 0 : i32
    %c0_i32_0 = arith.constant 0 : i32
    %c0_i32_1 = arith.constant 0 : i32
    return %c0_i32, %c0_i32_0 : i32, i32
  }
  func.func @transform_2(%arg0: i32) -> (i32, i32) {
    %c0_i32 = arith.constant 0 : i32
    %c0_i32_0 = arith.constant 0 : i32
    %c0_i32_1 = arith.constant 0 : i32
    return %c0_i32, %c0_i32_0 : i32, i32
  }
  func.func @transform_3(%arg0: i32) -> (i32, i32) {
    %c0_i32 = arith.constant 0 : i32
    %c0_i32_0 = arith.constant 0 : i32
    %c0_i32_1 = arith.constant 0 : i32
    return %c0_i32, %c0_i32_0 : i32, i32
  }
  func.func @transform_4(%arg0: i32) -> (i32, i32) {
    %c0_i32 = arith.constant 0 : i32
    %c0_i32_0 = arith.constant 0 : i32
    %c0_i32_1 = arith.constant 0 : i32
    return %c0_i32, %c0_i32_0 : i32, i32
  }
  func.func @transform_5(%arg0: i32) -> (i32, i32) {
    %c0_i32 = arith.constant 0 : i32
    %c0_i32_0 = arith.constant 0 : i32
    %c0_i32_1 = arith.constant 0 : i32
    return %c0_i32, %c0_i32_0 : i32, i32
  }
  func.func @transform_6(%arg0: i32) -> (i32, i32) {
    %c0_i32 = arith.constant 0 : i32
    %c0_i32_0 = arith.constant 0 : i32
    %c0_i32_1 = arith.constant 0 : i32
    return %c0_i32, %c0_i32_0 : i32, i32
  }
  func.func @transform_7(%arg0: i32) -> (i32, i32) {
    %c0_i32 = arith.constant 0 : i32
    %c0_i32_0 = arith.constant 0 : i32
    return %arg0, %c0_i32 : i32, i32
  }
}

module attributes {stable_mosaic.version = 11 : i64} {
  func.func @_ffn_block_kernel(%arg0: i32, %arg1: memref<8x128xf32, #tpu.memory_space<vmem>>, %arg2: memref<128x2048xf32, #tpu.memory_space<vmem>>, %arg3: memref<1x2048xf32, #tpu.memory_space<vmem>>, %arg4: memref<2048x128xf32, #tpu.memory_space<vmem>>, %arg5: memref<1x128xf32, #tpu.memory_space<vmem>>, %arg6: memref<1x128xf32, #tpu.memory_space<vmem>>, %arg7: memref<1x128xf32, #tpu.memory_space<vmem>>, %arg8: memref<8x128xf32, #tpu.memory_space<vmem>>) attributes {dimension_semantics = [#tpu.dimension_semantics<parallel>], iteration_bounds = array<i64: 2>, scalar_prefetch = 0 : i64, scratch_operands = 0 : i64, tpu.core_type = #tpu.core_type<tc>, window_params = [{transform_indices = @transform_0, window_bounds = array<i64: 8, 128>}, {pipeline_mode = #tpu.pipeline_mode<synchronous>, transform_indices = @transform_1, window_bounds = array<i64: 128, 2048>}, {pipeline_mode = #tpu.pipeline_mode<synchronous>, transform_indices = @transform_2, window_bounds = array<i64: 1, 2048>}, {pipeline_mode = #tpu.pipeline_mode<synchronous>, transform_indices = @transform_3, window_bounds = array<i64: 2048, 128>}, {pipeline_mode = #tpu.pipeline_mode<synchronous>, transform_indices = @transform_4, window_bounds = array<i64: 1, 128>}, {pipeline_mode = #tpu.pipeline_mode<synchronous>, transform_indices = @transform_5, window_bounds = array<i64: 1, 128>}, {pipeline_mode = #tpu.pipeline_mode<synchronous>, transform_indices = @transform_6, window_bounds = array<i64: 1, 128>}, {transform_indices = @transform_7, window_bounds = array<i64: 8, 128>}]} {
    %c0 = arith.constant 0 : index
    %c0_0 = arith.constant 0 : index
    %0 = vector.load %arg1[%c0, %c0_0] : memref<8x128xf32, #tpu.memory_space<vmem>>, vector<8x128xf32>
    %c0_1 = arith.constant 0 : index
    %c0_2 = arith.constant 0 : index
    %1 = vector.load %arg2[%c0_1, %c0_2] : memref<128x2048xf32, #tpu.memory_space<vmem>>, vector<128x2048xf32>
    %cst = arith.constant dense<0.000000e+00> : vector<8x2048xf32>
    %2 = tpu.matmul %0, %1, %cst {dimension_numbers = #tpu.dot_dimension_numbers<[1], [0], [0], [1], [0, 0, 1, 1], [], []>} : vector<8x128xf32>, vector<128x2048xf32>, vector<8x2048xf32> -> vector<8x2048xf32>
    %c0_3 = arith.constant 0 : index
    %c0_4 = arith.constant 0 : index
    %3 = vector.load %arg3[%c0_3, %c0_4] : memref<1x2048xf32, #tpu.memory_space<vmem>>, vector<1x2048xf32>
    %4 = vector.broadcast %3 : vector<1x2048xf32> to vector<8x2048xf32>
    %5 = arith.addf %2, %4 : vector<8x2048xf32>
    %cst_5 = arith.constant 0.000000e+00 : f32
    %6 = vector.broadcast %cst_5 : f32 to vector<8x2048xf32>
    %7 = arith.maximumf %5, %6 : vector<8x2048xf32>
    %c0_6 = arith.constant 0 : index
    %c0_7 = arith.constant 0 : index
    %8 = vector.load %arg4[%c0_6, %c0_7] : memref<2048x128xf32, #tpu.memory_space<vmem>>, vector<2048x128xf32>
    %cst_8 = arith.constant dense<0.000000e+00> : vector<8x128xf32>
    %9 = tpu.matmul %7, %8, %cst_8 {dimension_numbers = #tpu.dot_dimension_numbers<[1], [0], [0], [1], [0, 0, 1, 1], [], []>} : vector<8x2048xf32>, vector<2048x128xf32>, vector<8x128xf32> -> vector<8x128xf32>
    %c0_9 = arith.constant 0 : index
    %c0_10 = arith.constant 0 : index
    %10 = vector.load %arg5[%c0_9, %c0_10] : memref<1x128xf32, #tpu.memory_space<vmem>>, vector<1x128xf32>
    %11 = vector.broadcast %10 : vector<1x128xf32> to vector<8x128xf32>
    %12 = arith.addf %9, %11 : vector<8x128xf32>
    %13 = arith.addf %0, %12 : vector<8x128xf32>
    %cst_11 = arith.constant dense<0.000000e+00> : vector<8xf32>
    %14 = vector.multi_reduction <add>, %13, %cst_11 [1] : vector<8x128xf32> to vector<8xf32>
    %15 = vector.shape_cast %14 : vector<8xf32> to vector<8x1xf32>
    %cst_12 = arith.constant 1.280000e+02 : f32
    %16 = vector.broadcast %cst_12 : f32 to vector<8x1xf32>
    %17 = arith.divf %15, %16 : vector<8x1xf32>
    %18 = vector.broadcast %17 : vector<8x1xf32> to vector<8x128xf32>
    %19 = arith.subf %13, %18 : vector<8x128xf32>
    %20 = arith.mulf %19, %19 : vector<8x128xf32>
    %cst_13 = arith.constant dense<0.000000e+00> : vector<8xf32>
    %21 = vector.multi_reduction <add>, %20, %cst_13 [1] : vector<8x128xf32> to vector<8xf32>
    %22 = vector.shape_cast %21 : vector<8xf32> to vector<8x1xf32>
    %cst_14 = arith.constant 1.280000e+02 : f32
    %23 = vector.broadcast %cst_14 : f32 to vector<8x1xf32>
    %24 = arith.divf %22, %23 : vector<8x1xf32>
    %cst_15 = arith.constant 9.99999974E-6 : f32
    %25 = vector.broadcast %cst_15 : f32 to vector<8x1xf32>
    %26 = arith.addf %24, %25 : vector<8x1xf32>
    %27 = math.rsqrt %26 : vector<8x1xf32>
    %28 = vector.broadcast %27 : vector<8x1xf32> to vector<8x128xf32>
    %29 = arith.mulf %19, %28 : vector<8x128xf32>
    %c0_16 = arith.constant 0 : index
    %c0_17 = arith.constant 0 : index
    %30 = vector.load %arg6[%c0_16, %c0_17] : memref<1x128xf32, #tpu.memory_space<vmem>>, vector<1x128xf32>
    %31 = vector.broadcast %30 : vector<1x128xf32> to vector<8x128xf32>
    %32 = arith.mulf %29, %31 : vector<8x128xf32>
    %c0_18 = arith.constant 0 : index
    %c0_19 = arith.constant 0 : index
    %33 = vector.load %arg7[%c0_18, %c0_19] : memref<1x128xf32, #tpu.memory_space<vmem>>, vector<1x128xf32>
    %34 = vector.broadcast %33 : vector<1x128xf32> to vector<8x128xf32>
    %35 = arith.addf %32, %34 : vector<8x128xf32>
    %c0_20 = arith.constant 0 : index
    %c0_21 = arith.constant 0 : index
    %36 = vector.load %arg8[%c0_20, %c0_21] : memref<8x128xf32, #tpu.memory_space<vmem>>, vector<8x128xf32>
    tpu.vector_store %arg8[%c0_20, %c0_21], %35 {strides = array<i32>} : memref<8x128xf32, #tpu.memory_space<vmem>>, vector<8x128xf32>,
    return
  }
  func.func @transform_0(%arg0: i32) -> (i32, i32) {
    %c0_i32 = arith.constant 0 : i32
    %c0_i32_0 = arith.constant 0 : i32
    return %arg0, %c0_i32 : i32, i32
  }
  func.func @transform_1(%arg0: i32) -> (i32, i32) {
    %c0_i32 = arith.constant 0 : i32
    %c0_i32_0 = arith.constant 0 : i32
    %c0_i32_1 = arith.constant 0 : i32
    return %c0_i32, %c0_i32_0 : i32, i32
  }
  func.func @transform_2(%arg0: i32) -> (i32, i32) {
    %c0_i32 = arith.constant 0 : i32
    %c0_i32_0 = arith.constant 0 : i32
    %c0_i32_1 = arith.constant 0 : i32
    return %c0_i32, %c0_i32_0 : i32, i32
  }
  func.func @transform_3(%arg0: i32) -> (i32, i32) {
    %c0_i32 = arith.constant 0 : i32
    %c0_i32_0 = arith.constant 0 : i32
    %c0_i32_1 = arith.constant 0 : i32
    return %c0_i32, %c0_i32_0 : i32, i32
  }
  func.func @transform_4(%arg0: i32) -> (i32, i32) {
    %c0_i32 = arith.constant 0 : i32
    %c0_i32_0 = arith.constant 0 : i32
    %c0_i32_1 = arith.constant 0 : i32
    return %c0_i32, %c0_i32_0 : i32, i32
  }
  func.func @transform_5(%arg0: i32) -> (i32, i32) {
    %c0_i32 = arith.constant 0 : i32
    %c0_i32_0 = arith.constant 0 : i32
    %c0_i32_1 = arith.constant 0 : i32
    return %c0_i32, %c0_i32_0 : i32, i32
  }
  func.func @transform_6(%arg0: i32) -> (i32, i32) {
    %c0_i32 = arith.constant 0 : i32
    %c0_i32_0 = arith.constant 0 : i32
    %c0_i32_1 = arith.constant 0 : i32
    return %c0_i32, %c0_i32_0 : i32, i32
  }
  func.func @transform_7(%arg0: i32) -> (i32, i32) {
    %c0_i32 = arith.constant 0 : i32
    %c0_i32_0 = arith.constant 0 : i32
    return %arg0, %c0_i32 : i32, i32
  }
}

module attributes {stable_mosaic.version = 11 : i64} {
  func.func @_attn_block_kernel(%arg0: i32, %arg1: memref<1x8x128xf32, #tpu.memory_space<vmem>>, %arg2: memref<1x8x128xf32, #tpu.memory_space<vmem>>, %arg3: memref<128x128xf32, #tpu.memory_space<vmem>>, %arg4: memref<1x128xf32, #tpu.memory_space<vmem>>, %arg5: memref<128x256xf32, #tpu.memory_space<vmem>>, %arg6: memref<1x256xf32, #tpu.memory_space<vmem>>, %arg7: memref<128x128xf32, #tpu.memory_space<vmem>>, %arg8: memref<1x128xf32, #tpu.memory_space<vmem>>, %arg9: memref<1x128xf32, #tpu.memory_space<vmem>>, %arg10: memref<1x128xf32, #tpu.memory_space<vmem>>, %arg11: memref<1x8x128xf32, #tpu.memory_space<vmem>>) attributes {dimension_semantics = [#tpu.dimension_semantics<parallel>], iteration_bounds = array<i64: 2>, scalar_prefetch = 0 : i64, scratch_operands = 0 : i64, tpu.core_type = #tpu.core_type<tc>, window_params = [{transform_indices = @transform_0, window_bounds = array<i64: 1, 8, 128>}, {transform_indices = @transform_1, window_bounds = array<i64: 1, 8, 128>}, {pipeline_mode = #tpu.pipeline_mode<synchronous>, transform_indices = @transform_2, window_bounds = array<i64: 128, 128>}, {pipeline_mode = #tpu.pipeline_mode<synchronous>, transform_indices = @transform_3, window_bounds = array<i64: 1, 128>}, {pipeline_mode = #tpu.pipeline_mode<synchronous>, transform_indices = @transform_4, window_bounds = array<i64: 128, 256>}, {pipeline_mode = #tpu.pipeline_mode<synchronous>, transform_indices = @transform_5, window_bounds = array<i64: 1, 256>}, {pipeline_mode = #tpu.pipeline_mode<synchronous>, transform_indices = @transform_6, window_bounds = array<i64: 128, 128>}, {pipeline_mode = #tpu.pipeline_mode<synchronous>, transform_indices = @transform_7, window_bounds = array<i64: 1, 128>}, {pipeline_mode = #tpu.pipeline_mode<synchronous>, transform_indices = @transform_8, window_bounds = array<i64: 1, 128>}, {pipeline_mode = #tpu.pipeline_mode<synchronous>, transform_indices = @transform_9, window_bounds = array<i64: 1, 128>}, {transform_indices = @transform_10, window_bounds = array<i64: 1, 8, 128>}]} {
    %c0 = arith.constant 0 : index
    %c0_0 = arith.constant 0 : index
    %c0_1 = arith.constant 0 : index
    %0 = vector.load %arg1[%c0, %c0_0, %c0_1] : memref<1x8x128xf32, #tpu.memory_space<vmem>>, vector<1x8x128xf32>
    %1 = vector.shape_cast %0 : vector<1x8x128xf32> to vector<8x128xf32>
    %c0_2 = arith.constant 0 : index
    %c0_3 = arith.constant 0 : index
    %c0_4 = arith.constant 0 : index
    %2 = vector.load %arg2[%c0_2, %c0_3, %c0_4] : memref<1x8x128xf32, #tpu.memory_space<vmem>>, vector<1x8x128xf32>
    %3 = vector.shape_cast %2 : vector<1x8x128xf32> to vector<8x128xf32>
    %c0_5 = arith.constant 0 : index
    %c0_6 = arith.constant 0 : index
    %4 = vector.load %arg3[%c0_5, %c0_6] : memref<128x128xf32, #tpu.memory_space<vmem>>, vector<128x128xf32>
    %cst = arith.constant dense<0.000000e+00> : vector<8x128xf32>
    %5 = tpu.matmul %1, %4, %cst {dimension_numbers = #tpu.dot_dimension_numbers<[1], [0], [0], [1], [0, 0, 1, 1], [], []>} : vector<8x128xf32>, vector<128x128xf32>, vector<8x128xf32> -> vector<8x128xf32>
    %c0_7 = arith.constant 0 : index
    %c0_8 = arith.constant 0 : index
    %6 = vector.load %arg4[%c0_7, %c0_8] : memref<1x128xf32, #tpu.memory_space<vmem>>, vector<1x128xf32>
    %7 = vector.broadcast %6 : vector<1x128xf32> to vector<8x128xf32>
    %8 = arith.addf %5, %7 : vector<8x128xf32>
    %c0_9 = arith.constant 0 : index
    %c0_10 = arith.constant 0 : index
    %9 = vector.load %arg5[%c0_9, %c0_10] : memref<128x256xf32, #tpu.memory_space<vmem>>, vector<128x256xf32>
    %cst_11 = arith.constant dense<0.000000e+00> : vector<8x256xf32>
    %10 = tpu.matmul %3, %9, %cst_11 {dimension_numbers = #tpu.dot_dimension_numbers<[1], [0], [0], [1], [0, 0, 1, 1], [], []>} : vector<8x128xf32>, vector<128x256xf32>, vector<8x256xf32> -> vector<8x256xf32>
    %c0_12 = arith.constant 0 : index
    %c0_13 = arith.constant 0 : index
    %11 = vector.load %arg6[%c0_12, %c0_13] : memref<1x256xf32, #tpu.memory_space<vmem>>, vector<1x256xf32>
    %12 = vector.broadcast %11 : vector<1x256xf32> to vector<8x256xf32>
    %13 = arith.addf %10, %12 : vector<8x256xf32>
    %14 = vector.extract_strided_slice %13 {offsets = [0, 0], sizes = [8, 128], strides = [1, 1]} : vector<8x256xf32> to vector<8x128xf32>
    %15 = vector.extract_strided_slice %13 {offsets = [0, 128], sizes = [8, 128], strides = [1, 1]} : vector<8x256xf32> to vector<8x128xf32>
    %16 = vector.extract_strided_slice %8 {offsets = [0, 0], sizes = [8, 16], strides = [1, 1]} : vector<8x128xf32> to vector<8x16xf32>
    %17 = vector.extract_strided_slice %14 {offsets = [0, 0], sizes = [8, 16], strides = [1, 1]} : vector<8x128xf32> to vector<8x16xf32>
    %cst_14 = arith.constant dense<0.000000e+00> : vector<8x8xf32>
    %18 = tpu.matmul %16, %17, %cst_14 {dimension_numbers = #tpu.dot_dimension_numbers<[1], [1], [0], [0], [0, 0, 1, 0], [], []>} : vector<8x16xf32>, vector<8x16xf32>, vector<8x8xf32> -> vector<8x8xf32>
    %cst_15 = arith.constant 0.0883883461 : f32
    %19 = vector.broadcast %cst_15 : f32 to vector<8x8xf32>
    %20 = arith.mulf %18, %19 : vector<8x8xf32>
    %21 = vector.extract_strided_slice %8 {offsets = [0, 16], sizes = [8, 16], strides = [1, 1]} : vector<8x128xf32> to vector<8x16xf32>
    %22 = vector.extract_strided_slice %14 {offsets = [0, 16], sizes = [8, 16], strides = [1, 1]} : vector<8x128xf32> to vector<8x16xf32>
    %cst_16 = arith.constant dense<0.000000e+00> : vector<8x8xf32>
    %23 = tpu.matmul %21, %22, %cst_16 {dimension_numbers = #tpu.dot_dimension_numbers<[1], [1], [0], [0], [0, 0, 1, 0], [], []>} : vector<8x16xf32>, vector<8x16xf32>, vector<8x8xf32> -> vector<8x8xf32>
    %cst_17 = arith.constant 0.0883883461 : f32
    %24 = vector.broadcast %cst_17 : f32 to vector<8x8xf32>
    %25 = arith.mulf %23, %24 : vector<8x8xf32>
    %26 = vector.extract_strided_slice %8 {offsets = [0, 32], sizes = [8, 16], strides = [1, 1]} : vector<8x128xf32> to vector<8x16xf32>
    %27 = vector.extract_strided_slice %14 {offsets = [0, 32], sizes = [8, 16], strides = [1, 1]} : vector<8x128xf32> to vector<8x16xf32>
    %cst_18 = arith.constant dense<0.000000e+00> : vector<8x8xf32>
    %28 = tpu.matmul %26, %27, %cst_18 {dimension_numbers = #tpu.dot_dimension_numbers<[1], [1], [0], [0], [0, 0, 1, 0], [], []>} : vector<8x16xf32>, vector<8x16xf32>, vector<8x8xf32> -> vector<8x8xf32>
    %cst_19 = arith.constant 0.0883883461 : f32
    %29 = vector.broadcast %cst_19 : f32 to vector<8x8xf32>
    %30 = arith.mulf %28, %29 : vector<8x8xf32>
    %31 = vector.extract_strided_slice %8 {offsets = [0, 48], sizes = [8, 16], strides = [1, 1]} : vector<8x128xf32> to vector<8x16xf32>
    %32 = vector.extract_strided_slice %14 {offsets = [0, 48], sizes = [8, 16], strides = [1, 1]} : vector<8x128xf32> to vector<8x16xf32>
    %cst_20 = arith.constant dense<0.000000e+00> : vector<8x8xf32>
    %33 = tpu.matmul %31, %32, %cst_20 {dimension_numbers = #tpu.dot_dimension_numbers<[1], [1], [0], [0], [0, 0, 1, 0], [], []>} : vector<8x16xf32>, vector<8x16xf32>, vector<8x8xf32> -> vector<8x8xf32>
    %cst_21 = arith.constant 0.0883883461 : f32
    %34 = vector.broadcast %cst_21 : f32 to vector<8x8xf32>
    %35 = arith.mulf %33, %34 : vector<8x8xf32>
    %36 = vector.extract_strided_slice %8 {offsets = [0, 64], sizes = [8, 16], strides = [1, 1]} : vector<8x128xf32> to vector<8x16xf32>
    %37 = vector.extract_strided_slice %14 {offsets = [0, 64], sizes = [8, 16], strides = [1, 1]} : vector<8x128xf32> to vector<8x16xf32>
    %cst_22 = arith.constant dense<0.000000e+00> : vector<8x8xf32>
    %38 = tpu.matmul %36, %37, %cst_22 {dimension_numbers = #tpu.dot_dimension_numbers<[1], [1], [0], [0], [0, 0, 1, 0], [], []>} : vector<8x16xf32>, vector<8x16xf32>, vector<8x8xf32> -> vector<8x8xf32>
    %cst_23 = arith.constant 0.0883883461 : f32
    %39 = vector.broadcast %cst_23 : f32 to vector<8x8xf32>
    %40 = arith.mulf %38, %39 : vector<8x8xf32>
    %41 = vector.extract_strided_slice %8 {offsets = [0, 80], sizes = [8, 16], strides = [1, 1]} : vector<8x128xf32> to vector<8x16xf32>
    %42 = vector.extract_strided_slice %14 {offsets = [0, 80], sizes = [8, 16], strides = [1, 1]} : vector<8x128xf32> to vector<8x16xf32>
    %cst_24 = arith.constant dense<0.000000e+00> : vector<8x8xf32>
    %43 = tpu.matmul %41, %42, %cst_24 {dimension_numbers = #tpu.dot_dimension_numbers<[1], [1], [0], [0], [0, 0, 1, 0], [], []>} : vector<8x16xf32>, vector<8x16xf32>, vector<8x8xf32> -> vector<8x8xf32>
    %cst_25 = arith.constant 0.0883883461 : f32
    %44 = vector.broadcast %cst_25 : f32 to vector<8x8xf32>
    %45 = arith.mulf %43, %44 : vector<8x8xf32>
    %46 = vector.extract_strided_slice %8 {offsets = [0, 96], sizes = [8, 16], strides = [1, 1]} : vector<8x128xf32> to vector<8x16xf32>
    %47 = vector.extract_strided_slice %14 {offsets = [0, 96], sizes = [8, 16], strides = [1, 1]} : vector<8x128xf32> to vector<8x16xf32>
    %cst_26 = arith.constant dense<0.000000e+00> : vector<8x8xf32>
    %48 = tpu.matmul %46, %47, %cst_26 {dimension_numbers = #tpu.dot_dimension_numbers<[1], [1], [0], [0], [0, 0, 1, 0], [], []>} : vector<8x16xf32>, vector<8x16xf32>, vector<8x8xf32> -> vector<8x8xf32>
    %cst_27 = arith.constant 0.0883883461 : f32
    %49 = vector.broadcast %cst_27 : f32 to vector<8x8xf32>
    %50 = arith.mulf %48, %49 : vector<8x8xf32>
    %51 = vector.extract_strided_slice %8 {offsets = [0, 112], sizes = [8, 16], strides = [1, 1]} : vector<8x128xf32> to vector<8x16xf32>
    %52 = vector.extract_strided_slice %14 {offsets = [0, 112], sizes = [8, 16], strides = [1, 1]} : vector<8x128xf32> to vector<8x16xf32>
    %cst_28 = arith.constant dense<0.000000e+00> : vector<8x8xf32>
    %53 = tpu.matmul %51, %52, %cst_28 {dimension_numbers = #tpu.dot_dimension_numbers<[1], [1], [0], [0], [0, 0, 1, 0], [], []>} : vector<8x16xf32>, vector<8x16xf32>, vector<8x8xf32> -> vector<8x8xf32>
    %cst_29 = arith.constant 0.0883883461 : f32
    %54 = vector.broadcast %cst_29 : f32 to vector<8x8xf32>
    %55 = arith.mulf %53, %54 : vector<8x8xf32>
    %56 = tpu.concatenate %20, %25, %30, %35, %40, %45, %50, %55 in 0 : vector<8x8xf32>, vector<8x8xf32>, vector<8x8xf32>, vector<8x8xf32>, vector<8x8xf32>, vector<8x8xf32>, vector<8x8xf32>, vector<8x8xf32> -> vector<64x8xf32>
    %cst_30 = arith.constant dense<0xFF800000> : vector<64xf32>
    %57 = vector.multi_reduction <maximumf>, %56, %cst_30 [1] : vector<64x8xf32> to vector<64xf32>
    %58 = vector.shape_cast %57 : vector<64xf32> to vector<64x1xf32>
    %59 = vector.broadcast %58 : vector<64x1xf32> to vector<64x8xf32>
    %60 = arith.subf %56, %59 : vector<64x8xf32>
    %61 = math.exp %60 : vector<64x8xf32>
    %cst_31 = arith.constant dense<0.000000e+00> : vector<64xf32>
    %62 = vector.multi_reduction <add>, %61, %cst_31 [1] : vector<64x8xf32> to vector<64xf32>
    %63 = vector.shape_cast %62 : vector<64xf32> to vector<64x1xf32>
    %64 = vector.broadcast %63 : vector<64x1xf32> to vector<64x8xf32>
    %65 = arith.divf %61, %64 : vector<64x8xf32>
    %66 = vector.extract_strided_slice %65 {offsets = [0, 0], sizes = [8, 8], strides = [1, 1]} : vector<64x8xf32> to vector<8x8xf32>
    %67 = vector.extract_strided_slice %15 {offsets = [0, 0], sizes = [8, 16], strides = [1, 1]} : vector<8x128xf32> to vector<8x16xf32>
    %cst_32 = arith.constant dense<0.000000e+00> : vector<8x16xf32>
    %68 = tpu.matmul %66, %67, %cst_32 {dimension_numbers = #tpu.dot_dimension_numbers<[1], [0], [0], [1], [0, 0, 1, 1], [], []>} : vector<8x8xf32>, vector<8x16xf32>, vector<8x16xf32> -> vector<8x16xf32>
    %69 = vector.extract_strided_slice %65 {offsets = [8, 0], sizes = [8, 8], strides = [1, 1]} : vector<64x8xf32> to vector<8x8xf32>
    %70 = vector.extract_strided_slice %15 {offsets = [0, 16], sizes = [8, 16], strides = [1, 1]} : vector<8x128xf32> to vector<8x16xf32>
    %cst_33 = arith.constant dense<0.000000e+00> : vector<8x16xf32>
    %71 = tpu.matmul %69, %70, %cst_33 {dimension_numbers = #tpu.dot_dimension_numbers<[1], [0], [0], [1], [0, 0, 1, 1], [], []>} : vector<8x8xf32>, vector<8x16xf32>, vector<8x16xf32> -> vector<8x16xf32>
    %72 = vector.extract_strided_slice %65 {offsets = [16, 0], sizes = [8, 8], strides = [1, 1]} : vector<64x8xf32> to vector<8x8xf32>
    %73 = vector.extract_strided_slice %15 {offsets = [0, 32], sizes = [8, 16], strides = [1, 1]} : vector<8x128xf32> to vector<8x16xf32>
    %cst_34 = arith.constant dense<0.000000e+00> : vector<8x16xf32>
    %74 = tpu.matmul %72, %73, %cst_34 {dimension_numbers = #tpu.dot_dimension_numbers<[1], [0], [0], [1], [0, 0, 1, 1], [], []>} : vector<8x8xf32>, vector<8x16xf32>, vector<8x16xf32> -> vector<8x16xf32>
    %75 = vector.extract_strided_slice %65 {offsets = [24, 0], sizes = [8, 8], strides = [1, 1]} : vector<64x8xf32> to vector<8x8xf32>
    %76 = vector.extract_strided_slice %15 {offsets = [0, 48], sizes = [8, 16], strides = [1, 1]} : vector<8x128xf32> to vector<8x16xf32>
    %cst_35 = arith.constant dense<0.000000e+00> : vector<8x16xf32>
    %77 = tpu.matmul %75, %76, %cst_35 {dimension_numbers = #tpu.dot_dimension_numbers<[1], [0], [0], [1], [0, 0, 1, 1], [], []>} : vector<8x8xf32>, vector<8x16xf32>, vector<8x16xf32> -> vector<8x16xf32>
    %78 = vector.extract_strided_slice %65 {offsets = [32, 0], sizes = [8, 8], strides = [1, 1]} : vector<64x8xf32> to vector<8x8xf32>
    %79 = vector.extract_strided_slice %15 {offsets = [0, 64], sizes = [8, 16], strides = [1, 1]} : vector<8x128xf32> to vector<8x16xf32>
    %cst_36 = arith.constant dense<0.000000e+00> : vector<8x16xf32>
    %80 = tpu.matmul %78, %79, %cst_36 {dimension_numbers = #tpu.dot_dimension_numbers<[1], [0], [0], [1], [0, 0, 1, 1], [], []>} : vector<8x8xf32>, vector<8x16xf32>, vector<8x16xf32> -> vector<8x16xf32>
    %81 = vector.extract_strided_slice %65 {offsets = [40, 0], sizes = [8, 8], strides = [1, 1]} : vector<64x8xf32> to vector<8x8xf32>
    %82 = vector.extract_strided_slice %15 {offsets = [0, 80], sizes = [8, 16], strides = [1, 1]} : vector<8x128xf32> to vector<8x16xf32>
    %cst_37 = arith.constant dense<0.000000e+00> : vector<8x16xf32>
    %83 = tpu.matmul %81, %82, %cst_37 {dimension_numbers = #tpu.dot_dimension_numbers<[1], [0], [0], [1], [0, 0, 1, 1], [], []>} : vector<8x8xf32>, vector<8x16xf32>, vector<8x16xf32> -> vector<8x16xf32>
    %84 = vector.extract_strided_slice %65 {offsets = [48, 0], sizes = [8, 8], strides = [1, 1]} : vector<64x8xf32> to vector<8x8xf32>
    %85 = vector.extract_strided_slice %15 {offsets = [0, 96], sizes = [8, 16], strides = [1, 1]} : vector<8x128xf32> to vector<8x16xf32>
    %cst_38 = arith.constant dense<0.000000e+00> : vector<8x16xf32>
    %86 = tpu.matmul %84, %85, %cst_38 {dimension_numbers = #tpu.dot_dimension_numbers<[1], [0], [0], [1], [0, 0, 1, 1], [], []>} : vector<8x8xf32>, vector<8x16xf32>, vector<8x16xf32> -> vector<8x16xf32>
    %87 = vector.extract_strided_slice %65 {offsets = [56, 0], sizes = [8, 8], strides = [1, 1]} : vector<64x8xf32> to vector<8x8xf32>
    %88 = vector.extract_strided_slice %15 {offsets = [0, 112], sizes = [8, 16], strides = [1, 1]} : vector<8x128xf32> to vector<8x16xf32>
    %cst_39 = arith.constant dense<0.000000e+00> : vector<8x16xf32>
    %89 = tpu.matmul %87, %88, %cst_39 {dimension_numbers = #tpu.dot_dimension_numbers<[1], [0], [0], [1], [0, 0, 1, 1], [], []>} : vector<8x8xf32>, vector<8x16xf32>, vector<8x16xf32> -> vector<8x16xf32>
    %90 = tpu.concatenate %68, %71, %74, %77, %80, %83, %86, %89 in 1 : vector<8x16xf32>, vector<8x16xf32>, vector<8x16xf32>, vector<8x16xf32>, vector<8x16xf32>, vector<8x16xf32>, vector<8x16xf32>, vector<8x16xf32> -> vector<8x128xf32>
    %c0_40 = arith.constant 0 : index
    %c0_41 = arith.constant 0 : index
    %91 = vector.load %arg7[%c0_40, %c0_41] : memref<128x128xf32, #tpu.memory_space<vmem>>, vector<128x128xf32>
    %cst_42 = arith.constant dense<0.000000e+00> : vector<8x128xf32>
    %92 = tpu.matmul %90, %91, %cst_42 {dimension_numbers = #tpu.dot_dimension_numbers<[1], [0], [0], [1], [0, 0, 1, 1], [], []>} : vector<8x128xf32>, vector<128x128xf32>, vector<8x128xf32> -> vector<8x128xf32>
    %c0_43 = arith.constant 0 : index
    %c0_44 = arith.constant 0 : index
    %93 = vector.load %arg8[%c0_43, %c0_44] : memref<1x128xf32, #tpu.memory_space<vmem>>, vector<1x128xf32>
    %94 = vector.broadcast %93 : vector<1x128xf32> to vector<8x128xf32>
    %95 = arith.addf %92, %94 : vector<8x128xf32>
    %96 = arith.addf %1, %95 : vector<8x128xf32>
    %cst_45 = arith.constant dense<0.000000e+00> : vector<8xf32>
    %97 = vector.multi_reduction <add>, %96, %cst_45 [1] : vector<8x128xf32> to vector<8xf32>
    %98 = vector.shape_cast %97 : vector<8xf32> to vector<8x1xf32>
    %cst_46 = arith.constant 1.280000e+02 : f32
    %99 = vector.broadcast %cst_46 : f32 to vector<8x1xf32>
    %100 = arith.divf %98, %99 : vector<8x1xf32>
    %101 = vector.broadcast %100 : vector<8x1xf32> to vector<8x128xf32>
    %102 = arith.subf %96, %101 : vector<8x128xf32>
    %103 = arith.mulf %102, %102 : vector<8x128xf32>
    %cst_47 = arith.constant dense<0.000000e+00> : vector<8xf32>
    %104 = vector.multi_reduction <add>, %103, %cst_47 [1] : vector<8x128xf32> to vector<8xf32>
    %105 = vector.shape_cast %104 : vector<8xf32> to vector<8x1xf32>
    %cst_48 = arith.constant 1.280000e+02 : f32
    %106 = vector.broadcast %cst_48 : f32 to vector<8x1xf32>
    %107 = arith.divf %105, %106 : vector<8x1xf32>
    %cst_49 = arith.constant 9.99999974E-6 : f32
    %108 = vector.broadcast %cst_49 : f32 to vector<8x1xf32>
    %109 = arith.addf %107, %108 : vector<8x1xf32>
    %110 = math.rsqrt %109 : vector<8x1xf32>
    %111 = vector.broadcast %110 : vector<8x1xf32> to vector<8x128xf32>
    %112 = arith.mulf %102, %111 : vector<8x128xf32>
    %c0_50 = arith.constant 0 : index
    %c0_51 = arith.constant 0 : index
    %113 = vector.load %arg9[%c0_50, %c0_51] : memref<1x128xf32, #tpu.memory_space<vmem>>, vector<1x128xf32>
    %114 = vector.broadcast %113 : vector<1x128xf32> to vector<8x128xf32>
    %115 = arith.mulf %112, %114 : vector<8x128xf32>
    %c0_52 = arith.constant 0 : index
    %c0_53 = arith.constant 0 : index
    %116 = vector.load %arg10[%c0_52, %c0_53] : memref<1x128xf32, #tpu.memory_space<vmem>>, vector<1x128xf32>
    %117 = vector.broadcast %116 : vector<1x128xf32> to vector<8x128xf32>
    %118 = arith.addf %115, %117 : vector<8x128xf32>
    %c0_54 = arith.constant 0 : index
    %c0_55 = arith.constant 0 : index
    %c0_56 = arith.constant 0 : index
    %119 = vector.load %arg11[%c0_54, %c0_55, %c0_56] : memref<1x8x128xf32, #tpu.memory_space<vmem>>, vector<1x8x128xf32>
    %120 = vector.shape_cast %119 : vector<1x8x128xf32> to vector<8x128xf32>
    %121 = vector.shape_cast %118 : vector<8x128xf32> to vector<1x8x128xf32>
    tpu.vector_store %arg11[%c0_54, %c0_55, %c0_56], %121 {strides = array<i32>} : memref<1x8x128xf32, #tpu.memory_space<vmem>>, vector<1x8x128xf32>,
    return
  }
  func.func @transform_0(%arg0: i32) -> (i32, i32, i32) {
    %c0_i32 = arith.constant 0 : i32
    %c0_i32_0 = arith.constant 0 : i32
    %c0_i32_1 = arith.constant 0 : i32
    return %arg0, %c0_i32, %c0_i32_0 : i32, i32, i32
  }
  func.func @transform_1(%arg0: i32) -> (i32, i32, i32) {
    %c0_i32 = arith.constant 0 : i32
    %c0_i32_0 = arith.constant 0 : i32
    %c0_i32_1 = arith.constant 0 : i32
    return %arg0, %c0_i32, %c0_i32_0 : i32, i32, i32
  }
  func.func @transform_2(%arg0: i32) -> (i32, i32) {
    %c0_i32 = arith.constant 0 : i32
    %c0_i32_0 = arith.constant 0 : i32
    %c0_i32_1 = arith.constant 0 : i32
    return %c0_i32, %c0_i32_0 : i32, i32
  }
  func.func @transform_3(%arg0: i32) -> (i32, i32) {
    %c0_i32 = arith.constant 0 : i32
    %c0_i32_0 = arith.constant 0 : i32
    %c0_i32_1 = arith.constant 0 : i32
    return %c0_i32, %c0_i32_0 : i32, i32
  }
  func.func @transform_4(%arg0: i32) -> (i32, i32) {
    %c0_i32 = arith.constant 0 : i32
    %c0_i32_0 = arith.constant 0 : i32
    %c0_i32_1 = arith.constant 0 : i32
    return %c0_i32, %c0_i32_0 : i32, i32
  }
  func.func @transform_5(%arg0: i32) -> (i32, i32) {
    %c0_i32 = arith.constant 0 : i32
    %c0_i32_0 = arith.constant 0 : i32
    %c0_i32_1 = arith.constant 0 : i32
    return %c0_i32, %c0_i32_0 : i32, i32
  }
  func.func @transform_6(%arg0: i32) -> (i32, i32) {
    %c0_i32 = arith.constant 0 : i32
    %c0_i32_0 = arith.constant 0 : i32
    %c0_i32_1 = arith.constant 0 : i32
    return %c0_i32, %c0_i32_0 : i32, i32
  }
  func.func @transform_7(%arg0: i32) -> (i32, i32) {
    %c0_i32 = arith.constant 0 : i32
    %c0_i32_0 = arith.constant 0 : i32
    %c0_i32_1 = arith.constant 0 : i32
    return %c0_i32, %c0_i32_0 : i32, i32
  }
  func.func @transform_8(%arg0: i32) -> (i32, i32) {
    %c0_i32 = arith.constant 0 : i32
    %c0_i32_0 = arith.constant 0 : i32
    %c0_i32_1 = arith.constant 0 : i32
    return %c0_i32, %c0_i32_0 : i32, i32
  }
  func.func @transform_9(%arg0: i32) -> (i32, i32) {
    %c0_i32 = arith.constant 0 : i32
    %c0_i32_0 = arith.constant 0 : i32
    %c0_i32_1 = arith.constant 0 : i32
    return %c0_i32, %c0_i32_0 : i32, i32
  }
  func.func @transform_10(%arg0: i32) -> (i32, i32, i32) {
    %c0_i32 = arith.constant 0 : i32
    %c0_i32_0 = arith.constant 0 : i32
    %c0_i32_1 = arith.constant 0 : i32
    return %arg0, %c0_i32, %c0_i32_0 : i32, i32, i32
  }
}

module attributes {stable_mosaic.version = 11 : i64} {
  func.func @_attn_block_kernel(%arg0: i32, %arg1: memref<1x8x128xf32, #tpu.memory_space<vmem>>, %arg2: memref<1x8x128xf32, #tpu.memory_space<vmem>>, %arg3: memref<128x128xf32, #tpu.memory_space<vmem>>, %arg4: memref<1x128xf32, #tpu.memory_space<vmem>>, %arg5: memref<128x256xf32, #tpu.memory_space<vmem>>, %arg6: memref<1x256xf32, #tpu.memory_space<vmem>>, %arg7: memref<128x128xf32, #tpu.memory_space<vmem>>, %arg8: memref<1x128xf32, #tpu.memory_space<vmem>>, %arg9: memref<1x128xf32, #tpu.memory_space<vmem>>, %arg10: memref<1x128xf32, #tpu.memory_space<vmem>>, %arg11: memref<8x8xf32, #tpu.memory_space<vmem>>, %arg12: memref<1x8x128xf32, #tpu.memory_space<vmem>>) attributes {dimension_semantics = [#tpu.dimension_semantics<parallel>], iteration_bounds = array<i64: 2>, scalar_prefetch = 0 : i64, scratch_operands = 0 : i64, tpu.core_type = #tpu.core_type<tc>, window_params = [{transform_indices = @transform_0, window_bounds = array<i64: 1, 8, 128>}, {transform_indices = @transform_1, window_bounds = array<i64: 1, 8, 128>}, {pipeline_mode = #tpu.pipeline_mode<synchronous>, transform_indices = @transform_2, window_bounds = array<i64: 128, 128>}, {pipeline_mode = #tpu.pipeline_mode<synchronous>, transform_indices = @transform_3, window_bounds = array<i64: 1, 128>}, {pipeline_mode = #tpu.pipeline_mode<synchronous>, transform_indices = @transform_4, window_bounds = array<i64: 128, 256>}, {pipeline_mode = #tpu.pipeline_mode<synchronous>, transform_indices = @transform_5, window_bounds = array<i64: 1, 256>}, {pipeline_mode = #tpu.pipeline_mode<synchronous>, transform_indices = @transform_6, window_bounds = array<i64: 128, 128>}, {pipeline_mode = #tpu.pipeline_mode<synchronous>, transform_indices = @transform_7, window_bounds = array<i64: 1, 128>}, {pipeline_mode = #tpu.pipeline_mode<synchronous>, transform_indices = @transform_8, window_bounds = array<i64: 1, 128>}, {pipeline_mode = #tpu.pipeline_mode<synchronous>, transform_indices = @transform_9, window_bounds = array<i64: 1, 128>}, {pipeline_mode = #tpu.pipeline_mode<synchronous>, transform_indices = @transform_10, window_bounds = array<i64: 8, 8>}, {transform_indices = @transform_11, window_bounds = array<i64: 1, 8, 128>}]} {
    %c0 = arith.constant 0 : index
    %c0_0 = arith.constant 0 : index
    %c0_1 = arith.constant 0 : index
    %0 = vector.load %arg1[%c0, %c0_0, %c0_1] : memref<1x8x128xf32, #tpu.memory_space<vmem>>, vector<1x8x128xf32>
    %1 = vector.shape_cast %0 : vector<1x8x128xf32> to vector<8x128xf32>
    %c0_2 = arith.constant 0 : index
    %c0_3 = arith.constant 0 : index
    %c0_4 = arith.constant 0 : index
    %2 = vector.load %arg2[%c0_2, %c0_3, %c0_4] : memref<1x8x128xf32, #tpu.memory_space<vmem>>, vector<1x8x128xf32>
    %3 = vector.shape_cast %2 : vector<1x8x128xf32> to vector<8x128xf32>
    %c0_5 = arith.constant 0 : index
    %c0_6 = arith.constant 0 : index
    %4 = vector.load %arg3[%c0_5, %c0_6] : memref<128x128xf32, #tpu.memory_space<vmem>>, vector<128x128xf32>
    %cst = arith.constant dense<0.000000e+00> : vector<8x128xf32>
    %5 = tpu.matmul %1, %4, %cst {dimension_numbers = #tpu.dot_dimension_numbers<[1], [0], [0], [1], [0, 0, 1, 1], [], []>} : vector<8x128xf32>, vector<128x128xf32>, vector<8x128xf32> -> vector<8x128xf32>
    %c0_7 = arith.constant 0 : index
    %c0_8 = arith.constant 0 : index
    %6 = vector.load %arg4[%c0_7, %c0_8] : memref<1x128xf32, #tpu.memory_space<vmem>>, vector<1x128xf32>
    %7 = vector.broadcast %6 : vector<1x128xf32> to vector<8x128xf32>
    %8 = arith.addf %5, %7 : vector<8x128xf32>
    %c0_9 = arith.constant 0 : index
    %c0_10 = arith.constant 0 : index
    %9 = vector.load %arg5[%c0_9, %c0_10] : memref<128x256xf32, #tpu.memory_space<vmem>>, vector<128x256xf32>
    %cst_11 = arith.constant dense<0.000000e+00> : vector<8x256xf32>
    %10 = tpu.matmul %3, %9, %cst_11 {dimension_numbers = #tpu.dot_dimension_numbers<[1], [0], [0], [1], [0, 0, 1, 1], [], []>} : vector<8x128xf32>, vector<128x256xf32>, vector<8x256xf32> -> vector<8x256xf32>
    %c0_12 = arith.constant 0 : index
    %c0_13 = arith.constant 0 : index
    %11 = vector.load %arg6[%c0_12, %c0_13] : memref<1x256xf32, #tpu.memory_space<vmem>>, vector<1x256xf32>
    %12 = vector.broadcast %11 : vector<1x256xf32> to vector<8x256xf32>
    %13 = arith.addf %10, %12 : vector<8x256xf32>
    %14 = vector.extract_strided_slice %13 {offsets = [0, 0], sizes = [8, 128], strides = [1, 1]} : vector<8x256xf32> to vector<8x128xf32>
    %15 = vector.extract_strided_slice %13 {offsets = [0, 128], sizes = [8, 128], strides = [1, 1]} : vector<8x256xf32> to vector<8x128xf32>
    %c0_14 = arith.constant 0 : index
    %c0_15 = arith.constant 0 : index
    %16 = vector.load %arg11[%c0_14, %c0_15] : memref<8x8xf32, #tpu.memory_space<vmem>>, vector<8x8xf32>
    %17 = vector.extract_strided_slice %8 {offsets = [0, 0], sizes = [8, 16], strides = [1, 1]} : vector<8x128xf32> to vector<8x16xf32>
    %18 = vector.extract_strided_slice %14 {offsets = [0, 0], sizes = [8, 16], strides = [1, 1]} : vector<8x128xf32> to vector<8x16xf32>
    %cst_16 = arith.constant dense<0.000000e+00> : vector<8x8xf32>
    %19 = tpu.matmul %17, %18, %cst_16 {dimension_numbers = #tpu.dot_dimension_numbers<[1], [1], [0], [0], [0, 0, 1, 0], [], []>} : vector<8x16xf32>, vector<8x16xf32>, vector<8x8xf32> -> vector<8x8xf32>
    %cst_17 = arith.constant 0.0883883461 : f32
    %20 = vector.broadcast %cst_17 : f32 to vector<8x8xf32>
    %21 = arith.mulf %19, %20 : vector<8x8xf32>
    %cst_18 = arith.constant 0.000000e+00 : f32
    %22 = vector.broadcast %cst_18 : f32 to vector<8x8xf32>
    %23 = arith.cmpf one, %16, %22 : vector<8x8xf32>
    %cst_19 = arith.constant 0xCDA8965F : f32
    %24 = vector.broadcast %cst_19 : f32 to vector<8x8xf32>
    %25 = arith.select %23, %24, %21 : vector<8x8xi1>, vector<8x8xf32>
    %26 = vector.extract_strided_slice %8 {offsets = [0, 16], sizes = [8, 16], strides = [1, 1]} : vector<8x128xf32> to vector<8x16xf32>
    %27 = vector.extract_strided_slice %14 {offsets = [0, 16], sizes = [8, 16], strides = [1, 1]} : vector<8x128xf32> to vector<8x16xf32>
    %cst_20 = arith.constant dense<0.000000e+00> : vector<8x8xf32>
    %28 = tpu.matmul %26, %27, %cst_20 {dimension_numbers = #tpu.dot_dimension_numbers<[1], [1], [0], [0], [0, 0, 1, 0], [], []>} : vector<8x16xf32>, vector<8x16xf32>, vector<8x8xf32> -> vector<8x8xf32>
    %cst_21 = arith.constant 0.0883883461 : f32
    %29 = vector.broadcast %cst_21 : f32 to vector<8x8xf32>
    %30 = arith.mulf %28, %29 : vector<8x8xf32>
    %cst_22 = arith.constant 0.000000e+00 : f32
    %31 = vector.broadcast %cst_22 : f32 to vector<8x8xf32>
    %32 = arith.cmpf one, %16, %31 : vector<8x8xf32>
    %cst_23 = arith.constant 0xCDA8965F : f32
    %33 = vector.broadcast %cst_23 : f32 to vector<8x8xf32>
    %34 = arith.select %32, %33, %30 : vector<8x8xi1>, vector<8x8xf32>
    %35 = vector.extract_strided_slice %8 {offsets = [0, 32], sizes = [8, 16], strides = [1, 1]} : vector<8x128xf32> to vector<8x16xf32>
    %36 = vector.extract_strided_slice %14 {offsets = [0, 32], sizes = [8, 16], strides = [1, 1]} : vector<8x128xf32> to vector<8x16xf32>
    %cst_24 = arith.constant dense<0.000000e+00> : vector<8x8xf32>
    %37 = tpu.matmul %35, %36, %cst_24 {dimension_numbers = #tpu.dot_dimension_numbers<[1], [1], [0], [0], [0, 0, 1, 0], [], []>} : vector<8x16xf32>, vector<8x16xf32>, vector<8x8xf32> -> vector<8x8xf32>
    %cst_25 = arith.constant 0.0883883461 : f32
    %38 = vector.broadcast %cst_25 : f32 to vector<8x8xf32>
    %39 = arith.mulf %37, %38 : vector<8x8xf32>
    %cst_26 = arith.constant 0.000000e+00 : f32
    %40 = vector.broadcast %cst_26 : f32 to vector<8x8xf32>
    %41 = arith.cmpf one, %16, %40 : vector<8x8xf32>
    %cst_27 = arith.constant 0xCDA8965F : f32
    %42 = vector.broadcast %cst_27 : f32 to vector<8x8xf32>
    %43 = arith.select %41, %42, %39 : vector<8x8xi1>, vector<8x8xf32>
    %44 = vector.extract_strided_slice %8 {offsets = [0, 48], sizes = [8, 16], strides = [1, 1]} : vector<8x128xf32> to vector<8x16xf32>
    %45 = vector.extract_strided_slice %14 {offsets = [0, 48], sizes = [8, 16], strides = [1, 1]} : vector<8x128xf32> to vector<8x16xf32>
    %cst_28 = arith.constant dense<0.000000e+00> : vector<8x8xf32>
    %46 = tpu.matmul %44, %45, %cst_28 {dimension_numbers = #tpu.dot_dimension_numbers<[1], [1], [0], [0], [0, 0, 1, 0], [], []>} : vector<8x16xf32>, vector<8x16xf32>, vector<8x8xf32> -> vector<8x8xf32>
    %cst_29 = arith.constant 0.0883883461 : f32
    %47 = vector.broadcast %cst_29 : f32 to vector<8x8xf32>
    %48 = arith.mulf %46, %47 : vector<8x8xf32>
    %cst_30 = arith.constant 0.000000e+00 : f32
    %49 = vector.broadcast %cst_30 : f32 to vector<8x8xf32>
    %50 = arith.cmpf one, %16, %49 : vector<8x8xf32>
    %cst_31 = arith.constant 0xCDA8965F : f32
    %51 = vector.broadcast %cst_31 : f32 to vector<8x8xf32>
    %52 = arith.select %50, %51, %48 : vector<8x8xi1>, vector<8x8xf32>
    %53 = vector.extract_strided_slice %8 {offsets = [0, 64], sizes = [8, 16], strides = [1, 1]} : vector<8x128xf32> to vector<8x16xf32>
    %54 = vector.extract_strided_slice %14 {offsets = [0, 64], sizes = [8, 16], strides = [1, 1]} : vector<8x128xf32> to vector<8x16xf32>
    %cst_32 = arith.constant dense<0.000000e+00> : vector<8x8xf32>
    %55 = tpu.matmul %53, %54, %cst_32 {dimension_numbers = #tpu.dot_dimension_numbers<[1], [1], [0], [0], [0, 0, 1, 0], [], []>} : vector<8x16xf32>, vector<8x16xf32>, vector<8x8xf32> -> vector<8x8xf32>
    %cst_33 = arith.constant 0.0883883461 : f32
    %56 = vector.broadcast %cst_33 : f32 to vector<8x8xf32>
    %57 = arith.mulf %55, %56 : vector<8x8xf32>
    %cst_34 = arith.constant 0.000000e+00 : f32
    %58 = vector.broadcast %cst_34 : f32 to vector<8x8xf32>
    %59 = arith.cmpf one, %16, %58 : vector<8x8xf32>
    %cst_35 = arith.constant 0xCDA8965F : f32
    %60 = vector.broadcast %cst_35 : f32 to vector<8x8xf32>
    %61 = arith.select %59, %60, %57 : vector<8x8xi1>, vector<8x8xf32>
    %62 = vector.extract_strided_slice %8 {offsets = [0, 80], sizes = [8, 16], strides = [1, 1]} : vector<8x128xf32> to vector<8x16xf32>
    %63 = vector.extract_strided_slice %14 {offsets = [0, 80], sizes = [8, 16], strides = [1, 1]} : vector<8x128xf32> to vector<8x16xf32>
    %cst_36 = arith.constant dense<0.000000e+00> : vector<8x8xf32>
    %64 = tpu.matmul %62, %63, %cst_36 {dimension_numbers = #tpu.dot_dimension_numbers<[1], [1], [0], [0], [0, 0, 1, 0], [], []>} : vector<8x16xf32>, vector<8x16xf32>, vector<8x8xf32> -> vector<8x8xf32>
    %cst_37 = arith.constant 0.0883883461 : f32
    %65 = vector.broadcast %cst_37 : f32 to vector<8x8xf32>
    %66 = arith.mulf %64, %65 : vector<8x8xf32>
    %cst_38 = arith.constant 0.000000e+00 : f32
    %67 = vector.broadcast %cst_38 : f32 to vector<8x8xf32>
    %68 = arith.cmpf one, %16, %67 : vector<8x8xf32>
    %cst_39 = arith.constant 0xCDA8965F : f32
    %69 = vector.broadcast %cst_39 : f32 to vector<8x8xf32>
    %70 = arith.select %68, %69, %66 : vector<8x8xi1>, vector<8x8xf32>
    %71 = vector.extract_strided_slice %8 {offsets = [0, 96], sizes = [8, 16], strides = [1, 1]} : vector<8x128xf32> to vector<8x16xf32>
    %72 = vector.extract_strided_slice %14 {offsets = [0, 96], sizes = [8, 16], strides = [1, 1]} : vector<8x128xf32> to vector<8x16xf32>
    %cst_40 = arith.constant dense<0.000000e+00> : vector<8x8xf32>
    %73 = tpu.matmul %71, %72, %cst_40 {dimension_numbers = #tpu.dot_dimension_numbers<[1], [1], [0], [0], [0, 0, 1, 0], [], []>} : vector<8x16xf32>, vector<8x16xf32>, vector<8x8xf32> -> vector<8x8xf32>
    %cst_41 = arith.constant 0.0883883461 : f32
    %74 = vector.broadcast %cst_41 : f32 to vector<8x8xf32>
    %75 = arith.mulf %73, %74 : vector<8x8xf32>
    %cst_42 = arith.constant 0.000000e+00 : f32
    %76 = vector.broadcast %cst_42 : f32 to vector<8x8xf32>
    %77 = arith.cmpf one, %16, %76 : vector<8x8xf32>
    %cst_43 = arith.constant 0xCDA8965F : f32
    %78 = vector.broadcast %cst_43 : f32 to vector<8x8xf32>
    %79 = arith.select %77, %78, %75 : vector<8x8xi1>, vector<8x8xf32>
    %80 = vector.extract_strided_slice %8 {offsets = [0, 112], sizes = [8, 16], strides = [1, 1]} : vector<8x128xf32> to vector<8x16xf32>
    %81 = vector.extract_strided_slice %14 {offsets = [0, 112], sizes = [8, 16], strides = [1, 1]} : vector<8x128xf32> to vector<8x16xf32>
    %cst_44 = arith.constant dense<0.000000e+00> : vector<8x8xf32>
    %82 = tpu.matmul %80, %81, %cst_44 {dimension_numbers = #tpu.dot_dimension_numbers<[1], [1], [0], [0], [0, 0, 1, 0], [], []>} : vector<8x16xf32>, vector<8x16xf32>, vector<8x8xf32> -> vector<8x8xf32>
    %cst_45 = arith.constant 0.0883883461 : f32
    %83 = vector.broadcast %cst_45 : f32 to vector<8x8xf32>
    %84 = arith.mulf %82, %83 : vector<8x8xf32>
    %cst_46 = arith.constant 0.000000e+00 : f32
    %85 = vector.broadcast %cst_46 : f32 to vector<8x8xf32>
    %86 = arith.cmpf one, %16, %85 : vector<8x8xf32>
    %cst_47 = arith.constant 0xCDA8965F : f32
    %87 = vector.broadcast %cst_47 : f32 to vector<8x8xf32>
    %88 = arith.select %86, %87, %84 : vector<8x8xi1>, vector<8x8xf32>
    %89 = tpu.concatenate %25, %34, %43, %52, %61, %70, %79, %88 in 0 : vector<8x8xf32>, vector<8x8xf32>, vector<8x8xf32>, vector<8x8xf32>, vector<8x8xf32>, vector<8x8xf32>, vector<8x8xf32>, vector<8x8xf32> -> vector<64x8xf32>
    %cst_48 = arith.constant dense<0xFF800000> : vector<64xf32>
    %90 = vector.multi_reduction <maximumf>, %89, %cst_48 [1] : vector<64x8xf32> to vector<64xf32>
    %91 = vector.shape_cast %90 : vector<64xf32> to vector<64x1xf32>
    %92 = vector.broadcast %91 : vector<64x1xf32> to vector<64x8xf32>
    %93 = arith.subf %89, %92 : vector<64x8xf32>
    %94 = math.exp %93 : vector<64x8xf32>
    %cst_49 = arith.constant dense<0.000000e+00> : vector<64xf32>
    %95 = vector.multi_reduction <add>, %94, %cst_49 [1] : vector<64x8xf32> to vector<64xf32>
    %96 = vector.shape_cast %95 : vector<64xf32> to vector<64x1xf32>
    %97 = vector.broadcast %96 : vector<64x1xf32> to vector<64x8xf32>
    %98 = arith.divf %94, %97 : vector<64x8xf32>
    %99 = vector.extract_strided_slice %98 {offsets = [0, 0], sizes = [8, 8], strides = [1, 1]} : vector<64x8xf32> to vector<8x8xf32>
    %100 = vector.extract_strided_slice %15 {offsets = [0, 0], sizes = [8, 16], strides = [1, 1]} : vector<8x128xf32> to vector<8x16xf32>
    %cst_50 = arith.constant dense<0.000000e+00> : vector<8x16xf32>
    %101 = tpu.matmul %99, %100, %cst_50 {dimension_numbers = #tpu.dot_dimension_numbers<[1], [0], [0], [1], [0, 0, 1, 1], [], []>} : vector<8x8xf32>, vector<8x16xf32>, vector<8x16xf32> -> vector<8x16xf32>
    %102 = vector.extract_strided_slice %98 {offsets = [8, 0], sizes = [8, 8], strides = [1, 1]} : vector<64x8xf32> to vector<8x8xf32>
    %103 = vector.extract_strided_slice %15 {offsets = [0, 16], sizes = [8, 16], strides = [1, 1]} : vector<8x128xf32> to vector<8x16xf32>
    %cst_51 = arith.constant dense<0.000000e+00> : vector<8x16xf32>
    %104 = tpu.matmul %102, %103, %cst_51 {dimension_numbers = #tpu.dot_dimension_numbers<[1], [0], [0], [1], [0, 0, 1, 1], [], []>} : vector<8x8xf32>, vector<8x16xf32>, vector<8x16xf32> -> vector<8x16xf32>
    %105 = vector.extract_strided_slice %98 {offsets = [16, 0], sizes = [8, 8], strides = [1, 1]} : vector<64x8xf32> to vector<8x8xf32>
    %106 = vector.extract_strided_slice %15 {offsets = [0, 32], sizes = [8, 16], strides = [1, 1]} : vector<8x128xf32> to vector<8x16xf32>
    %cst_52 = arith.constant dense<0.000000e+00> : vector<8x16xf32>
    %107 = tpu.matmul %105, %106, %cst_52 {dimension_numbers = #tpu.dot_dimension_numbers<[1], [0], [0], [1], [0, 0, 1, 1], [], []>} : vector<8x8xf32>, vector<8x16xf32>, vector<8x16xf32> -> vector<8x16xf32>
    %108 = vector.extract_strided_slice %98 {offsets = [24, 0], sizes = [8, 8], strides = [1, 1]} : vector<64x8xf32> to vector<8x8xf32>
    %109 = vector.extract_strided_slice %15 {offsets = [0, 48], sizes = [8, 16], strides = [1, 1]} : vector<8x128xf32> to vector<8x16xf32>
    %cst_53 = arith.constant dense<0.000000e+00> : vector<8x16xf32>
    %110 = tpu.matmul %108, %109, %cst_53 {dimension_numbers = #tpu.dot_dimension_numbers<[1], [0], [0], [1], [0, 0, 1, 1], [], []>} : vector<8x8xf32>, vector<8x16xf32>, vector<8x16xf32> -> vector<8x16xf32>
    %111 = vector.extract_strided_slice %98 {offsets = [32, 0], sizes = [8, 8], strides = [1, 1]} : vector<64x8xf32> to vector<8x8xf32>
    %112 = vector.extract_strided_slice %15 {offsets = [0, 64], sizes = [8, 16], strides = [1, 1]} : vector<8x128xf32> to vector<8x16xf32>
    %cst_54 = arith.constant dense<0.000000e+00> : vector<8x16xf32>
    %113 = tpu.matmul %111, %112, %cst_54 {dimension_numbers = #tpu.dot_dimension_numbers<[1], [0], [0], [1], [0, 0, 1, 1], [], []>} : vector<8x8xf32>, vector<8x16xf32>, vector<8x16xf32> -> vector<8x16xf32>
    %114 = vector.extract_strided_slice %98 {offsets = [40, 0], sizes = [8, 8], strides = [1, 1]} : vector<64x8xf32> to vector<8x8xf32>
    %115 = vector.extract_strided_slice %15 {offsets = [0, 80], sizes = [8, 16], strides = [1, 1]} : vector<8x128xf32> to vector<8x16xf32>
    %cst_55 = arith.constant dense<0.000000e+00> : vector<8x16xf32>
    %116 = tpu.matmul %114, %115, %cst_55 {dimension_numbers = #tpu.dot_dimension_numbers<[1], [0], [0], [1], [0, 0, 1, 1], [], []>} : vector<8x8xf32>, vector<8x16xf32>, vector<8x16xf32> -> vector<8x16xf32>
    %117 = vector.extract_strided_slice %98 {offsets = [48, 0], sizes = [8, 8], strides = [1, 1]} : vector<64x8xf32> to vector<8x8xf32>
    %118 = vector.extract_strided_slice %15 {offsets = [0, 96], sizes = [8, 16], strides = [1, 1]} : vector<8x128xf32> to vector<8x16xf32>
    %cst_56 = arith.constant dense<0.000000e+00> : vector<8x16xf32>
    %119 = tpu.matmul %117, %118, %cst_56 {dimension_numbers = #tpu.dot_dimension_numbers<[1], [0], [0], [1], [0, 0, 1, 1], [], []>} : vector<8x8xf32>, vector<8x16xf32>, vector<8x16xf32> -> vector<8x16xf32>
    %120 = vector.extract_strided_slice %98 {offsets = [56, 0], sizes = [8, 8], strides = [1, 1]} : vector<64x8xf32> to vector<8x8xf32>
    %121 = vector.extract_strided_slice %15 {offsets = [0, 112], sizes = [8, 16], strides = [1, 1]} : vector<8x128xf32> to vector<8x16xf32>
    %cst_57 = arith.constant dense<0.000000e+00> : vector<8x16xf32>
    %122 = tpu.matmul %120, %121, %cst_57 {dimension_numbers = #tpu.dot_dimension_numbers<[1], [0], [0], [1], [0, 0, 1, 1], [], []>} : vector<8x8xf32>, vector<8x16xf32>, vector<8x16xf32> -> vector<8x16xf32>
    %123 = tpu.concatenate %101, %104, %107, %110, %113, %116, %119, %122 in 1 : vector<8x16xf32>, vector<8x16xf32>, vector<8x16xf32>, vector<8x16xf32>, vector<8x16xf32>, vector<8x16xf32>, vector<8x16xf32>, vector<8x16xf32> -> vector<8x128xf32>
    %c0_58 = arith.constant 0 : index
    %c0_59 = arith.constant 0 : index
    %124 = vector.load %arg7[%c0_58, %c0_59] : memref<128x128xf32, #tpu.memory_space<vmem>>, vector<128x128xf32>
    %cst_60 = arith.constant dense<0.000000e+00> : vector<8x128xf32>
    %125 = tpu.matmul %123, %124, %cst_60 {dimension_numbers = #tpu.dot_dimension_numbers<[1], [0], [0], [1], [0, 0, 1, 1], [], []>} : vector<8x128xf32>, vector<128x128xf32>, vector<8x128xf32> -> vector<8x128xf32>
    %c0_61 = arith.constant 0 : index
    %c0_62 = arith.constant 0 : index
    %126 = vector.load %arg8[%c0_61, %c0_62] : memref<1x128xf32, #tpu.memory_space<vmem>>, vector<1x128xf32>
    %127 = vector.broadcast %126 : vector<1x128xf32> to vector<8x128xf32>
    %128 = arith.addf %125, %127 : vector<8x128xf32>
    %129 = arith.addf %1, %128 : vector<8x128xf32>
    %cst_63 = arith.constant dense<0.000000e+00> : vector<8xf32>
    %130 = vector.multi_reduction <add>, %129, %cst_63 [1] : vector<8x128xf32> to vector<8xf32>
    %131 = vector.shape_cast %130 : vector<8xf32> to vector<8x1xf32>
    %cst_64 = arith.constant 1.280000e+02 : f32
    %132 = vector.broadcast %cst_64 : f32 to vector<8x1xf32>
    %133 = arith.divf %131, %132 : vector<8x1xf32>
    %134 = vector.broadcast %133 : vector<8x1xf32> to vector<8x128xf32>
    %135 = arith.subf %129, %134 : vector<8x128xf32>
    %136 = arith.mulf %135, %135 : vector<8x128xf32>
    %cst_65 = arith.constant dense<0.000000e+00> : vector<8xf32>
    %137 = vector.multi_reduction <add>, %136, %cst_65 [1] : vector<8x128xf32> to vector<8xf32>
    %138 = vector.shape_cast %137 : vector<8xf32> to vector<8x1xf32>
    %cst_66 = arith.constant 1.280000e+02 : f32
    %139 = vector.broadcast %cst_66 : f32 to vector<8x1xf32>
    %140 = arith.divf %138, %139 : vector<8x1xf32>
    %cst_67 = arith.constant 9.99999974E-6 : f32
    %141 = vector.broadcast %cst_67 : f32 to vector<8x1xf32>
    %142 = arith.addf %140, %141 : vector<8x1xf32>
    %143 = math.rsqrt %142 : vector<8x1xf32>
    %144 = vector.broadcast %143 : vector<8x1xf32> to vector<8x128xf32>
    %145 = arith.mulf %135, %144 : vector<8x128xf32>
    %c0_68 = arith.constant 0 : index
    %c0_69 = arith.constant 0 : index
    %146 = vector.load %arg9[%c0_68, %c0_69] : memref<1x128xf32, #tpu.memory_space<vmem>>, vector<1x128xf32>
    %147 = vector.broadcast %146 : vector<1x128xf32> to vector<8x128xf32>
    %148 = arith.mulf %145, %147 : vector<8x128xf32>
    %c0_70 = arith.constant 0 : index
    %c0_71 = arith.constant 0 : index
    %149 = vector.load %arg10[%c0_70, %c0_71] : memref<1x128xf32, #tpu.memory_space<vmem>>, vector<1x128xf32>
    %150 = vector.broadcast %149 : vector<1x128xf32> to vector<8x128xf32>
    %151 = arith.addf %148, %150 : vector<8x128xf32>
    %c0_72 = arith.constant 0 : index
    %c0_73 = arith.constant 0 : index
    %c0_74 = arith.constant 0 : index
    %152 = vector.load %arg12[%c0_72, %c0_73, %c0_74] : memref<1x8x128xf32, #tpu.memory_space<vmem>>, vector<1x8x128xf32>
    %153 = vector.shape_cast %152 : vector<1x8x128xf32> to vector<8x128xf32>
    %154 = vector.shape_cast %151 : vector<8x128xf32> to vector<1x8x128xf32>
    tpu.vector_store %arg12[%c0_72, %c0_73, %c0_74], %154 {strides = array<i32>} : memref<1x8x128xf32, #tpu.memory_space<vmem>>, vector<1x8x128xf32>,
    return
  }
  func.func @transform_0(%arg0: i32) -> (i32, i32, i32) {
    %c0_i32 = arith.constant 0 : i32
    %c0_i32_0 = arith.constant 0 : i32
    %c0_i32_1 = arith.constant 0 : i32
    return %arg0, %c0_i32, %c0_i32_0 : i32, i32, i32
  }
  func.func @transform_1(%arg0: i32) -> (i32, i32, i32) {
    %c0_i32 = arith.constant 0 : i32
    %c0_i32_0 = arith.constant 0 : i32
    %c0_i32_1 = arith.constant 0 : i32
    return %arg0, %c0_i32, %c0_i32_0 : i32, i32, i32
  }
  func.func @transform_2(%arg0: i32) -> (i32, i32) {
    %c0_i32 = arith.constant 0 : i32
    %c0_i32_0 = arith.constant 0 : i32
    %c0_i32_1 = arith.constant 0 : i32
    return %c0_i32, %c0_i32_0 : i32, i32
  }
  func.func @transform_3(%arg0: i32) -> (i32, i32) {
    %c0_i32 = arith.constant 0 : i32
    %c0_i32_0 = arith.constant 0 : i32
    %c0_i32_1 = arith.constant 0 : i32
    return %c0_i32, %c0_i32_0 : i32, i32
  }
  func.func @transform_4(%arg0: i32) -> (i32, i32) {
    %c0_i32 = arith.constant 0 : i32
    %c0_i32_0 = arith.constant 0 : i32
    %c0_i32_1 = arith.constant 0 : i32
    return %c0_i32, %c0_i32_0 : i32, i32
  }
  func.func @transform_5(%arg0: i32) -> (i32, i32) {
    %c0_i32 = arith.constant 0 : i32
    %c0_i32_0 = arith.constant 0 : i32
    %c0_i32_1 = arith.constant 0 : i32
    return %c0_i32, %c0_i32_0 : i32, i32
  }
  func.func @transform_6(%arg0: i32) -> (i32, i32) {
    %c0_i32 = arith.constant 0 : i32
    %c0_i32_0 = arith.constant 0 : i32
    %c0_i32_1 = arith.constant 0 : i32
    return %c0_i32, %c0_i32_0 : i32, i32
  }
  func.func @transform_7(%arg0: i32) -> (i32, i32) {
    %c0_i32 = arith.constant 0 : i32
    %c0_i32_0 = arith.constant 0 : i32
    %c0_i32_1 = arith.constant 0 : i32
    return %c0_i32, %c0_i32_0 : i32, i32
  }
  func.func @transform_8(%arg0: i32) -> (i32, i32) {
    %c0_i32 = arith.constant 0 : i32
    %c0_i32_0 = arith.constant 0 : i32
    %c0_i32_1 = arith.constant 0 : i32
    return %c0_i32, %c0_i32_0 : i32, i32
  }
  func.func @transform_9(%arg0: i32) -> (i32, i32) {
    %c0_i32 = arith.constant 0 : i32
    %c0_i32_0 = arith.constant 0 : i32
    %c0_i32_1 = arith.constant 0 : i32
    return %c0_i32, %c0_i32_0 : i32, i32
  }
  func.func @transform_10(%arg0: i32) -> (i32, i32) {
    %c0_i32 = arith.constant 0 : i32
    %c0_i32_0 = arith.constant 0 : i32
    %c0_i32_1 = arith.constant 0 : i32
    return %c0_i32, %c0_i32_0 : i32, i32
  }
  func.func @transform_11(%arg0: i32) -> (i32, i32, i32) {
    %c0_i32 = arith.constant 0 : i32
    %c0_i32_0 = arith.constant 0 : i32
    %c0_i32_1 = arith.constant 0 : i32
    return %arg0, %c0_i32, %c0_i32_0 : i32, i32, i32
  }
}

module attributes {stable_mosaic.version = 11 : i64} {
  func.func @_linear_kernel(%arg0: i32, %arg1: memref<8x128xf32, #tpu.memory_space<vmem>>, %arg2: memref<128x128xf32, #tpu.memory_space<vmem>>, %arg3: memref<1x128xf32, #tpu.memory_space<vmem>>, %arg4: memref<8x128xf32, #tpu.memory_space<vmem>>) attributes {dimension_semantics = [#tpu.dimension_semantics<parallel>], iteration_bounds = array<i64: 2>, scalar_prefetch = 0 : i64, scratch_operands = 0 : i64, tpu.core_type = #tpu.core_type<tc>, window_params = [{transform_indices = @transform_0, window_bounds = array<i64: 8, 128>}, {pipeline_mode = #tpu.pipeline_mode<synchronous>, transform_indices = @transform_1, window_bounds = array<i64: 128, 128>}, {pipeline_mode = #tpu.pipeline_mode<synchronous>, transform_indices = @transform_2, window_bounds = array<i64: 1, 128>}, {transform_indices = @transform_3, window_bounds = array<i64: 8, 128>}]} {
    %c0 = arith.constant 0 : index
    %c0_0 = arith.constant 0 : index
    %0 = vector.load %arg1[%c0, %c0_0] : memref<8x128xf32, #tpu.memory_space<vmem>>, vector<8x128xf32>
    %c0_1 = arith.constant 0 : index
    %c0_2 = arith.constant 0 : index
    %1 = vector.load %arg2[%c0_1, %c0_2] : memref<128x128xf32, #tpu.memory_space<vmem>>, vector<128x128xf32>
    %cst = arith.constant dense<0.000000e+00> : vector<8x128xf32>
    %2 = tpu.matmul %0, %1, %cst {dimension_numbers = #tpu.dot_dimension_numbers<[1], [0], [0], [1], [0, 0, 1, 1], [], []>} : vector<8x128xf32>, vector<128x128xf32>, vector<8x128xf32> -> vector<8x128xf32>
    %c0_3 = arith.constant 0 : index
    %c0_4 = arith.constant 0 : index
    %3 = vector.load %arg3[%c0_3, %c0_4] : memref<1x128xf32, #tpu.memory_space<vmem>>, vector<1x128xf32>
    %4 = vector.broadcast %3 : vector<1x128xf32> to vector<8x128xf32>
    %5 = arith.addf %2, %4 : vector<8x128xf32>
    %c0_5 = arith.constant 0 : index
    %c0_6 = arith.constant 0 : index
    %6 = vector.load %arg4[%c0_5, %c0_6] : memref<8x128xf32, #tpu.memory_space<vmem>>, vector<8x128xf32>
    tpu.vector_store %arg4[%c0_5, %c0_6], %5 {strides = array<i32>} : memref<8x128xf32, #tpu.memory_space<vmem>>, vector<8x128xf32>,
    return
  }
  func.func @transform_0(%arg0: i32) -> (i32, i32) {
    %c0_i32 = arith.constant 0 : i32
    %c0_i32_0 = arith.constant 0 : i32
    return %arg0, %c0_i32 : i32, i32
  }
  func.func @transform_1(%arg0: i32) -> (i32, i32) {
    %c0_i32 = arith.constant 0 : i32
    %c0_i32_0 = arith.constant 0 : i32
    %c0_i32_1 = arith.constant 0 : i32
    return %c0_i32, %c0_i32_0 : i32, i32
  }
  func.func @transform_2(%arg0: i32) -> (i32, i32) {
    %c0_i32 = arith.constant 0 : i32
    %c0_i32_0 = arith.constant 0 : i32
    %c0_i32_1 = arith.constant 0 : i32
    return %c0_i32, %c0_i32_0 : i32, i32
  }
  func.func @transform_3(%arg0: i32) -> (i32, i32) {
    %c0_i32 = arith.constant 0 : i32
    %c0_i32_0 = arith.constant 0 : i32
    return %arg0, %c0_i32 : i32, i32
  }
}

</mosaic_0001>

<bundles_post_ra>
// kernel: transformer_forward.11
= control target key start
LH: loop header
LB: loop body
LE: loop exit
PB: predicated region body
PF: predicated region fallthrough
CT: control target
= control target key end

     0   :  { %s2596_s13 = smov 0   ;;  %s2998_s0 = inlined_call_operand.vmem [shape: f32[2,8,128], index: 0, kind: input, shape index: {}, may-alias: {0,1}]   ;;  %s2999_s1 = inlined_call_operand.vmem [shape: f32[2,8,128], index: 1, kind: input, shape index: {}, may-alias: {0,1}]   ;;  %s3000_s2 = inlined_call_operand.vmem [shape: f32[128,128], index: 2, kind: input, shape index: {}]   ;;  %s3001_s3 = inlined_call_operand.vmem [shape: f32[1,128], index: 3, kind: input, shape index: {}]   ;;  %s3002_s4 = inlined_call_operand.vmem [shape: f32[128,256], index: 4, kind: input, shape index: {}]   ;;  %s3003_s5 = inlined_call_operand.vmem [shape: f32[1,256], index: 5, kind: input, shape index: {}]   ;;  %s3004_s6 = inlined_call_operand.vmem [shape: f32[128,128], index: 6, kind: input, shape index: {}]   ;;  %s3005_s7 = inlined_call_operand.vmem [shape: f32[1,128], index: 7, kind: input, shape index: {}]   ;;  %s3006_s8 = inlined_call_operand.vmem [shape: f32[1,128], index: 8, kind: input, shape index: {}]   ;;  %s3007_s9 = inlined_call_operand.vmem [shape: f32[1,128], index: 9, kind: input, shape index: {}]   ;;  %s3008_s10 = inlined_call_operand.vmem [shape: f32[2,8,128], index: 10, kind: output, shape index: {}]  }
   0x1 LB: > { %s2137_s14 = sadd.s32 4294967295, %s2529_s13   ;;  %p2141_p0 = scmp.ge.s32.totalorder %s2529_s13, 1  ;;  %s2529_s13 = sphi %s2596_s13, %s20_s13  }
   0x2   : > { %p320_p1 = scmp.lt.s32.totalorder %s2529_s13, 3 }
   0x4   : > { %p321_p2 = pnand %p2141_p0, %p320_p1 }
   0x5   : > { %v468_v0 = vld [vmem:[%s3002_s4 + $0x8] sm:$0xff] (!%p321_p2)  ;;  %v470_v1 = vld [vmem:[%s3002_s4 + $0x18] sm:$0xff] (!%p321_p2)  ;;  %v467_v2 = vld [vmem:[%s3002_s4] sm:$0xff] (!%p321_p2)  ;;  %v2531_v5 = vmov (!%p321_p2), 0.0|0.0   ;;  %v2532_v8 = vmov (!%p321_p2), 0.0   ;;  %vm2533_vm0 = vmmov (!%p321_p2), 0  }
   0x6   : > { %324 = sbr.rel (%p321_p2) target bundleno = 1782 (0x6f6), region = 60  ;;  %v2415_v3 = vpack.c.bf16 (!%p321_p2), %v470_v1, %v468_v0  ;;  %v469_v4 = vld [vmem:[%s3002_s4 + $0x10] sm:$0xff] (!%p321_p2)  ;;  %2391 = vmatprep.subr.bf16.mxu0 (!%p321_p2), %v2531_v5  ;;  %v374_v6 = vld [vmem:[%s3000_s2] sm:$0xff] (!%p321_p2)  ;;  %v375_v7 = vld [vmem:[%s3000_s2 + $0x8] sm:$0xff] (!%p321_p2)  ;;  %575 = vmatprep.mubr.f32.mxu1 (!%p321_p2), %v2532_v8  ;;  %p2728_p3 = scmp.lt.s32.totalorder (!%p321_p2), %s2137_s14, 1  ;;  %vm582_vm1 = vcmask (!%p321_p2), 130048  }
   0x7   : > { %v2417_v9 = vpack.c.bf16 (!%p321_p2), %v469_v4, %v467_v2  ;;  %v2392_v10 = vpack.c.bf16 (!%p321_p2), %v375_v7, %v374_v6  ;;  %v472_v11 = vld [vmem:[%s3002_s4 + $0x28] sm:$0xff] (!%p321_p2)  ;;  %v474_v12 = vld [vmem:[%s3002_s4 + $0x38] sm:$0xff] (!%p321_p2)  ;;  %v471_v13 = vld [vmem:[%s3002_s4 + $0x20] sm:$0xff] (!%p321_p2)  ;;  %2273 = vmatprep.mubr.msk.f32.mxu0 (!%p321_p2), %vm2533_vm0, %v2532_v8  ;;  %s2534_s12 = smov (!%p321_p2), 96   ;;  %s2535_s15 = smov (!%p321_p2), 112   ;;  %vm1213_vm2 = vcmask (!%p321_p2), 64512  }
   0x8   : > { %2416 = vmatprep.subr.bf16.mxu1 (!%p321_p2), %v2415_v3  ;;  %v2419_v14 = vpack.c.bf16 (!%p321_p2), %v474_v12, %v472_v11  ;;  %v473_v15 = vld [vmem:[%s3002_s4 + $0x30] sm:$0xff] (!%p321_p2)  ;;  %v377_v17 = vld [vmem:[%s3000_s2 + $0x18] sm:$0xff] (!%p321_p2)  ;;  %v476_v20 = vld [vmem:[%s3002_s4 + $0x48] sm:$0xff] (!%p321_p2)  ;;  %s2536_s16 = smov (!%p321_p2), 80   ;;  %s2537_s17 = smov (!%p321_p2), 64   ;;  %vm1937_vm3 = vcmask (!%p321_p2), 261120  }
   0x9   : > { %v376_v16 = vld [vmem:[%s3000_s2 + $0x10] sm:$0xff] (!%p321_p2)  ;;  %2418 = vmatpush1.bf16.msra.mxu1 (!%p321_p2), %v2417_v9  ;;  %2393 = vmatpush3.bf16.msra.mxu0 (!%p321_p2), %v2392_v10  ;;  %v2421_v18 = vpack.c.bf16 (!%p321_p2), %v473_v15, %v471_v13  ;;  %v478_v21 = vld [vmem:[%s3002_s4 + $0x58] sm:$0xff] (!%p321_p2)  ;;  %v475_v22 = vld [vmem:[%s3002_s4 + $0x40] sm:$0xff] (!%p321_p2)  ;;  %s2538_s18 = smov (!%p321_p2), 48   ;;  %s2539_s20 = smov (!%p321_p2), 32   ;;  %vm1939_vm4 = vcmask (!%p321_p2), 392192  }
   0xa   : > { %v2395_v19 = vpack.c.bf16 (!%p321_p2), %v377_v17, %v376_v16  ;;  %2420 = vmatprep.subr.bf16.mxu1 (!%p321_p2), %v2419_v14  ;;  %2394 = vmatprep.subr.bf16.mxu0 (!%p321_p2), %v2531_v5  ;;  %v2423_v23 = vpack.c.bf16 (!%p321_p2), %v478_v21, %v476_v20  ;;  %v477_v24 = vld [vmem:[%s3002_s4 + $0x50] sm:$0xff] (!%p321_p2)  ;;  %v378_v25 = vld [vmem:[%s3000_s2 + $0x20] sm:$0xff] (!%p321_p2)  ;;  %v379_v26 = vld [vmem:[%s3000_s2 + $0x28] sm:$0xff] (!%p321_p2)  ;;  %v501_v14 = vlaneseq (!%p321_p2)  ;;  %s2540_s19 = smov (!%p321_p2), 16   ;;  %vm1941_vm5 = vcmask (!%p321_p2), 523264  }
   0xb   : > { %v480_v27 = vld [vmem:[%s3002_s4 + $0x68] sm:$0xff] (!%p321_p2)  ;;  %v482_v28 = vld [vmem:[%s3002_s4 + $0x78] sm:$0xff] (!%p321_p2)  ;;  %v2425_v29 = vpack.c.bf16 (!%p321_p2), %v477_v24, %v475_v22  ;;  %v2398_v30 = vpack.c.bf16 (!%p321_p2), %v379_v26, %v378_v25  ;;  %v479_v31 = vld [vmem:[%s3002_s4 + $0x60] sm:$0xff] (!%p321_p2)  ;;  %vm1943_vm6 = vcmask (!%p321_p2), 654336   ;;  %vm1945_vm7 = vcmask (!%p321_p2), 785408  }
   0xc   : > { %v2427_v32 = vpack.c.bf16 (!%p321_p2), %v482_v28, %v480_v27  ;;  %v481_v33 = vld [vmem:[%s3002_s4 + $0x70] sm:$0xff] (!%p321_p2)  ;;  %v381_v35 = vld [vmem:[%s3000_s2 + $0x38] sm:$0xff] (!%p321_p2)  ;;  %v484_v36 = vld [vmem:[%s3002_s4 + $0x88] sm:$0xff] (!%p321_p2)  ;;  %v502_v15 = vshrl.u32 (!%p321_p2), %v501_v14, 7  ;;  %vm1947_vm8 = vcmask (!%p321_p2), 916480  }
   0xd   : > { %2422 = vmatpush1.bf16.msra.mxu1 %v2421_v18  ;;  %2396 = vmatpush3.bf16.msra.mxu0 %v2395_v19  ;;  %v380_v34 = vld [vmem:[%s3000_s2 + $0x30] sm:$0xff]  ;;  %v486_v37 = vld [vmem:[%s3002_s4 + $0x98] sm:$0xff]  ;;  %v2429_v38 = vpack.c.bf16 %v481_v33, %v479_v31  ;;  %v483_v40 = vld [vmem:[%s3002_s4 + $0x80] sm:$0xff]  ;;  %s3011_s14 = smov (!%p2728_p3, %s2137_s14), 1 }
   0xe   : > { %2424 = vmatprep.subr.bf16.mxu1 %v2423_v23  ;;  %2397 = vmatprep.subr.bf16.mxu0 %v2531_v5  ;;  %v2401_v39 = vpack.c.bf16 %v381_v35, %v380_v34  ;;  %v2431_v41 = vpack.c.bf16 %v486_v37, %v484_v36  ;;  %v485_v42 = vld [vmem:[%s3002_s4 + $0x90] sm:$0xff]  ;;  %v382_v43 = vld [vmem:[%s3000_s2 + $0x40] sm:$0xff]  ;;  %v383_v44 = vld [vmem:[%s3000_s2 + $0x48] sm:$0xff]  ;;  %s2768_s22 = sshll.u32 %s3011_s14, 3  ;;  %v503_v16 = vsub.s32 0, %v502_v15  ;;  %v507_v18 = vsub.s32 1, %v502_v15 }
   0xf   : > { %v488_v45 = vld [vmem:[%s3002_s4 + $0xa8] sm:$0xff]  ;;  %v490_v46 = vld [vmem:[%s3002_s4 + $0xb8] sm:$0xff]  ;;  %v2433_v47 = vpack.c.bf16 %v485_v42, %v483_v40  ;;  %v2404_v48 = vpack.c.bf16 %v383_v44, %v382_v43  ;;  %v487_v49 = vld [vmem:[%s3002_s4 + $0xa0] sm:$0xff]  ;;  %s367_s25 = scalar_lea.vmem %s2999_s1, %s2768_s22  ;;  %s363_s28 = scalar_lea.vmem %s2998_s0, %s2768_s22 }
  0x10   : > { %v2435_v50 = vpack.c.bf16 %v490_v46, %v488_v45  ;;  %v489_v51 = vld [vmem:[%s3002_s4 + $0xb0] sm:$0xff]  ;;  %v385_v53 = vld [vmem:[%s3000_s2 + $0x58] sm:$0xff]  ;;  %v492_v54 = vld [vmem:[%s3002_s4 + $0xc8] sm:$0xff]  ;;  %s371_s21 = scalar_lea.vmem %s3008_s10, %s2768_s22 }
  0x11   : > { %2426 = vmatpush1.bf16.msra.mxu1 %v2425_v29  ;;  %2399 = vmatpush3.bf16.msra.mxu0 %v2398_v30  ;;  %v384_v52 = vld [vmem:[%s3000_s2 + $0x50] sm:$0xff]  ;;  %v494_v55 = vld [vmem:[%s3002_s4 + $0xd8] sm:$0xff]  ;;  %v2437_v56 = vpack.c.bf16 %v489_v51, %v487_v49  ;;  %v491_v58 = vld [vmem:[%s3002_s4 + $0xc0] sm:$0xff] }
  0x12   : > { %2428 = vmatprep.subr.bf16.mxu1 %v2427_v32  ;;  %2400 = vmatprep.subr.bf16.mxu0 %v2531_v5  ;;  %v2407_v57 = vpack.c.bf16 %v385_v53, %v384_v52  ;;  %v2439_v59 = vpack.c.bf16 %v494_v55, %v492_v54  ;;  %v493_v60 = vld [vmem:[%s3002_s4 + $0xd0] sm:$0xff]  ;;  %v386_v61 = vld [vmem:[%s3000_s2 + $0x60] sm:$0xff]  ;;  %v387_v62 = vld [vmem:[%s3000_s2 + $0x68] sm:$0xff] }
  0x13   : > { %v496_v63 = vld [vmem:[%s3002_s4 + $0xe8] sm:$0xff]  ;;  %v498_v0 = vld [vmem:[%s3002_s4 + $0xf8] sm:$0xff]  ;;  %v2441_v1 = vpack.c.bf16 %v493_v60, %v491_v58  ;;  %v2410_v2 = vpack.c.bf16 %v387_v62, %v386_v61  ;;  %v495_v3 = vld [vmem:[%s3002_s4 + $0xe0] sm:$0xff] }
  0x14   : > { %v2443_v4 = vpack.c.bf16 %v498_v0, %v496_v63  ;;  %v497_v6 = vld [vmem:[%s3002_s4 + $0xf0] sm:$0xff]  ;;  %v389_v9 = vld [vmem:[%s3000_s2 + $0x78] sm:$0xff]  ;;  %v373_v12 = vld [vmem:[%s367_s25] sm:$0xff] }
  0x15   : > { %2430 = vmatpush1.bf16.msra.mxu1 %v2429_v38  ;;  %2402 = vmatpush3.bf16.msra.mxu0 %v2401_v39  ;;  %v388_v7 = vld [vmem:[%s3000_s2 + $0x70] sm:$0xff]  ;;  %v2445_v10 = vpack.c.bf16 %v497_v6, %v495_v3  ;;  %v2779_v13 = vld [vmem:[%s363_s28] sm:$0xff] }
  0x16   : > { %2432 = vmatprep.subr.bf16.mxu1 %v2431_v41  ;;  %2403 = vmatprep.subr.bf16.mxu0 %v2531_v5  ;;  %v2413_v11 = vpack.c.bf16 %v389_v9, %v388_v7  ;;  %v499_v17 = vld [vmem:[%s3003_s5] sm:$0x3] }
  0x17   : > { %v504_v19 = vrot.slane %v499_v17, %v503_v16  ;;  %v508_v20 = vrot.slane %v499_v17, %v507_v18  ;;  %v2145_v22 = vld [vmem:[%s3001_s3] ss:$0 sm:$0xff] }
  0x19   : > { %2434 = vmatpush1.bf16.msra.mxu1 %v2433_v47  ;;  %2405 = vmatpush3.bf16.msra.mxu0 %v2404_v48 }
  0x1a   : > { %2436 = vmatprep.subr.bf16.mxu1 %v2435_v50  ;;  %2406 = vmatprep.subr.bf16.mxu0 %v2531_v5 }
  0x1d   : > { %2438 = vmatpush1.bf16.msra.mxu1 %v2437_v56  ;;  %2408 = vmatpush3.bf16.msra.mxu0 %v2407_v57 }
  0x1e   : > { %2440 = vmatprep.subr.bf16.mxu1 %v2439_v59  ;;  %2409 = vmatprep.subr.bf16.mxu0 %v2531_v5 }
  0x21   : > { %2442 = vmatpush1.bf16.msra.mxu1 %v2441_v1  ;;  %2411 = vmatpush3.bf16.msra.mxu0 %v2410_v2 }
  0x22   : > { %2444 = vmatprep.subr.bf16.mxu1 %v2443_v4  ;;  %2412 = vmatprep.subr.bf16.mxu0 %v2531_v5 }
  0x25   : > { %2446 = vmatpush1.bf16.msra.mxu1 %v2445_v10  ;;  %2414 = vmatpush3.bf16.msra.mxu0 %v2413_v11 }
  0x26   : > { %2276 = vmatprep.subr.mxu1 %v2532_v8  ;;  %2316 = vmatprep.subr.mxu0 %v2532_v8 }
  0x28   : > { %576 = vmatmul.mubr.f32.vlgmr.msra.gmra.mrb[0].mxu1 %v373_v12  ;;  %2274 = vmatmul.mubr.f32.vlgmr.msra.gmra.mrb[0].mxu0 %v2779_v13 }
  0x29   : > { %2278 = vmatprep.mubr.msk.f32.mxu1 %vm2533_vm0, %v2532_v8  ;;  %2318 = vmatprep.mubr.msk.f32.mxu0 %vm2533_vm0, %v2532_v8 }
  0xfb   : > { %v577_v21 = vpop.f32.mrb[0].mxu1  ;;  %v463_v23 = vpop.f32.mrb[0].mxu0 }
  0xfc   : > { %v578_v24 = vadd.f32 %v577_v21, %v504_v19  ;;  %v579_v25 = vpop.f32.mrb[1].mxu1  ;;  %v2275_v26 = vpop.f32.mrb[1].mxu0  ;;  %v464_v28 = vadd.f32 %v2145_v22, %v463_v23 }
  0xfd   : > { %v2794_v27 = vadd.f32 %v579_v25, %v508_v20 }
  0xfe   : > { %741 = vrot.lane.b32.xlu1 %v578_v24, %s2534_s12  ;;  %662 = vrot.lane.b32.xlu0 %v578_v24, %s2535_s15 }
  0xff   : > { %2277 = vmatpush3.xpose.msk.msra.mxu1 %vm582_vm1, %v578_v24  ;;  %2317 = vmatpush3.msra.mxu0 %v2794_v27 }
 0x100   : > { %2281 = vmatprep.subr.mxu1 %v2532_v8  ;;  %2326 = vmatprep.subr.mxu0 %v2532_v8 }
 0x102   : > { %2279 = vmatmul.mubr.msk.f32.vlgmr.msra.gmra.mrb[2].mxu1 %vm582_vm1, %v464_v28  ;;  %739 = vrot.lane.b32.xlu1 %v464_v28, %s2534_s12 }
 0x103   : > { %660 = vrot.lane.b32.xlu0 %v464_v28, %s2535_s15  ;;  %2283 = vmatprep.mubr.msk.f32.mxu1 %vm2533_vm0, %v2532_v8 }
 0x106   : > { %818 = vrot.lane.b32.xlu1 %v464_v28, %s2536_s16 }
 0x107   : > { %820 = vrot.lane.b32.xlu0 %v578_v24, %s2536_s16 }
 0x10a   : > { %897 = vrot.lane.b32.xlu1 %v464_v28, %s2537_s17 }
 0x10b   : > { %899 = vrot.lane.b32.xlu0 %v578_v24, %s2537_s17 }
 0x10e   : > { %976 = vrot.lane.b32.xlu1 %v464_v28, %s2538_s18 }
 0x10f   : > { %978 = vrot.lane.b32.xlu0 %v578_v24, %s2538_s18 }
 0x112   : > { %1055 = vrot.lane.b32.xlu1 %v464_v28, %s2539_s20 }
 0x113   : > { %1057 = vrot.lane.b32.xlu0 %v578_v24, %s2539_s20 }
 0x116   : > { %1134 = vrot.lane.b32.xlu1 %v464_v28, %s2540_s19 }
 0x117   : > { %1136 = vrot.lane.b32.xlu0 %v578_v24, %s2540_s19 }
 0x170   : > { %v742_v29 = vpop.permute.xlu1 %741  ;;  %v663_v30 = vpop.permute.xlu0 %662 }
 0x171   : > { %2282 = vmatpush3.xpose.msk.msra.mxu1 %vm582_vm1, %v663_v30 }
 0x172   : > { %2286 = vmatprep.subr.mxu1 %v2532_v8 }
 0x174   : > { %v740_v31 = vpop.permute.xlu1 %739 }
 0x175   : > { %v661_v32 = vpop.permute.xlu0 %660 }
 0x176   : > { %2284 = vmatmul.mubr.msk.f32.vlgmr.msra.gmra.mrb[4].mxu1 %vm582_vm1, %v661_v32 }
 0x177   : > { %2287 = vmatpush3.xpose.msk.msra.mxu1 %vm582_vm1, %v742_v29  ;;  %2288 = vmatprep.mubr.msk.f32.mxu1 %vm2533_vm0, %v2532_v8 }
 0x178   : > { %v819_v33 = vpop.permute.xlu1 %818  ;;  %2291 = vmatprep.subr.mxu1 %v2532_v8 }
 0x179   : > { %v821_v34 = vpop.permute.xlu0 %820 }
 0x17a   : > { %2289 = vmatmul.mubr.msk.f32.vlgmr.msra.gmra.mrb[6].mxu1 %vm582_vm1, %v740_v31 }
 0x17b   : > { %2292 = vmatpush3.xpose.msk.msra.mxu1 %vm582_vm1, %v821_v34  ;;  %2293 = vmatprep.mubr.msk.f32.mxu1 %vm2533_vm0, %v2532_v8 }
 0x17c   : > { %v898_v35 = vpop.permute.xlu1 %897  ;;  %2296 = vmatprep.subr.mxu1 %v2532_v8 }
 0x17d   : > { %v900_v36 = vpop.permute.xlu0 %899 }
 0x17e   : > { %2294 = vmatmul.mubr.msk.f32.vlgmr.msra.gmra.mrb[8].mxu1 %vm582_vm1, %v819_v33 }
 0x17f   : > { %2297 = vmatpush3.xpose.msk.msra.mxu1 %vm582_vm1, %v900_v36  ;;  %2298 = vmatprep.mubr.msk.f32.mxu1 %vm2533_vm0, %v2532_v8 }
 0x180   : > { %2301 = vmatprep.subr.mxu1 %v2532_v8  ;;  %v977_v37 = vpop.permute.xlu1 %976 }
 0x181   : > { %v979_v38 = vpop.permute.xlu0 %978 }
 0x182   : > { %2299 = vmatmul.mubr.msk.f32.vlgmr.msra.gmra.mrb[10].mxu1 %vm582_vm1, %v898_v35 }
 0x183   : > { %2302 = vmatpush3.xpose.msk.msra.mxu1 %vm582_vm1, %v979_v38  ;;  %2303 = vmatprep.mubr.msk.f32.mxu1 %vm2533_vm0, %v2532_v8 }
 0x184   : > { %2306 = vmatprep.subr.mxu1 %v2532_v8  ;;  %v1056_v40 = vpop.permute.xlu1 %1055 }
 0x185   : > { %v1058_v39 = vpop.permute.xlu0 %1057 }
 0x186   : > { %2304 = vmatmul.mubr.msk.f32.vlgmr.msra.gmra.mrb[12].mxu1 %vm582_vm1, %v977_v37 }
 0x187   : > { %2307 = vmatpush3.xpose.msk.msra.mxu1 %vm582_vm1, %v1058_v39  ;;  %2308 = vmatprep.mubr.msk.f32.mxu1 %vm2533_vm0, %v2532_v8 }
 0x188   : > { %2311 = vmatprep.subr.mxu1 %v2532_v8  ;;  %v1135_v42 = vpop.permute.xlu1 %1134 }
 0x189   : > { %v1137_v41 = vpop.permute.xlu0 %1136 }
 0x18a   : > { %2309 = vmatmul.mubr.msk.f32.vlgmr.msra.gmra.mrb[14].mxu1 %vm582_vm1, %v1056_v40 }
 0x18b   : > { %2312 = vmatpush3.xpose.msk.msra.mxu1 %vm582_vm1, %v1137_v41  ;;  %2313 = vmatprep.mubr.msk.f32.mxu1 %vm2533_vm0, %v2532_v8 }
 0x18c   : > { %2321 = vmatprep.subr.mxu1 %v2532_v8 }
 0x18e   : > { %2314 = vmatmul.mubr.msk.f32.vlgmr.msra.gmra.mrb[16].mxu1 %vm582_vm1, %v1135_v42 }
 0x18f   : > { %2323 = vmatprep.mubr.msk.f32.mxu1 %vm2533_vm0, %v2532_v8 }
 0x1d5   : > { %v655_v43 = vpop.f32.mrb[2].mxu1 }
 0x1d6   : > { %v659_v44 = vmul.f32 0.088388346, %v655_v43  ;;  %v2280_v45 = vpop.f32.mrb[3].mxu1 }
 0x1d8   : > { %v1214_v46 = vsel %vm1213_vm2, %v659_v44, -inf }
 0x1d9   : > { %1215 = vmax.xlane.f32.xlu0 %v1214_v46 }
 0x249   : > { %v734_v47 = vpop.f32.mrb[4].mxu1 }
 0x24a   : > { %v738_v48 = vmul.f32 0.088388346, %v734_v47  ;;  %v2285_v49 = vpop.f32.mrb[5].mxu1 }
 0x24c   : > { %v1217_v50 = vsel %vm1213_vm2, %v738_v48, -inf }
 0x24d   : > { %1218 = vmax.xlane.f32.xlu1 %v1217_v50  ;;  %v813_v51 = vpop.f32.mrb[6].mxu1 }
 0x24e   : > { %v817_v52 = vmul.f32 0.088388346, %v813_v51  ;;  %v2290_v53 = vpop.f32.mrb[7].mxu1 }
 0x250   : > { %v1220_v54 = vsel %vm1213_vm2, %v817_v52, -inf }
 0x251   : > { %1221 = vmax.xlane.f32.xlu0 %v1220_v54  ;;  %v892_v55 = vpop.f32.mrb[8].mxu1 }
 0x252   : > { %v896_v56 = vmul.f32 0.088388346, %v892_v55  ;;  %v2295_v57 = vpop.f32.mrb[9].mxu1 }
 0x254   : > { %v1223_v58 = vsel %vm1213_vm2, %v896_v56, -inf }
 0x255   : > { %1224 = vmax.xlane.f32.xlu0 %v1223_v58  ;;  %v971_v59 = vpop.f32.mrb[10].mxu1 }
 0x256   : > { %v975_v60 = vmul.f32 0.088388346, %v971_v59  ;;  %v2300_v61 = vpop.f32.mrb[11].mxu1 }
 0x258   : > { %v1226_v62 = vsel %vm1213_vm2, %v975_v60, -inf }
 0x259   : > { %1227 = vmax.xlane.f32.xlu1 %v1226_v62  ;;  %v1050_v63 = vpop.f32.mrb[12].mxu1 }
 0x25a   : > { %v1054_v0 = vmul.f32 0.088388346, %v1050_v63  ;;  %v2305_v1 = vpop.f32.mrb[13].mxu1 }
 0x25c   : > { %v1229_v2 = vsel %vm1213_vm2, %v1054_v0, -inf }
 0x25d   : > { %1230 = vmax.xlane.f32.xlu0 %v1229_v2  ;;  %v1129_v3 = vpop.f32.mrb[14].mxu1 }
 0x25e   : > { %v1133_v4 = vmul.f32 0.088388346, %v1129_v3  ;;  %v2310_v6 = vpop.f32.mrb[15].mxu1 }
 0x260   : > { %v1232_v7 = vsel %vm1213_vm2, %v1133_v4, -inf }
 0x261   : > { %1233 = vmax.xlane.f32.xlu1 %v1232_v7  ;;  %v1208_v9 = vpop.f32.mrb[16].mxu1 }
 0x262   : > { %v1212_v10 = vmul.f32 0.088388346, %v1208_v9  ;;  %v2315_v11 = vpop.f32.mrb[17].mxu1 }
 0x264   : > { %v1235_v12 = vsel %vm1213_vm2, %v1212_v10, -inf }
 0x265   : > { %1236 = vmax.xlane.f32.xlu0 %v1235_v12 }
 0x266   : > { %v1216_v14 = vpop.xlane.xlu0 %1215 }
 0x267   : > { %v1238_v15 = vsub.f32 %v659_v44, %v1216_v14 }
 0x269   : > { %v1246_v16 = vmul.f32 1.442695, %v1238_v15 }
 0x26b   : > { %2489 = vpow2.f32 %v1246_v16 }
 0x272   : > { %1376 = vrot.lane.b32.xlu1 %v2794_v27, %s2535_s15 }
 0x275   : > { %v2490_v17 = vpop.eup %2489 }
 0x276   : > { %1528 = vrot.lane.b32.xlu1 %v2794_v27, %s2536_s16  ;;  %v1262_v18 = vsel %vm1213_vm2, %v2490_v17, 0.0 }
 0x27a   : > { %1604 = vrot.lane.b32.xlu1 %v2794_v27, %s2537_s17 }
 0x27b   : > { %1452 = vrot.lane.b32.xlu0 %v2794_v27, %s2534_s12 }
 0x27f   : > { %1680 = vrot.lane.b32.xlu0 %v2794_v27, %s2538_s18 }
 0x29e   : > { %1263 = vadd.xlane.f32.xlu1 %v1262_v18 }
 0x2da   : > { %v1219_v19 = vpop.xlane.xlu1 %1218 }
 0x2db   : > { %v1239_v20 = vsub.f32 %v738_v48, %v1219_v19 }
 0x2dd   : > { %v1248_v21 = vmul.f32 1.442695, %v1239_v20 }
 0x2de   : > { %v1222_v22 = vpop.xlane.xlu0 %1221 }
 0x2df   : > { %2491 = vpow2.f32 %v1248_v21  ;;  %v1240_v23 = vsub.f32 %v817_v52, %v1222_v22 }
 0x2e1   : > { %v1250_v24 = vmul.f32 1.442695, %v1240_v23 }
 0x2e2   : > { %v1225_v25 = vpop.xlane.xlu0 %1224 }
 0x2e3   : > { %2493 = vpow2.f32 %v1250_v24  ;;  %v1241_v26 = vsub.f32 %v896_v56, %v1225_v25  ;;  %v1949_v24 = vld [vmem:[%s3004_s6] sm:$0xff]  ;;  %v1950_v25 = vld [vmem:[%s3004_s6 + $0x8] sm:$0xff] }
 0x2e5   : > { %v1252_v28 = vmul.f32 1.442695, %v1241_v26  ;;  %v1951_v26 = vld [vmem:[%s3004_s6 + $0x10] sm:$0xff] }
 0x2e6   : > { %v1228_v29 = vpop.xlane.xlu1 %1227 }
 0x2e7   : > { %2495 = vpow2.f32 %v1252_v28  ;;  %v1242_v30 = vsub.f32 %v975_v60, %v1228_v29  ;;  %v2448_v28 = vpack.c.bf16 %v1950_v25, %v1949_v24 }
 0x2e9   : > { %v2492_v31 = vpop.eup %2491  ;;  %v1254_v32 = vmul.f32 1.442695, %v1242_v30 }
 0x2ea   : > { %v1231_v33 = vpop.xlane.xlu0 %1230  ;;  %v1265_v34 = vsel %vm1213_vm2, %v2492_v31, 0.0 }
 0x2eb   : > { %2497 = vpow2.f32 %v1254_v32  ;;  %v1243_v35 = vsub.f32 %v1054_v0, %v1231_v33  ;;  %1266 = vadd.xlane.f32.xlu0 %v1265_v34  ;;  %v1953_v32 = vld [vmem:[%s3004_s6 + $0x20] sm:$0xff]  ;;  %v1954_v33 = vld [vmem:[%s3004_s6 + $0x28] sm:$0xff] }
 0x2ec   : > { %v2454_v34 = vpack.c.bf16 %v1954_v33, %v1953_v32 }
 0x2ed   : > { %v2494_v36 = vpop.eup %2493  ;;  %v1256_v37 = vmul.f32 1.442695, %v1243_v35  ;;  %v1955_v35 = vld [vmem:[%s3004_s6 + $0x30] sm:$0xff] }
 0x2ee   : > { %v1234_v38 = vpop.xlane.xlu1 %1233  ;;  %v1268_v39 = vsel %vm1213_vm2, %v2494_v36, 0.0 }
 0x2ef   : > { %2499 = vpow2.f32 %v1256_v37  ;;  %v1244_v40 = vsub.f32 %v1133_v4, %v1234_v38  ;;  %1269 = vadd.xlane.f32.xlu1 %v1268_v39  ;;  %v1957_v38 = vld [vmem:[%s3004_s6 + $0x40] sm:$0xff]  ;;  %v1958_v39 = vld [vmem:[%s3004_s6 + $0x48] sm:$0xff] }
 0x2f1   : > { %v2496_v41 = vpop.eup %2495  ;;  %v1258_v42 = vmul.f32 1.442695, %v1244_v40  ;;  %v2460_v40 = vpack.c.bf16 %v1958_v39, %v1957_v38 }
 0x2f2   : > { %v1377_v43 = vpop.permute.xlu1 %1376  ;;  %v1237_v44 = vpop.xlane.xlu0 %1236  ;;  %v1271_v45 = vsel %vm1213_vm2, %v2496_v41, 0.0 }
 0x2f3   : > { %2501 = vpow2.f32 %v1258_v42  ;;  %v1245_v46 = vsub.f32 %v1212_v10, %v1237_v44  ;;  %2322 = vmatpush3.msra.mxu1 %v1377_v43  ;;  %1272 = vadd.xlane.f32.xlu0 %v1271_v45  ;;  %v1959_v42 = vld [vmem:[%s3004_s6 + $0x50] sm:$0xff]  ;;  %v1960_v43 = vld [vmem:[%s3004_s6 + $0x58] sm:$0xff] }
 0x2f4   : > { %2331 = vmatprep.subr.mxu1 %v2532_v8  ;;  %v2463_v45 = vpack.c.bf16 %v1960_v43, %v1959_v42 }
 0x2f5   : > { %v2498_v47 = vpop.eup %2497  ;;  %v1260_v48 = vmul.f32 1.442695, %v1245_v46 }
 0x2f6   : > { %v1274_v49 = vsel %vm1213_vm2, %v2498_v47, 0.0  ;;  %v1529_v56 = vpop.permute.xlu1 %1528  ;;  %v1453_v61 = vpop.permute.xlu0 %1452 }
 0x2f7   : > { %2503 = vpow2.f32 %v1260_v48  ;;  %1275 = vadd.xlane.f32.xlu1 %v1274_v49  ;;  %v1962_v48 = vld [vmem:[%s3004_s6 + $0x68] sm:$0xff] }
 0x2f9   : > { %v2500_v50 = vpop.eup %2499 }
 0x2fa   : > { %v1277_v51 = vsel %vm1213_vm2, %v2500_v50, 0.0  ;;  %v1605_v57 = vpop.permute.xlu1 %1604  ;;  %v1681_v62 = vpop.permute.xlu0 %1680 }
 0x2fb   : > { %1278 = vadd.xlane.f32.xlu0 %v1277_v51 }
 0x2fd   : > { %v2877_v52 = vpop.eup %2501 }
 0x2fe   : > { %v1280_v53 = vsel %vm1213_vm2, %v2877_v52, 0.0 }
 0x2ff   : > { %1281 = vadd.xlane.f32.xlu1 %v1280_v53  ;;  %v1964_v53 = vld [vmem:[%s3004_s6 + $0x78] sm:$0xff] }
 0x301   : > { %v2881_v54 = vpop.eup %2503 }
 0x302   : > { %v1283_v55 = vsel %vm1213_vm2, %v2881_v54, 0.0 }
 0x303   : > { %1284 = vadd.xlane.f32.xlu0 %v1283_v55 }
 0x310   : > { %1756 = vrot.lane.b32.xlu1 %v2794_v27, %s2539_s20 }
 0x319   : > { %1832 = vrot.lane.b32.xlu0 %v2794_v27, %s2540_s19 }
 0x32b   : > { %v1264_v58 = vpop.xlane.xlu1 %1263 }
 0x32c   : > { %2505 = vrcp.f32 %v1264_v58 }
 0x336   : > { %v2506_v59 = vpop.eup %2505 }
 0x337   : > { %v1287_v60 = vmul.f32 %v2506_v59, %v2490_v17 }
 0x339   : > { %2319 = vmatmul.mubr.msk.f32.vlgmr.msra.gmra.mrb[2].mxu0 %vm1213_vm2, %v1287_v60 }
 0x33a   : > { %2327 = vmatpush3.msra.mxu0 %v1453_v61  ;;  %2328 = vmatprep.mubr.msk.f32.mxu0 %vm2533_vm0, %v2532_v8 }
 0x33b   : > { %2336 = vmatprep.subr.mxu0 %v2532_v8 }
 0x378   : > { %v1267_v63 = vpop.xlane.xlu0 %1266 }
 0x379   : > { %2507 = vrcp.f32 %v1267_v63 }
 0x37c   : > { %v1270_v0 = vpop.xlane.xlu1 %1269 }
 0x37d   : > { %2509 = vrcp.f32 %v1270_v0 }
 0x380   : > { %v1273_v27 = vpop.xlane.xlu0 %1272 }
 0x381   : > { %2511 = vrcp.f32 %v1273_v27 }
 0x383   : > { %v2508_v1 = vpop.eup %2507 }
 0x384   : > { %v1289_v2 = vmul.f32 %v2508_v1, %v2492_v31  ;;  %v1276_v3 = vpop.xlane.xlu1 %1275 }
 0x385   : > { %2513 = vrcp.f32 %v1276_v3 }
 0x386   : > { %2324 = vmatmul.mubr.msk.f32.vlgmr.msra.gmra.mrb[18].mxu1 %vm1213_vm2, %v1289_v2 }
 0x387   : > { %v2510_v4 = vpop.eup %2509  ;;  %2332 = vmatpush3.msra.mxu1 %v1529_v56  ;;  %2333 = vmatprep.mubr.msk.f32.mxu1 %vm2533_vm0, %v2532_v8 }
 0x388   : > { %v1291_v6 = vmul.f32 %v2510_v4, %v2494_v36  ;;  %v1279_v7 = vpop.xlane.xlu0 %1278  ;;  %2341 = vmatprep.subr.mxu1 %v2532_v8  ;;  %v1956_v36 = vld [vmem:[%s3004_s6 + $0x38] sm:$0xff] }
 0x389   : > { %2515 = vrcp.f32 %v1279_v7  ;;  %v2457_v37 = vpack.c.bf16 %v1956_v36, %v1955_v35 }
 0x38a   : > { %2329 = vmatmul.mubr.msk.f32.vlgmr.msra.gmra.mrb[4].mxu0 %vm1213_vm2, %v1291_v6 }
 0x38b   : > { %v2512_v9 = vpop.eup %2511  ;;  %2337 = vmatpush3.msra.mxu0 %v1605_v57  ;;  %2338 = vmatprep.mubr.msk.f32.mxu0 %vm2533_vm0, %v2532_v8 }
 0x38c   : > { %v1293_v10 = vmul.f32 %v2512_v9, %v2496_v41  ;;  %v1282_v11 = vpop.xlane.xlu1 %1281  ;;  %2346 = vmatprep.subr.mxu0 %v2532_v8 }
 0x38d   : > { %2517 = vrcp.f32 %v1282_v11 }
 0x38e   : > { %2334 = vmatmul.mubr.msk.f32.vlgmr.msra.gmra.mrb[20].mxu1 %vm1213_vm2, %v1293_v10 }
 0x38f   : > { %v2514_v12 = vpop.eup %2513  ;;  %2342 = vmatpush3.msra.mxu1 %v1681_v62  ;;  %2343 = vmatprep.mubr.msk.f32.mxu1 %vm2533_vm0, %v2532_v8 }
 0x390   : > { %v1295_v14 = vmul.f32 %v2514_v12, %v2498_v47  ;;  %v1757_v15 = vpop.permute.xlu1 %1756  ;;  %v1285_v16 = vpop.xlane.xlu0 %1284  ;;  %2351 = vmatprep.subr.mxu1 %v2532_v8  ;;  %v1961_v47 = vld [vmem:[%s3004_s6 + $0x60] sm:$0xff] }
 0x391   : > { %2519 = vrcp.f32 %v1285_v16 }
 0x392   : > { %2339 = vmatmul.mubr.msk.f32.vlgmr.msra.gmra.mrb[6].mxu0 %vm1213_vm2, %v1295_v14 }
 0x393   : > { %v2516_v17 = vpop.eup %2515  ;;  %2347 = vmatpush3.msra.mxu0 %v1757_v15  ;;  %2348 = vmatprep.mubr.msk.f32.mxu0 %vm2533_vm0, %v2532_v8  ;;  %v2170_v15 = vld [vmem:[%s3005_s7] ss:$0 sm:$0xff] }
 0x394   : > { %v1297_v18 = vmul.f32 %v2516_v17, %v2500_v50  ;;  %v1833_v19 = vpop.permute.xlu0 %1832  ;;  %2447 = vmatprep.subr.bf16.mxu0 %v2531_v5  ;;  %v2466_v50 = vpack.c.bf16 %v1962_v48, %v1961_v47 }
 0x396   : > { %2344 = vmatmul.mubr.msk.f32.vlgmr.msra.gmra.mrb[22].mxu1 %vm1213_vm2, %v1297_v18 }
 0x397   : > { %v2518_v20 = vpop.eup %2517  ;;  %2352 = vmatpush3.msra.mxu1 %v1833_v19  ;;  %2353 = vmatprep.mubr.msk.f32.mxu1 %vm2533_vm0, %v2532_v8 }
 0x398   : > { %v1299_v21 = vmul.f32 %v2518_v20, %v2877_v52  ;;  %v1963_v52 = vld [vmem:[%s3004_s6 + $0x70] sm:$0xff] }
 0x399   : > { %v2469_v55 = vpack.c.bf16 %v1964_v53, %v1963_v52 }
 0x39a   : > { %2349 = vmatmul.mubr.msk.f32.vlgmr.msra.gmra.mrb[8].mxu0 %vm1213_vm2, %v1299_v21 }
 0x39b   : > { %v2520_v22 = vpop.eup %2519  ;;  %2388 = vmatprep.mubr.msk.f32.mxu0 %vm2533_vm0, %v2532_v8  ;;  %v1952_v8 = vld [vmem:[%s3004_s6 + $0x18] sm:$0xff]  ;;  %2449 = vmatpush3.bf16.msra.mxu0 %v2448_v28 }
 0x39c   : > { %v1301_v23 = vmul.f32 %v2520_v22, %v2881_v54  ;;  %v2451_v29 = vpack.c.bf16 %v1952_v8, %v1951_v26  ;;  %2450 = vmatprep.subr.bf16.mxu0 %v2531_v5  ;;  %v2171_v8 = vld [vmem:[%s3006_s8] ss:$0 sm:$0xff] }
 0x39e   : > { %2354 = vmatmul.mubr.msk.f32.vlgmr.msra.gmra.mrb[24].mxu1 %vm1213_vm2, %v1301_v23 }
 0x39f   : > { %2452 = vmatpush3.bf16.msra.mxu0 %v2451_v29 }
 0x3a0   : > { %2453 = vmatprep.subr.bf16.mxu0 %v2531_v5 }
 0x3a3   : > { %2455 = vmatpush3.bf16.msra.mxu0 %v2454_v34 }
 0x3a4   : > { %2456 = vmatprep.subr.bf16.mxu0 %v2531_v5 }
 0x3a7   : > { %2458 = vmatpush3.bf16.msra.mxu0 %v2457_v37 }
 0x3a8   : > { %2459 = vmatprep.subr.bf16.mxu0 %v2531_v5 }
 0x3ab   : > { %2461 = vmatpush3.bf16.msra.mxu0 %v2460_v40 }
 0x3ac   : > { %2462 = vmatprep.subr.bf16.mxu0 %v2531_v5 }
 0x3af   : > { %2464 = vmatpush3.bf16.msra.mxu0 %v2463_v45 }
 0x3b0   : > { %2465 = vmatprep.subr.bf16.mxu0 %v2531_v5 }
 0x3b3   : > { %2467 = vmatpush3.bf16.msra.mxu0 %v2466_v50 }
 0x3b4   : > { %2468 = vmatprep.subr.bf16.mxu0 %v2531_v5 }
 0x3b7   : > { %2470 = vmatpush3.bf16.msra.mxu0 %v2469_v55 }
 0x40c   : > { %v1371_v30 = vpop.f32.mrb[2].mxu0 }
 0x40d   : > { %v2320_v31 = vpop.f32.mrb[3].mxu0 }
 0x459   : > { %v1448_v41 = vpop.f32.mrb[18].mxu1 }
 0x45a   : > { %1909 = vrot.lane.b32.xlu1 %v1448_v41, %s2540_s19  ;;  %v2325_v44 = vpop.f32.mrb[19].mxu1 }
 0x45d   : > { %v1524_v46 = vpop.f32.mrb[4].mxu0 }
 0x45e   : > { %1913 = vrot.lane.b32.xlu0 %v1524_v46, %s2539_s20  ;;  %v2330_v49 = vpop.f32.mrb[5].mxu0 }
 0x461   : > { %v1600_v51 = vpop.f32.mrb[20].mxu1 }
 0x462   : > { %1917 = vrot.lane.b32.xlu1 %v1600_v51, %s2538_s18  ;;  %v2335_v54 = vpop.f32.mrb[21].mxu1 }
 0x465   : > { %v1676_v56 = vpop.f32.mrb[6].mxu0 }
 0x466   : > { %1921 = vrot.lane.b32.xlu0 %v1676_v56, %s2537_s17  ;;  %v2340_v57 = vpop.f32.mrb[7].mxu0 }
 0x469   : > { %v1752_v58 = vpop.f32.mrb[22].mxu1 }
 0x46a   : > { %1925 = vrot.lane.b32.xlu1 %v1752_v58, %s2536_s16  ;;  %v2345_v5 = vpop.f32.mrb[23].mxu1 }
 0x46d   : > { %v1828_v59 = vpop.f32.mrb[8].mxu0 }
 0x46e   : > { %1929 = vrot.lane.b32.xlu0 %v1828_v59, %s2534_s12  ;;  %v2350_v60 = vpop.f32.mrb[9].mxu0 }
 0x471   : > { %v1904_v61 = vpop.f32.mrb[24].mxu1 }
 0x472   : > { %1933 = vrot.lane.b32.xlu1 %v1904_v61, %s2535_s15  ;;  %v2355_v62 = vpop.f32.mrb[25].mxu1 }
 0x4cc   : > { %v1910_v63 = vpop.permute.xlu1 %1909 }
 0x4cd   : > { %v1936_v2 = vsel %vm582_vm1, %v1371_v30, %v1910_v63 }
 0x4d0   : > { %v1914_v0 = vpop.permute.xlu0 %1913 }
 0x4d1   : > { %v1938_v3 = vsel %vm1937_vm3, %v1936_v2, %v1914_v0 }
 0x4d4   : > { %v1918_v27 = vpop.permute.xlu1 %1917 }
 0x4d5   : > { %v1940_v6 = vsel %vm1939_vm4, %v1938_v3, %v1918_v27 }
 0x4d8   : > { %v1922_v1 = vpop.permute.xlu0 %1921 }
 0x4d9   : > { %v1942_v9 = vsel %vm1941_vm5, %v1940_v6, %v1922_v1 }
 0x4dc   : > { %v1926_v4 = vpop.permute.xlu1 %1925 }
 0x4dd   : > { %v1944_v10 = vsel %vm1943_vm6, %v1942_v9, %v1926_v4 }
 0x4e0   : > { %v1930_v7 = vpop.permute.xlu0 %1929 }
 0x4e1   : > { %v1946_v11 = vsel %vm1945_vm7, %v1944_v10, %v1930_v7 }
 0x4e4   : > { %v1934_v12 = vpop.permute.xlu1 %1933 }
 0x4e5   : > { %v1948_v14 = vsel %vm1947_vm8, %v1946_v11, %v1934_v12 }
 0x4e6   : > { %2389 = vmatmul.mubr.f32.vlgmr.msra.gmra.mrb[10].mxu0 %v1948_v14 }
 0x5b9   : > { %v2038_v16 = vpop.f32.mrb[10].mxu0 }
 0x5ba   : > { %v2039_v17 = vadd.f32 %v2170_v15, %v2038_v16  ;;  %v2390_v18 = vpop.f32.mrb[11].mxu0 }
 0x5bc   : > { %v2042_v19 = vadd.f32 %v2039_v17, %v2779_v13  ;;  %v2172_v13 = vld [vmem:[%s3007_s9] ss:$0 sm:$0xff] }
 0x5be   : > { %2043 = vadd.xlane.f32.xlu0 %v2042_v19 }
 0x64b   : > { %v2044_v20 = vpop.xlane.xlu0 %2043 }
 0x64c   : > { %v2046_v21 = vmul.f32 0.0078125, %v2044_v20 }
 0x64e   : > { %v2047_v22 = vsub.f32 %v2042_v19, %v2046_v21 }
 0x650   : > { %v2048_v23 = vmul.f32 %v2047_v22, %v2047_v22 }
 0x652   : > { %2049 = vadd.xlane.f32.xlu1 %v2048_v23 }
 0x6df   : > { %v2050_v24 = vpop.xlane.xlu1 %2049 }
 0x6e0   : > { %v2051_v25 = vmul.f32 0.0078125, %v2050_v24 }
 0x6e2   : > { %v2052_v26 = vadd.f32 1e-05, %v2051_v25 }
 0x6e4   : > { %2521 = vrsqrt.f32 %v2052_v26 }
 0x6ee   : > { %v2522_v28 = vpop.eup %2521 }
 0x6ef   : > { %v2054_v29 = vmul.f32 %v2522_v28, %v2047_v22 }
 0x6f1   : > { %v2062_v30 = vmul.f32 %v2171_v8, %v2054_v29 }
 0x6f3   : > { %v2070_v31 = vadd.f32 %v2172_v13, %v2062_v30 }
 0x6f5   : > { %2071 = vst [vmem:[%s371_s21] sm:$0xff] %v2070_v31 }
 0x6f6 PF: > { %s20_s13 = sadd.s32 1, %s2529_s13  }
 0x6f7   : > { %p17_p4 = scmp.ge.s32.totalorder %s20_s13, 4  }
 0x6f9   :  { %19 = sbr.rel (!%p17_p4) target bundleno = 1 (0x1), region = 93 }

// kernel: transformer_forward.15
= control target key start
LH: loop header
LB: loop body
LE: loop exit
PB: predicated region body
PF: predicated region fallthrough
CT: control target
= control target key end

     0   :  { %s2638_s17 = smov 0   ;;  %s3051_s0 = inlined_call_operand.vmem [shape: f32[2,8,128], index: 0, kind: input, shape index: {}, may-alias: {0,1}]   ;;  %s3052_s1 = inlined_call_operand.vmem [shape: f32[2,8,128], index: 1, kind: input, shape index: {}, may-alias: {0,1}]   ;;  %s3053_s2 = inlined_call_operand.vmem [shape: f32[128,128], index: 2, kind: input, shape index: {}]   ;;  %s3054_s3 = inlined_call_operand.vmem [shape: f32[1,128], index: 3, kind: input, shape index: {}]   ;;  %s3055_s4 = inlined_call_operand.vmem [shape: f32[128,256], index: 4, kind: input, shape index: {}]   ;;  %s3056_s5 = inlined_call_operand.vmem [shape: f32[1,256], index: 5, kind: input, shape index: {}]   ;;  %s3057_s6 = inlined_call_operand.vmem [shape: f32[128,128], index: 6, kind: input, shape index: {}]   ;;  %s3058_s7 = inlined_call_operand.vmem [shape: f32[1,128], index: 7, kind: input, shape index: {}]   ;;  %s3059_s8 = inlined_call_operand.vmem [shape: f32[1,128], index: 8, kind: input, shape index: {}]   ;;  %s3060_s9 = inlined_call_operand.vmem [shape: f32[1,128], index: 9, kind: input, shape index: {}]   ;;  %s3061_s10 = inlined_call_operand.vmem [shape: f32[8,8], index: 10, kind: input, shape index: {}]   ;;  %s3062_s11 = inlined_call_operand.vmem [shape: f32[2,8,128], index: 11, kind: output, shape index: {}]  }
   0x1 LB: > { %s2174_s18 = sadd.s32 4294967295, %s2566_s17   ;;  %p2178_p0 = scmp.ge.s32.totalorder %s2566_s17, 1  ;;  %s2566_s17 = sphi %s2638_s17, %s21_s17  }
   0x2   : > { %p345_p1 = scmp.lt.s32.totalorder %s2566_s17, 3 }
   0x4   : > { %p346_p2 = pnand %p2178_p0, %p345_p1 }
   0x5   : > { %v495_v0 = vld [vmem:[%s3055_s4 + $0x8] sm:$0xff] (!%p346_p2)  ;;  %v497_v1 = vld [vmem:[%s3055_s4 + $0x18] sm:$0xff] (!%p346_p2)  ;;  %v494_v2 = vld [vmem:[%s3055_s4] sm:$0xff] (!%p346_p2)  ;;  %v2568_v5 = vmov (!%p346_p2), 0.0|0.0   ;;  %v2569_v8 = vmov (!%p346_p2), 0.0   ;;  %vm2570_vm0 = vmmov (!%p346_p2), 0  }
   0x6   : > { %349 = sbr.rel (%p346_p2) target bundleno = 1783 (0x6f7), region = 64  ;;  %v2452_v3 = vpack.c.bf16 (!%p346_p2), %v497_v1, %v495_v0  ;;  %v496_v4 = vld [vmem:[%s3055_s4 + $0x10] sm:$0xff] (!%p346_p2)  ;;  %2428 = vmatprep.subr.bf16.mxu0 (!%p346_p2), %v2568_v5  ;;  %v401_v6 = vld [vmem:[%s3053_s2] sm:$0xff] (!%p346_p2)  ;;  %v402_v7 = vld [vmem:[%s3053_s2 + $0x8] sm:$0xff] (!%p346_p2)  ;;  %602 = vmatprep.mubr.f32.mxu1 (!%p346_p2), %v2569_v8  ;;  %p2770_p3 = scmp.lt.s32.totalorder (!%p346_p2), %s2174_s18, 1  ;;  %vm610_vm1 = vcmask (!%p346_p2), 130048  }
   0x7   : > { %v2454_v9 = vpack.c.bf16 (!%p346_p2), %v496_v4, %v494_v2  ;;  %v2429_v10 = vpack.c.bf16 (!%p346_p2), %v402_v7, %v401_v6  ;;  %v499_v11 = vld [vmem:[%s3055_s4 + $0x28] sm:$0xff] (!%p346_p2)  ;;  %v501_v12 = vld [vmem:[%s3055_s4 + $0x38] sm:$0xff] (!%p346_p2)  ;;  %v498_v13 = vld [vmem:[%s3055_s4 + $0x20] sm:$0xff] (!%p346_p2)  ;;  %2310 = vmatprep.mubr.msk.f32.mxu0 (!%p346_p2), %vm2570_vm0, %v2569_v8  ;;  %s2571_s24 = smov (!%p346_p2), 96   ;;  %s2572_s25 = smov (!%p346_p2), 112   ;;  %vm1250_vm3 = vcmask (!%p346_p2), 64512  }
   0x8   : > { %2453 = vmatprep.subr.bf16.mxu1 (!%p346_p2), %v2452_v3  ;;  %v2456_v14 = vpack.c.bf16 (!%p346_p2), %v501_v12, %v499_v11  ;;  %v500_v15 = vld [vmem:[%s3055_s4 + $0x30] sm:$0xff] (!%p346_p2)  ;;  %v404_v17 = vld [vmem:[%s3053_s2 + $0x18] sm:$0xff] (!%p346_p2)  ;;  %v503_v20 = vld [vmem:[%s3055_s4 + $0x48] sm:$0xff] (!%p346_p2)  ;;  %s2573_s26 = smov (!%p346_p2), 80   ;;  %s2574_s28 = smov (!%p346_p2), 64   ;;  %vm1974_vm4 = vcmask (!%p346_p2), 261120  }
   0x9   : > { %v403_v16 = vld [vmem:[%s3053_s2 + $0x10] sm:$0xff] (!%p346_p2)  ;;  %2455 = vmatpush1.bf16.msra.mxu1 (!%p346_p2), %v2454_v9  ;;  %2430 = vmatpush3.bf16.msra.mxu0 (!%p346_p2), %v2429_v10  ;;  %v2458_v18 = vpack.c.bf16 (!%p346_p2), %v500_v15, %v498_v13  ;;  %v505_v21 = vld [vmem:[%s3055_s4 + $0x58] sm:$0xff] (!%p346_p2)  ;;  %v502_v22 = vld [vmem:[%s3055_s4 + $0x40] sm:$0xff] (!%p346_p2)  ;;  %s2575_s29 = smov (!%p346_p2), 48   ;;  %s2576_s27 = smov (!%p346_p2), 32   ;;  %vm1976_vm5 = vcmask (!%p346_p2), 392192  }
   0xa   : > { %v2432_v19 = vpack.c.bf16 (!%p346_p2), %v404_v17, %v403_v16  ;;  %2457 = vmatprep.subr.bf16.mxu1 (!%p346_p2), %v2456_v14  ;;  %2431 = vmatprep.subr.bf16.mxu0 (!%p346_p2), %v2568_v5  ;;  %v2460_v23 = vpack.c.bf16 (!%p346_p2), %v505_v21, %v503_v20  ;;  %v504_v24 = vld [vmem:[%s3055_s4 + $0x50] sm:$0xff] (!%p346_p2)  ;;  %v405_v25 = vld [vmem:[%s3053_s2 + $0x20] sm:$0xff] (!%p346_p2)  ;;  %v406_v26 = vld [vmem:[%s3053_s2 + $0x28] sm:$0xff] (!%p346_p2)  ;;  %v528_v14 = vlaneseq (!%p346_p2)  ;;  %s2577_s30 = smov (!%p346_p2), 16   ;;  %vm1978_vm6 = vcmask (!%p346_p2), 523264  }
   0xb   : > { %v507_v27 = vld [vmem:[%s3055_s4 + $0x68] sm:$0xff] (!%p346_p2)  ;;  %v509_v28 = vld [vmem:[%s3055_s4 + $0x78] sm:$0xff] (!%p346_p2)  ;;  %v2462_v29 = vpack.c.bf16 (!%p346_p2), %v504_v24, %v502_v22  ;;  %v2435_v30 = vpack.c.bf16 (!%p346_p2), %v406_v26, %v405_v25  ;;  %v506_v31 = vld [vmem:[%s3055_s4 + $0x60] sm:$0xff] (!%p346_p2)  ;;  %vm1980_vm7 = vcmask (!%p346_p2), 654336   ;;  %vm1982_vm8 = vcmask (!%p346_p2), 785408  }
   0xc   : > { %v2464_v32 = vpack.c.bf16 (!%p346_p2), %v509_v28, %v507_v27  ;;  %v508_v33 = vld [vmem:[%s3055_s4 + $0x70] sm:$0xff] (!%p346_p2)  ;;  %v408_v35 = vld [vmem:[%s3053_s2 + $0x38] sm:$0xff] (!%p346_p2)  ;;  %v511_v36 = vld [vmem:[%s3055_s4 + $0x88] sm:$0xff] (!%p346_p2)  ;;  %v529_v15 = vshrl.u32 (!%p346_p2), %v528_v14, 7  ;;  %vm1984_vm9 = vcmask (!%p346_p2), 916480  }
   0xd   : > { %2459 = vmatpush1.bf16.msra.mxu1 %v2458_v18  ;;  %2433 = vmatpush3.bf16.msra.mxu0 %v2432_v19  ;;  %v407_v34 = vld [vmem:[%s3053_s2 + $0x30] sm:$0xff]  ;;  %v513_v37 = vld [vmem:[%s3055_s4 + $0x98] sm:$0xff]  ;;  %v2466_v38 = vpack.c.bf16 %v508_v33, %v506_v31  ;;  %v510_v40 = vld [vmem:[%s3055_s4 + $0x80] sm:$0xff]  ;;  %s3065_s18 = smov (!%p2770_p3, %s2174_s18), 1 }
   0xe   : > { %2461 = vmatprep.subr.bf16.mxu1 %v2460_v23  ;;  %2434 = vmatprep.subr.bf16.mxu0 %v2568_v5  ;;  %v2438_v39 = vpack.c.bf16 %v408_v35, %v407_v34  ;;  %v2468_v41 = vpack.c.bf16 %v513_v37, %v511_v36  ;;  %v512_v42 = vld [vmem:[%s3055_s4 + $0x90] sm:$0xff]  ;;  %v409_v43 = vld [vmem:[%s3053_s2 + $0x40] sm:$0xff]  ;;  %v410_v44 = vld [vmem:[%s3053_s2 + $0x48] sm:$0xff]  ;;  %s2810_s12 = sshll.u32 %s3065_s18, 3  ;;  %v530_v16 = vsub.s32 0, %v529_v15  ;;  %v534_v18 = vsub.s32 1, %v529_v15 }
   0xf   : > { %v515_v45 = vld [vmem:[%s3055_s4 + $0xa8] sm:$0xff]  ;;  %v517_v46 = vld [vmem:[%s3055_s4 + $0xb8] sm:$0xff]  ;;  %v2470_v47 = vpack.c.bf16 %v512_v42, %v510_v40  ;;  %v2441_v48 = vpack.c.bf16 %v410_v44, %v409_v43  ;;  %v514_v49 = vld [vmem:[%s3055_s4 + $0xa0] sm:$0xff]  ;;  %s394_s15 = scalar_lea.vmem %s3052_s1, %s2810_s12  ;;  %s390_s20 = scalar_lea.vmem %s3051_s0, %s2810_s12 }
  0x10   : > { %v2472_v50 = vpack.c.bf16 %v517_v46, %v515_v45  ;;  %v516_v51 = vld [vmem:[%s3055_s4 + $0xb0] sm:$0xff]  ;;  %v412_v53 = vld [vmem:[%s3053_s2 + $0x58] sm:$0xff]  ;;  %v519_v54 = vld [vmem:[%s3055_s4 + $0xc8] sm:$0xff] }
  0x11   : > { %2463 = vmatpush1.bf16.msra.mxu1 %v2462_v29  ;;  %2436 = vmatpush3.bf16.msra.mxu0 %v2435_v30  ;;  %v411_v52 = vld [vmem:[%s3053_s2 + $0x50] sm:$0xff]  ;;  %v521_v55 = vld [vmem:[%s3055_s4 + $0xd8] sm:$0xff]  ;;  %v2474_v56 = vpack.c.bf16 %v516_v51, %v514_v49  ;;  %v518_v58 = vld [vmem:[%s3055_s4 + $0xc0] sm:$0xff] }
  0x12   : > { %2465 = vmatprep.subr.bf16.mxu1 %v2464_v32  ;;  %2437 = vmatprep.subr.bf16.mxu0 %v2568_v5  ;;  %v2444_v57 = vpack.c.bf16 %v412_v53, %v411_v52  ;;  %v2476_v59 = vpack.c.bf16 %v521_v55, %v519_v54  ;;  %v520_v60 = vld [vmem:[%s3055_s4 + $0xd0] sm:$0xff]  ;;  %v413_v61 = vld [vmem:[%s3053_s2 + $0x60] sm:$0xff]  ;;  %v414_v62 = vld [vmem:[%s3053_s2 + $0x68] sm:$0xff] }
  0x13   : > { %v523_v63 = vld [vmem:[%s3055_s4 + $0xe8] sm:$0xff]  ;;  %v525_v0 = vld [vmem:[%s3055_s4 + $0xf8] sm:$0xff]  ;;  %v2478_v1 = vpack.c.bf16 %v520_v60, %v518_v58  ;;  %v2447_v2 = vpack.c.bf16 %v414_v62, %v413_v61  ;;  %v522_v3 = vld [vmem:[%s3055_s4 + $0xe0] sm:$0xff] }
  0x14   : > { %v2480_v4 = vpack.c.bf16 %v525_v0, %v523_v63  ;;  %v524_v6 = vld [vmem:[%s3055_s4 + $0xf0] sm:$0xff]  ;;  %v416_v9 = vld [vmem:[%s3053_s2 + $0x78] sm:$0xff]  ;;  %v400_v12 = vld [vmem:[%s394_s15] sm:$0xff] }
  0x15   : > { %2467 = vmatpush1.bf16.msra.mxu1 %v2466_v38  ;;  %2439 = vmatpush3.bf16.msra.mxu0 %v2438_v39  ;;  %v415_v7 = vld [vmem:[%s3053_s2 + $0x70] sm:$0xff]  ;;  %v2482_v10 = vpack.c.bf16 %v524_v6, %v522_v3  ;;  %v2821_v13 = vld [vmem:[%s390_s20] sm:$0xff]  ;;  %s398_s20 = scalar_lea.vmem %s3062_s11, %s2810_s12 }
  0x16   : > { %2469 = vmatprep.subr.bf16.mxu1 %v2468_v41  ;;  %2440 = vmatprep.subr.bf16.mxu0 %v2568_v5  ;;  %v2450_v11 = vpack.c.bf16 %v416_v9, %v415_v7  ;;  %v526_v17 = vld [vmem:[%s3056_s5] sm:$0x3] }
  0x17   : > { %v531_v19 = vrot.slane %v526_v17, %v530_v16  ;;  %v535_v20 = vrot.slane %v526_v17, %v534_v18  ;;  %v2182_v22 = vld [vmem:[%s3054_s3] ss:$0 sm:$0xff] }
  0x18   : > { %v609_v43 = vld [vmem:[%s3061_s10] sm:$0xff] }
  0x19   : > { %2471 = vmatpush1.bf16.msra.mxu1 %v2470_v47  ;;  %2442 = vmatpush3.bf16.msra.mxu0 %v2441_v48  ;;  %vm688_vm2 = vcmp.ne.f32.partialorder %v609_v43, 0.0 }
  0x1a   : > { %2473 = vmatprep.subr.bf16.mxu1 %v2472_v50  ;;  %2443 = vmatprep.subr.bf16.mxu0 %v2568_v5 }
  0x1d   : > { %2475 = vmatpush1.bf16.msra.mxu1 %v2474_v56  ;;  %2445 = vmatpush3.bf16.msra.mxu0 %v2444_v57 }
  0x1e   : > { %2477 = vmatprep.subr.bf16.mxu1 %v2476_v59  ;;  %2446 = vmatprep.subr.bf16.mxu0 %v2568_v5 }
  0x21   : > { %2479 = vmatpush1.bf16.msra.mxu1 %v2478_v1  ;;  %2448 = vmatpush3.bf16.msra.mxu0 %v2447_v2 }
  0x22   : > { %2481 = vmatprep.subr.bf16.mxu1 %v2480_v4  ;;  %2449 = vmatprep.subr.bf16.mxu0 %v2568_v5 }
  0x25   : > { %2483 = vmatpush1.bf16.msra.mxu1 %v2482_v10  ;;  %2451 = vmatpush3.bf16.msra.mxu0 %v2450_v11 }
  0x26   : > { %2313 = vmatprep.subr.mxu1 %v2569_v8  ;;  %2353 = vmatprep.subr.mxu0 %v2569_v8 }
  0x28   : > { %603 = vmatmul.mubr.f32.vlgmr.msra.gmra.mrb[0].mxu1 %v400_v12  ;;  %2311 = vmatmul.mubr.f32.vlgmr.msra.gmra.mrb[0].mxu0 %v2821_v13 }
  0x29   : > { %2315 = vmatprep.mubr.msk.f32.mxu1 %vm2570_vm0, %v2569_v8  ;;  %2355 = vmatprep.mubr.msk.f32.mxu0 %vm2570_vm0, %v2569_v8 }
  0xfb   : > { %v604_v21 = vpop.f32.mrb[0].mxu1  ;;  %v490_v23 = vpop.f32.mrb[0].mxu0 }
  0xfc   : > { %v605_v24 = vadd.f32 %v604_v21, %v531_v19  ;;  %v606_v25 = vpop.f32.mrb[1].mxu1  ;;  %v2312_v26 = vpop.f32.mrb[1].mxu0  ;;  %v491_v28 = vadd.f32 %v2182_v22, %v490_v23 }
  0xfd   : > { %v2836_v27 = vadd.f32 %v606_v25, %v535_v20 }
  0xfe   : > { %772 = vrot.lane.b32.xlu1 %v605_v24, %s2571_s24  ;;  %692 = vrot.lane.b32.xlu0 %v605_v24, %s2572_s25 }
  0xff   : > { %2314 = vmatpush3.xpose.msk.msra.mxu1 %vm610_vm1, %v605_v24  ;;  %2354 = vmatpush3.msra.mxu0 %v2836_v27 }
 0x100   : > { %2318 = vmatprep.subr.mxu1 %v2569_v8  ;;  %2363 = vmatprep.subr.mxu0 %v2569_v8 }
 0x102   : > { %2316 = vmatmul.mubr.msk.f32.vlgmr.msra.gmra.mrb[2].mxu1 %vm610_vm1, %v491_v28  ;;  %770 = vrot.lane.b32.xlu1 %v491_v28, %s2571_s24 }
 0x103   : > { %690 = vrot.lane.b32.xlu0 %v491_v28, %s2572_s25  ;;  %2320 = vmatprep.mubr.msk.f32.mxu1 %vm2570_vm0, %v2569_v8 }
 0x106   : > { %850 = vrot.lane.b32.xlu1 %v491_v28, %s2573_s26 }
 0x107   : > { %852 = vrot.lane.b32.xlu0 %v605_v24, %s2573_s26 }
 0x10a   : > { %930 = vrot.lane.b32.xlu1 %v491_v28, %s2574_s28 }
 0x10b   : > { %932 = vrot.lane.b32.xlu0 %v605_v24, %s2574_s28 }
 0x10e   : > { %1010 = vrot.lane.b32.xlu1 %v491_v28, %s2575_s29 }
 0x10f   : > { %1012 = vrot.lane.b32.xlu0 %v605_v24, %s2575_s29 }
 0x112   : > { %1090 = vrot.lane.b32.xlu1 %v491_v28, %s2576_s27 }
 0x113   : > { %1092 = vrot.lane.b32.xlu0 %v605_v24, %s2576_s27 }
 0x116   : > { %1170 = vrot.lane.b32.xlu1 %v491_v28, %s2577_s30 }
 0x117   : > { %1172 = vrot.lane.b32.xlu0 %v605_v24, %s2577_s30 }
 0x170   : > { %v773_v29 = vpop.permute.xlu1 %772  ;;  %v693_v30 = vpop.permute.xlu0 %692 }
 0x171   : > { %2319 = vmatpush3.xpose.msk.msra.mxu1 %vm610_vm1, %v693_v30 }
 0x172   : > { %2323 = vmatprep.subr.mxu1 %v2569_v8 }
 0x174   : > { %v771_v31 = vpop.permute.xlu1 %770 }
 0x175   : > { %v691_v32 = vpop.permute.xlu0 %690 }
 0x176   : > { %2321 = vmatmul.mubr.msk.f32.vlgmr.msra.gmra.mrb[4].mxu1 %vm610_vm1, %v691_v32 }
 0x177   : > { %2324 = vmatpush3.xpose.msk.msra.mxu1 %vm610_vm1, %v773_v29  ;;  %2325 = vmatprep.mubr.msk.f32.mxu1 %vm2570_vm0, %v2569_v8 }
 0x178   : > { %v851_v33 = vpop.permute.xlu1 %850  ;;  %2328 = vmatprep.subr.mxu1 %v2569_v8 }
 0x179   : > { %v853_v34 = vpop.permute.xlu0 %852 }
 0x17a   : > { %2326 = vmatmul.mubr.msk.f32.vlgmr.msra.gmra.mrb[6].mxu1 %vm610_vm1, %v771_v31 }
 0x17b   : > { %2329 = vmatpush3.xpose.msk.msra.mxu1 %vm610_vm1, %v853_v34  ;;  %2330 = vmatprep.mubr.msk.f32.mxu1 %vm2570_vm0, %v2569_v8 }
 0x17c   : > { %v931_v35 = vpop.permute.xlu1 %930  ;;  %2333 = vmatprep.subr.mxu1 %v2569_v8 }
 0x17d   : > { %v933_v36 = vpop.permute.xlu0 %932 }
 0x17e   : > { %2331 = vmatmul.mubr.msk.f32.vlgmr.msra.gmra.mrb[8].mxu1 %vm610_vm1, %v851_v33 }
 0x17f   : > { %2334 = vmatpush3.xpose.msk.msra.mxu1 %vm610_vm1, %v933_v36  ;;  %2335 = vmatprep.mubr.msk.f32.mxu1 %vm2570_vm0, %v2569_v8 }
 0x180   : > { %2338 = vmatprep.subr.mxu1 %v2569_v8  ;;  %v1011_v37 = vpop.permute.xlu1 %1010 }
 0x181   : > { %v1013_v38 = vpop.permute.xlu0 %1012 }
 0x182   : > { %2336 = vmatmul.mubr.msk.f32.vlgmr.msra.gmra.mrb[10].mxu1 %vm610_vm1, %v931_v35 }
 0x183   : > { %2339 = vmatpush3.xpose.msk.msra.mxu1 %vm610_vm1, %v1013_v38  ;;  %2340 = vmatprep.mubr.msk.f32.mxu1 %vm2570_vm0, %v2569_v8 }
 0x184   : > { %2343 = vmatprep.subr.mxu1 %v2569_v8  ;;  %v1091_v40 = vpop.permute.xlu1 %1090 }
 0x185   : > { %v1093_v39 = vpop.permute.xlu0 %1092 }
 0x186   : > { %2341 = vmatmul.mubr.msk.f32.vlgmr.msra.gmra.mrb[12].mxu1 %vm610_vm1, %v1011_v37 }
 0x187   : > { %2344 = vmatpush3.xpose.msk.msra.mxu1 %vm610_vm1, %v1093_v39  ;;  %2345 = vmatprep.mubr.msk.f32.mxu1 %vm2570_vm0, %v2569_v8 }
 0x188   : > { %2348 = vmatprep.subr.mxu1 %v2569_v8  ;;  %v1171_v42 = vpop.permute.xlu1 %1170 }
 0x189   : > { %v1173_v41 = vpop.permute.xlu0 %1172 }
 0x18a   : > { %2346 = vmatmul.mubr.msk.f32.vlgmr.msra.gmra.mrb[14].mxu1 %vm610_vm1, %v1091_v40 }
 0x18b   : > { %2349 = vmatpush3.xpose.msk.msra.mxu1 %vm610_vm1, %v1173_v41  ;;  %2350 = vmatprep.mubr.msk.f32.mxu1 %vm2570_vm0, %v2569_v8 }
 0x18c   : > { %2358 = vmatprep.subr.mxu1 %v2569_v8 }
 0x18e   : > { %2351 = vmatmul.mubr.msk.f32.vlgmr.msra.gmra.mrb[16].mxu1 %vm610_vm1, %v1171_v42 }
 0x18f   : > { %2360 = vmatprep.mubr.msk.f32.mxu1 %vm2570_vm0, %v2569_v8 }
 0x1d5   : > { %v683_v44 = vpop.f32.mrb[2].mxu1 }
 0x1d6   : > { %v687_v45 = vmul.f32 0.088388346, %v683_v44  ;;  %v2317_v46 = vpop.f32.mrb[3].mxu1 }
 0x1d8   : > { %v689_v47 = vsel %vm688_vm2, -3.5355338e+08, %v687_v45 }
 0x1d9   : > { %v1251_v48 = vsel %vm1250_vm3, %v689_v47, -inf }
 0x1da   : > { %1252 = vmax.xlane.f32.xlu0 %v1251_v48 }
 0x249   : > { %v764_v49 = vpop.f32.mrb[4].mxu1 }
 0x24a   : > { %v768_v50 = vmul.f32 0.088388346, %v764_v49  ;;  %v2322_v51 = vpop.f32.mrb[5].mxu1 }
 0x24c   : > { %v769_v52 = vsel %vm688_vm2, -3.5355338e+08, %v768_v50 }
 0x24d   : > { %v844_v53 = vpop.f32.mrb[6].mxu1  ;;  %v1254_v54 = vsel %vm1250_vm3, %v769_v52, -inf }
 0x24e   : > { %v848_v55 = vmul.f32 0.088388346, %v844_v53  ;;  %1255 = vmax.xlane.f32.xlu1 %v1254_v54  ;;  %v2327_v56 = vpop.f32.mrb[7].mxu1 }
 0x250   : > { %v849_v57 = vsel %vm688_vm2, -3.5355338e+08, %v848_v55 }
 0x251   : > { %v924_v58 = vpop.f32.mrb[8].mxu1  ;;  %v1257_v59 = vsel %vm1250_vm3, %v849_v57, -inf }
 0x252   : > { %v928_v60 = vmul.f32 0.088388346, %v924_v58  ;;  %1258 = vmax.xlane.f32.xlu0 %v1257_v59  ;;  %v2332_v61 = vpop.f32.mrb[9].mxu1 }
 0x254   : > { %v929_v62 = vsel %vm688_vm2, -3.5355338e+08, %v928_v60 }
 0x255   : > { %v1004_v63 = vpop.f32.mrb[10].mxu1  ;;  %v1260_v0 = vsel %vm1250_vm3, %v929_v62, -inf }
 0x256   : > { %v1008_v1 = vmul.f32 0.088388346, %v1004_v63  ;;  %1261 = vmax.xlane.f32.xlu0 %v1260_v0  ;;  %v2337_v2 = vpop.f32.mrb[11].mxu1 }
 0x258   : > { %v1009_v3 = vsel %vm688_vm2, -3.5355338e+08, %v1008_v1 }
 0x259   : > { %v1084_v4 = vpop.f32.mrb[12].mxu1  ;;  %v1263_v6 = vsel %vm1250_vm3, %v1009_v3, -inf }
 0x25a   : > { %v1088_v7 = vmul.f32 0.088388346, %v1084_v4  ;;  %1264 = vmax.xlane.f32.xlu1 %v1263_v6  ;;  %v2342_v9 = vpop.f32.mrb[13].mxu1 }
 0x25c   : > { %v1089_v10 = vsel %vm688_vm2, -3.5355338e+08, %v1088_v7 }
 0x25d   : > { %v1164_v11 = vpop.f32.mrb[14].mxu1  ;;  %v1266_v12 = vsel %vm1250_vm3, %v1089_v10, -inf }
 0x25e   : > { %v1168_v14 = vmul.f32 0.088388346, %v1164_v11  ;;  %1267 = vmax.xlane.f32.xlu0 %v1266_v12  ;;  %v2347_v15 = vpop.f32.mrb[15].mxu1 }
 0x260   : > { %v1169_v16 = vsel %vm688_vm2, -3.5355338e+08, %v1168_v14 }
 0x261   : > { %v1244_v17 = vpop.f32.mrb[16].mxu1  ;;  %v1269_v18 = vsel %vm1250_vm3, %v1169_v16, -inf }
 0x262   : > { %v1248_v19 = vmul.f32 0.088388346, %v1244_v17  ;;  %1270 = vmax.xlane.f32.xlu1 %v1269_v18  ;;  %v2352_v20 = vpop.f32.mrb[17].mxu1 }
 0x264   : > { %v1249_v21 = vsel %vm688_vm2, -3.5355338e+08, %v1248_v19 }
 0x265   : > { %v1272_v22 = vsel %vm1250_vm3, %v1249_v21, -inf }
 0x266   : > { %1273 = vmax.xlane.f32.xlu0 %v1272_v22 }
 0x267   : > { %v1253_v23 = vpop.xlane.xlu0 %1252 }
 0x268   : > { %v1275_v24 = vsub.f32 %v689_v47, %v1253_v23 }
 0x26a   : > { %v1283_v25 = vmul.f32 1.442695, %v1275_v24 }
 0x26c   : > { %2526 = vpow2.f32 %v1283_v25 }
 0x273   : > { %1413 = vrot.lane.b32.xlu1 %v2836_v27, %s2572_s25 }
 0x276   : > { %v2527_v26 = vpop.eup %2526 }
 0x277   : > { %1565 = vrot.lane.b32.xlu1 %v2836_v27, %s2573_s26  ;;  %v1299_v28 = vsel %vm1250_vm3, %v2527_v26, 0.0 }
 0x27b   : > { %1641 = vrot.lane.b32.xlu1 %v2836_v27, %s2574_s28 }
 0x27c   : > { %1489 = vrot.lane.b32.xlu0 %v2836_v27, %s2571_s24 }
 0x280   : > { %1717 = vrot.lane.b32.xlu0 %v2836_v27, %s2575_s29 }
 0x29f   : > { %1300 = vadd.xlane.f32.xlu1 %v1299_v28 }
 0x2db   : > { %v1256_v29 = vpop.xlane.xlu1 %1255 }
 0x2dc   : > { %v1276_v30 = vsub.f32 %v769_v52, %v1256_v29 }
 0x2de   : > { %v1285_v31 = vmul.f32 1.442695, %v1276_v30 }
 0x2df   : > { %v1259_v32 = vpop.xlane.xlu0 %1258 }
 0x2e0   : > { %2528 = vpow2.f32 %v1285_v31  ;;  %v1277_v33 = vsub.f32 %v849_v57, %v1259_v32 }
 0x2e2   : > { %v1287_v34 = vmul.f32 1.442695, %v1277_v33 }
 0x2e3   : > { %v1262_v35 = vpop.xlane.xlu0 %1261 }
 0x2e4   : > { %2530 = vpow2.f32 %v1287_v34  ;;  %v1278_v36 = vsub.f32 %v929_v62, %v1262_v35  ;;  %v1986_v34 = vld [vmem:[%s3057_s6] sm:$0xff]  ;;  %v1987_v35 = vld [vmem:[%s3057_s6 + $0x8] sm:$0xff] }
 0x2e6   : > { %v1289_v37 = vmul.f32 1.442695, %v1278_v36  ;;  %v1988_v36 = vld [vmem:[%s3057_s6 + $0x10] sm:$0xff] }
 0x2e7   : > { %v1265_v38 = vpop.xlane.xlu1 %1264 }
 0x2e8   : > { %2532 = vpow2.f32 %v1289_v37  ;;  %v1279_v39 = vsub.f32 %v1009_v3, %v1265_v38  ;;  %v2485_v37 = vpack.c.bf16 %v1987_v35, %v1986_v34 }
 0x2ea   : > { %v2529_v40 = vpop.eup %2528  ;;  %v1291_v41 = vmul.f32 1.442695, %v1279_v39 }
 0x2eb   : > { %v1268_v42 = vpop.xlane.xlu0 %1267  ;;  %v1302_v43 = vsel %vm1250_vm3, %v2529_v40, 0.0 }
 0x2ec   : > { %2534 = vpow2.f32 %v1291_v41  ;;  %v1280_v44 = vsub.f32 %v1089_v10, %v1268_v42  ;;  %1303 = vadd.xlane.f32.xlu0 %v1302_v43  ;;  %v1990_v41 = vld [vmem:[%s3057_s6 + $0x20] sm:$0xff]  ;;  %v1991_v42 = vld [vmem:[%s3057_s6 + $0x28] sm:$0xff] }
 0x2ed   : > { %v2491_v43 = vpack.c.bf16 %v1991_v42, %v1990_v41 }
 0x2ee   : > { %v2531_v45 = vpop.eup %2530  ;;  %v1293_v46 = vmul.f32 1.442695, %v1280_v44  ;;  %v1992_v44 = vld [vmem:[%s3057_s6 + $0x30] sm:$0xff] }
 0x2ef   : > { %v1271_v47 = vpop.xlane.xlu1 %1270  ;;  %v1305_v48 = vsel %vm1250_vm3, %v2531_v45, 0.0 }
 0x2f0   : > { %2536 = vpow2.f32 %v1293_v46  ;;  %v1281_v49 = vsub.f32 %v1169_v16, %v1271_v47  ;;  %1306 = vadd.xlane.f32.xlu1 %v1305_v48  ;;  %v1994_v47 = vld [vmem:[%s3057_s6 + $0x40] sm:$0xff]  ;;  %v1995_v48 = vld [vmem:[%s3057_s6 + $0x48] sm:$0xff] }
 0x2f2   : > { %v2533_v50 = vpop.eup %2532  ;;  %v1295_v51 = vmul.f32 1.442695, %v1281_v49  ;;  %v2497_v49 = vpack.c.bf16 %v1995_v48, %v1994_v47 }
 0x2f3   : > { %v1414_v52 = vpop.permute.xlu1 %1413  ;;  %v1274_v53 = vpop.xlane.xlu0 %1273  ;;  %v1308_v54 = vsel %vm1250_vm3, %v2533_v50, 0.0 }
 0x2f4   : > { %2538 = vpow2.f32 %v1295_v51  ;;  %v1282_v55 = vsub.f32 %v1249_v21, %v1274_v53  ;;  %2359 = vmatpush3.msra.mxu1 %v1414_v52  ;;  %1309 = vadd.xlane.f32.xlu0 %v1308_v54  ;;  %v1996_v51 = vld [vmem:[%s3057_s6 + $0x50] sm:$0xff]  ;;  %v1997_v52 = vld [vmem:[%s3057_s6 + $0x58] sm:$0xff] }
 0x2f5   : > { %2368 = vmatprep.subr.mxu1 %v2569_v8  ;;  %v2500_v54 = vpack.c.bf16 %v1997_v52, %v1996_v51 }
 0x2f6   : > { %v2535_v56 = vpop.eup %2534  ;;  %v1297_v57 = vmul.f32 1.442695, %v1282_v55 }
 0x2f7   : > { %v1311_v58 = vsel %vm1250_vm3, %v2535_v56, 0.0  ;;  %v1566_v1 = vpop.permute.xlu1 %1565  ;;  %v1490_v7 = vpop.permute.xlu0 %1489 }
 0x2f8   : > { %2540 = vpow2.f32 %v1297_v57  ;;  %1312 = vadd.xlane.f32.xlu1 %v1311_v58  ;;  %v1999_v57 = vld [vmem:[%s3057_s6 + $0x68] sm:$0xff] }
 0x2fa   : > { %v2537_v59 = vpop.eup %2536 }
 0x2fb   : > { %v1314_v60 = vsel %vm1250_vm3, %v2537_v59, 0.0  ;;  %v1642_v2 = vpop.permute.xlu1 %1641  ;;  %v1718_v9 = vpop.permute.xlu0 %1717 }
 0x2fc   : > { %1315 = vadd.xlane.f32.xlu0 %v1314_v60 }
 0x2fe   : > { %v2930_v61 = vpop.eup %2538 }
 0x2ff   : > { %v1317_v62 = vsel %vm1250_vm3, %v2930_v61, 0.0 }
 0x300   : > { %1318 = vadd.xlane.f32.xlu1 %v1317_v62  ;;  %v2001_v62 = vld [vmem:[%s3057_s6 + $0x78] sm:$0xff] }
 0x302   : > { %v2934_v63 = vpop.eup %2540 }
 0x303   : > { %v1320_v0 = vsel %vm1250_vm3, %v2934_v63, 0.0 }
 0x304   : > { %1321 = vadd.xlane.f32.xlu0 %v1320_v0 }
 0x311   : > { %1793 = vrot.lane.b32.xlu1 %v2836_v27, %s2576_s27 }
 0x31a   : > { %1869 = vrot.lane.b32.xlu0 %v2836_v27, %s2577_s30 }
 0x32c   : > { %v1301_v3 = vpop.xlane.xlu1 %1300 }
 0x32d   : > { %2542 = vrcp.f32 %v1301_v3 }
 0x337   : > { %v2543_v4 = vpop.eup %2542 }
 0x338   : > { %v1324_v6 = vmul.f32 %v2543_v4, %v2527_v26 }
 0x33a   : > { %2356 = vmatmul.mubr.msk.f32.vlgmr.msra.gmra.mrb[2].mxu0 %vm1250_vm3, %v1324_v6 }
 0x33b   : > { %2364 = vmatpush3.msra.mxu0 %v1490_v7  ;;  %2365 = vmatprep.mubr.msk.f32.mxu0 %vm2570_vm0, %v2569_v8 }
 0x33c   : > { %2373 = vmatprep.subr.mxu0 %v2569_v8 }
 0x379   : > { %v1304_v10 = vpop.xlane.xlu0 %1303 }
 0x37a   : > { %2544 = vrcp.f32 %v1304_v10 }
 0x37d   : > { %v1307_v11 = vpop.xlane.xlu1 %1306 }
 0x37e   : > { %2546 = vrcp.f32 %v1307_v11 }
 0x381   : > { %v1310_v27 = vpop.xlane.xlu0 %1309 }
 0x382   : > { %2548 = vrcp.f32 %v1310_v27 }
 0x384   : > { %v2545_v12 = vpop.eup %2544 }
 0x385   : > { %v1326_v14 = vmul.f32 %v2545_v12, %v2529_v40  ;;  %v1313_v15 = vpop.xlane.xlu1 %1312 }
 0x386   : > { %2550 = vrcp.f32 %v1313_v15 }
 0x387   : > { %2361 = vmatmul.mubr.msk.f32.vlgmr.msra.gmra.mrb[18].mxu1 %vm1250_vm3, %v1326_v14 }
 0x388   : > { %v2547_v16 = vpop.eup %2546  ;;  %2369 = vmatpush3.msra.mxu1 %v1566_v1  ;;  %2370 = vmatprep.mubr.msk.f32.mxu1 %vm2570_vm0, %v2569_v8 }
 0x389   : > { %v1328_v17 = vmul.f32 %v2547_v16, %v2531_v45  ;;  %v1316_v18 = vpop.xlane.xlu0 %1315  ;;  %2378 = vmatprep.subr.mxu1 %v2569_v8  ;;  %v1993_v45 = vld [vmem:[%s3057_s6 + $0x38] sm:$0xff] }
 0x38a   : > { %2552 = vrcp.f32 %v1316_v18  ;;  %v2494_v46 = vpack.c.bf16 %v1993_v45, %v1992_v44 }
 0x38b   : > { %2366 = vmatmul.mubr.msk.f32.vlgmr.msra.gmra.mrb[4].mxu0 %vm1250_vm3, %v1328_v17 }
 0x38c   : > { %v2549_v19 = vpop.eup %2548  ;;  %2374 = vmatpush3.msra.mxu0 %v1642_v2  ;;  %2375 = vmatprep.mubr.msk.f32.mxu0 %vm2570_vm0, %v2569_v8 }
 0x38d   : > { %v1330_v20 = vmul.f32 %v2549_v19, %v2533_v50  ;;  %v1319_v21 = vpop.xlane.xlu1 %1318  ;;  %2383 = vmatprep.subr.mxu0 %v2569_v8 }
 0x38e   : > { %2554 = vrcp.f32 %v1319_v21 }
 0x38f   : > { %2371 = vmatmul.mubr.msk.f32.vlgmr.msra.gmra.mrb[20].mxu1 %vm1250_vm3, %v1330_v20 }
 0x390   : > { %v2551_v22 = vpop.eup %2550  ;;  %2379 = vmatpush3.msra.mxu1 %v1718_v9  ;;  %2380 = vmatprep.mubr.msk.f32.mxu1 %vm2570_vm0, %v2569_v8 }
 0x391   : > { %v1332_v23 = vmul.f32 %v2551_v22, %v2535_v56  ;;  %v1794_v24 = vpop.permute.xlu1 %1793  ;;  %v1322_v25 = vpop.xlane.xlu0 %1321  ;;  %2388 = vmatprep.subr.mxu1 %v2569_v8  ;;  %v1998_v56 = vld [vmem:[%s3057_s6 + $0x60] sm:$0xff] }
 0x392   : > { %2556 = vrcp.f32 %v1322_v25 }
 0x393   : > { %2376 = vmatmul.mubr.msk.f32.vlgmr.msra.gmra.mrb[6].mxu0 %vm1250_vm3, %v1332_v23 }
 0x394   : > { %v2553_v26 = vpop.eup %2552  ;;  %2384 = vmatpush3.msra.mxu0 %v1794_v24  ;;  %2385 = vmatprep.mubr.msk.f32.mxu0 %vm2570_vm0, %v2569_v8  ;;  %v2207_v24 = vld [vmem:[%s3058_s7] ss:$0 sm:$0xff] }
 0x395   : > { %v1334_v28 = vmul.f32 %v2553_v26, %v2537_v59  ;;  %v1870_v29 = vpop.permute.xlu0 %1869  ;;  %2484 = vmatprep.subr.bf16.mxu0 %v2568_v5  ;;  %v2503_v59 = vpack.c.bf16 %v1999_v57, %v1998_v56 }
 0x397   : > { %2381 = vmatmul.mubr.msk.f32.vlgmr.msra.gmra.mrb[22].mxu1 %vm1250_vm3, %v1334_v28 }
 0x398   : > { %v2555_v30 = vpop.eup %2554  ;;  %2389 = vmatpush3.msra.mxu1 %v1870_v29  ;;  %2390 = vmatprep.mubr.msk.f32.mxu1 %vm2570_vm0, %v2569_v8 }
 0x399   : > { %v1336_v31 = vmul.f32 %v2555_v30, %v2930_v61  ;;  %v2000_v61 = vld [vmem:[%s3057_s6 + $0x70] sm:$0xff] }
 0x39a   : > { %v2506_v0 = vpack.c.bf16 %v2001_v62, %v2000_v61 }
 0x39b   : > { %2386 = vmatmul.mubr.msk.f32.vlgmr.msra.gmra.mrb[8].mxu0 %vm1250_vm3, %v1336_v31 }
 0x39c   : > { %v2557_v32 = vpop.eup %2556  ;;  %2425 = vmatprep.mubr.msk.f32.mxu0 %vm2570_vm0, %v2569_v8  ;;  %v1989_v8 = vld [vmem:[%s3057_s6 + $0x18] sm:$0xff]  ;;  %2486 = vmatpush3.bf16.msra.mxu0 %v2485_v37 }
 0x39d   : > { %v1338_v33 = vmul.f32 %v2557_v32, %v2934_v63  ;;  %v2488_v38 = vpack.c.bf16 %v1989_v8, %v1988_v36  ;;  %2487 = vmatprep.subr.bf16.mxu0 %v2568_v5  ;;  %v2208_v8 = vld [vmem:[%s3059_s8] ss:$0 sm:$0xff] }
 0x39f   : > { %2391 = vmatmul.mubr.msk.f32.vlgmr.msra.gmra.mrb[24].mxu1 %vm1250_vm3, %v1338_v33 }
 0x3a0   : > { %2489 = vmatpush3.bf16.msra.mxu0 %v2488_v38 }
 0x3a1   : > { %2490 = vmatprep.subr.bf16.mxu0 %v2568_v5 }
 0x3a4   : > { %2492 = vmatpush3.bf16.msra.mxu0 %v2491_v43 }
 0x3a5   : > { %2493 = vmatprep.subr.bf16.mxu0 %v2568_v5 }
 0x3a8   : > { %2495 = vmatpush3.bf16.msra.mxu0 %v2494_v46 }
 0x3a9   : > { %2496 = vmatprep.subr.bf16.mxu0 %v2568_v5 }
 0x3ac   : > { %2498 = vmatpush3.bf16.msra.mxu0 %v2497_v49 }
 0x3ad   : > { %2499 = vmatprep.subr.bf16.mxu0 %v2568_v5 }
 0x3b0   : > { %2501 = vmatpush3.bf16.msra.mxu0 %v2500_v54 }
 0x3b1   : > { %2502 = vmatprep.subr.bf16.mxu0 %v2568_v5 }
 0x3b4   : > { %2504 = vmatpush3.bf16.msra.mxu0 %v2503_v59 }
 0x3b5   : > { %2505 = vmatprep.subr.bf16.mxu0 %v2568_v5 }
 0x3b8   : > { %2507 = vmatpush3.bf16.msra.mxu0 %v2506_v0 }
 0x40d   : > { %v1408_v39 = vpop.f32.mrb[2].mxu0 }
 0x40e   : > { %v2357_v40 = vpop.f32.mrb[3].mxu0 }
 0x45a   : > { %v1485_v50 = vpop.f32.mrb[18].mxu1 }
 0x45b   : > { %1946 = vrot.lane.b32.xlu1 %v1485_v50, %s2577_s30  ;;  %v2362_v53 = vpop.f32.mrb[19].mxu1 }
 0x45e   : > { %v1561_v55 = vpop.f32.mrb[4].mxu0 }
 0x45f   : > { %1950 = vrot.lane.b32.xlu0 %v1561_v55, %s2576_s27  ;;  %v2367_v58 = vpop.f32.mrb[5].mxu0 }
 0x462   : > { %v1637_v60 = vpop.f32.mrb[20].mxu1 }
 0x463   : > { %1954 = vrot.lane.b32.xlu1 %v1637_v60, %s2575_s29  ;;  %v2372_v63 = vpop.f32.mrb[21].mxu1 }
 0x466   : > { %v1713_v1 = vpop.f32.mrb[6].mxu0 }
 0x467   : > { %1958 = vrot.lane.b32.xlu0 %v1713_v1, %s2574_s28  ;;  %v2377_v2 = vpop.f32.mrb[7].mxu0 }
 0x46a   : > { %v1789_v3 = vpop.f32.mrb[22].mxu1 }
 0x46b   : > { %1962 = vrot.lane.b32.xlu1 %v1789_v3, %s2573_s26  ;;  %v2382_v5 = vpop.f32.mrb[23].mxu1 }
 0x46e   : > { %v1865_v4 = vpop.f32.mrb[8].mxu0 }
 0x46f   : > { %1966 = vrot.lane.b32.xlu0 %v1865_v4, %s2571_s24  ;;  %v2387_v6 = vpop.f32.mrb[9].mxu0 }
 0x472   : > { %v1941_v7 = vpop.f32.mrb[24].mxu1 }
 0x473   : > { %1970 = vrot.lane.b32.xlu1 %v1941_v7, %s2572_s25  ;;  %v2392_v9 = vpop.f32.mrb[25].mxu1 }
 0x4cd   : > { %v1947_v10 = vpop.permute.xlu1 %1946 }
 0x4ce   : > { %v1973_v14 = vsel %vm610_vm1, %v1408_v39, %v1947_v10 }
 0x4d1   : > { %v1951_v11 = vpop.permute.xlu0 %1950 }
 0x4d2   : > { %v1975_v15 = vsel %vm1974_vm4, %v1973_v14, %v1951_v11 }
 0x4d5   : > { %v1955_v27 = vpop.permute.xlu1 %1954 }
 0x4d6   : > { %v1977_v17 = vsel %vm1976_vm5, %v1975_v15, %v1955_v27 }
 0x4d9   : > { %v1959_v12 = vpop.permute.xlu0 %1958 }
 0x4da   : > { %v1979_v19 = vsel %vm1978_vm6, %v1977_v17, %v1959_v12 }
 0x4dd   : > { %v1963_v16 = vpop.permute.xlu1 %1962 }
 0x4de   : > { %v1981_v20 = vsel %vm1980_vm7, %v1979_v19, %v1963_v16 }
 0x4e1   : > { %v1967_v18 = vpop.permute.xlu0 %1966 }
 0x4e2   : > { %v1983_v21 = vsel %vm1982_vm8, %v1981_v20, %v1967_v18 }
 0x4e5   : > { %v1971_v22 = vpop.permute.xlu1 %1970 }
 0x4e6   : > { %v1985_v23 = vsel %vm1984_vm9, %v1983_v21, %v1971_v22 }
 0x4e7   : > { %2426 = vmatmul.mubr.f32.vlgmr.msra.gmra.mrb[10].mxu0 %v1985_v23 }
 0x5ba   : > { %v2075_v25 = vpop.f32.mrb[10].mxu0 }
 0x5bb   : > { %v2076_v26 = vadd.f32 %v2207_v24, %v2075_v25  ;;  %v2427_v28 = vpop.f32.mrb[11].mxu0 }
 0x5bd   : > { %v2079_v29 = vadd.f32 %v2076_v26, %v2821_v13  ;;  %v2209_v13 = vld [vmem:[%s3060_s9] ss:$0 sm:$0xff] }
 0x5bf   : > { %2080 = vadd.xlane.f32.xlu0 %v2079_v29 }
 0x64c   : > { %v2081_v30 = vpop.xlane.xlu0 %2080 }
 0x64d   : > { %v2083_v31 = vmul.f32 0.0078125, %v2081_v30 }
 0x64f   : > { %v2084_v32 = vsub.f32 %v2079_v29, %v2083_v31 }
 0x651   : > { %v2085_v33 = vmul.f32 %v2084_v32, %v2084_v32 }
 0x653   : > { %2086 = vadd.xlane.f32.xlu1 %v2085_v33 }
 0x6e0   : > { %v2087_v34 = vpop.xlane.xlu1 %2086 }
 0x6e1   : > { %v2088_v35 = vmul.f32 0.0078125, %v2087_v34 }
 0x6e3   : > { %v2089_v36 = vadd.f32 1e-05, %v2088_v35 }
 0x6e5   : > { %2558 = vrsqrt.f32 %v2089_v36 }
 0x6ef   : > { %v2559_v37 = vpop.eup %2558 }
 0x6f0   : > { %v2091_v38 = vmul.f32 %v2559_v37, %v2084_v32 }
 0x6f2   : > { %v2099_v39 = vmul.f32 %v2208_v8, %v2091_v38 }
 0x6f4   : > { %v2107_v40 = vadd.f32 %v2209_v13, %v2099_v39 }
 0x6f6   : > { %2108 = vst [vmem:[%s398_s20] sm:$0xff] %v2107_v40 }
 0x6f7 PF: > { %s21_s17 = sadd.s32 1, %s2566_s17  }
 0x6f8   : > { %p18_p4 = scmp.ge.s32.totalorder %s21_s17, 4  }
 0x6fa   :  { %20 = sbr.rel (!%p18_p4) target bundleno = 1 (0x1), region = 97 }

// kernel: transformer_forward.14
= control target key start
LH: loop header
LB: loop body
LE: loop exit
PB: predicated region body
PF: predicated region fallthrough
CT: control target
= control target key end

     0   :  { %s2970_s24 = smov 0   ;;  %s4639_s0 = inlined_call_operand.vmem [shape: f32[16,128], index: 0, kind: input, shape index: {}]   ;;  %s4640_s1 = inlined_call_operand.vmem [shape: f32[128,2048], index: 1, kind: input, shape index: {}]   ;;  %s4641_s2 = inlined_call_operand.vmem [shape: f32[1,2048], index: 2, kind: input, shape index: {}]   ;;  %s4642_s3 = inlined_call_operand.vmem [shape: f32[2048,128], index: 3, kind: input, shape index: {}]   ;;  %s4643_s4 = inlined_call_operand.vmem [shape: f32[1,128], index: 4, kind: input, shape index: {}]   ;;  %s4644_s5 = inlined_call_operand.vmem [shape: f32[1,128], index: 5, kind: input, shape index: {}]   ;;  %s4645_s6 = inlined_call_operand.vmem [shape: f32[1,128], index: 6, kind: input, shape index: {}]   ;;  %s4646_s7 = inlined_call_operand.vmem [shape: f32[16,128], index: 7, kind: output, shape index: {}]  }
   0x1 LB: > { %s2105_s25 = sadd.s32 4294967295, %s2927_s24   ;;  %p2109_p0 = scmp.ge.s32.totalorder %s2927_s24, 1  ;;  %s2927_s24 = sphi %s2970_s24, %s17_s24  }
   0x2   : > { %p236_p1 = scmp.lt.s32.totalorder %s2927_s24, 3 }
   0x4   : > { %p237_p2 = pnand %p2109_p0, %p236_p1 }
   0x5   : > { %v276_v0 = vld [vmem:[%s4640_s1 + $0x8] sm:$0xff] (!%p237_p2)  ;;  %v278_v2 = vld [vmem:[%s4640_s1 + $0x18] sm:$0xff] (!%p237_p2)  ;;  %v275_v5 = vld [vmem:[%s4640_s1] sm:$0xff] (!%p237_p2)  ;;  %v2929_v7 = vmov (!%p237_p2), 0.0   ;;  %p3132_p3 = scmp.lt.s32.totalorder (!%p237_p2), %s2105_s25, 1 }
   0x6   : > { %240 = sbr.rel (%p237_p2) target bundleno = 888 (0x378), region = 48  ;;  %v292_v1 = vld [vmem:[%s4640_s1 + $0x88] sm:$0xff] (!%p237_p2)  ;;  %v294_v4 = vld [vmem:[%s4640_s1 + $0x98] sm:$0xff] (!%p237_p2)  ;;  %v291_v6 = vld [vmem:[%s4640_s1 + $0x80] sm:$0xff] (!%p237_p2)  ;;  %679 = vmatprep.mubr.f32.mxu0 (!%p237_p2), %v2929_v7  ;;  %750 = vmatprep.mubr.f32.mxu1 (!%p237_p2), %v2929_v7 }
   0x7   : > { %v2397_v3 = vpack.c.bf16 (!%p237_p2), %v292_v1, %v276_v0  ;;  %v2429_v8 = vpack.c.bf16 (!%p237_p2), %v294_v4, %v278_v2  ;;  %v2399_v9 = vpack.c.bf16 (!%p237_p2), %v291_v6, %v275_v5  ;;  %v277_v10 = vld [vmem:[%s4640_s1 + $0x10] sm:$0xff] (!%p237_p2)  ;;  %v308_v12 = vld [vmem:[%s4640_s1 + $0x108] sm:$0xff] (!%p237_p2)  ;;  %v310_v15 = vld [vmem:[%s4640_s1 + $0x118] sm:$0xff] (!%p237_p2) }
   0x8   : > { %v293_v11 = vld [vmem:[%s4640_s1 + $0x90] sm:$0xff] (!%p237_p2)  ;;  %v324_v14 = vld [vmem:[%s4640_s1 + $0x188] sm:$0xff] (!%p237_p2)  ;;  %v326_v16 = vld [vmem:[%s4640_s1 + $0x198] sm:$0xff] (!%p237_p2) }
   0x9   : > { %2398 = vmatprep.subr.bf16.mxu0 (!%p237_p2), %v2397_v3  ;;  %v2431_v13 = vpack.c.bf16 (!%p237_p2), %v293_v11, %v277_v10  ;;  %2430 = vmatprep.subr.bf16.mxu1 (!%p237_p2), %v2429_v8  ;;  %v2401_v17 = vpack.c.bf16 (!%p237_p2), %v324_v14, %v308_v12  ;;  %v2433_v18 = vpack.c.bf16 (!%p237_p2), %v326_v16, %v310_v15  ;;  %v307_v19 = vld [vmem:[%s4640_s1 + $0x100] sm:$0xff] (!%p237_p2)  ;;  %v309_v21 = vld [vmem:[%s4640_s1 + $0x110] sm:$0xff] (!%p237_p2)  ;;  %v340_v24 = vld [vmem:[%s4640_s1 + $0x208] sm:$0xff] (!%p237_p2) }
   0xa   : > { %2400 = vmatpush1.bf16.msra.mxu0 (!%p237_p2), %v2399_v9  ;;  %v323_v20 = vld [vmem:[%s4640_s1 + $0x180] sm:$0xff] (!%p237_p2)  ;;  %v325_v23 = vld [vmem:[%s4640_s1 + $0x190] sm:$0xff] (!%p237_p2)  ;;  %v356_v25 = vld [vmem:[%s4640_s1 + $0x288] sm:$0xff] (!%p237_p2) }
   0xb   : > { %2432 = vmatpush1.bf16.msra.mxu1 (!%p237_p2), %v2431_v13  ;;  %v2403_v22 = vpack.c.bf16 (!%p237_p2), %v323_v20, %v307_v19  ;;  %2402 = vmatprep.subr.bf16.mxu0 (!%p237_p2), %v2401_v17  ;;  %v2435_v26 = vpack.c.bf16 (!%p237_p2), %v325_v23, %v309_v21  ;;  %v2405_v27 = vpack.c.bf16 (!%p237_p2), %v356_v25, %v340_v24  ;;  %v342_v28 = vld [vmem:[%s4640_s1 + $0x218] sm:$0xff] (!%p237_p2)  ;;  %v339_v30 = vld [vmem:[%s4640_s1 + $0x200] sm:$0xff] (!%p237_p2)  ;;  %v341_v33 = vld [vmem:[%s4640_s1 + $0x210] sm:$0xff] (!%p237_p2) }
   0xc   : > { %2434 = vmatprep.subr.bf16.mxu1 (!%p237_p2), %v2433_v18  ;;  %v358_v29 = vld [vmem:[%s4640_s1 + $0x298] sm:$0xff] (!%p237_p2)  ;;  %v355_v32 = vld [vmem:[%s4640_s1 + $0x280] sm:$0xff] (!%p237_p2)  ;;  %v357_v34 = vld [vmem:[%s4640_s1 + $0x290] sm:$0xff] (!%p237_p2) }
   0xd   : > { %v2437_v31 = vpack.c.bf16 %v358_v29, %v342_v28  ;;  %v2407_v35 = vpack.c.bf16 %v355_v32, %v339_v30  ;;  %v372_v36 = vld [vmem:[%s4640_s1 + $0x308] sm:$0xff]  ;;  %v374_v38 = vld [vmem:[%s4640_s1 + $0x318] sm:$0xff]  ;;  %v2439_v39 = vpack.c.bf16 %v357_v34, %v341_v33  ;;  %v371_v42 = vld [vmem:[%s4640_s1 + $0x300] sm:$0xff]  ;;  %s4649_s25 = smov (!%p3132_p3, %s2105_s25), 1 }
   0xe   : > { %2404 = vmatpush1.bf16.msra.mxu0 %v2403_v22  ;;  %v388_v37 = vld [vmem:[%s4640_s1 + $0x388] sm:$0xff]  ;;  %v390_v41 = vld [vmem:[%s4640_s1 + $0x398] sm:$0xff]  ;;  %v387_v43 = vld [vmem:[%s4640_s1 + $0x380] sm:$0xff]  ;;  %s2110_s29 = sshll.u32 %s4649_s25, 3 }
   0xf   : > { %2436 = vmatpush1.bf16.msra.mxu1 %v2435_v26  ;;  %2406 = vmatprep.subr.bf16.mxu0 %v2405_v27  ;;  %v2409_v40 = vpack.c.bf16 %v388_v37, %v372_v36  ;;  %v2441_v44 = vpack.c.bf16 %v390_v41, %v374_v38  ;;  %v373_v45 = vld [vmem:[%s4640_s1 + $0x310] sm:$0xff]  ;;  %v404_v47 = vld [vmem:[%s4640_s1 + $0x408] sm:$0xff]  ;;  %v406_v49 = vld [vmem:[%s4640_s1 + $0x418] sm:$0xff]  ;;  %v2411_v51 = vpack.c.bf16 %v387_v43, %v371_v42  ;;  %s3202_s17 = scalar_lea.vmem %s4639_s0, %s2110_s29  ;;  %s273_s26 = scalar_lea.vmem %s4646_s7, %s2110_s29 }
  0x10   : > { %2438 = vmatprep.subr.bf16.mxu1 %v2437_v31  ;;  %v389_v46 = vld [vmem:[%s4640_s1 + $0x390] sm:$0xff]  ;;  %v420_v48 = vld [vmem:[%s4640_s1 + $0x488] sm:$0xff]  ;;  %v422_v50 = vld [vmem:[%s4640_s1 + $0x498] sm:$0xff] }
  0x11   : > { %v2443_v52 = vpack.c.bf16 %v389_v46, %v373_v45  ;;  %v2413_v53 = vpack.c.bf16 %v420_v48, %v404_v47  ;;  %v403_v54 = vld [vmem:[%s4640_s1 + $0x400] sm:$0xff]  ;;  %v405_v56 = vld [vmem:[%s4640_s1 + $0x410] sm:$0xff]  ;;  %v2445_v57 = vpack.c.bf16 %v422_v50, %v406_v49  ;;  %v436_v59 = vld [vmem:[%s4640_s1 + $0x508] sm:$0xff] }
  0x12   : > { %2408 = vmatpush1.bf16.msra.mxu0 %v2407_v35  ;;  %v419_v55 = vld [vmem:[%s4640_s1 + $0x480] sm:$0xff]  ;;  %v421_v58 = vld [vmem:[%s4640_s1 + $0x490] sm:$0xff]  ;;  %v452_v60 = vld [vmem:[%s4640_s1 + $0x588] sm:$0xff] }
  0x13   : > { %2440 = vmatpush1.bf16.msra.mxu1 %v2439_v39  ;;  %2410 = vmatprep.subr.bf16.mxu0 %v2409_v40  ;;  %v438_v61 = vld [vmem:[%s4640_s1 + $0x518] sm:$0xff]  ;;  %v2415_v63 = vpack.c.bf16 %v419_v55, %v403_v54  ;;  %v2447_v0 = vpack.c.bf16 %v421_v58, %v405_v56  ;;  %v2417_v1 = vpack.c.bf16 %v452_v60, %v436_v59  ;;  %v435_v2 = vld [vmem:[%s4640_s1 + $0x500] sm:$0xff]  ;;  %v437_v4 = vld [vmem:[%s4640_s1 + $0x510] sm:$0xff] }
  0x14   : > { %2442 = vmatprep.subr.bf16.mxu1 %v2441_v44  ;;  %v454_v62 = vld [vmem:[%s4640_s1 + $0x598] sm:$0xff]  ;;  %v451_v3 = vld [vmem:[%s4640_s1 + $0x580] sm:$0xff]  ;;  %v453_v6 = vld [vmem:[%s4640_s1 + $0x590] sm:$0xff] }
  0x15   : > { %v2449_v5 = vpack.c.bf16 %v454_v62, %v438_v61  ;;  %v468_v8 = vld [vmem:[%s4640_s1 + $0x608] sm:$0xff]  ;;  %v470_v10 = vld [vmem:[%s4640_s1 + $0x618] sm:$0xff]  ;;  %v2419_v12 = vpack.c.bf16 %v451_v3, %v435_v2  ;;  %v2451_v13 = vpack.c.bf16 %v453_v6, %v437_v4  ;;  %v467_v15 = vld [vmem:[%s4640_s1 + $0x600] sm:$0xff] }
  0x16   : > { %2412 = vmatpush1.bf16.msra.mxu0 %v2411_v51  ;;  %v484_v9 = vld [vmem:[%s4640_s1 + $0x688] sm:$0xff]  ;;  %v486_v11 = vld [vmem:[%s4640_s1 + $0x698] sm:$0xff]  ;;  %v483_v16 = vld [vmem:[%s4640_s1 + $0x680] sm:$0xff] }
  0x17   : > { %2444 = vmatpush1.bf16.msra.mxu1 %v2443_v52  ;;  %2414 = vmatprep.subr.bf16.mxu0 %v2413_v53  ;;  %v2421_v14 = vpack.c.bf16 %v484_v9, %v468_v8  ;;  %v469_v17 = vld [vmem:[%s4640_s1 + $0x610] sm:$0xff]  ;;  %v2453_v18 = vpack.c.bf16 %v486_v11, %v470_v10  ;;  %v500_v20 = vld [vmem:[%s4640_s1 + $0x708] sm:$0xff]  ;;  %v502_v22 = vld [vmem:[%s4640_s1 + $0x718] sm:$0xff]  ;;  %v2423_v24 = vpack.c.bf16 %v483_v16, %v467_v15 }
  0x18   : > { %2446 = vmatprep.subr.bf16.mxu1 %v2445_v57  ;;  %v485_v19 = vld [vmem:[%s4640_s1 + $0x690] sm:$0xff]  ;;  %v516_v21 = vld [vmem:[%s4640_s1 + $0x788] sm:$0xff]  ;;  %v518_v23 = vld [vmem:[%s4640_s1 + $0x798] sm:$0xff] }
  0x19   : > { %v2455_v25 = vpack.c.bf16 %v485_v19, %v469_v17  ;;  %v2425_v26 = vpack.c.bf16 %v516_v21, %v500_v20  ;;  %v499_v27 = vld [vmem:[%s4640_s1 + $0x700] sm:$0xff]  ;;  %v501_v29 = vld [vmem:[%s4640_s1 + $0x710] sm:$0xff]  ;;  %v2457_v30 = vpack.c.bf16 %v518_v23, %v502_v22  ;;  %v280_v32 = vld [vmem:[%s4640_s1 + $0x28] sm:$0xff] }
  0x1a   : > { %2416 = vmatpush1.bf16.msra.mxu0 %v2415_v63  ;;  %v515_v28 = vld [vmem:[%s4640_s1 + $0x780] sm:$0xff]  ;;  %v517_v31 = vld [vmem:[%s4640_s1 + $0x790] sm:$0xff]  ;;  %v296_v33 = vld [vmem:[%s4640_s1 + $0xa8] sm:$0xff] }
  0x1b   : > { %2448 = vmatpush1.bf16.msra.mxu1 %v2447_v0  ;;  %2418 = vmatprep.subr.bf16.mxu0 %v2417_v1  ;;  %v282_v34 = vld [vmem:[%s4640_s1 + $0x38] sm:$0xff]  ;;  %v2427_v36 = vpack.c.bf16 %v515_v28, %v499_v27  ;;  %v2459_v37 = vpack.c.bf16 %v517_v31, %v501_v29  ;;  %v2461_v38 = vpack.c.bf16 %v296_v33, %v280_v32  ;;  %v279_v39 = vld [vmem:[%s4640_s1 + $0x20] sm:$0xff]  ;;  %v281_v41 = vld [vmem:[%s4640_s1 + $0x30] sm:$0xff] }
  0x1c   : > { %2450 = vmatprep.subr.bf16.mxu1 %v2449_v5  ;;  %v298_v35 = vld [vmem:[%s4640_s1 + $0xb8] sm:$0xff]  ;;  %v295_v40 = vld [vmem:[%s4640_s1 + $0xa0] sm:$0xff]  ;;  %v297_v43 = vld [vmem:[%s4640_s1 + $0xb0] sm:$0xff] }
  0x1d   : > { %v2493_v42 = vpack.c.bf16 %v298_v35, %v282_v34  ;;  %v312_v44 = vld [vmem:[%s4640_s1 + $0x128] sm:$0xff]  ;;  %v314_v46 = vld [vmem:[%s4640_s1 + $0x138] sm:$0xff]  ;;  %v3229_v48 = vld [vmem:[%s3202_s17] sm:$0xff]  ;;  %v2463_v49 = vpack.c.bf16 %v295_v40, %v279_v39  ;;  %v2495_v50 = vpack.c.bf16 %v297_v43, %v281_v41 }
  0x1e   : > { %2420 = vmatpush1.bf16.msra.mxu0 %v2419_v12  ;;  %v328_v45 = vld [vmem:[%s4640_s1 + $0x1a8] sm:$0xff]  ;;  %v330_v47 = vld [vmem:[%s4640_s1 + $0x1b8] sm:$0xff]  ;;  %v311_v52 = vld [vmem:[%s4640_s1 + $0x120] sm:$0xff] }
  0x1f   : > { %2452 = vmatpush1.bf16.msra.mxu1 %v2451_v13  ;;  %2422 = vmatprep.subr.bf16.mxu0 %v2421_v14  ;;  %v2465_v51 = vpack.c.bf16 %v328_v45, %v312_v44  ;;  %v327_v53 = vld [vmem:[%s4640_s1 + $0x1a0] sm:$0xff]  ;;  %v313_v54 = vld [vmem:[%s4640_s1 + $0x130] sm:$0xff]  ;;  %v2497_v55 = vpack.c.bf16 %v330_v47, %v314_v46  ;;  %v344_v57 = vld [vmem:[%s4640_s1 + $0x228] sm:$0xff] }
  0x20   : > { %2454 = vmatprep.subr.bf16.mxu1 %v2453_v18  ;;  %v329_v56 = vld [vmem:[%s4640_s1 + $0x1b0] sm:$0xff]  ;;  %v360_v58 = vld [vmem:[%s4640_s1 + $0x2a8] sm:$0xff]  ;;  %v346_v59 = vld [vmem:[%s4640_s1 + $0x238] sm:$0xff]  ;;  %v2467_v61 = vpack.c.bf16 %v327_v53, %v311_v52 }
  0x21   : > { %v362_v60 = vld [vmem:[%s4640_s1 + $0x2b8] sm:$0xff]  ;;  %v2499_v62 = vpack.c.bf16 %v329_v56, %v313_v54  ;;  %v2469_v63 = vpack.c.bf16 %v360_v58, %v344_v57  ;;  %v343_v0 = vld [vmem:[%s4640_s1 + $0x220] sm:$0xff]  ;;  %v345_v2 = vld [vmem:[%s4640_s1 + $0x230] sm:$0xff] }
  0x22   : > { %2424 = vmatpush1.bf16.msra.mxu0 %v2423_v24  ;;  %v359_v1 = vld [vmem:[%s4640_s1 + $0x2a0] sm:$0xff]  ;;  %v2501_v3 = vpack.c.bf16 %v362_v60, %v346_v59  ;;  %v361_v4 = vld [vmem:[%s4640_s1 + $0x2b0] sm:$0xff]  ;;  %v376_v5 = vld [vmem:[%s4640_s1 + $0x328] sm:$0xff] }
  0x23   : > { %2456 = vmatpush1.bf16.msra.mxu1 %v2455_v25  ;;  %2426 = vmatprep.subr.bf16.mxu0 %v2425_v26  ;;  %v392_v6 = vld [vmem:[%s4640_s1 + $0x3a8] sm:$0xff]  ;;  %v378_v8 = vld [vmem:[%s4640_s1 + $0x338] sm:$0xff]  ;;  %v2471_v10 = vpack.c.bf16 %v359_v1, %v343_v0  ;;  %v2503_v11 = vpack.c.bf16 %v361_v4, %v345_v2  ;;  %v375_v13 = vld [vmem:[%s4640_s1 + $0x320] sm:$0xff] }
  0x24   : > { %2458 = vmatprep.subr.bf16.mxu1 %v2457_v30  ;;  %v394_v9 = vld [vmem:[%s4640_s1 + $0x3b8] sm:$0xff]  ;;  %v2473_v12 = vpack.c.bf16 %v392_v6, %v376_v5  ;;  %v391_v14 = vld [vmem:[%s4640_s1 + $0x3a0] sm:$0xff]  ;;  %v377_v15 = vld [vmem:[%s4640_s1 + $0x330] sm:$0xff] }
  0x25   : > { %v2505_v16 = vpack.c.bf16 %v394_v9, %v378_v8  ;;  %v393_v17 = vld [vmem:[%s4640_s1 + $0x3b0] sm:$0xff]  ;;  %v408_v18 = vld [vmem:[%s4640_s1 + $0x428] sm:$0xff]  ;;  %v410_v20 = vld [vmem:[%s4640_s1 + $0x438] sm:$0xff]  ;;  %v2475_v22 = vpack.c.bf16 %v391_v14, %v375_v13 }
  0x26   : > { %2428 = vmatpush1.bf16.msra.mxu0 %v2427_v36  ;;  %v424_v19 = vld [vmem:[%s4640_s1 + $0x4a8] sm:$0xff]  ;;  %v426_v21 = vld [vmem:[%s4640_s1 + $0x4b8] sm:$0xff]  ;;  %v2507_v23 = vpack.c.bf16 %v393_v17, %v377_v15  ;;  %v407_v25 = vld [vmem:[%s4640_s1 + $0x420] sm:$0xff] }
  0x27   : > { %2460 = vmatpush1.bf16.msra.mxu1 %v2459_v37  ;;  %2462 = vmatprep.subr.bf16.mxu0 %v2461_v38  ;;  %v2477_v24 = vpack.c.bf16 %v424_v19, %v408_v18  ;;  %v423_v26 = vld [vmem:[%s4640_s1 + $0x4a0] sm:$0xff]  ;;  %v409_v27 = vld [vmem:[%s4640_s1 + $0x430] sm:$0xff]  ;;  %v2509_v28 = vpack.c.bf16 %v426_v21, %v410_v20  ;;  %v440_v30 = vld [vmem:[%s4640_s1 + $0x528] sm:$0xff] }
  0x28   : > { %2494 = vmatprep.subr.bf16.mxu1 %v2493_v42  ;;  %v425_v29 = vld [vmem:[%s4640_s1 + $0x4b0] sm:$0xff]  ;;  %v456_v31 = vld [vmem:[%s4640_s1 + $0x5a8] sm:$0xff]  ;;  %v442_v32 = vld [vmem:[%s4640_s1 + $0x538] sm:$0xff]  ;;  %v2479_v34 = vpack.c.bf16 %v423_v26, %v407_v25 }
  0x29   : > { %680 = vmatmul.mubr.f32.vlgmr.msra.gmra.mrb[0].mxu0 %v3229_v48  ;;  %v458_v33 = vld [vmem:[%s4640_s1 + $0x5b8] sm:$0xff]  ;;  %v2511_v35 = vpack.c.bf16 %v425_v29, %v409_v27  ;;  %v2481_v36 = vpack.c.bf16 %v456_v31, %v440_v30  ;;  %v439_v37 = vld [vmem:[%s4640_s1 + $0x520] sm:$0xff]  ;;  %v441_v39 = vld [vmem:[%s4640_s1 + $0x530] sm:$0xff] }
  0x2a   : > { %751 = vmatmul.mubr.f32.vlgmr.msra.gmra.mrb[0].mxu1 %v3229_v48  ;;  %2464 = vmatpush1.bf16.msra.mxu0 %v2463_v49  ;;  %v455_v38 = vld [vmem:[%s4640_s1 + $0x5a0] sm:$0xff]  ;;  %v2513_v40 = vpack.c.bf16 %v458_v33, %v442_v32  ;;  %v457_v41 = vld [vmem:[%s4640_s1 + $0x5b0] sm:$0xff]  ;;  %v472_v42 = vld [vmem:[%s4640_s1 + $0x628] sm:$0xff] }
  0x2b   : > { %2496 = vmatpush1.bf16.msra.mxu1 %v2495_v50  ;;  %2466 = vmatprep.subr.bf16.mxu0 %v2465_v51  ;;  %v488_v43 = vld [vmem:[%s4640_s1 + $0x6a8] sm:$0xff]  ;;  %v474_v44 = vld [vmem:[%s4640_s1 + $0x638] sm:$0xff]  ;;  %v2483_v46 = vpack.c.bf16 %v455_v38, %v439_v37  ;;  %v2515_v47 = vpack.c.bf16 %v457_v41, %v441_v39  ;;  %v471_v50 = vld [vmem:[%s4640_s1 + $0x620] sm:$0xff] }
  0x2c   : > { %2498 = vmatprep.subr.bf16.mxu1 %v2497_v55  ;;  %821 = vmatprep.mubr.f32.mxu0 %v2929_v7  ;;  %v490_v45 = vld [vmem:[%s4640_s1 + $0x6b8] sm:$0xff]  ;;  %v2485_v49 = vpack.c.bf16 %v488_v43, %v472_v42  ;;  %v487_v51 = vld [vmem:[%s4640_s1 + $0x6a0] sm:$0xff]  ;;  %v473_v52 = vld [vmem:[%s4640_s1 + $0x630] sm:$0xff] }
  0x2d   : > { %892 = vmatprep.mubr.f32.mxu1 %v2929_v7  ;;  %v2517_v53 = vpack.c.bf16 %v490_v45, %v474_v44  ;;  %v489_v54 = vld [vmem:[%s4640_s1 + $0x6b0] sm:$0xff]  ;;  %v504_v55 = vld [vmem:[%s4640_s1 + $0x728] sm:$0xff]  ;;  %v506_v57 = vld [vmem:[%s4640_s1 + $0x738] sm:$0xff]  ;;  %v2487_v59 = vpack.c.bf16 %v487_v51, %v471_v50 }
  0x2e   : > { %2468 = vmatpush1.bf16.msra.mxu0 %v2467_v61  ;;  %v520_v56 = vld [vmem:[%s4640_s1 + $0x7a8] sm:$0xff]  ;;  %v522_v58 = vld [vmem:[%s4640_s1 + $0x7b8] sm:$0xff]  ;;  %v2519_v60 = vpack.c.bf16 %v489_v54, %v473_v52  ;;  %v505_v0 = vld [vmem:[%s4640_s1 + $0x730] sm:$0xff] }
  0x2f   : > { %2500 = vmatpush1.bf16.msra.mxu1 %v2499_v62  ;;  %2470 = vmatprep.subr.bf16.mxu0 %v2469_v63  ;;  %v2489_v61 = vpack.c.bf16 %v520_v56, %v504_v55  ;;  %v503_v62 = vld [vmem:[%s4640_s1 + $0x720] sm:$0xff]  ;;  %v2521_v1 = vpack.c.bf16 %v522_v58, %v506_v57  ;;  %v521_v2 = vld [vmem:[%s4640_s1 + $0x7b0] sm:$0xff]  ;;  %v300_v4 = vld [vmem:[%s4640_s1 + $0xc8] sm:$0xff] }
  0x30   : > { %2502 = vmatprep.subr.bf16.mxu1 %v2501_v3  ;;  %v519_v63 = vld [vmem:[%s4640_s1 + $0x7a0] sm:$0xff]  ;;  %v284_v3 = vld [vmem:[%s4640_s1 + $0x48] sm:$0xff]  ;;  %v286_v5 = vld [vmem:[%s4640_s1 + $0x58] sm:$0xff]  ;;  %v2523_v9 = vpack.c.bf16 %v521_v2, %v505_v0 }
  0x31   : > { %v302_v6 = vld [vmem:[%s4640_s1 + $0xd8] sm:$0xff]  ;;  %v2491_v8 = vpack.c.bf16 %v519_v63, %v503_v62  ;;  %v285_v13 = vld [vmem:[%s4640_s1 + $0x50] sm:$0xff]  ;;  %v332_v17 = vld [vmem:[%s4640_s1 + $0x1c8] sm:$0xff] }
  0x32   : > { %2472 = vmatpush1.bf16.msra.mxu0 %v2471_v10  ;;  %v2525_v10 = vpack.c.bf16 %v300_v4, %v284_v3  ;;  %v2557_v14 = vpack.c.bf16 %v302_v6, %v286_v5  ;;  %v301_v15 = vld [vmem:[%s4640_s1 + $0xd0] sm:$0xff]  ;;  %v318_v18 = vld [vmem:[%s4640_s1 + $0x158] sm:$0xff]  ;;  %v364_v29 = vld [vmem:[%s4640_s1 + $0x2c8] sm:$0xff] }
  0x33   : > { %2504 = vmatpush1.bf16.msra.mxu1 %v2503_v11  ;;  %2474 = vmatprep.subr.bf16.mxu0 %v2473_v12  ;;  %v283_v11 = vld [vmem:[%s4640_s1 + $0x40] sm:$0xff]  ;;  %v334_v19 = vld [vmem:[%s4640_s1 + $0x1d8] sm:$0xff]  ;;  %v2559_v21 = vpack.c.bf16 %v301_v15, %v285_v13  ;;  %v317_v25 = vld [vmem:[%s4640_s1 + $0x150] sm:$0xff] }
  0x34   : > { %2506 = vmatprep.subr.bf16.mxu1 %v2505_v16  ;;  %v299_v12 = vld [vmem:[%s4640_s1 + $0xc0] sm:$0xff]  ;;  %v316_v16 = vld [vmem:[%s4640_s1 + $0x148] sm:$0xff]  ;;  %v2561_v26 = vpack.c.bf16 %v334_v19, %v318_v18  ;;  %v333_v27 = vld [vmem:[%s4640_s1 + $0x1d0] sm:$0xff] }
  0x35   : > { %v2527_v20 = vpack.c.bf16 %v299_v12, %v283_v11  ;;  %v350_v30 = vld [vmem:[%s4640_s1 + $0x258] sm:$0xff]  ;;  %v2563_v33 = vpack.c.bf16 %v333_v27, %v317_v25  ;;  %v349_v37 = vld [vmem:[%s4640_s1 + $0x250] sm:$0xff]  ;;  %v396_v41 = vld [vmem:[%s4640_s1 + $0x3c8] sm:$0xff] }
  0x36   : > { %2476 = vmatpush1.bf16.msra.mxu0 %v2475_v22  ;;  %v2529_v22 = vpack.c.bf16 %v332_v17, %v316_v16  ;;  %v366_v31 = vld [vmem:[%s4640_s1 + $0x2d8] sm:$0xff]  ;;  %v365_v39 = vld [vmem:[%s4640_s1 + $0x2d0] sm:$0xff]  ;;  %v428_v54 = vld [vmem:[%s4640_s1 + $0x4c8] sm:$0xff] }
  0x37   : > { %2508 = vmatpush1.bf16.msra.mxu1 %v2507_v23  ;;  %2478 = vmatprep.subr.bf16.mxu0 %v2477_v24  ;;  %v315_v23 = vld [vmem:[%s4640_s1 + $0x140] sm:$0xff]  ;;  %v2565_v38 = vpack.c.bf16 %v366_v31, %v350_v30  ;;  %v382_v42 = vld [vmem:[%s4640_s1 + $0x358] sm:$0xff]  ;;  %v2567_v45 = vpack.c.bf16 %v365_v39, %v349_v37  ;;  %v381_v50 = vld [vmem:[%s4640_s1 + $0x350] sm:$0xff] }
  0x38   : > { %2510 = vmatprep.subr.bf16.mxu1 %v2509_v28  ;;  %v331_v24 = vld [vmem:[%s4640_s1 + $0x1c0] sm:$0xff]  ;;  %v348_v28 = vld [vmem:[%s4640_s1 + $0x248] sm:$0xff]  ;;  %v398_v43 = vld [vmem:[%s4640_s1 + $0x3d8] sm:$0xff] }
  0x39   : > { %v2531_v32 = vpack.c.bf16 %v331_v24, %v315_v23  ;;  %v2569_v51 = vpack.c.bf16 %v398_v43, %v382_v42  ;;  %v397_v52 = vld [vmem:[%s4640_s1 + $0x3d0] sm:$0xff]  ;;  %v414_v55 = vld [vmem:[%s4640_s1 + $0x458] sm:$0xff]  ;;  %v460_v2 = vld [vmem:[%s4640_s1 + $0x5c8] sm:$0xff] }
  0x3a   : > { %2480 = vmatpush1.bf16.msra.mxu0 %v2479_v34  ;;  %v2533_v34 = vpack.c.bf16 %v364_v29, %v348_v28  ;;  %v430_v56 = vld [vmem:[%s4640_s1 + $0x4d8] sm:$0xff]  ;;  %v2571_v58 = vpack.c.bf16 %v397_v52, %v381_v50  ;;  %v413_v62 = vld [vmem:[%s4640_s1 + $0x450] sm:$0xff]  ;;  %v492_v15 = vld [vmem:[%s4640_s1 + $0x6c8] sm:$0xff] }
  0x3b   : > { %2512 = vmatpush1.bf16.msra.mxu1 %v2511_v35  ;;  %2482 = vmatprep.subr.bf16.mxu0 %v2481_v36  ;;  %v347_v35 = vld [vmem:[%s4640_s1 + $0x240] sm:$0xff]  ;;  %v2573_v63 = vpack.c.bf16 %v430_v56, %v414_v55  ;;  %v429_v0 = vld [vmem:[%s4640_s1 + $0x4d0] sm:$0xff]  ;;  %v446_v3 = vld [vmem:[%s4640_s1 + $0x558] sm:$0xff] }
  0x3c   : > { %2514 = vmatprep.subr.bf16.mxu1 %v2513_v40  ;;  %v363_v36 = vld [vmem:[%s4640_s1 + $0x2c0] sm:$0xff]  ;;  %v380_v40 = vld [vmem:[%s4640_s1 + $0x348] sm:$0xff]  ;;  %v462_v4 = vld [vmem:[%s4640_s1 + $0x5d8] sm:$0xff]  ;;  %v2575_v6 = vpack.c.bf16 %v429_v0, %v413_v62 }
  0x3d   : > { %v2535_v44 = vpack.c.bf16 %v363_v36, %v347_v35  ;;  %v445_v11 = vld [vmem:[%s4640_s1 + $0x550] sm:$0xff]  ;;  %v2577_v12 = vpack.c.bf16 %v462_v4, %v446_v3  ;;  %v478_v16 = vld [vmem:[%s4640_s1 + $0x658] sm:$0xff]  ;;  %v524_v27 = vld [vmem:[%s4640_s1 + $0x7c8] sm:$0xff] }
  0x3e   : > { %2484 = vmatpush1.bf16.msra.mxu0 %v2483_v46  ;;  %v2537_v46 = vpack.c.bf16 %v396_v41, %v380_v40  ;;  %v461_v13 = vld [vmem:[%s4640_s1 + $0x5d0] sm:$0xff]  ;;  %v494_v17 = vld [vmem:[%s4640_s1 + $0x6d8] sm:$0xff]  ;;  %v304_v39 = vld [vmem:[%s4640_s1 + $0xe8] sm:$0xff] }
  0x3f   : > { %2516 = vmatpush1.bf16.msra.mxu1 %v2515_v47  ;;  %2486 = vmatprep.subr.bf16.mxu0 %v2485_v49  ;;  %v379_v47 = vld [vmem:[%s4640_s1 + $0x340] sm:$0xff]  ;;  %v2579_v19 = vpack.c.bf16 %v461_v13, %v445_v11  ;;  %v477_v23 = vld [vmem:[%s4640_s1 + $0x650] sm:$0xff]  ;;  %v2581_v24 = vpack.c.bf16 %v494_v17, %v478_v16  ;;  %v510_v28 = vld [vmem:[%s4640_s1 + $0x758] sm:$0xff] }
  0x40   : > { %2518 = vmatprep.subr.bf16.mxu1 %v2517_v53  ;;  %v395_v49 = vld [vmem:[%s4640_s1 + $0x3c0] sm:$0xff]  ;;  %v412_v53 = vld [vmem:[%s4640_s1 + $0x448] sm:$0xff]  ;;  %v493_v25 = vld [vmem:[%s4640_s1 + $0x6d0] sm:$0xff] }
  0x41   : > { %v2539_v57 = vpack.c.bf16 %v395_v49, %v379_v47  ;;  %v526_v29 = vld [vmem:[%s4640_s1 + $0x7d8] sm:$0xff]  ;;  %v2583_v31 = vpack.c.bf16 %v493_v25, %v477_v23  ;;  %v509_v35 = vld [vmem:[%s4640_s1 + $0x750] sm:$0xff]  ;;  %v336_v52 = vld [vmem:[%s4640_s1 + $0x1e8] sm:$0xff] }
  0x42   : > { %2488 = vmatpush1.bf16.msra.mxu0 %v2487_v59  ;;  %v2541_v59 = vpack.c.bf16 %v428_v54, %v412_v53  ;;  %v2585_v36 = vpack.c.bf16 %v526_v29, %v510_v28  ;;  %v525_v37 = vld [vmem:[%s4640_s1 + $0x7d0] sm:$0xff]  ;;  %v290_v40 = vld [vmem:[%s4640_s1 + $0x78] sm:$0xff]  ;;  %v368_v0 = vld [vmem:[%s4640_s1 + $0x2e8] sm:$0xff] }
  0x43   : > { %2520 = vmatpush1.bf16.msra.mxu1 %v2519_v60  ;;  %2490 = vmatprep.subr.bf16.mxu0 %v2489_v61  ;;  %v411_v60 = vld [vmem:[%s4640_s1 + $0x440] sm:$0xff]  ;;  %v306_v41 = vld [vmem:[%s4640_s1 + $0xf8] sm:$0xff]  ;;  %v2587_v43 = vpack.c.bf16 %v525_v37, %v509_v35  ;;  %v289_v47 = vld [vmem:[%s4640_s1 + $0x70] sm:$0xff] }
  0x44   : > { %2522 = vmatprep.subr.bf16.mxu1 %v2521_v1  ;;  %v427_v61 = vld [vmem:[%s4640_s1 + $0x4c0] sm:$0xff]  ;;  %v444_v1 = vld [vmem:[%s4640_s1 + $0x548] sm:$0xff]  ;;  %v2621_v49 = vpack.c.bf16 %v306_v41, %v290_v40  ;;  %v305_v50 = vld [vmem:[%s4640_s1 + $0xf0] sm:$0xff] }
  0x45   : > { %v2543_v5 = vpack.c.bf16 %v427_v61, %v411_v60  ;;  %v322_v53 = vld [vmem:[%s4640_s1 + $0x178] sm:$0xff]  ;;  %v2623_v56 = vpack.c.bf16 %v305_v50, %v289_v47  ;;  %v321_v60 = vld [vmem:[%s4640_s1 + $0x170] sm:$0xff]  ;;  %v400_v13 = vld [vmem:[%s4640_s1 + $0x3e8] sm:$0xff] }
  0x46   : > { %2492 = vmatpush1.bf16.msra.mxu0 %v2491_v8  ;;  %v2545_v8 = vpack.c.bf16 %v460_v2, %v444_v1  ;;  %v338_v54 = vld [vmem:[%s4640_s1 + $0x1f8] sm:$0xff]  ;;  %v337_v62 = vld [vmem:[%s4640_s1 + $0x1f0] sm:$0xff]  ;;  %v416_v23 = vld [vmem:[%s4640_s1 + $0x468] sm:$0xff] }
  0x47   : > { %2524 = vmatpush1.bf16.msra.mxu1 %v2523_v9  ;;  %2526 = vmatprep.subr.bf16.mxu0 %v2525_v10  ;;  %v443_v9 = vld [vmem:[%s4640_s1 + $0x540] sm:$0xff]  ;;  %v2625_v61 = vpack.c.bf16 %v338_v54, %v322_v53  ;;  %v354_v1 = vld [vmem:[%s4640_s1 + $0x278] sm:$0xff]  ;;  %v2627_v4 = vpack.c.bf16 %v337_v62, %v321_v60  ;;  %v369_v11 = vld [vmem:[%s4640_s1 + $0x2f0] sm:$0xff] }
  0x48   : > { %2558 = vmatprep.subr.bf16.mxu1 %v2557_v14  ;;  %v459_v10 = vld [vmem:[%s4640_s1 + $0x5c0] sm:$0xff]  ;;  %v476_v14 = vld [vmem:[%s4640_s1 + $0x648] sm:$0xff]  ;;  %v370_v2 = vld [vmem:[%s4640_s1 + $0x2f8] sm:$0xff] }
  0x49   : > { %822 = vmatmul.mubr.f32.vlgmr.msra.gmra.mrb[2].mxu0 %v3229_v48  ;;  %v2547_v18 = vpack.c.bf16 %v459_v10, %v443_v9  ;;  %v353_v9 = vld [vmem:[%s4640_s1 + $0x270] sm:$0xff]  ;;  %v2629_v10 = vpack.c.bf16 %v370_v2, %v354_v1  ;;  %v418_v25 = vld [vmem:[%s4640_s1 + $0x478] sm:$0xff]  ;;  %v448_v35 = vld [vmem:[%s4640_s1 + $0x568] sm:$0xff] }
  0x4a   : > { %893 = vmatmul.mubr.f32.vlgmr.msra.gmra.mrb[2].mxu1 %v3229_v48  ;;  %2528 = vmatpush1.bf16.msra.mxu0 %v2527_v20  ;;  %v2549_v20 = vpack.c.bf16 %v492_v15, %v476_v14  ;;  %v386_v14 = vld [vmem:[%s4640_s1 + $0x378] sm:$0xff]  ;;  %v2631_v17 = vpack.c.bf16 %v369_v11, %v353_v9  ;;  %v480_v47 = vld [vmem:[%s4640_s1 + $0x668] sm:$0xff]  ;;  %v1215_v9 = vld [vmem:[%s4642_s3 + $0x80] sm:$0xff] }
  0x4b   : > { %2560 = vmatpush1.bf16.msra.mxu1 %v2559_v21  ;;  %2530 = vmatprep.subr.bf16.mxu0 %v2529_v22  ;;  %v475_v21 = vld [vmem:[%s4640_s1 + $0x640] sm:$0xff]  ;;  %v402_v15 = vld [vmem:[%s4640_s1 + $0x3f8] sm:$0xff]  ;;  %v512_v60 = vld [vmem:[%s4640_s1 + $0x768] sm:$0xff] }
  0x4c   : > { %2562 = vmatprep.subr.bf16.mxu1 %v2561_v26  ;;  %963 = vmatprep.mubr.f32.mxu0 %v2929_v7  ;;  %v491_v22 = vld [vmem:[%s4640_s1 + $0x6c0] sm:$0xff]  ;;  %v508_v26 = vld [vmem:[%s4640_s1 + $0x748] sm:$0xff]  ;;  %v450_v37 = vld [vmem:[%s4640_s1 + $0x578] sm:$0xff] }
  0x4d   : > { %1034 = vmatprep.mubr.f32.mxu1 %v2929_v7  ;;  %v2551_v30 = vpack.c.bf16 %v491_v22, %v475_v21  ;;  %v385_v21 = vld [vmem:[%s4640_s1 + $0x370] sm:$0xff]  ;;  %v482_v50 = vld [vmem:[%s4640_s1 + $0x678] sm:$0xff]  ;;  %v1247_v11 = vld [vmem:[%s4642_s3 + $0x180] sm:$0xff] }
  0x4e   : > { %2532 = vmatpush1.bf16.msra.mxu0 %v2531_v32  ;;  %v2553_v32 = vpack.c.bf16 %v524_v27, %v508_v26  ;;  %v401_v22 = vld [vmem:[%s4640_s1 + $0x3f0] sm:$0xff]  ;;  %v434_v26 = vld [vmem:[%s4640_s1 + $0x4f8] sm:$0xff] }
  0x4f   : > { %2564 = vmatpush1.bf16.msra.mxu1 %v2563_v33  ;;  %2534 = vmatprep.subr.bf16.mxu0 %v2533_v34  ;;  %v507_v33 = vld [vmem:[%s4640_s1 + $0x740] sm:$0xff]  ;;  %v2635_v28 = vpack.c.bf16 %v401_v22, %v385_v21  ;;  %v514_v62 = vld [vmem:[%s4640_s1 + $0x778] sm:$0xff]  ;;  %v1217_v21 = vld [vmem:[%s4642_s3 + $0x90] sm:$0xff] }
  0x50   : > { %2566 = vmatprep.subr.bf16.mxu1 %v2565_v38  ;;  %v523_v34 = vld [vmem:[%s4640_s1 + $0x7c0] sm:$0xff]  ;;  %v288_v38 = vld [vmem:[%s4640_s1 + $0x68] sm:$0xff]  ;;  %v1249_v22 = vld [vmem:[%s4642_s3 + $0x190] sm:$0xff] }
  0x51   : > { %v2555_v42 = vpack.c.bf16 %v523_v34, %v507_v33  ;;  %v2637_v33 = vpack.c.bf16 %v434_v26, %v418_v25  ;;  %v433_v34 = vld [vmem:[%s4640_s1 + $0x4f0] sm:$0xff] }
  0x52   : > { %2536 = vmatpush1.bf16.msra.mxu0 %v2535_v44  ;;  %v2589_v44 = vpack.c.bf16 %v304_v39, %v288_v38  ;;  %v466_v38 = vld [vmem:[%s4640_s1 + $0x5f8] sm:$0xff] }
  0x53   : > { %2568 = vmatpush1.bf16.msra.mxu1 %v2567_v45  ;;  %2538 = vmatprep.subr.bf16.mxu0 %v2537_v46  ;;  %v287_v45 = vld [vmem:[%s4640_s1 + $0x60] sm:$0xff] }
  0x54   : > { %2570 = vmatprep.subr.bf16.mxu1 %v2569_v51  ;;  %v303_v46 = vld [vmem:[%s4640_s1 + $0xe0] sm:$0xff]  ;;  %v320_v51 = vld [vmem:[%s4640_s1 + $0x168] sm:$0xff] }
  0x55   : > { %v2591_v55 = vpack.c.bf16 %v303_v46, %v287_v45  ;;  %v2641_v45 = vpack.c.bf16 %v466_v38, %v450_v37  ;;  %v465_v46 = vld [vmem:[%s4640_s1 + $0x5f0] sm:$0xff] }
  0x56   : > { %2540 = vmatpush1.bf16.msra.mxu0 %v2539_v57  ;;  %v2593_v57 = vpack.c.bf16 %v336_v52, %v320_v51  ;;  %v498_v51 = vld [vmem:[%s4640_s1 + $0x6f8] sm:$0xff] }
  0x57   : > { %2572 = vmatpush1.bf16.msra.mxu1 %v2571_v58  ;;  %2542 = vmatprep.subr.bf16.mxu0 %v2541_v59  ;;  %v319_v58 = vld [vmem:[%s4640_s1 + $0x160] sm:$0xff] }
  0x58   : > { %2574 = vmatprep.subr.bf16.mxu1 %v2573_v63  ;;  %v335_v59 = vld [vmem:[%s4640_s1 + $0x1e0] sm:$0xff]  ;;  %v352_v63 = vld [vmem:[%s4640_s1 + $0x268] sm:$0xff] }
  0x59   : > { %v2595_v3 = vpack.c.bf16 %v335_v59, %v319_v58  ;;  %v2645_v58 = vpack.c.bf16 %v498_v51, %v482_v50  ;;  %v497_v59 = vld [vmem:[%s4640_s1 + $0x6f0] sm:$0xff] }
  0x5a   : > { %2544 = vmatpush1.bf16.msra.mxu0 %v2543_v5  ;;  %v2597_v5 = vpack.c.bf16 %v368_v0, %v352_v63  ;;  %v530_v63 = vld [vmem:[%s4640_s1 + $0x7f8] sm:$0xff]  ;;  %v1205_v51 = vld [vmem:[%s4642_s3 + $0x30] sm:$0xff] }
  0x5b   : > { %2576 = vmatpush1.bf16.msra.mxu1 %v2575_v6  ;;  %2546 = vmatprep.subr.bf16.mxu0 %v2545_v8  ;;  %v351_v6 = vld [vmem:[%s4640_s1 + $0x260] sm:$0xff] }
  0x5c   : > { %2578 = vmatprep.subr.bf16.mxu1 %v2577_v12  ;;  %v367_v8 = vld [vmem:[%s4640_s1 + $0x2e0] sm:$0xff]  ;;  %v384_v12 = vld [vmem:[%s4640_s1 + $0x368] sm:$0xff] }
  0x5d   : > { %v2599_v16 = vpack.c.bf16 %v367_v8, %v351_v6  ;;  %v2649_v6 = vpack.c.bf16 %v530_v63, %v514_v62  ;;  %v529_v8 = vld [vmem:[%s4640_s1 + $0x7f0] sm:$0xff]  ;;  %v1207_v63 = vld [vmem:[%s4642_s3 + $0x40] sm:$0xff] }
  0x5e   : > { %2548 = vmatpush1.bf16.msra.mxu0 %v2547_v18  ;;  %v2601_v18 = vpack.c.bf16 %v400_v13, %v384_v12  ;;  %v1248_v12 = vld [vmem:[%s4642_s3 + $0x188] sm:$0xff] }
  0x5f   : > { %2580 = vmatpush1.bf16.msra.mxu1 %v2579_v19  ;;  %2550 = vmatprep.subr.bf16.mxu0 %v2549_v20  ;;  %v383_v19 = vld [vmem:[%s4640_s1 + $0x360] sm:$0xff] }
  0x60   : > { %2582 = vmatprep.subr.bf16.mxu1 %v2581_v24  ;;  %v399_v20 = vld [vmem:[%s4640_s1 + $0x3e0] sm:$0xff]  ;;  %v432_v24 = vld [vmem:[%s4640_s1 + $0x4e8] sm:$0xff] }
  0x61   : > { %v2603_v27 = vpack.c.bf16 %v399_v20, %v383_v19  ;;  %v2605_v29 = vpack.c.bf16 %v432_v24, %v416_v23  ;;  %v2685_v19 = vpack.c.bf16 %v1248_v12, %v1247_v11  ;;  %v1232_v20 = vld [vmem:[%s4642_s3 + $0x108] sm:$0xff]  ;;  %v1250_v23 = vld [vmem:[%s4642_s3 + $0x198] sm:$0xff]  ;;  %v1209_v12 = vld [vmem:[%s4642_s3 + $0x50] sm:$0xff] }
  0x62   : > { %2552 = vmatpush1.bf16.msra.mxu0 %v2551_v30  ;;  %v415_v30 = vld [vmem:[%s4640_s1 + $0x460] sm:$0xff] }
  0x63   : > { %2584 = vmatpush1.bf16.msra.mxu1 %v2583_v31  ;;  %2554 = vmatprep.subr.bf16.mxu0 %v2553_v32  ;;  %v431_v31 = vld [vmem:[%s4640_s1 + $0x4e0] sm:$0xff]  ;;  %v417_v32 = vld [vmem:[%s4640_s1 + $0x470] sm:$0xff] }
  0x64   : > { %2586 = vmatprep.subr.bf16.mxu1 %v2585_v36  ;;  %v464_v36 = vld [vmem:[%s4640_s1 + $0x5e8] sm:$0xff]  ;;  %v2607_v39 = vpack.c.bf16 %v431_v31, %v415_v30  ;;  %v2639_v40 = vpack.c.bf16 %v433_v34, %v417_v32  ;;  %v2689_v30 = vpack.c.bf16 %v1250_v23, %v1249_v22  ;;  %v1234_v31 = vld [vmem:[%s4642_s3 + $0x118] sm:$0xff]  ;;  %v1219_v32 = vld [vmem:[%s4642_s3 + $0xa0] sm:$0xff] }
  0x65   : > { %v2609_v41 = vpack.c.bf16 %v464_v36, %v448_v35  ;;  %v1251_v34 = vld [vmem:[%s4642_s3 + $0x1a0] sm:$0xff]  ;;  %v1252_v35 = vld [vmem:[%s4642_s3 + $0x1a8] sm:$0xff] }
  0x66   : > { %2556 = vmatpush1.bf16.msra.mxu0 %v2555_v42  ;;  %v447_v42 = vld [vmem:[%s4640_s1 + $0x560] sm:$0xff] }
  0x67   : > { %2588 = vmatpush1.bf16.msra.mxu1 %v2587_v43  ;;  %2590 = vmatprep.subr.bf16.mxu0 %v2589_v44  ;;  %v463_v43 = vld [vmem:[%s4640_s1 + $0x5e0] sm:$0xff]  ;;  %v449_v44 = vld [vmem:[%s4640_s1 + $0x570] sm:$0xff] }
  0x68   : > { %2622 = vmatprep.subr.bf16.mxu1 %v2621_v49  ;;  %v496_v49 = vld [vmem:[%s4640_s1 + $0x6e8] sm:$0xff]  ;;  %v2611_v52 = vpack.c.bf16 %v463_v43, %v447_v42  ;;  %v2643_v53 = vpack.c.bf16 %v465_v46, %v449_v44  ;;  %v1221_v43 = vld [vmem:[%s4642_s3 + $0xb0] sm:$0xff]  ;;  %v1222_v44 = vld [vmem:[%s4642_s3 + $0xb8] sm:$0xff] }
  0x69   : > { %964 = vmatmul.mubr.f32.vlgmr.msra.gmra.mrb[4].mxu0 %v3229_v48  ;;  %v2613_v54 = vpack.c.bf16 %v496_v49, %v480_v47  ;;  %v1236_v42 = vld [vmem:[%s4642_s3 + $0x128] sm:$0xff]  ;;  %v1254_v46 = vld [vmem:[%s4642_s3 + $0x1b8] sm:$0xff]  ;;  %v2665_v50 = vpack.c.bf16 %v1222_v44, %v1221_v43  ;;  %v1211_v23 = vld [vmem:[%s4642_s3 + $0x60] sm:$0xff] }
  0x6a   : > { %1035 = vmatmul.mubr.f32.vlgmr.msra.gmra.mrb[4].mxu1 %v3229_v48  ;;  %2592 = vmatpush1.bf16.msra.mxu0 %v2591_v55  ;;  %v479_v55 = vld [vmem:[%s4640_s1 + $0x660] sm:$0xff] }
  0x6b   : > { %2624 = vmatpush1.bf16.msra.mxu1 %v2623_v56  ;;  %2594 = vmatprep.subr.bf16.mxu0 %v2593_v57  ;;  %v495_v56 = vld [vmem:[%s4640_s1 + $0x6e0] sm:$0xff]  ;;  %v481_v57 = vld [vmem:[%s4640_s1 + $0x670] sm:$0xff] }
  0x6c   : > { %2626 = vmatprep.subr.bf16.mxu1 %v2625_v61  ;;  %1105 = vmatprep.mubr.f32.mxu0 %v2929_v7  ;;  %v528_v61 = vld [vmem:[%s4640_s1 + $0x7e8] sm:$0xff]  ;;  %v2615_v0 = vpack.c.bf16 %v495_v56, %v479_v55  ;;  %v2647_v1 = vpack.c.bf16 %v497_v59, %v481_v57  ;;  %v1238_v55 = vld [vmem:[%s4642_s3 + $0x138] sm:$0xff]  ;;  %v1223_v56 = vld [vmem:[%s4642_s3 + $0xc0] sm:$0xff] }
  0x6d   : > { %1176 = vmatprep.mubr.f32.mxu1 %v2929_v7  ;;  %v2633_v7 = vpack.c.bf16 %v402_v15, %v386_v14  ;;  %v2617_v2 = vpack.c.bf16 %v528_v61, %v512_v60  ;;  %v1224_v57 = vld [vmem:[%s4642_s3 + $0xc8] sm:$0xff] }
  0x6e   : > { %2596 = vmatpush1.bf16.msra.mxu0 %v2595_v3  ;;  %v511_v3 = vld [vmem:[%s4640_s1 + $0x760] sm:$0xff]  ;;  %v1256_v59 = vld [vmem:[%s4642_s3 + $0x1c8] sm:$0xff]  ;;  %v2669_v62 = vpack.c.bf16 %v1224_v57, %v1223_v56 }
  0x6f   : > { %2628 = vmatpush1.bf16.msra.mxu1 %v2627_v4  ;;  %2598 = vmatprep.subr.bf16.mxu0 %v2597_v5  ;;  %v527_v4 = vld [vmem:[%s4640_s1 + $0x7e0] sm:$0xff]  ;;  %v513_v5 = vld [vmem:[%s4640_s1 + $0x770] sm:$0xff] }
  0x70   : > { %2630 = vmatprep.subr.bf16.mxu1 %v2629_v10  ;;  %v1216_v10 = vld [vmem:[%s4642_s3 + $0x88] sm:$0xff]  ;;  %v2619_v13 = vpack.c.bf16 %v527_v4, %v511_v3  ;;  %v2651_v14 = vpack.c.bf16 %v529_v8, %v513_v5  ;;  %v1225_v4 = vld [vmem:[%s4642_s3 + $0xd0] sm:$0xff]  ;;  %v1226_v5 = vld [vmem:[%s4642_s3 + $0xd8] sm:$0xff] }
  0x71   : > { %v2653_v15 = vpack.c.bf16 %v1216_v10, %v1215_v9  ;;  %v1240_v3 = vld [vmem:[%s4642_s3 + $0x148] sm:$0xff]  ;;  %v1258_v8 = vld [vmem:[%s4642_s3 + $0x1d8] sm:$0xff]  ;;  %v2673_v11 = vpack.c.bf16 %v1226_v5, %v1225_v4 }
  0x72   : > { %2600 = vmatpush1.bf16.msra.mxu0 %v2599_v16  ;;  %v1199_v16 = vld [vmem:[%s4642_s3] sm:$0xff]  ;;  %v1296_v5 = vld [vmem:[%s4642_s3 + $0x308] sm:$0xff] }
  0x73   : > { %2632 = vmatpush1.bf16.msra.mxu1 %v2631_v17  ;;  %2602 = vmatprep.subr.bf16.mxu0 %v2601_v18  ;;  %v1200_v17 = vld [vmem:[%s4642_s3 + $0x8] sm:$0xff]  ;;  %v1231_v18 = vld [vmem:[%s4642_s3 + $0x100] sm:$0xff] }
  0x74   : > { %2634 = vmatprep.subr.bf16.mxu1 %v2633_v7  ;;  %v1218_v7 = vld [vmem:[%s4642_s3 + $0x98] sm:$0xff]  ;;  %v2655_v24 = vpack.c.bf16 %v1200_v17, %v1199_v16  ;;  %v2687_v25 = vpack.c.bf16 %v1232_v20, %v1231_v18  ;;  %v1227_v17 = vld [vmem:[%s4642_s3 + $0xe0] sm:$0xff]  ;;  %v1228_v18 = vld [vmem:[%s4642_s3 + $0xe8] sm:$0xff] }
  0x75   : > { %v2657_v26 = vpack.c.bf16 %v1218_v7, %v1217_v21  ;;  %v1242_v16 = vld [vmem:[%s4642_s3 + $0x158] sm:$0xff]  ;;  %v1260_v20 = vld [vmem:[%s4642_s3 + $0x1e8] sm:$0xff]  ;;  %v2677_v22 = vpack.c.bf16 %v1228_v18, %v1227_v17 }
  0x76   : > { %2604 = vmatpush1.bf16.msra.mxu0 %v2603_v27  ;;  %v1201_v27 = vld [vmem:[%s4642_s3 + $0x10] sm:$0xff] }
  0x77   : > { %2636 = vmatpush1.bf16.msra.mxu1 %v2635_v28  ;;  %2606 = vmatprep.subr.bf16.mxu0 %v2605_v29  ;;  %v1202_v28 = vld [vmem:[%s4642_s3 + $0x18] sm:$0xff]  ;;  %v1233_v29 = vld [vmem:[%s4642_s3 + $0x110] sm:$0xff] }
  0x78   : > { %2638 = vmatprep.subr.bf16.mxu1 %v2637_v33  ;;  %v1220_v33 = vld [vmem:[%s4642_s3 + $0xa8] sm:$0xff]  ;;  %v2659_v36 = vpack.c.bf16 %v1202_v28, %v1201_v27  ;;  %v2691_v37 = vpack.c.bf16 %v1234_v31, %v1233_v29  ;;  %v1229_v28 = vld [vmem:[%s4642_s3 + $0xf0] sm:$0xff]  ;;  %v1230_v29 = vld [vmem:[%s4642_s3 + $0xf8] sm:$0xff] }
  0x79   : > { %v2661_v38 = vpack.c.bf16 %v1220_v33, %v1219_v32  ;;  %v1244_v27 = vld [vmem:[%s4642_s3 + $0x168] sm:$0xff]  ;;  %v1262_v31 = vld [vmem:[%s4642_s3 + $0x1f8] sm:$0xff] }
  0x7a   : > { %2608 = vmatpush1.bf16.msra.mxu0 %v2607_v39  ;;  %v1203_v39 = vld [vmem:[%s4642_s3 + $0x20] sm:$0xff] }
  0x7b   : > { %2640 = vmatpush1.bf16.msra.mxu1 %v2639_v40  ;;  %2610 = vmatprep.subr.bf16.mxu0 %v2609_v41  ;;  %v1204_v40 = vld [vmem:[%s4642_s3 + $0x28] sm:$0xff]  ;;  %v1235_v41 = vld [vmem:[%s4642_s3 + $0x120] sm:$0xff] }
  0x7c   : > { %2642 = vmatprep.subr.bf16.mxu1 %v2641_v45  ;;  %v1253_v45 = vld [vmem:[%s4642_s3 + $0x1b0] sm:$0xff]  ;;  %v2663_v47 = vpack.c.bf16 %v1204_v40, %v1203_v39  ;;  %v2695_v49 = vpack.c.bf16 %v1236_v42, %v1235_v41  ;;  %v1246_v39 = vld [vmem:[%s4642_s3 + $0x178] sm:$0xff]  ;;  %v1279_v40 = vld [vmem:[%s4642_s3 + $0x280] sm:$0xff] }
  0x7d   : > { %v1280_v41 = vld [vmem:[%s4642_s3 + $0x288] sm:$0xff] }
  0x7e   : > { %2612 = vmatpush1.bf16.msra.mxu0 %v2611_v52  ;;  %v1206_v52 = vld [vmem:[%s4642_s3 + $0x38] sm:$0xff]  ;;  %v1312_v42 = vld [vmem:[%s4642_s3 + $0x388] sm:$0xff] }
  0x7f   : > { %2644 = vmatpush1.bf16.msra.mxu1 %v2643_v53  ;;  %2614 = vmatprep.subr.bf16.mxu0 %v2613_v54  ;;  %v1237_v53 = vld [vmem:[%s4642_s3 + $0x130] sm:$0xff]  ;;  %v2697_v54 = vpack.c.bf16 %v1254_v46, %v1253_v45  ;;  %v2667_v60 = vpack.c.bf16 %v1206_v52, %v1205_v51  ;;  %v2717_v45 = vpack.c.bf16 %v1280_v41, %v1279_v40  ;;  %v3995_v51 = vld [vmem:[%s4641_s2] sm:$0xff] }
  0x80   : > { %2646 = vmatprep.subr.bf16.mxu1 %v2645_v58  ;;  %v1255_v58 = vld [vmem:[%s4642_s3 + $0x1c0] sm:$0xff]  ;;  %v2699_v61 = vpack.c.bf16 %v1238_v55, %v1237_v53 }
  0x82   : > { %2616 = vmatpush1.bf16.msra.mxu0 %v2615_v0  ;;  %v1208_v0 = vld [vmem:[%s4642_s3 + $0x48] sm:$0xff] }
  0x83   : > { %2648 = vmatpush1.bf16.msra.mxu1 %v2647_v1  ;;  %2618 = vmatprep.subr.bf16.mxu0 %v2617_v2  ;;  %v1239_v1 = vld [vmem:[%s4642_s3 + $0x140] sm:$0xff]  ;;  %v2701_v2 = vpack.c.bf16 %v1256_v59, %v1255_v58  ;;  %v2671_v9 = vpack.c.bf16 %v1208_v0, %v1207_v63  ;;  %v1264_v0 = vld [vmem:[%s4642_s3 + $0x208] sm:$0xff] }
  0x84   : > { %2650 = vmatprep.subr.bf16.mxu1 %v2649_v6  ;;  %v1257_v6 = vld [vmem:[%s4642_s3 + $0x1d0] sm:$0xff]  ;;  %v2703_v10 = vpack.c.bf16 %v1240_v3, %v1239_v1  ;;  %v1263_v63 = vld [vmem:[%s4642_s3 + $0x200] sm:$0xff] }
  0x85   : > { %v1295_v1 = vld [vmem:[%s4642_s3 + $0x300] sm:$0xff] }
  0x86   : > { %2620 = vmatpush1.bf16.msra.mxu0 %v2619_v13  ;;  %v1210_v13 = vld [vmem:[%s4642_s3 + $0x58] sm:$0xff]  ;;  %v2751_v17 = vpack.c.bf16 %v1296_v5, %v1295_v1  ;;  %v1289_v1 = vld [vmem:[%s4642_s3 + $0x2d0] sm:$0xff] }
  0x87   : > { %2652 = vmatpush1.bf16.msra.mxu1 %v2651_v14  ;;  %2654 = vmatprep.subr.bf16.mxu0 %v2653_v15  ;;  %v1241_v14 = vld [vmem:[%s4642_s3 + $0x150] sm:$0xff]  ;;  %v2705_v15 = vpack.c.bf16 %v1258_v8, %v1257_v6  ;;  %v2675_v21 = vpack.c.bf16 %v1210_v13, %v1209_v12  ;;  %v1282_v8 = vld [vmem:[%s4642_s3 + $0x298] sm:$0xff] }
  0x88   : > { %2686 = vmatprep.subr.bf16.mxu1 %v2685_v19  ;;  %v1259_v19 = vld [vmem:[%s4642_s3 + $0x1e0] sm:$0xff]  ;;  %v2707_v7 = vpack.c.bf16 %v1242_v16, %v1241_v14  ;;  %v1281_v6 = vld [vmem:[%s4642_s3 + $0x290] sm:$0xff]  ;;  %v1314_v12 = vld [vmem:[%s4642_s3 + $0x398] sm:$0xff] }
  0x89   : > { %1106 = vmatmul.mubr.f32.vlgmr.msra.gmra.mrb[6].mxu0 %v3229_v48  ;;  %v2721_v18 = vpack.c.bf16 %v1282_v8, %v1281_v6 }
  0x8a   : > { %1177 = vmatmul.mubr.f32.vlgmr.msra.gmra.mrb[6].mxu1 %v3229_v48  ;;  %2656 = vmatpush3.bf16.msra.mxu0 %v2655_v24  ;;  %v2693_v48 = vpack.c.bf16 %v1252_v35, %v1251_v34  ;;  %v1212_v24 = vld [vmem:[%s4642_s3 + $0x68] sm:$0xff]  ;;  %v2681_v34 = vpack.c.bf16 %v1230_v29, %v1229_v28  ;;  %v1213_v35 = vld [vmem:[%s4642_s3 + $0x70] sm:$0xff] }
  0x8b   : > { %2688 = vmatpush3.bf16.msra.mxu1 %v2687_v25  ;;  %2658 = vmatprep.subr.bf16.mxu0 %v2657_v26  ;;  %v1243_v25 = vld [vmem:[%s4642_s3 + $0x160] sm:$0xff]  ;;  %v2709_v26 = vpack.c.bf16 %v1260_v20, %v1259_v19  ;;  %v2679_v32 = vpack.c.bf16 %v1212_v24, %v1211_v23  ;;  %v1265_v19 = vld [vmem:[%s4642_s3 + $0x210] sm:$0xff]  ;;  %v1266_v20 = vld [vmem:[%s4642_s3 + $0x218] sm:$0xff] }
  0x8c   : > { %2690 = vmatprep.subr.bf16.mxu1 %v2689_v30  ;;  %v1261_v30 = vld [vmem:[%s4642_s3 + $0x1f0] sm:$0xff]  ;;  %v2711_v33 = vpack.c.bf16 %v1244_v27, %v1243_v25  ;;  %v1283_v23 = vld [vmem:[%s4642_s3 + $0x2a0] sm:$0xff]  ;;  %v1284_v24 = vld [vmem:[%s4642_s3 + $0x2a8] sm:$0xff]  ;;  %v2723_v27 = vpack.c.bf16 %v1266_v20, %v1265_v19 }
  0x8d   : > { %v1315_v25 = vld [vmem:[%s4642_s3 + $0x3a0] sm:$0xff]  ;;  %v2725_v29 = vpack.c.bf16 %v1284_v24, %v1283_v23 }
  0x8e   : > { %2660 = vmatpush3.bf16.msra.mxu0 %v2659_v36  ;;  %v1214_v36 = vld [vmem:[%s4642_s3 + $0x78] sm:$0xff]  ;;  %v1307_v23 = vld [vmem:[%s4642_s3 + $0x360] sm:$0xff] }
  0x8f   : > { %2692 = vmatpush3.bf16.msra.mxu1 %v2691_v37  ;;  %2662 = vmatprep.subr.bf16.mxu0 %v2661_v38  ;;  %v1245_v37 = vld [vmem:[%s4642_s3 + $0x170] sm:$0xff]  ;;  %v2713_v38 = vpack.c.bf16 %v1262_v31, %v1261_v30  ;;  %v2683_v43 = vpack.c.bf16 %v1214_v36, %v1213_v35  ;;  %v1267_v30 = vld [vmem:[%s4642_s3 + $0x220] sm:$0xff]  ;;  %v1268_v31 = vld [vmem:[%s4642_s3 + $0x228] sm:$0xff] }
  0x90   : > { %2694 = vmatprep.subr.bf16.mxu1 %v2693_v48  ;;  %v1311_v48 = vld [vmem:[%s4642_s3 + $0x380] sm:$0xff]  ;;  %v2715_v44 = vpack.c.bf16 %v1246_v39, %v1245_v37  ;;  %v1285_v35 = vld [vmem:[%s4642_s3 + $0x2b0] sm:$0xff]  ;;  %v1286_v36 = vld [vmem:[%s4642_s3 + $0x2b8] sm:$0xff]  ;;  %v2727_v39 = vpack.c.bf16 %v1268_v31, %v1267_v30 }
  0x91   : > { %v2749_v46 = vpack.c.bf16 %v1312_v42, %v1311_v48  ;;  %v1317_v37 = vld [vmem:[%s4642_s3 + $0x3b0] sm:$0xff]  ;;  %v2729_v41 = vpack.c.bf16 %v1286_v36, %v1285_v35  ;;  %v1270_v42 = vld [vmem:[%s4642_s3 + $0x238] sm:$0xff] }
  0x92   : > { %2664 = vmatpush3.bf16.msra.mxu0 %v2663_v47  ;;  %v535_v47 = vlaneseq  ;;  %v1269_v48 = vld [vmem:[%s4642_s3 + $0x230] sm:$0xff] }
  0x93   : > { %2696 = vmatpush3.bf16.msra.mxu1 %v2695_v49  ;;  %2666 = vmatprep.subr.bf16.mxu0 %v2665_v50  ;;  %v1325_v31 = vld [vmem:[%s4642_s3 + $0x3f0] sm:$0xff] }
  0x94   : > { %2698 = vmatprep.subr.bf16.mxu1 %v2697_v54  ;;  %v3989_v49 = vshrl.u32 %v535_v47, 7  ;;  %v1288_v47 = vld [vmem:[%s4642_s3 + $0x2c8] sm:$0xff] }
  0x96   : > { %2668 = vmatpush3.bf16.msra.mxu0 %v2667_v60  ;;  %v537_v50 = vsub.s32 0, %v3989_v49  ;;  %v545_v52 = vsub.s32 2, %v3989_v49  ;;  %v541_v53 = vsub.s32 1, %v3989_v49  ;;  %v549_v54 = vsub.s32 3, %v3989_v49 }
  0x97   : > { %2700 = vmatpush3.bf16.msra.mxu1 %v2699_v61  ;;  %2670 = vmatprep.subr.bf16.mxu0 %v2669_v62  ;;  %v565_v30 = vsub.s32 7, %v3989_v49 }
  0x98   : > { %2702 = vmatprep.subr.bf16.mxu1 %v2701_v2  ;;  %v538_v55 = vrot.slane %v3995_v51, %v537_v50  ;;  %v546_v56 = vrot.slane %v3995_v51, %v545_v52  ;;  %v542_v57 = vrot.slane %v3995_v51, %v541_v53  ;;  %v550_v58 = vrot.slane %v3995_v51, %v549_v54 }
  0x9a   : > { %2672 = vmatpush3.bf16.msra.mxu0 %v2671_v9 }
  0x9b   : > { %2704 = vmatpush3.bf16.msra.mxu1 %v2703_v10  ;;  %2674 = vmatprep.subr.bf16.mxu0 %v2673_v11  ;;  %v1313_v11 = vld [vmem:[%s4642_s3 + $0x390] sm:$0xff] }
  0x9c   : > { %2706 = vmatprep.subr.bf16.mxu1 %v2705_v15  ;;  %v2719_v15 = vpack.c.bf16 %v1264_v0, %v1263_v63  ;;  %v1304_v0 = vld [vmem:[%s4642_s3 + $0x348] sm:$0xff] }
  0x9e   : > { %2676 = vmatpush3.bf16.msra.mxu0 %v2675_v21  ;;  %v1297_v21 = vld [vmem:[%s4642_s3 + $0x310] sm:$0xff] }
  0x9f   : > { %2708 = vmatpush3.bf16.msra.mxu1 %v2707_v7  ;;  %2678 = vmatprep.subr.bf16.mxu0 %v2677_v22  ;;  %v2753_v7 = vpack.c.bf16 %v1314_v12, %v1313_v11  ;;  %v1298_v22 = vld [vmem:[%s4642_s3 + $0x318] sm:$0xff]  ;;  %v1305_v11 = vld [vmem:[%s4642_s3 + $0x350] sm:$0xff] }
  0xa0   : > { %2710 = vmatprep.subr.bf16.mxu1 %v2709_v26  ;;  %v1316_v26 = vld [vmem:[%s4642_s3 + $0x3a8] sm:$0xff]  ;;  %v2755_v28 = vpack.c.bf16 %v1298_v22, %v1297_v21  ;;  %v553_v21 = vsub.s32 4, %v3989_v49 }
  0xa1   : > { %v1276_v22 = vld [vmem:[%s4642_s3 + $0x268] sm:$0xff] }
  0xa2   : > { %2680 = vmatpush3.bf16.msra.mxu0 %v2679_v32  ;;  %v1299_v32 = vld [vmem:[%s4642_s3 + $0x320] sm:$0xff] }
  0xa3   : > { %2712 = vmatpush3.bf16.msra.mxu1 %v2711_v33  ;;  %2682 = vmatprep.subr.bf16.mxu0 %v2681_v34  ;;  %v2757_v33 = vpack.c.bf16 %v1316_v26, %v1315_v25  ;;  %v1300_v34 = vld [vmem:[%s4642_s3 + $0x328] sm:$0xff]  ;;  %v561_v25 = vsub.s32 6, %v3989_v49 }
  0xa4   : > { %2714 = vmatprep.subr.bf16.mxu1 %v2713_v38  ;;  %v1318_v38 = vld [vmem:[%s4642_s3 + $0x3b8] sm:$0xff]  ;;  %v2759_v40 = vpack.c.bf16 %v1300_v34, %v1299_v32  ;;  %v1308_v26 = vld [vmem:[%s4642_s3 + $0x368] sm:$0xff]  ;;  %v554_v34 = vrot.slane %v3995_v51, %v553_v21 }
  0xa5   : > { %v1326_v32 = vld [vmem:[%s4642_s3 + $0x3f8] sm:$0xff]  ;;  %v2775_v35 = vpack.c.bf16 %v1308_v26, %v1307_v23  ;;  %v1347_v23 = vld [vmem:[%s4642_s3 + $0x4a0] sm:$0xff] }
  0xa6   : > { %2684 = vmatpush3.bf16.msra.mxu0 %v2683_v43  ;;  %v1301_v43 = vld [vmem:[%s4642_s3 + $0x330] sm:$0xff]  ;;  %v1379_v26 = vld [vmem:[%s4642_s3 + $0x5a0] sm:$0xff] }
  0xa7   : > { %2716 = vmatpush3.bf16.msra.mxu1 %v2715_v44  ;;  %2718 = vmatprep.subr.bf16.mxu0 %v2717_v45  ;;  %v2761_v44 = vpack.c.bf16 %v1318_v38, %v1317_v37  ;;  %v1302_v45 = vld [vmem:[%s4642_s3 + $0x338] sm:$0xff]  ;;  %v1277_v37 = vld [vmem:[%s4642_s3 + $0x270] sm:$0xff] }
  0xa8   : > { %2750 = vmatprep.subr.bf16.mxu1 %v2749_v46  ;;  %v1287_v46 = vld [vmem:[%s4642_s3 + $0x2c0] sm:$0xff]  ;;  %v1278_v38 = vld [vmem:[%s4642_s3 + $0x278] sm:$0xff] }
  0xfc   : > { %v681_v59 = vpop.f32.mrb[0].mxu0 }
  0xfd   : > { %v682_v60 = vadd.f32 %v681_v59, %v538_v55  ;;  %v752_v61 = vpop.f32.mrb[0].mxu1  ;;  %v683_v62 = vpop.f32.mrb[1].mxu0  ;;  %v1319_v55 = vld [vmem:[%s4642_s3 + $0x3c0] sm:$0xff]  ;;  %v2733_v59 = vpack.c.bf16 %v1288_v47, %v1287_v46  ;;  %v1376_v47 = vld [vmem:[%s4642_s3 + $0x588] sm:$0xff] }
  0xfe   : > { %v753_v2 = vadd.f32 %v752_v61, %v546_v56  ;;  %v684_v3 = vadd.f32 %v683_v62, %v542_v57  ;;  %v754_v4 = vpop.f32.mrb[1].mxu1  ;;  %v1320_v56 = vld [vmem:[%s4642_s3 + $0x3c8] sm:$0xff]  ;;  %v2731_v57 = vpack.c.bf16 %v1270_v42, %v1269_v48  ;;  %v1303_v62 = vld [vmem:[%s4642_s3 + $0x340] sm:$0xff]  ;;  %v2777_v48 = vpack.c.bf16 %v1326_v32, %v1325_v31  ;;  %v1310_v42 = vld [vmem:[%s4642_s3 + $0x378] sm:$0xff] }
  0xff   : > { %v1183_v9 = vmax.f32 %v682_v60, 0.0  ;;  %v755_v10 = vadd.f32 %v754_v4, %v550_v58  ;;  %v2763_v58 = vpack.c.bf16 %v1302_v45, %v1301_v43  ;;  %v1271_v60 = vld [vmem:[%s4642_s3 + $0x240] sm:$0xff]  ;;  %v1272_v61 = vld [vmem:[%s4642_s3 + $0x248] sm:$0xff]  ;;  %v2765_v63 = vpack.c.bf16 %v1320_v56, %v1319_v55  ;;  %v1322_v4 = vld [vmem:[%s4642_s3 + $0x3d8] sm:$0xff] }
 0x100   : > { %v1185_v13 = vmax.f32 %v753_v2, 0.0  ;;  %v1184_v14 = vmax.f32 %v684_v3, 0.0  ;;  %v1290_v2 = vld [vmem:[%s4642_s3 + $0x2d8] sm:$0xff]  ;;  %v1321_v3 = vld [vmem:[%s4642_s3 + $0x3d0] sm:$0xff]  ;;  %v2735_v5 = vpack.c.bf16 %v1272_v61, %v1271_v60  ;;  %v2767_v6 = vpack.c.bf16 %v1304_v0, %v1303_v62  ;;  %v1343_v43 = vld [vmem:[%s4642_s3 + $0x480] sm:$0xff] }
 0x101   : > { %v1186_v16 = vmax.f32 %v755_v10, 0.0  ;;  %v2737_v8 = vpack.c.bf16 %v1290_v2, %v1289_v1  ;;  %v1274_v10 = vld [vmem:[%s4642_s3 + $0x258] sm:$0xff]  ;;  %v2769_v12 = vpack.c.bf16 %v1322_v4, %v1321_v3  ;;  %v566_v45 = vrot.slane %v3995_v51, %v565_v30  ;;  %v1375_v46 = vld [vmem:[%s4642_s3 + $0x580] sm:$0xff]  ;;  %v1328_v62 = vld [vmem:[%s4642_s3 + $0x408] sm:$0xff] }
 0x102   : > { %1526 = vmatprep.mubr.f32.mxu0 %v1184_v14  ;;  %v1291_v14 = vld [vmem:[%s4642_s3 + $0x2e0] sm:$0xff]  ;;  %v2747_v56 = vpack.c.bf16 %v1278_v38, %v1277_v37  ;;  %v2813_v3 = vpack.c.bf16 %v1376_v47, %v1375_v46  ;;  %v1360_v4 = vld [vmem:[%s4642_s3 + $0x508] sm:$0xff]  ;;  %v1349_v38 = vld [vmem:[%s4642_s3 + $0x4b0] sm:$0xff] }
 0x103   : > { %1596 = vmatprep.mubr.f32.mxu1 %v1186_v16  ;;  %1527 = vmatmul.mubr.f32.vlgmr.msra.gmra.mrb[8].mxu0 %v1183_v9  ;;  %v1273_v9 = vld [vmem:[%s4642_s3 + $0x250] sm:$0xff]  ;;  %v1323_v16 = vld [vmem:[%s4642_s3 + $0x3e0] sm:$0xff]  ;;  %v1364_v37 = vld [vmem:[%s4642_s3 + $0x528] sm:$0xff] }
 0x104   : > { %1597 = vmatmul.mubr.f32.vlgmr.msra.gmra.mrb[8].mxu1 %v1185_v13  ;;  %2720 = vmatpush3.bf16.msra.mxu0 %v2719_v15  ;;  %v1306_v13 = vld [vmem:[%s4642_s3 + $0x358] sm:$0xff]  ;;  %v1292_v15 = vld [vmem:[%s4642_s3 + $0x2e8] sm:$0xff]  ;;  %v1365_v46 = vld [vmem:[%s4642_s3 + $0x530] sm:$0xff] }
 0x105   : > { %2752 = vmatpush3.bf16.msra.mxu1 %v2751_v17  ;;  %2722 = vmatprep.subr.bf16.mxu0 %v2721_v18  ;;  %v1324_v17 = vld [vmem:[%s4642_s3 + $0x3e8] sm:$0xff]  ;;  %v2739_v18 = vpack.c.bf16 %v1274_v10, %v1273_v9  ;;  %v2771_v19 = vpack.c.bf16 %v1306_v13, %v1305_v11  ;;  %v2741_v20 = vpack.c.bf16 %v1292_v15, %v1291_v14  ;;  %v1377_v10 = vld [vmem:[%s4642_s3 + $0x590] sm:$0xff]  ;;  %v1378_v11 = vld [vmem:[%s4642_s3 + $0x598] sm:$0xff] }
 0x106   : > { %2754 = vmatprep.subr.bf16.mxu1 %v2753_v7  ;;  %v1275_v7 = vld [vmem:[%s4642_s3 + $0x260] sm:$0xff]  ;;  %v2773_v24 = vpack.c.bf16 %v1324_v17, %v1323_v16 }
 0x108   : > { %2724 = vmatpush3.bf16.msra.mxu0 %v2723_v27  ;;  %v557_v27 = vsub.s32 5, %v3989_v49 }
 0x109   : > { %2756 = vmatpush3.bf16.msra.mxu1 %v2755_v28  ;;  %2726 = vmatprep.subr.bf16.mxu0 %v2725_v29  ;;  %v1293_v28 = vld [vmem:[%s4642_s3 + $0x2f0] sm:$0xff]  ;;  %v1294_v29 = vld [vmem:[%s4642_s3 + $0x2f8] sm:$0xff] }
 0x10a   : > { %2758 = vmatprep.subr.bf16.mxu1 %v2757_v33  ;;  %v2743_v33 = vpack.c.bf16 %v1276_v22, %v1275_v7  ;;  %v2745_v36 = vpack.c.bf16 %v1294_v29, %v1293_v28  ;;  %v2817_v7 = vpack.c.bf16 %v1378_v11, %v1377_v10  ;;  %v1362_v22 = vld [vmem:[%s4642_s3 + $0x518] sm:$0xff]  ;;  %v1380_v28 = vld [vmem:[%s4642_s3 + $0x5a8] sm:$0xff]  ;;  %v1337_v11 = vld [vmem:[%s4642_s3 + $0x450] sm:$0xff] }
 0x10c   : > { %2728 = vmatpush3.bf16.msra.mxu0 %v2727_v39  ;;  %v1309_v39 = vld [vmem:[%s4642_s3 + $0x370] sm:$0xff] }
 0x10d   : > { %2760 = vmatpush3.bf16.msra.mxu1 %v2759_v40  ;;  %2730 = vmatprep.subr.bf16.mxu0 %v2729_v41  ;;  %v562_v40 = vrot.slane %v3995_v51, %v561_v25  ;;  %v558_v41 = vrot.slane %v3995_v51, %v557_v27  ;;  %v2779_v60 = vpack.c.bf16 %v1310_v42, %v1309_v39  ;;  %v1327_v51 = vld [vmem:[%s4642_s3 + $0x400] sm:$0xff]  ;;  %v1350_v39 = vld [vmem:[%s4642_s3 + $0x4b8] sm:$0xff] }
 0x10e   : > { %2762 = vmatprep.subr.bf16.mxu1 %v2761_v44  ;;  %v1344_v44 = vld [vmem:[%s4642_s3 + $0x488] sm:$0xff]  ;;  %v2783_v14 = vpack.c.bf16 %v1328_v62, %v1327_v51  ;;  %v1335_v62 = vld [vmem:[%s4642_s3 + $0x440] sm:$0xff] }
 0x10f   : > { %v2781_v61 = vpack.c.bf16 %v1344_v44, %v1343_v43  ;;  %v2793_v43 = vpack.c.bf16 %v1350_v39, %v1349_v38  ;;  %v1333_v44 = vld [vmem:[%s4642_s3 + $0x430] sm:$0xff] }
 0x110   : > { %2732 = vmatpush3.bf16.msra.mxu0 %v2731_v57 }
 0x111   : > { %2764 = vmatpush3.bf16.msra.mxu1 %v2763_v58  ;;  %2734 = vmatprep.subr.bf16.mxu0 %v2733_v59 }
 0x112   : > { %2766 = vmatprep.subr.bf16.mxu1 %v2765_v63  ;;  %v1359_v63 = vld [vmem:[%s4642_s3 + $0x500] sm:$0xff] }
 0x113   : > { %v2815_v16 = vpack.c.bf16 %v1360_v4, %v1359_v63  ;;  %v1336_v63 = vld [vmem:[%s4642_s3 + $0x448] sm:$0xff]  ;;  %v1354_v4 = vld [vmem:[%s4642_s3 + $0x4d8] sm:$0xff] }
 0x114   : > { %2736 = vmatpush3.bf16.msra.mxu0 %v2735_v5  ;;  %v1345_v5 = vld [vmem:[%s4642_s3 + $0x490] sm:$0xff] }
 0x115   : > { %2768 = vmatpush3.bf16.msra.mxu1 %v2767_v6  ;;  %2738 = vmatprep.subr.bf16.mxu0 %v2737_v8  ;;  %v1346_v6 = vld [vmem:[%s4642_s3 + $0x498] sm:$0xff] }
 0x116   : > { %2770 = vmatprep.subr.bf16.mxu1 %v2769_v12  ;;  %v2785_v17 = vpack.c.bf16 %v1346_v6, %v1345_v5  ;;  %v1385_v5 = vld [vmem:[%s4642_s3 + $0x5d0] sm:$0xff]  ;;  %v1386_v6 = vld [vmem:[%s4642_s3 + $0x5d8] sm:$0xff] }
 0x118   : > { %2740 = vmatpush3.bf16.msra.mxu0 %v2739_v18  ;;  %v1329_v18 = vld [vmem:[%s4642_s3 + $0x410] sm:$0xff] }
 0x119   : > { %2772 = vmatpush3.bf16.msra.mxu1 %v2771_v19  ;;  %2742 = vmatprep.subr.bf16.mxu0 %v2741_v20  ;;  %v1330_v19 = vld [vmem:[%s4642_s3 + $0x418] sm:$0xff]  ;;  %v1361_v20 = vld [vmem:[%s4642_s3 + $0x510] sm:$0xff] }
 0x11a   : > { %2774 = vmatprep.subr.bf16.mxu1 %v2773_v24  ;;  %v1348_v24 = vld [vmem:[%s4642_s3 + $0x4a8] sm:$0xff]  ;;  %v2787_v29 = vpack.c.bf16 %v1330_v19, %v1329_v18  ;;  %v2819_v31 = vpack.c.bf16 %v1362_v22, %v1361_v20  ;;  %v1387_v18 = vld [vmem:[%s4642_s3 + $0x5e0] sm:$0xff] }
 0x11b   : > { %v2789_v32 = vpack.c.bf16 %v1348_v24, %v1347_v23  ;;  %v1388_v19 = vld [vmem:[%s4642_s3 + $0x5e8] sm:$0xff]  ;;  %v1339_v24 = vld [vmem:[%s4642_s3 + $0x460] sm:$0xff] }
 0x11c   : > { %v823_v55 = vpop.f32.mrb[2].mxu0  ;;  %2744 = vmatpush3.bf16.msra.mxu0 %v2743_v33  ;;  %v1331_v33 = vld [vmem:[%s4642_s3 + $0x420] sm:$0xff] }
 0x11d   : > { %v824_v57 = vadd.f32 %v823_v55, %v554_v34  ;;  %v894_v58 = vpop.f32.mrb[2].mxu1  ;;  %2776 = vmatpush3.bf16.msra.mxu1 %v2775_v35  ;;  %v825_v59 = vpop.f32.mrb[3].mxu0  ;;  %2746 = vmatprep.subr.bf16.mxu0 %v2745_v36  ;;  %v1332_v34 = vld [vmem:[%s4642_s3 + $0x428] sm:$0xff]  ;;  %v1363_v35 = vld [vmem:[%s4642_s3 + $0x520] sm:$0xff]  ;;  %v2821_v36 = vpack.c.bf16 %v1380_v28, %v1379_v26  ;;  %v1366_v55 = vld [vmem:[%s4642_s3 + $0x538] sm:$0xff] }
 0x11e   : > { %v895_v0 = vadd.f32 %v894_v58, %v562_v40  ;;  %v826_v1 = vadd.f32 %v825_v59, %v558_v41  ;;  %v896_v2 = vpop.f32.mrb[3].mxu1  ;;  %2778 = vmatprep.subr.bf16.mxu1 %v2777_v48  ;;  %v1381_v40 = vld [vmem:[%s4642_s3 + $0x5b0] sm:$0xff]  ;;  %v1382_v41 = vld [vmem:[%s4642_s3 + $0x5b8] sm:$0xff]  ;;  %v2791_v48 = vpack.c.bf16 %v1332_v34, %v1331_v33  ;;  %v2823_v42 = vpack.c.bf16 %v1364_v37, %v1363_v35  ;;  %v1383_v58 = vld [vmem:[%s4642_s3 + $0x5c0] sm:$0xff] }
 0x11f   : > { %v1187_v8 = vmax.f32 %v824_v57, 0.0  ;;  %v897_v9 = vadd.f32 %v896_v2, %v566_v45  ;;  %v1334_v45 = vld [vmem:[%s4642_s3 + $0x438] sm:$0xff]  ;;  %v2825_v47 = vpack.c.bf16 %v1382_v41, %v1381_v40  ;;  %v1352_v57 = vld [vmem:[%s4642_s3 + $0x4c8] sm:$0xff]  ;;  %v1371_v28 = vld [vmem:[%s4642_s3 + $0x560] sm:$0xff] }
 0x120   : > { %v1189_v12 = vmax.f32 %v895_v0, 0.0  ;;  %v1188_v13 = vmax.f32 %v826_v1, 0.0  ;;  %2748 = vmatpush3.bf16.msra.mxu0 %v2747_v56  ;;  %v1351_v56 = vld [vmem:[%s4642_s3 + $0x4c0] sm:$0xff]  ;;  %v1384_v59 = vld [vmem:[%s4642_s3 + $0x5c8] sm:$0xff]  ;;  %v1358_v33 = vld [vmem:[%s4642_s3 + $0x4f8] sm:$0xff] }
 0x121   : > { %v1190_v15 = vmax.f32 %v897_v9, 0.0  ;;  %2780 = vmatpush3.bf16.msra.mxu1 %v2779_v60  ;;  %2782 = vmatprep.subr.bf16.mxu0 %v2781_v61  ;;  %v2795_v60 = vpack.c.bf16 %v1334_v45, %v1333_v44  ;;  %v2827_v61 = vpack.c.bf16 %v1366_v55, %v1365_v46  ;;  %v2797_v51 = vpack.c.bf16 %v1352_v57, %v1351_v56  ;;  %v1367_v0 = vld [vmem:[%s4642_s3 + $0x540] sm:$0xff]  ;;  %v1368_v2 = vld [vmem:[%s4642_s3 + $0x548] sm:$0xff]  ;;  %v1389_v34 = vld [vmem:[%s4642_s3 + $0x5f0] sm:$0xff] }
 0x122   : > { %1666 = vmatprep.mubr.f32.mxu0 %v1188_v13  ;;  %2814 = vmatprep.subr.bf16.mxu1 %v2813_v3  ;;  %v2829_v1 = vpack.c.bf16 %v1384_v59, %v1383_v58  ;;  %v1353_v3 = vld [vmem:[%s4642_s3 + $0x4d0] sm:$0xff]  ;;  %v2831_v9 = vpack.c.bf16 %v1368_v2, %v1367_v0  ;;  %v1340_v26 = vld [vmem:[%s4642_s3 + $0x468] sm:$0xff]  ;;  %v1390_v35 = vld [vmem:[%s4642_s3 + $0x5f8] sm:$0xff] }
 0x123   : > { %1736 = vmatprep.mubr.f32.mxu1 %v1190_v15  ;;  %1667 = vmatmul.mubr.f32.vlgmr.msra.gmra.mrb[10].mxu0 %v1187_v8  ;;  %v2799_v8 = vpack.c.bf16 %v1336_v63, %v1335_v62  ;;  %v2801_v10 = vpack.c.bf16 %v1354_v4, %v1353_v3  ;;  %v1369_v13 = vld [vmem:[%s4642_s3 + $0x550] sm:$0xff]  ;;  %v1370_v15 = vld [vmem:[%s4642_s3 + $0x558] sm:$0xff]  ;;  %v1407_v45 = vld [vmem:[%s4642_s3 + $0x680] sm:$0xff] }
 0x124   : > { %1737 = vmatmul.mubr.f32.vlgmr.msra.gmra.mrb[10].mxu1 %v1189_v12  ;;  %2784 = vmatpush3.bf16.msra.mxu0 %v2783_v14  ;;  %v1338_v12 = vld [vmem:[%s4642_s3 + $0x458] sm:$0xff]  ;;  %v2833_v14 = vpack.c.bf16 %v1386_v6, %v1385_v5  ;;  %v2835_v22 = vpack.c.bf16 %v1370_v15, %v1369_v13  ;;  %v1341_v40 = vld [vmem:[%s4642_s3 + $0x470] sm:$0xff]  ;;  %v1408_v46 = vld [vmem:[%s4642_s3 + $0x688] sm:$0xff] }
 0x125   : > { %2816 = vmatpush3.bf16.msra.mxu1 %v2815_v16  ;;  %2786 = vmatprep.subr.bf16.mxu0 %v2785_v17  ;;  %v1355_v16 = vld [vmem:[%s4642_s3 + $0x4e0] sm:$0xff]  ;;  %v1356_v17 = vld [vmem:[%s4642_s3 + $0x4e8] sm:$0xff]  ;;  %v2803_v20 = vpack.c.bf16 %v1338_v12, %v1337_v11  ;;  %v1342_v41 = vld [vmem:[%s4642_s3 + $0x478] sm:$0xff] }
 0x126   : > { %2818 = vmatprep.subr.bf16.mxu1 %v2817_v7  ;;  %v4367_v7 = vld [vmem:[%s4641_s2 + $0x8] sm:$0xff]  ;;  %v2805_v23 = vpack.c.bf16 %v1356_v17, %v1355_v16  ;;  %v1374_v44 = vld [vmem:[%s4642_s3 + $0x578] sm:$0xff]  ;;  %v2811_v56 = vpack.c.bf16 %v1342_v41, %v1341_v40  ;;  %v1423_v62 = vld [vmem:[%s4642_s3 + $0x700] sm:$0xff] }
 0x127   : > { %v570_v37 = vrot.slane %v4367_v7, %v537_v50  ;;  %v574_v50 = vrot.slane %v4367_v7, %v541_v53  ;;  %v1439_v53 = vld [vmem:[%s4642_s3 + $0x780] sm:$0xff]  ;;  %v1424_v3 = vld [vmem:[%s4642_s3 + $0x708] sm:$0xff]  ;;  %v1409_v4 = vld [vmem:[%s4642_s3 + $0x690] sm:$0xff] }
 0x128   : > { %2788 = vmatpush3.bf16.msra.mxu0 %v2787_v29  ;;  %v2837_v29 = vpack.c.bf16 %v1388_v19, %v1387_v18  ;;  %v1410_v5 = vld [vmem:[%s4642_s3 + $0x698] sm:$0xff]  ;;  %v2879_v15 = vpack.c.bf16 %v1424_v3, %v1423_v62  ;;  %v1393_v17 = vld [vmem:[%s4642_s3 + $0x610] sm:$0xff]  ;;  %v1432_v62 = vld [vmem:[%s4642_s3 + $0x748] sm:$0xff] }
 0x129   : > { %2820 = vmatpush3.bf16.msra.mxu1 %v2819_v31  ;;  %2790 = vmatprep.subr.bf16.mxu0 %v2789_v32  ;;  %v1372_v31 = vld [vmem:[%s4642_s3 + $0x568] sm:$0xff]  ;;  %v1357_v32 = vld [vmem:[%s4642_s3 + $0x4f0] sm:$0xff]  ;;  %v2849_v16 = vpack.c.bf16 %v1410_v5, %v1409_v4  ;;  %v1394_v18 = vld [vmem:[%s4642_s3 + $0x618] sm:$0xff] }
 0x12a   : > { %2822 = vmatprep.subr.bf16.mxu1 %v2821_v36  ;;  %v2807_v36 = vpack.c.bf16 %v1340_v26, %v1339_v24  ;;  %v2839_v38 = vpack.c.bf16 %v1372_v31, %v1371_v28  ;;  %v2809_v39 = vpack.c.bf16 %v1358_v33, %v1357_v32  ;;  %v1425_v19 = vld [vmem:[%s4642_s3 + $0x710] sm:$0xff]  ;;  %v1412_v24 = vld [vmem:[%s4642_s3 + $0x6a8] sm:$0xff]  ;;  %v1443_v26 = vld [vmem:[%s4642_s3 + $0x7a0] sm:$0xff] }
 0x12b   : > { %v1444_v28 = vld [vmem:[%s4642_s3 + $0x7a8] sm:$0xff]  ;;  %v1395_v33 = vld [vmem:[%s4642_s3 + $0x620] sm:$0xff]  ;;  %v1445_v40 = vld [vmem:[%s4642_s3 + $0x7b0] sm:$0xff] }
 0x12c   : > { %2792 = vmatpush3.bf16.msra.mxu0 %v2791_v48  ;;  %v1373_v48 = vld [vmem:[%s4642_s3 + $0x570] sm:$0xff]  ;;  %v1446_v41 = vld [vmem:[%s4642_s3 + $0x7b8] sm:$0xff] }
 0x12d   : > { %2824 = vmatpush3.bf16.msra.mxu1 %v2823_v42  ;;  %2794 = vmatprep.subr.bf16.mxu0 %v2793_v43  ;;  %v578_v42 = vrot.slane %v4367_v7, %v545_v52  ;;  %v2841_v43 = vpack.c.bf16 %v1390_v35, %v1389_v34  ;;  %v582_v52 = vrot.slane %v4367_v7, %v549_v54  ;;  %v1391_v54 = vld [vmem:[%s4642_s3 + $0x600] sm:$0xff]  ;;  %v1396_v34 = vld [vmem:[%s4642_s3 + $0x628] sm:$0xff] }
 0x12e   : > { %2826 = vmatprep.subr.bf16.mxu1 %v2825_v47  ;;  %v1440_v47 = vld [vmem:[%s4642_s3 + $0x788] sm:$0xff]  ;;  %v1427_v35 = vld [vmem:[%s4642_s3 + $0x720] sm:$0xff] }
 0x12f   : > { %v2877_v2 = vpack.c.bf16 %v1440_v47, %v1439_v53  ;;  %v1415_v53 = vld [vmem:[%s4642_s3 + $0x6c0] sm:$0xff]  ;;  %v1416_v47 = vld [vmem:[%s4642_s3 + $0x6c8] sm:$0xff] }
 0x130   : > { %2796 = vmatpush3.bf16.msra.mxu0 %v2795_v60  ;;  %v2843_v60 = vpack.c.bf16 %v1374_v44, %v1373_v48  ;;  %v2855_v48 = vpack.c.bf16 %v1396_v34, %v1395_v33  ;;  %v1398_v44 = vld [vmem:[%s4642_s3 + $0x638] sm:$0xff]  ;;  %v586_v33 = vrot.slane %v4367_v7, %v553_v21 }
 0x131   : > { %2828 = vmatpush3.bf16.msra.mxu1 %v2827_v61  ;;  %2798 = vmatprep.subr.bf16.mxu0 %v2797_v51  ;;  %v2845_v61 = vpack.c.bf16 %v1408_v46, %v1407_v45  ;;  %v1392_v51 = vld [vmem:[%s4642_s3 + $0x608] sm:$0xff]  ;;  %v1429_v45 = vld [vmem:[%s4642_s3 + $0x730] sm:$0xff]  ;;  %v2889_v46 = vpack.c.bf16 %v1446_v41, %v1445_v40  ;;  %v1438_v41 = vld [vmem:[%s4642_s3 + $0x778] sm:$0xff] }
 0x132   : > { %2830 = vmatprep.subr.bf16.mxu1 %v2829_v1  ;;  %v2847_v13 = vpack.c.bf16 %v1392_v51, %v1391_v54  ;;  %v1431_v54 = vld [vmem:[%s4642_s3 + $0x740] sm:$0xff]  ;;  %v1437_v40 = vld [vmem:[%s4642_s3 + $0x770] sm:$0xff] }
 0x133   : > { %v2895_v4 = vpack.c.bf16 %v1432_v62, %v1431_v54 }
 0x134   : > { %2800 = vmatpush3.bf16.msra.mxu0 %v2799_v8 }
 0x135   : > { %2832 = vmatpush3.bf16.msra.mxu1 %v2831_v9  ;;  %2802 = vmatprep.subr.bf16.mxu0 %v2801_v10  ;;  %v1441_v9 = vld [vmem:[%s4642_s3 + $0x790] sm:$0xff]  ;;  %v1442_v10 = vld [vmem:[%s4642_s3 + $0x798] sm:$0xff] }
 0x136   : > { %2834 = vmatprep.subr.bf16.mxu1 %v2833_v14 }
 0x138   : > { %2804 = vmatpush3.bf16.msra.mxu0 %v2803_v20  ;;  %v2881_v20 = vpack.c.bf16 %v1442_v10, %v1441_v9  ;;  %v1433_v9 = vld [vmem:[%s4642_s3 + $0x750] sm:$0xff] }
 0x139   : > { %2836 = vmatpush3.bf16.msra.mxu1 %v2835_v22  ;;  %2806 = vmatprep.subr.bf16.mxu0 %v2805_v23  ;;  %v1426_v22 = vld [vmem:[%s4642_s3 + $0x718] sm:$0xff]  ;;  %v1411_v23 = vld [vmem:[%s4642_s3 + $0x6a0] sm:$0xff] }
 0x13a   : > { %2838 = vmatprep.subr.bf16.mxu1 %v2837_v29  ;;  %v2851_v29 = vpack.c.bf16 %v1394_v18, %v1393_v17  ;;  %v2883_v31 = vpack.c.bf16 %v1426_v22, %v1425_v19  ;;  %v2853_v32 = vpack.c.bf16 %v1412_v24, %v1411_v23  ;;  %v1403_v19 = vld [vmem:[%s4642_s3 + $0x660] sm:$0xff]  ;;  %v1436_v24 = vld [vmem:[%s4642_s3 + $0x768] sm:$0xff] }
 0x13b   : > { %v1435_v22 = vld [vmem:[%s4642_s3 + $0x760] sm:$0xff] }
 0x13c   : > { %v965_v55 = vpop.f32.mrb[4].mxu0  ;;  %2808 = vmatpush3.bf16.msra.mxu0 %v2807_v36  ;;  %v2885_v36 = vpack.c.bf16 %v1444_v28, %v1443_v26  ;;  %v1421_v26 = vld [vmem:[%s4642_s3 + $0x6f0] sm:$0xff]  ;;  %v1422_v28 = vld [vmem:[%s4642_s3 + $0x6f8] sm:$0xff]  ;;  %v2903_v34 = vpack.c.bf16 %v1436_v24, %v1435_v22  ;;  %v2920_v24 = vld [vmem:[%s3202_s17] sm:$0xff] }
 0x13d   : > { %v966_v57 = vadd.f32 %v965_v55, %v570_v37  ;;  %v1036_v58 = vpop.f32.mrb[4].mxu1  ;;  %2840 = vmatpush3.bf16.msra.mxu1 %v2839_v38  ;;  %v967_v59 = vpop.f32.mrb[5].mxu0  ;;  %2810 = vmatprep.subr.bf16.mxu0 %v2809_v39  ;;  %v1428_v37 = vld [vmem:[%s4642_s3 + $0x728] sm:$0xff]  ;;  %v1413_v38 = vld [vmem:[%s4642_s3 + $0x6b0] sm:$0xff]  ;;  %v1414_v39 = vld [vmem:[%s4642_s3 + $0x6b8] sm:$0xff] }
 0x13e   : > { %v1037_v63 = vadd.f32 %v1036_v58, %v578_v42  ;;  %v968_v0 = vadd.f32 %v967_v59, %v574_v50  ;;  %v1038_v1 = vpop.f32.mrb[5].mxu1  ;;  %2842 = vmatprep.subr.bf16.mxu1 %v2841_v43  ;;  %v2887_v42 = vpack.c.bf16 %v1428_v37, %v1427_v35  ;;  %v2857_v50 = vpack.c.bf16 %v1414_v39, %v1413_v38  ;;  %v1397_v43 = vld [vmem:[%s4642_s3 + $0x630] sm:$0xff]  ;;  %v1447_v55 = vld [vmem:[%s4642_s3 + $0x7c0] sm:$0xff]  ;;  %v1406_v37 = vld [vmem:[%s4642_s3 + $0x678] sm:$0xff] }
 0x13f   : > { %v1191_v6 = vmax.f32 %v966_v57, 0.0  ;;  %v1039_v8 = vadd.f32 %v1038_v1, %v582_v52  ;;  %v1430_v52 = vld [vmem:[%s4642_s3 + $0x738] sm:$0xff]  ;;  %v2859_v57 = vpack.c.bf16 %v1398_v44, %v1397_v43  ;;  %v2861_v59 = vpack.c.bf16 %v1416_v47, %v1415_v53  ;;  %v1449_v1 = vld [vmem:[%s4642_s3 + $0x7d0] sm:$0xff] }
 0x140   : > { %v1193_v11 = vmax.f32 %v1037_v63, 0.0  ;;  %v1192_v12 = vmax.f32 %v968_v0, 0.0  ;;  %2812 = vmatpush3.bf16.msra.mxu0 %v2811_v56  ;;  %v1448_v56 = vld [vmem:[%s4642_s3 + $0x7c8] sm:$0xff]  ;;  %v2891_v58 = vpack.c.bf16 %v1430_v52, %v1429_v45  ;;  %v1417_v63 = vld [vmem:[%s4642_s3 + $0x6d0] sm:$0xff]  ;;  %v1418_v0 = vld [vmem:[%s4642_s3 + $0x6d8] sm:$0xff]  ;;  %v2873_v35 = vpack.c.bf16 %v1422_v28, %v1421_v26 }
 0x141   : > { %v1194_v14 = vmax.f32 %v1039_v8, 0.0  ;;  %2844 = vmatpush3.bf16.msra.mxu1 %v2843_v60  ;;  %2846 = vmatprep.subr.bf16.mxu0 %v2845_v61  ;;  %v1399_v60 = vld [vmem:[%s4642_s3 + $0x640] sm:$0xff]  ;;  %v1400_v61 = vld [vmem:[%s4642_s3 + $0x648] sm:$0xff]  ;;  %v2893_v51 = vpack.c.bf16 %v1448_v56, %v1447_v55  ;;  %v2865_v5 = vpack.c.bf16 %v1418_v0, %v1417_v63  ;;  %v1402_v8 = vld [vmem:[%s4642_s3 + $0x658] sm:$0xff]  ;;  %v594_v38 = vrot.slane %v4367_v7, %v561_v25 }
 0x142   : > { %1806 = vmatprep.mubr.f32.mxu0 %v1192_v12  ;;  %2878 = vmatprep.subr.bf16.mxu1 %v2877_v2  ;;  %v1450_v2 = vld [vmem:[%s4642_s3 + $0x7d8] sm:$0xff]  ;;  %v2863_v3 = vpack.c.bf16 %v1400_v61, %v1399_v60  ;;  %v1419_v12 = vld [vmem:[%s4642_s3 + $0x6e0] sm:$0xff]  ;;  %v590_v39 = vrot.slane %v4367_v7, %v557_v27  ;;  %v2907_v44 = vpack.c.bf16 %v1438_v41, %v1437_v40 }
 0x143   : > { %1876 = vmatprep.mubr.f32.mxu1 %v1194_v14  ;;  %1807 = vmatmul.mubr.f32.vlgmr.msra.gmra.mrb[12].mxu0 %v1191_v6  ;;  %v1401_v6 = vld [vmem:[%s4642_s3 + $0x650] sm:$0xff]  ;;  %v2897_v10 = vpack.c.bf16 %v1450_v2, %v1449_v1  ;;  %v1451_v14 = vld [vmem:[%s4642_s3 + $0x7e0] sm:$0xff] }
 0x144   : > { %1877 = vmatmul.mubr.f32.vlgmr.msra.gmra.mrb[12].mxu1 %v1193_v11  ;;  %2848 = vmatpush3.bf16.msra.mxu0 %v2847_v13  ;;  %v1434_v11 = vld [vmem:[%s4642_s3 + $0x758] sm:$0xff]  ;;  %v1420_v13 = vld [vmem:[%s4642_s3 + $0x6e8] sm:$0xff] }
 0x145   : > { %2880 = vmatpush3.bf16.msra.mxu1 %v2879_v15  ;;  %2850 = vmatprep.subr.bf16.mxu0 %v2849_v16  ;;  %v1452_v15 = vld [vmem:[%s4642_s3 + $0x7e8] sm:$0xff]  ;;  %v2867_v16 = vpack.c.bf16 %v1402_v8, %v1401_v6  ;;  %v2899_v17 = vpack.c.bf16 %v1434_v11, %v1433_v9  ;;  %v2869_v18 = vpack.c.bf16 %v1420_v13, %v1419_v12 }
 0x146   : > { %2882 = vmatprep.subr.bf16.mxu1 %v2881_v20  ;;  %v1404_v20 = vld [vmem:[%s4642_s3 + $0x668] sm:$0xff]  ;;  %v2901_v23 = vpack.c.bf16 %v1452_v15, %v1451_v14 }
 0x148   : > { %2852 = vmatpush3.bf16.msra.mxu0 %v2851_v29  ;;  %v1453_v29 = vld [vmem:[%s4642_s3 + $0x7f0] sm:$0xff] }
 0x149   : > { %2884 = vmatpush3.bf16.msra.mxu1 %v2883_v31  ;;  %2854 = vmatprep.subr.bf16.mxu0 %v2853_v32  ;;  %v1454_v31 = vld [vmem:[%s4642_s3 + $0x7f8] sm:$0xff]  ;;  %v2871_v32 = vpack.c.bf16 %v1404_v20, %v1403_v19 }
 0x14a   : > { %2886 = vmatprep.subr.bf16.mxu1 %v2885_v36  ;;  %v1405_v36 = vld [vmem:[%s4642_s3 + $0x670] sm:$0xff]  ;;  %v2905_v21 = vpack.c.bf16 %v1454_v31, %v1453_v29 }
 0x14b   : > { %v2875_v25 = vpack.c.bf16 %v1406_v37, %v1405_v36  ;;  %v2113_v37 = vld [vmem:[%s4644_s5] ss:$0 sm:$0xff] }
 0x14c   : > { %2856 = vmatpush3.bf16.msra.mxu0 %v2855_v48  ;;  %v598_v48 = vrot.slane %v4367_v7, %v565_v30 }
 0x14d   : > { %2888 = vmatpush3.bf16.msra.mxu1 %v2887_v42  ;;  %2858 = vmatprep.subr.bf16.mxu0 %v2857_v50 }
 0x14e   : > { %2890 = vmatprep.subr.bf16.mxu1 %v2889_v46 }
 0x150   : > { %2860 = vmatpush3.bf16.msra.mxu0 %v2859_v57  ;;  %v2112_v57 = vld [vmem:[%s4643_s4] ss:$0 sm:$0xff] }
 0x151   : > { %2892 = vmatpush3.bf16.msra.mxu1 %v2891_v58  ;;  %2862 = vmatprep.subr.bf16.mxu0 %v2861_v59 }
 0x152   : > { %2894 = vmatprep.subr.bf16.mxu1 %v2893_v51 }
 0x154   : > { %2864 = vmatpush3.bf16.msra.mxu0 %v2863_v3 }
 0x155   : > { %2896 = vmatpush3.bf16.msra.mxu1 %v2895_v4  ;;  %2866 = vmatprep.subr.bf16.mxu0 %v2865_v5 }
 0x156   : > { %2898 = vmatprep.subr.bf16.mxu1 %v2897_v10 }
 0x158   : > { %2868 = vmatpush3.bf16.msra.mxu0 %v2867_v16 }
 0x159   : > { %2900 = vmatpush3.bf16.msra.mxu1 %v2899_v17  ;;  %2870 = vmatprep.subr.bf16.mxu0 %v2869_v18 }
 0x15a   : > { %2902 = vmatprep.subr.bf16.mxu1 %v2901_v23 }
 0x15c   : > { %v1107_v42 = vpop.f32.mrb[6].mxu0  ;;  %2872 = vmatpush3.bf16.msra.mxu0 %v2871_v32 }
 0x15d   : > { %v1108_v50 = vadd.f32 %v1107_v42, %v586_v33  ;;  %v1178_v43 = vpop.f32.mrb[6].mxu1  ;;  %2904 = vmatpush3.bf16.msra.mxu1 %v2903_v34  ;;  %v1109_v27 = vpop.f32.mrb[7].mxu0  ;;  %2874 = vmatprep.subr.bf16.mxu0 %v2873_v35 }
 0x15e   : > { %v1179_v45 = vadd.f32 %v1178_v43, %v594_v38  ;;  %v1110_v46 = vadd.f32 %v1109_v27, %v590_v39  ;;  %v1180_v52 = vpop.f32.mrb[7].mxu1  ;;  %2906 = vmatprep.subr.bf16.mxu1 %v2905_v21  ;;  %v2114_v39 = vld [vmem:[%s4645_s6] ss:$0 sm:$0xff] }
 0x15f   : > { %v1181_v53 = vadd.f32 %v1180_v52, %v598_v48  ;;  %v1195_v49 = vmax.f32 %v1108_v50, 0.0 }
 0x160   : > { %v1197_v47 = vmax.f32 %v1179_v45, 0.0  ;;  %v1196_v55 = vmax.f32 %v1110_v46, 0.0  ;;  %2876 = vmatpush3.bf16.msra.mxu0 %v2875_v25 }
 0x161   : > { %v1198_v56 = vmax.f32 %v1181_v53, 0.0  ;;  %2908 = vmatpush3.bf16.msra.mxu1 %v2907_v44 }
 0x162   : > { %1946 = vmatprep.mubr.f32.mxu0 %v1196_v55 }
 0x163   : > { %2016 = vmatprep.mubr.f32.mxu1 %v1198_v56  ;;  %1947 = vmatmul.mubr.f32.vlgmr.msra.gmra.mrb[14].mxu0 %v1195_v49 }
 0x164   : > { %2017 = vmatmul.mubr.f32.vlgmr.msra.gmra.mrb[14].mxu1 %v1197_v47 }
 0x1d6   : > { %v2149_v30 = vpop.f32.mrb[8].mxu0 }
 0x1d7   : > { %v2184_v7 = vpop.f32.mrb[8].mxu1  ;;  %v2150_v58 = vpop.f32.mrb[9].mxu0 }
 0x1d8   : > { %v2151_v59 = vadd.f32 %v2150_v58, %v2149_v30  ;;  %v2185_v60 = vpop.f32.mrb[9].mxu1 }
 0x1d9   : > { %v2186_v61 = vadd.f32 %v2185_v60, %v2184_v7 }
 0x1da   : > { %v1529_v54 = vadd.f32 %v2151_v59, %v2112_v57 }
 0x1dc   : > { %v1599_v51 = vadd.f32 %v2186_v61, %v1529_v54 }
 0x1f6   : > { %v2219_v62 = vpop.f32.mrb[10].mxu0 }
 0x1f7   : > { %v2254_v63 = vpop.f32.mrb[10].mxu1  ;;  %v2220_v0 = vpop.f32.mrb[11].mxu0 }
 0x1f8   : > { %v2221_v1 = vadd.f32 %v2220_v0, %v2219_v62  ;;  %v2255_v2 = vpop.f32.mrb[11].mxu1 }
 0x1f9   : > { %v2256_v3 = vadd.f32 %v2255_v2, %v2254_v63 }
 0x1fa   : > { %v1669_v4 = vadd.f32 %v2221_v1, %v1599_v51 }
 0x1fc   : > { %v1739_v5 = vadd.f32 %v2256_v3, %v1669_v4 }
 0x216   : > { %v2289_v6 = vpop.f32.mrb[12].mxu0 }
 0x217   : > { %v2324_v8 = vpop.f32.mrb[12].mxu1  ;;  %v2290_v9 = vpop.f32.mrb[13].mxu0 }
 0x218   : > { %v2291_v10 = vadd.f32 %v2290_v9, %v2289_v6  ;;  %v2325_v11 = vpop.f32.mrb[13].mxu1 }
 0x219   : > { %v2326_v12 = vadd.f32 %v2325_v11, %v2324_v8 }
 0x21a   : > { %v1809_v13 = vadd.f32 %v2291_v10, %v1739_v5 }
 0x21c   : > { %v1879_v14 = vadd.f32 %v2326_v12, %v1809_v13 }
 0x236   : > { %v2359_v15 = vpop.f32.mrb[14].mxu0 }
 0x237   : > { %v2394_v16 = vpop.f32.mrb[14].mxu1  ;;  %v2360_v17 = vpop.f32.mrb[15].mxu0 }
 0x238   : > { %v2361_v18 = vadd.f32 %v2360_v17, %v2359_v15  ;;  %v2395_v19 = vpop.f32.mrb[15].mxu1 }
 0x239   : > { %v2396_v20 = vadd.f32 %v2395_v19, %v2394_v16 }
 0x23a   : > { %v1949_v22 = vadd.f32 %v2361_v18, %v1879_v14 }
 0x23c   : > { %v2019_v23 = vadd.f32 %v2396_v20, %v1949_v22 }
 0x23e   : > { %v2022_v26 = vadd.f32 %v2920_v24, %v2019_v23 }
 0x240   : > { %2023 = vadd.xlane.f32.xlu0 %v2022_v26 }
 0x2cd   : > { %v2024_v28 = vpop.xlane.xlu0 %2023 }
 0x2ce   : > { %v2026_v29 = vmul.f32 0.0078125, %v2024_v28 }
 0x2d0   : > { %v2027_v31 = vsub.f32 %v2022_v26, %v2026_v29 }
 0x2d2   : > { %v2028_v32 = vmul.f32 %v2027_v31, %v2027_v31 }
 0x2d4   : > { %2029 = vadd.xlane.f32.xlu0 %v2028_v32 }
 0x361   : > { %v2030_v33 = vpop.xlane.xlu0 %2029 }
 0x362   : > { %v2031_v34 = vmul.f32 0.0078125, %v2030_v33 }
 0x364   : > { %v2032_v35 = vadd.f32 1e-05, %v2031_v34 }
 0x366   : > { %2918 = vrsqrt.f32 %v2032_v35 }
 0x370   : > { %v2919_v36 = vpop.eup %2918 }
 0x371   : > { %v2034_v38 = vmul.f32 %v2919_v36, %v2027_v31 }
 0x373   : > { %v2042_v21 = vmul.f32 %v2113_v37, %v2034_v38 }
 0x375   : > { %v2050_v40 = vadd.f32 %v2114_v39, %v2042_v21 }
 0x377   : > { %2051 = vst [vmem:[%s273_s26] sm:$0xff] %v2050_v40 }
 0x378 PF: > { %s17_s24 = sadd.s32 1, %s2927_s24  }
 0x379   : > { %p14_p4 = scmp.ge.s32.totalorder %s17_s24, 4  }
 0x37b   :  { %16 = sbr.rel (!%p14_p4) target bundleno = 1 (0x1), region = 78 }

// kernel: transformer_forward.12
= control target key start
LH: loop header
LB: loop body
LE: loop exit
PB: predicated region body
PF: predicated region fallthrough
CT: control target
= control target key end

     0   :  { %12 = vsyncpa [#allocation3], 0  ;;  %s3320_s0 = inlined_call_operand.vmem [shape: f32[16,128], index: 0, kind: input, shape index: {}]   ;;  %s3321_s1 = inlined_call_operand.hbm [shape: f32[128,2048], index: 1, kind: input, shape index: {}]   ;;  %s3322_s2 = inlined_call_operand.vmem [shape: f32[1,2048], index: 2, kind: input, shape index: {}]   ;;  %s3323_s3 = inlined_call_operand.hbm [shape: f32[2048,128], index: 3, kind: input, shape index: {}]   ;;  %s3324_s4 = inlined_call_operand.vmem [shape: f32[1,128], index: 4, kind: input, shape index: {}]   ;;  %s3325_s5 = inlined_call_operand.vmem [shape: f32[1,128], index: 5, kind: input, shape index: {}]   ;;  %s3326_s6 = inlined_call_operand.vmem [shape: f32[1,128], index: 6, kind: input, shape index: {}]   ;;  %s3327_s7 = inlined_call_operand.vmem [shape: f32[16,128], index: 7, kind: output, shape index: {}]  }
   0x1   :  { %13 = vsyncpa [#allocation5], 0  ;;  %s3119_s24 = smov 0  }
   0x2 LB: > { %s3125_s25 = sadd.s32 4294967295, %s3071_s24   ;;  %p2159_p0 = scmp.ge.s32.totalorder %s3071_s24, 1  ;;  %s3071_s24 = sphi %s3119_s24, %s19_s24  }
   0x3   : > { %p202_p1 = scmp.lt.s32.totalorder %s3071_s24, 3  ;;  %s3073_s26 = smov [#allocation2]  }
   0x4   : > { %s214_s27 = sshll.u32 %s3073_s26, 4  ;;  %p3328_p3 = scmp.eq.s32.totalorder %s3125_s25, 0  ;;  %s215_s27 = int_to_ptr.vmem [resolvable:$true] %s214_s27 }
   0x5   : > { %p3129_p2 = pnand %p2159_p0, %p202_p1  ;;  %s3074_s29 = smov [#allocation4]  }
   0x6   : > { %s230_s30 = sshll.u32 %s3074_s29, 4  ;;  %s3001_s11 = scalar_lea.hbm %s3321_s1, 32768  ;;  %s3142_s30 = int_to_ptr.vmem [resolvable:$true] %s230_s30 }
   0x7   : > { %s3330_s28 = scalar_select %p3129_p2, 1, 0 }
   0x8   : > { %p2973_p4 = pneg %p3129_p2  ;;  %p3002_p6 = scmp.ne.s32.totalorder %s3321_s1, %s3001_s11 }
   0x9   : > { %p3008_p10 = scmp.lt.u32.totalorder %s3001_s11, %s3321_s1 }
   0xa   : > { %p3138_p5 = pnand %p3328_p3, %p2973_p4 }
   0xc   : > { %p3003_p7 = pneg %p3138_p5 }
   0xe   : > { %p3004_p8 = pnand %p3003_p7, %p3002_p6 }
  0x10   : > { %p3005_p9 = pneg %p3004_p8 }
  0x12   : > { %p3010_p11 = pnand %p3008_p10, %p3005_p9 }
  0x14   : > { %3013 = shalt.err (!%p3010_p11)
}
  0x15   : > { %s3014_s16 = scalar_lea.vmem %s215_s27, 32768  ;;  %p3022_p1 = scmp.lt.s32.totalorder %s215_s27, %s215_s27 }
  0x16   : > { %p3015_p12 = scmp.ne.s32.totalorder %s215_s27, %s3014_s16  ;;  %p3023_p4 = scmp.lt.s32.totalorder %s3014_s16, %s3014_s16 }
  0x18   : > { %p3017_p13 = pnand %p3015_p12, %p3003_p7  ;;  %p3024_p3 = por %p3023_p4, %p3022_p1 }
  0x1a   : > { %p3018_p0 = pneg %p3017_p13 }
  0x1c   : > { %p3025_p2 = pnand %p3024_p3, %p3018_p0 }
  0x1e   : > { %3028 = shalt.err (!%p3025_p2)
}
  0x1f   : > { %s3075_s17 = smov 2048   ;;  %s3076_s18 = smov 128  }
  0x20   : > { %2976 = dma.hbm_to_vmem [thread:$0]  (!%p3138_p5), %s3321_s1, 32768, %s215_s27, [#allocation3], %s3075_s17, %s3075_s17, %s3076_s18  }
  0x21   : > { %s3029_s23 = scalar_lea.hbm %s3323_s3, 32768 }
  0x22   : > { %p3030_p6 = scmp.ne.s32.totalorder %s3323_s3, %s3029_s23  ;;  %p3036_p8 = scmp.lt.u32.totalorder %s3029_s23, %s3323_s3 }
  0x24   : > { %p3032_p2 = pnand %p3030_p6, %p3003_p7 }
  0x26   : > { %p3033_p3 = pneg %p3032_p2 }
  0x28   : > { %p3038_p9 = pnand %p3036_p8, %p3033_p3 }
  0x2a   : > { %3041 = shalt.err (!%p3038_p9)
}
  0x2b   : > { %s3042_s27 = scalar_lea.vmem %s3142_s30, 32768  ;;  %p3050_p13 = scmp.lt.s32.totalorder %s3142_s30, %s3142_s30 }
  0x2c   : > { %p3043_p10 = scmp.ne.s32.totalorder %s3142_s30, %s3042_s27  ;;  %p3051_p0 = scmp.lt.s32.totalorder %s3042_s27, %s3042_s27 }
  0x2e   : > { %p3045_p11 = pnand %p3043_p10, %p3003_p7  ;;  %p3052_p1 = por %p3051_p0, %p3050_p13 }
  0x30   : > { %p3046_p12 = pneg %p3045_p11 }
  0x32   : > { %p3053_p4 = pnand %p3052_p1, %p3046_p12 }
  0x34   : > { %3056 = shalt.err (!%p3053_p4)
}
  0x35   : > { %s3077_s11 = smov 8   ;;  %p3332_p6 = scmp.ne.s32.totalorder %s3330_s28, 0 }
  0x36   : > { %2979 = dma.hbm_to_vmem [thread:$0]  (!%p3138_p5), %s3323_s3, 32768, %s3142_s30, [#allocation5], %s3076_s18, %s3076_s18, %s3077_s11  }
  0x37   : > { %262 = sbr.rel (%p3332_p6) target bundleno = 950 (0x3b6), region = 48  ;;  %p3333_p7 = scmp.eq.s32.totalorder (!%p3332_p6), %s3125_s25, 0 }
  0x3e   : > { %3062 = dma.done.wait (%p3333_p7), [#allocation3], 32768   ;;  %p3334_p2 = pmov %p3333_p7 }
  0x40   : > { %3064 = vsyncadd (%p3334_p2), [#allocation3], 4294934528  ;;  %p3335_p3 = pmov %p3334_p2 }
  0x41   : > { %p3336_p8 = pmov %p3334_p2 }
  0x42   : > { %3066 = dma.done.wait (%p3335_p3), [#allocation5], 32768  }
  0x43   : > { %3068 = vsyncadd (%p3336_p8), [#allocation5], 4294934528  ;;  %v3078_v0 = vmov 0.0   ;;  %v306_v1 = vld [vmem:[#allocation2 + $0x8] sm:$0xff]  ;;  %v308_v3 = vld [vmem:[#allocation2 + $0x18] sm:$0xff]  ;;  %p296_p5 = scmp.lt.s32.totalorder %s3125_s25, 1 }
  0x44   : > { %709 = vmatprep.mubr.f32.mxu0 %v3078_v0  ;;  %780 = vmatprep.mubr.f32.mxu1 %v3078_v0  ;;  %v322_v2 = vld [vmem:[#allocation2 + $0x88] sm:$0xff]  ;;  %v324_v5 = vld [vmem:[#allocation2 + $0x98] sm:$0xff]  ;;  %v305_v6 = vld [vmem:[#allocation2] sm:$0xff] }
  0x45   : > { %v2453_v4 = vpack.c.bf16 %v322_v2, %v306_v1  ;;  %v321_v7 = vld [vmem:[#allocation2 + $0x80] sm:$0xff]  ;;  %v2485_v8 = vpack.c.bf16 %v324_v5, %v308_v3  ;;  %v307_v10 = vld [vmem:[#allocation2 + $0x10] sm:$0xff]  ;;  %v338_v12 = vld [vmem:[#allocation2 + $0x108] sm:$0xff]  ;;  %s3338_s25 = smov (!%p296_p5, %s3125_s25), 1 }
  0x46   : > { %v2455_v9 = vpack.c.bf16 %v321_v7, %v305_v6  ;;  %v323_v11 = vld [vmem:[#allocation2 + $0x90] sm:$0xff]  ;;  %v354_v14 = vld [vmem:[#allocation2 + $0x188] sm:$0xff]  ;;  %v340_v15 = vld [vmem:[#allocation2 + $0x118] sm:$0xff]  ;;  %s2166_s28 = sshll.u32 %s3338_s25, 3 }
  0x47   : > { %2454 = vmatprep.subr.bf16.mxu0 %v2453_v4  ;;  %v2487_v13 = vpack.c.bf16 %v323_v11, %v307_v10  ;;  %v356_v16 = vld [vmem:[#allocation2 + $0x198] sm:$0xff]  ;;  %2486 = vmatprep.subr.bf16.mxu1 %v2485_v8  ;;  %v2457_v17 = vpack.c.bf16 %v354_v14, %v338_v12  ;;  %v337_v19 = vld [vmem:[#allocation2 + $0x100] sm:$0xff]  ;;  %v339_v21 = vld [vmem:[#allocation2 + $0x110] sm:$0xff]  ;;  %s3215_s14 = scalar_lea.vmem %s3320_s0, %s2166_s28  ;;  %s303_s10 = scalar_lea.vmem %s3327_s7, %s2166_s28 }
  0x48   : > { %2456 = vmatpush1.bf16.msra.mxu0 %v2455_v9  ;;  %v2489_v18 = vpack.c.bf16 %v356_v16, %v340_v15  ;;  %v353_v20 = vld [vmem:[#allocation2 + $0x180] sm:$0xff]  ;;  %v355_v23 = vld [vmem:[#allocation2 + $0x190] sm:$0xff]  ;;  %v370_v24 = vld [vmem:[#allocation2 + $0x208] sm:$0xff] }
  0x49   : > { %2488 = vmatpush1.bf16.msra.mxu1 %v2487_v13  ;;  %v2459_v22 = vpack.c.bf16 %v353_v20, %v337_v19  ;;  %v386_v25 = vld [vmem:[#allocation2 + $0x288] sm:$0xff]  ;;  %2458 = vmatprep.subr.bf16.mxu0 %v2457_v17  ;;  %v2491_v26 = vpack.c.bf16 %v355_v23, %v339_v21  ;;  %v372_v28 = vld [vmem:[#allocation2 + $0x218] sm:$0xff]  ;;  %v369_v30 = vld [vmem:[#allocation2 + $0x200] sm:$0xff] }
  0x4a   : > { %2490 = vmatprep.subr.bf16.mxu1 %v2489_v18  ;;  %v2461_v27 = vpack.c.bf16 %v386_v25, %v370_v24  ;;  %v388_v29 = vld [vmem:[#allocation2 + $0x298] sm:$0xff]  ;;  %v385_v32 = vld [vmem:[#allocation2 + $0x280] sm:$0xff]  ;;  %v371_v33 = vld [vmem:[#allocation2 + $0x210] sm:$0xff] }
  0x4b   : > { %v2493_v31 = vpack.c.bf16 %v388_v29, %v372_v28  ;;  %v387_v34 = vld [vmem:[#allocation2 + $0x290] sm:$0xff]  ;;  %v2463_v35 = vpack.c.bf16 %v385_v32, %v369_v30  ;;  %v402_v36 = vld [vmem:[#allocation2 + $0x308] sm:$0xff]  ;;  %v404_v38 = vld [vmem:[#allocation2 + $0x318] sm:$0xff] }
  0x4c   : > { %2460 = vmatpush1.bf16.msra.mxu0 %v2459_v22  ;;  %v418_v37 = vld [vmem:[#allocation2 + $0x388] sm:$0xff]  ;;  %v2495_v39 = vpack.c.bf16 %v387_v34, %v371_v33  ;;  %v420_v41 = vld [vmem:[#allocation2 + $0x398] sm:$0xff]  ;;  %v401_v42 = vld [vmem:[#allocation2 + $0x300] sm:$0xff] }
  0x4d   : > { %2492 = vmatpush1.bf16.msra.mxu1 %v2491_v26  ;;  %2462 = vmatprep.subr.bf16.mxu0 %v2461_v27  ;;  %v2465_v40 = vpack.c.bf16 %v418_v37, %v402_v36  ;;  %v417_v43 = vld [vmem:[#allocation2 + $0x380] sm:$0xff]  ;;  %v2497_v44 = vpack.c.bf16 %v420_v41, %v404_v38  ;;  %v403_v45 = vld [vmem:[#allocation2 + $0x310] sm:$0xff]  ;;  %v434_v47 = vld [vmem:[#allocation2 + $0x408] sm:$0xff] }
  0x4e   : > { %2494 = vmatprep.subr.bf16.mxu1 %v2493_v31  ;;  %v419_v46 = vld [vmem:[#allocation2 + $0x390] sm:$0xff]  ;;  %v450_v48 = vld [vmem:[#allocation2 + $0x488] sm:$0xff]  ;;  %v436_v49 = vld [vmem:[#allocation2 + $0x418] sm:$0xff]  ;;  %v2467_v51 = vpack.c.bf16 %v417_v43, %v401_v42 }
  0x4f   : > { %v452_v50 = vld [vmem:[#allocation2 + $0x498] sm:$0xff]  ;;  %v2499_v52 = vpack.c.bf16 %v419_v46, %v403_v45  ;;  %v2469_v53 = vpack.c.bf16 %v450_v48, %v434_v47  ;;  %v433_v54 = vld [vmem:[#allocation2 + $0x400] sm:$0xff]  ;;  %v435_v56 = vld [vmem:[#allocation2 + $0x410] sm:$0xff] }
  0x50   : > { %2464 = vmatpush1.bf16.msra.mxu0 %v2463_v35  ;;  %v449_v55 = vld [vmem:[#allocation2 + $0x480] sm:$0xff]  ;;  %v2501_v57 = vpack.c.bf16 %v452_v50, %v436_v49  ;;  %v451_v58 = vld [vmem:[#allocation2 + $0x490] sm:$0xff]  ;;  %v466_v59 = vld [vmem:[#allocation2 + $0x508] sm:$0xff] }
  0x51   : > { %2496 = vmatpush1.bf16.msra.mxu1 %v2495_v39  ;;  %2466 = vmatprep.subr.bf16.mxu0 %v2465_v40  ;;  %v482_v60 = vld [vmem:[#allocation2 + $0x588] sm:$0xff]  ;;  %v468_v61 = vld [vmem:[#allocation2 + $0x518] sm:$0xff]  ;;  %v2471_v63 = vpack.c.bf16 %v449_v55, %v433_v54  ;;  %v2503_v1 = vpack.c.bf16 %v451_v58, %v435_v56  ;;  %v465_v3 = vld [vmem:[#allocation2 + $0x500] sm:$0xff] }
  0x52   : > { %2498 = vmatprep.subr.bf16.mxu1 %v2497_v44  ;;  %v484_v62 = vld [vmem:[#allocation2 + $0x598] sm:$0xff]  ;;  %v2473_v2 = vpack.c.bf16 %v482_v60, %v466_v59  ;;  %v481_v4 = vld [vmem:[#allocation2 + $0x580] sm:$0xff]  ;;  %v467_v5 = vld [vmem:[#allocation2 + $0x510] sm:$0xff] }
  0x53   : > { %v2505_v6 = vpack.c.bf16 %v484_v62, %v468_v61  ;;  %v483_v7 = vld [vmem:[#allocation2 + $0x590] sm:$0xff]  ;;  %v498_v8 = vld [vmem:[#allocation2 + $0x608] sm:$0xff]  ;;  %v500_v10 = vld [vmem:[#allocation2 + $0x618] sm:$0xff]  ;;  %v2475_v12 = vpack.c.bf16 %v481_v4, %v465_v3 }
  0x54   : > { %2468 = vmatpush1.bf16.msra.mxu0 %v2467_v51  ;;  %v514_v9 = vld [vmem:[#allocation2 + $0x688] sm:$0xff]  ;;  %v516_v11 = vld [vmem:[#allocation2 + $0x698] sm:$0xff]  ;;  %v2507_v13 = vpack.c.bf16 %v483_v7, %v467_v5  ;;  %v497_v15 = vld [vmem:[#allocation2 + $0x600] sm:$0xff] }
  0x55   : > { %2500 = vmatpush1.bf16.msra.mxu1 %v2499_v52  ;;  %2470 = vmatprep.subr.bf16.mxu0 %v2469_v53  ;;  %v2477_v14 = vpack.c.bf16 %v514_v9, %v498_v8  ;;  %v513_v16 = vld [vmem:[#allocation2 + $0x680] sm:$0xff]  ;;  %v499_v17 = vld [vmem:[#allocation2 + $0x610] sm:$0xff]  ;;  %v2509_v18 = vpack.c.bf16 %v516_v11, %v500_v10  ;;  %v530_v20 = vld [vmem:[#allocation2 + $0x708] sm:$0xff] }
  0x56   : > { %2502 = vmatprep.subr.bf16.mxu1 %v2501_v57  ;;  %v515_v19 = vld [vmem:[#allocation2 + $0x690] sm:$0xff]  ;;  %v546_v21 = vld [vmem:[#allocation2 + $0x788] sm:$0xff]  ;;  %v532_v22 = vld [vmem:[#allocation2 + $0x718] sm:$0xff]  ;;  %v2479_v24 = vpack.c.bf16 %v513_v16, %v497_v15 }
  0x57   : > { %v548_v23 = vld [vmem:[#allocation2 + $0x798] sm:$0xff]  ;;  %v2511_v25 = vpack.c.bf16 %v515_v19, %v499_v17  ;;  %v2481_v26 = vpack.c.bf16 %v546_v21, %v530_v20  ;;  %v529_v27 = vld [vmem:[#allocation2 + $0x700] sm:$0xff]  ;;  %v531_v29 = vld [vmem:[#allocation2 + $0x710] sm:$0xff] }
  0x58   : > { %2472 = vmatpush1.bf16.msra.mxu0 %v2471_v63  ;;  %v545_v28 = vld [vmem:[#allocation2 + $0x780] sm:$0xff]  ;;  %v2513_v30 = vpack.c.bf16 %v548_v23, %v532_v22  ;;  %v547_v31 = vld [vmem:[#allocation2 + $0x790] sm:$0xff]  ;;  %v310_v32 = vld [vmem:[#allocation2 + $0x28] sm:$0xff] }
  0x59   : > { %2504 = vmatpush1.bf16.msra.mxu1 %v2503_v1  ;;  %2474 = vmatprep.subr.bf16.mxu0 %v2473_v2  ;;  %v326_v33 = vld [vmem:[#allocation2 + $0xa8] sm:$0xff]  ;;  %v312_v34 = vld [vmem:[#allocation2 + $0x38] sm:$0xff]  ;;  %v2483_v36 = vpack.c.bf16 %v545_v28, %v529_v27  ;;  %v2515_v37 = vpack.c.bf16 %v547_v31, %v531_v29  ;;  %v309_v39 = vld [vmem:[#allocation2 + $0x20] sm:$0xff] }
  0x5a   : > { %2506 = vmatprep.subr.bf16.mxu1 %v2505_v6  ;;  %v328_v35 = vld [vmem:[#allocation2 + $0xb8] sm:$0xff]  ;;  %v2517_v38 = vpack.c.bf16 %v326_v33, %v310_v32  ;;  %v325_v40 = vld [vmem:[#allocation2 + $0xa0] sm:$0xff]  ;;  %v311_v41 = vld [vmem:[#allocation2 + $0x30] sm:$0xff] }
  0x5b   : > { %v2549_v42 = vpack.c.bf16 %v328_v35, %v312_v34  ;;  %v327_v43 = vld [vmem:[#allocation2 + $0xb0] sm:$0xff]  ;;  %v342_v44 = vld [vmem:[#allocation2 + $0x128] sm:$0xff]  ;;  %v344_v46 = vld [vmem:[#allocation2 + $0x138] sm:$0xff]  ;;  %v2519_v49 = vpack.c.bf16 %v325_v40, %v309_v39 }
  0x5c   : > { %2476 = vmatpush1.bf16.msra.mxu0 %v2475_v12  ;;  %v358_v45 = vld [vmem:[#allocation2 + $0x1a8] sm:$0xff]  ;;  %v360_v47 = vld [vmem:[#allocation2 + $0x1b8] sm:$0xff]  ;;  %v3218_v48 = vld [vmem:[%s3215_s14] sm:$0xff]  ;;  %v2551_v50 = vpack.c.bf16 %v327_v43, %v311_v41 }
  0x5d   : > { %2508 = vmatpush1.bf16.msra.mxu1 %v2507_v13  ;;  %2478 = vmatprep.subr.bf16.mxu0 %v2477_v14  ;;  %v2521_v51 = vpack.c.bf16 %v358_v45, %v342_v44  ;;  %v341_v52 = vld [vmem:[#allocation2 + $0x120] sm:$0xff]  ;;  %v343_v54 = vld [vmem:[#allocation2 + $0x130] sm:$0xff]  ;;  %v2553_v55 = vpack.c.bf16 %v360_v47, %v344_v46  ;;  %v374_v57 = vld [vmem:[#allocation2 + $0x228] sm:$0xff] }
  0x5e   : > { %2510 = vmatprep.subr.bf16.mxu1 %v2509_v18  ;;  %v357_v53 = vld [vmem:[#allocation2 + $0x1a0] sm:$0xff]  ;;  %v359_v56 = vld [vmem:[#allocation2 + $0x1b0] sm:$0xff]  ;;  %v390_v58 = vld [vmem:[#allocation2 + $0x2a8] sm:$0xff] }
  0x5f   : > { %v376_v59 = vld [vmem:[#allocation2 + $0x238] sm:$0xff]  ;;  %v2523_v61 = vpack.c.bf16 %v357_v53, %v341_v52  ;;  %v2555_v62 = vpack.c.bf16 %v359_v56, %v343_v54  ;;  %v2525_v63 = vpack.c.bf16 %v390_v58, %v374_v57  ;;  %v373_v1 = vld [vmem:[#allocation2 + $0x220] sm:$0xff]  ;;  %v375_v3 = vld [vmem:[#allocation2 + $0x230] sm:$0xff] }
  0x60   : > { %2480 = vmatpush1.bf16.msra.mxu0 %v2479_v24  ;;  %v392_v60 = vld [vmem:[#allocation2 + $0x2b8] sm:$0xff]  ;;  %v389_v2 = vld [vmem:[#allocation2 + $0x2a0] sm:$0xff]  ;;  %v391_v5 = vld [vmem:[#allocation2 + $0x2b0] sm:$0xff] }
  0x61   : > { %2512 = vmatpush1.bf16.msra.mxu1 %v2511_v25  ;;  %2482 = vmatprep.subr.bf16.mxu0 %v2481_v26  ;;  %v2557_v4 = vpack.c.bf16 %v392_v60, %v376_v59  ;;  %v406_v6 = vld [vmem:[#allocation2 + $0x328] sm:$0xff]  ;;  %v408_v8 = vld [vmem:[#allocation2 + $0x338] sm:$0xff]  ;;  %v2527_v10 = vpack.c.bf16 %v389_v2, %v373_v1  ;;  %v2559_v11 = vpack.c.bf16 %v391_v5, %v375_v3  ;;  %v405_v13 = vld [vmem:[#allocation2 + $0x320] sm:$0xff] }
  0x62   : > { %2514 = vmatprep.subr.bf16.mxu1 %v2513_v30  ;;  %v422_v7 = vld [vmem:[#allocation2 + $0x3a8] sm:$0xff]  ;;  %v424_v9 = vld [vmem:[#allocation2 + $0x3b8] sm:$0xff]  ;;  %v421_v14 = vld [vmem:[#allocation2 + $0x3a0] sm:$0xff] }
  0x63   : > { %v2529_v12 = vpack.c.bf16 %v422_v7, %v406_v6  ;;  %v407_v15 = vld [vmem:[#allocation2 + $0x330] sm:$0xff]  ;;  %v2561_v16 = vpack.c.bf16 %v424_v9, %v408_v8  ;;  %v438_v18 = vld [vmem:[#allocation2 + $0x428] sm:$0xff]  ;;  %v440_v20 = vld [vmem:[#allocation2 + $0x438] sm:$0xff]  ;;  %v2531_v22 = vpack.c.bf16 %v421_v14, %v405_v13 }
  0x64   : > { %2484 = vmatpush1.bf16.msra.mxu0 %v2483_v36  ;;  %v423_v17 = vld [vmem:[#allocation2 + $0x3b0] sm:$0xff]  ;;  %v454_v19 = vld [vmem:[#allocation2 + $0x4a8] sm:$0xff]  ;;  %v456_v21 = vld [vmem:[#allocation2 + $0x4b8] sm:$0xff] }
  0x65   : > { %2516 = vmatpush1.bf16.msra.mxu1 %v2515_v37  ;;  %2518 = vmatprep.subr.bf16.mxu0 %v2517_v38  ;;  %v2563_v23 = vpack.c.bf16 %v423_v17, %v407_v15  ;;  %v2533_v24 = vpack.c.bf16 %v454_v19, %v438_v18  ;;  %v437_v25 = vld [vmem:[#allocation2 + $0x420] sm:$0xff]  ;;  %v439_v27 = vld [vmem:[#allocation2 + $0x430] sm:$0xff]  ;;  %v2565_v28 = vpack.c.bf16 %v456_v21, %v440_v20  ;;  %v470_v30 = vld [vmem:[#allocation2 + $0x528] sm:$0xff] }
  0x66   : > { %2550 = vmatprep.subr.bf16.mxu1 %v2549_v42  ;;  %v453_v26 = vld [vmem:[#allocation2 + $0x4a0] sm:$0xff]  ;;  %v455_v29 = vld [vmem:[#allocation2 + $0x4b0] sm:$0xff]  ;;  %v486_v31 = vld [vmem:[#allocation2 + $0x5a8] sm:$0xff] }
  0x67   : > { %710 = vmatmul.mubr.f32.vlgmr.msra.gmra.mrb[0].mxu0 %v3218_v48  ;;  %v472_v32 = vld [vmem:[#allocation2 + $0x538] sm:$0xff]  ;;  %v2535_v34 = vpack.c.bf16 %v453_v26, %v437_v25  ;;  %v2567_v35 = vpack.c.bf16 %v455_v29, %v439_v27  ;;  %v2537_v36 = vpack.c.bf16 %v486_v31, %v470_v30  ;;  %v469_v37 = vld [vmem:[#allocation2 + $0x520] sm:$0xff]  ;;  %v471_v39 = vld [vmem:[#allocation2 + $0x530] sm:$0xff] }
  0x68   : > { %781 = vmatmul.mubr.f32.vlgmr.msra.gmra.mrb[0].mxu1 %v3218_v48  ;;  %2520 = vmatpush1.bf16.msra.mxu0 %v2519_v49  ;;  %v488_v33 = vld [vmem:[#allocation2 + $0x5b8] sm:$0xff]  ;;  %v485_v38 = vld [vmem:[#allocation2 + $0x5a0] sm:$0xff]  ;;  %v487_v41 = vld [vmem:[#allocation2 + $0x5b0] sm:$0xff] }
  0x69   : > { %2552 = vmatpush1.bf16.msra.mxu1 %v2551_v50  ;;  %2522 = vmatprep.subr.bf16.mxu0 %v2521_v51  ;;  %v2569_v40 = vpack.c.bf16 %v488_v33, %v472_v32  ;;  %v502_v42 = vld [vmem:[#allocation2 + $0x628] sm:$0xff]  ;;  %v504_v44 = vld [vmem:[#allocation2 + $0x638] sm:$0xff]  ;;  %v2539_v46 = vpack.c.bf16 %v485_v38, %v469_v37  ;;  %v2571_v47 = vpack.c.bf16 %v487_v41, %v471_v39  ;;  %v501_v50 = vld [vmem:[#allocation2 + $0x620] sm:$0xff] }
  0x6a   : > { %2554 = vmatprep.subr.bf16.mxu1 %v2553_v55  ;;  %851 = vmatprep.mubr.f32.mxu0 %v3078_v0  ;;  %v518_v43 = vld [vmem:[#allocation2 + $0x6a8] sm:$0xff]  ;;  %v520_v45 = vld [vmem:[#allocation2 + $0x6b8] sm:$0xff]  ;;  %v517_v51 = vld [vmem:[#allocation2 + $0x6a0] sm:$0xff] }
  0x6b   : > { %922 = vmatprep.mubr.f32.mxu1 %v3078_v0  ;;  %v2541_v49 = vpack.c.bf16 %v518_v43, %v502_v42  ;;  %v503_v52 = vld [vmem:[#allocation2 + $0x630] sm:$0xff]  ;;  %v2573_v53 = vpack.c.bf16 %v520_v45, %v504_v44  ;;  %v534_v55 = vld [vmem:[#allocation2 + $0x728] sm:$0xff]  ;;  %v536_v57 = vld [vmem:[#allocation2 + $0x738] sm:$0xff]  ;;  %v2543_v59 = vpack.c.bf16 %v517_v51, %v501_v50 }
  0x6c   : > { %2524 = vmatpush1.bf16.msra.mxu0 %v2523_v61  ;;  %v519_v54 = vld [vmem:[#allocation2 + $0x6b0] sm:$0xff]  ;;  %v550_v56 = vld [vmem:[#allocation2 + $0x7a8] sm:$0xff]  ;;  %v552_v58 = vld [vmem:[#allocation2 + $0x7b8] sm:$0xff] }
  0x6d   : > { %2556 = vmatpush1.bf16.msra.mxu1 %v2555_v62  ;;  %2526 = vmatprep.subr.bf16.mxu0 %v2525_v63  ;;  %v2575_v60 = vpack.c.bf16 %v519_v54, %v503_v52  ;;  %v2545_v61 = vpack.c.bf16 %v550_v56, %v534_v55  ;;  %v533_v62 = vld [vmem:[#allocation2 + $0x720] sm:$0xff]  ;;  %v535_v1 = vld [vmem:[#allocation2 + $0x730] sm:$0xff]  ;;  %v2577_v2 = vpack.c.bf16 %v552_v58, %v536_v57  ;;  %v330_v5 = vld [vmem:[#allocation2 + $0xc8] sm:$0xff] }
  0x6e   : > { %2558 = vmatprep.subr.bf16.mxu1 %v2557_v4  ;;  %v549_v63 = vld [vmem:[#allocation2 + $0x7a0] sm:$0xff]  ;;  %v551_v3 = vld [vmem:[#allocation2 + $0x7b0] sm:$0xff]  ;;  %v314_v4 = vld [vmem:[#allocation2 + $0x48] sm:$0xff] }
  0x6f   : > { %v316_v6 = vld [vmem:[#allocation2 + $0x58] sm:$0xff]  ;;  %v2547_v8 = vpack.c.bf16 %v549_v63, %v533_v62  ;;  %v2579_v9 = vpack.c.bf16 %v551_v3, %v535_v1  ;;  %v315_v13 = vld [vmem:[#allocation2 + $0x50] sm:$0xff]  ;;  %v362_v17 = vld [vmem:[#allocation2 + $0x1c8] sm:$0xff] }
  0x70   : > { %2528 = vmatpush1.bf16.msra.mxu0 %v2527_v10  ;;  %v332_v7 = vld [vmem:[#allocation2 + $0xd8] sm:$0xff]  ;;  %v2581_v10 = vpack.c.bf16 %v330_v5, %v314_v4  ;;  %v331_v15 = vld [vmem:[#allocation2 + $0xd0] sm:$0xff]  ;;  %v394_v29 = vld [vmem:[#allocation2 + $0x2c8] sm:$0xff] }
  0x71   : > { %2560 = vmatpush1.bf16.msra.mxu1 %v2559_v11  ;;  %2530 = vmatprep.subr.bf16.mxu0 %v2529_v12  ;;  %v313_v11 = vld [vmem:[#allocation2 + $0x40] sm:$0xff]  ;;  %v2613_v14 = vpack.c.bf16 %v332_v7, %v316_v6  ;;  %v348_v18 = vld [vmem:[#allocation2 + $0x158] sm:$0xff]  ;;  %v2615_v21 = vpack.c.bf16 %v331_v15, %v315_v13  ;;  %v347_v25 = vld [vmem:[#allocation2 + $0x150] sm:$0xff] }
  0x72   : > { %2562 = vmatprep.subr.bf16.mxu1 %v2561_v16  ;;  %v329_v12 = vld [vmem:[#allocation2 + $0xc0] sm:$0xff]  ;;  %v346_v16 = vld [vmem:[#allocation2 + $0x148] sm:$0xff]  ;;  %v364_v19 = vld [vmem:[#allocation2 + $0x1d8] sm:$0xff] }
  0x73   : > { %v2583_v20 = vpack.c.bf16 %v329_v12, %v313_v11  ;;  %v2617_v26 = vpack.c.bf16 %v364_v19, %v348_v18  ;;  %v363_v27 = vld [vmem:[#allocation2 + $0x1d0] sm:$0xff]  ;;  %v380_v30 = vld [vmem:[#allocation2 + $0x258] sm:$0xff]  ;;  %v426_v41 = vld [vmem:[#allocation2 + $0x3c8] sm:$0xff] }
  0x74   : > { %2532 = vmatpush1.bf16.msra.mxu0 %v2531_v22  ;;  %v2585_v22 = vpack.c.bf16 %v362_v17, %v346_v16  ;;  %v396_v31 = vld [vmem:[#allocation2 + $0x2d8] sm:$0xff]  ;;  %v2619_v33 = vpack.c.bf16 %v363_v27, %v347_v25  ;;  %v379_v37 = vld [vmem:[#allocation2 + $0x250] sm:$0xff]  ;;  %v458_v54 = vld [vmem:[#allocation2 + $0x4c8] sm:$0xff] }
  0x75   : > { %2564 = vmatpush1.bf16.msra.mxu1 %v2563_v23  ;;  %2534 = vmatprep.subr.bf16.mxu0 %v2533_v24  ;;  %v345_v23 = vld [vmem:[#allocation2 + $0x140] sm:$0xff]  ;;  %v2621_v38 = vpack.c.bf16 %v396_v31, %v380_v30  ;;  %v395_v39 = vld [vmem:[#allocation2 + $0x2d0] sm:$0xff]  ;;  %v412_v42 = vld [vmem:[#allocation2 + $0x358] sm:$0xff] }
  0x76   : > { %2566 = vmatprep.subr.bf16.mxu1 %v2565_v28  ;;  %v361_v24 = vld [vmem:[#allocation2 + $0x1c0] sm:$0xff]  ;;  %v378_v28 = vld [vmem:[#allocation2 + $0x248] sm:$0xff]  ;;  %v428_v43 = vld [vmem:[#allocation2 + $0x3d8] sm:$0xff]  ;;  %v2623_v45 = vpack.c.bf16 %v395_v39, %v379_v37 }
  0x77   : > { %v2587_v32 = vpack.c.bf16 %v361_v24, %v345_v23  ;;  %v411_v50 = vld [vmem:[#allocation2 + $0x350] sm:$0xff]  ;;  %v2625_v51 = vpack.c.bf16 %v428_v43, %v412_v42  ;;  %v444_v55 = vld [vmem:[#allocation2 + $0x458] sm:$0xff]  ;;  %v490_v3 = vld [vmem:[#allocation2 + $0x5c8] sm:$0xff] }
  0x78   : > { %2536 = vmatpush1.bf16.msra.mxu0 %v2535_v34  ;;  %v2589_v34 = vpack.c.bf16 %v394_v29, %v378_v28  ;;  %v427_v52 = vld [vmem:[#allocation2 + $0x3d0] sm:$0xff]  ;;  %v460_v56 = vld [vmem:[#allocation2 + $0x4d8] sm:$0xff]  ;;  %v522_v15 = vld [vmem:[#allocation2 + $0x6c8] sm:$0xff] }
  0x79   : > { %2568 = vmatpush1.bf16.msra.mxu1 %v2567_v35  ;;  %2538 = vmatprep.subr.bf16.mxu0 %v2537_v36  ;;  %v377_v35 = vld [vmem:[#allocation2 + $0x240] sm:$0xff]  ;;  %v2627_v58 = vpack.c.bf16 %v427_v52, %v411_v50  ;;  %v443_v62 = vld [vmem:[#allocation2 + $0x450] sm:$0xff]  ;;  %v2629_v63 = vpack.c.bf16 %v460_v56, %v444_v55  ;;  %v476_v4 = vld [vmem:[#allocation2 + $0x558] sm:$0xff] }
  0x7a   : > { %2570 = vmatprep.subr.bf16.mxu1 %v2569_v40  ;;  %v393_v36 = vld [vmem:[#allocation2 + $0x2c0] sm:$0xff]  ;;  %v410_v40 = vld [vmem:[#allocation2 + $0x348] sm:$0xff]  ;;  %v459_v1 = vld [vmem:[#allocation2 + $0x4d0] sm:$0xff] }
  0x7b   : > { %v2591_v44 = vpack.c.bf16 %v393_v36, %v377_v35  ;;  %v492_v5 = vld [vmem:[#allocation2 + $0x5d8] sm:$0xff]  ;;  %v2631_v7 = vpack.c.bf16 %v459_v1, %v443_v62  ;;  %v475_v11 = vld [vmem:[#allocation2 + $0x550] sm:$0xff]  ;;  %v554_v27 = vld [vmem:[#allocation2 + $0x7c8] sm:$0xff] }
  0x7c   : > { %2540 = vmatpush1.bf16.msra.mxu0 %v2539_v46  ;;  %v2593_v46 = vpack.c.bf16 %v426_v41, %v410_v40  ;;  %v2633_v12 = vpack.c.bf16 %v492_v5, %v476_v4  ;;  %v491_v13 = vld [vmem:[#allocation2 + $0x5d0] sm:$0xff]  ;;  %v508_v16 = vld [vmem:[#allocation2 + $0x658] sm:$0xff]  ;;  %v334_v39 = vld [vmem:[#allocation2 + $0xe8] sm:$0xff] }
  0x7d   : > { %2572 = vmatpush1.bf16.msra.mxu1 %v2571_v47  ;;  %2542 = vmatprep.subr.bf16.mxu0 %v2541_v49  ;;  %v409_v47 = vld [vmem:[#allocation2 + $0x340] sm:$0xff]  ;;  %v524_v17 = vld [vmem:[#allocation2 + $0x6d8] sm:$0xff]  ;;  %v2635_v19 = vpack.c.bf16 %v491_v13, %v475_v11  ;;  %v507_v23 = vld [vmem:[#allocation2 + $0x650] sm:$0xff] }
  0x7e   : > { %2574 = vmatprep.subr.bf16.mxu1 %v2573_v53  ;;  %v425_v49 = vld [vmem:[#allocation2 + $0x3c0] sm:$0xff]  ;;  %v442_v53 = vld [vmem:[#allocation2 + $0x448] sm:$0xff]  ;;  %v2637_v24 = vpack.c.bf16 %v524_v17, %v508_v16  ;;  %v523_v25 = vld [vmem:[#allocation2 + $0x6d0] sm:$0xff] }
  0x7f   : > { %v2595_v57 = vpack.c.bf16 %v425_v49, %v409_v47  ;;  %v540_v28 = vld [vmem:[#allocation2 + $0x758] sm:$0xff]  ;;  %v2639_v31 = vpack.c.bf16 %v523_v25, %v507_v23  ;;  %v539_v35 = vld [vmem:[#allocation2 + $0x750] sm:$0xff]  ;;  %v366_v52 = vld [vmem:[#allocation2 + $0x1e8] sm:$0xff] }
  0x80   : > { %2544 = vmatpush1.bf16.msra.mxu0 %v2543_v59  ;;  %v2597_v59 = vpack.c.bf16 %v458_v54, %v442_v53  ;;  %v556_v29 = vld [vmem:[#allocation2 + $0x7d8] sm:$0xff]  ;;  %v555_v37 = vld [vmem:[#allocation2 + $0x7d0] sm:$0xff]  ;;  %v398_v1 = vld [vmem:[#allocation2 + $0x2e8] sm:$0xff] }
  0x81   : > { %2576 = vmatpush1.bf16.msra.mxu1 %v2575_v60  ;;  %2546 = vmatprep.subr.bf16.mxu0 %v2545_v61  ;;  %v441_v60 = vld [vmem:[#allocation2 + $0x440] sm:$0xff]  ;;  %v2641_v36 = vpack.c.bf16 %v556_v29, %v540_v28  ;;  %v320_v40 = vld [vmem:[#allocation2 + $0x78] sm:$0xff]  ;;  %v2643_v43 = vpack.c.bf16 %v555_v37, %v539_v35  ;;  %v319_v47 = vld [vmem:[#allocation2 + $0x70] sm:$0xff] }
  0x82   : > { %2578 = vmatprep.subr.bf16.mxu1 %v2577_v2  ;;  %v457_v61 = vld [vmem:[#allocation2 + $0x4c0] sm:$0xff]  ;;  %v474_v2 = vld [vmem:[#allocation2 + $0x548] sm:$0xff]  ;;  %v336_v41 = vld [vmem:[#allocation2 + $0xf8] sm:$0xff] }
  0x83   : > { %v2599_v6 = vpack.c.bf16 %v457_v61, %v441_v60  ;;  %v2677_v49 = vpack.c.bf16 %v336_v41, %v320_v40  ;;  %v335_v50 = vld [vmem:[#allocation2 + $0xf0] sm:$0xff]  ;;  %v352_v53 = vld [vmem:[#allocation2 + $0x178] sm:$0xff]  ;;  %v430_v13 = vld [vmem:[#allocation2 + $0x3e8] sm:$0xff] }
  0x84   : > { %2548 = vmatpush1.bf16.msra.mxu0 %v2547_v8  ;;  %v2601_v8 = vpack.c.bf16 %v490_v3, %v474_v2  ;;  %v368_v54 = vld [vmem:[#allocation2 + $0x1f8] sm:$0xff]  ;;  %v2679_v56 = vpack.c.bf16 %v335_v50, %v319_v47  ;;  %v351_v60 = vld [vmem:[#allocation2 + $0x170] sm:$0xff]  ;;  %v462_v25 = vld [vmem:[#allocation2 + $0x4e8] sm:$0xff] }
  0x85   : > { %2580 = vmatpush1.bf16.msra.mxu1 %v2579_v9  ;;  %2582 = vmatprep.subr.bf16.mxu0 %v2581_v10  ;;  %v473_v9 = vld [vmem:[#allocation2 + $0x540] sm:$0xff]  ;;  %v2681_v61 = vpack.c.bf16 %v368_v54, %v352_v53  ;;  %v367_v62 = vld [vmem:[#allocation2 + $0x1f0] sm:$0xff]  ;;  %v384_v2 = vld [vmem:[#allocation2 + $0x278] sm:$0xff] }
  0x86   : > { %2614 = vmatprep.subr.bf16.mxu1 %v2613_v14  ;;  %v489_v10 = vld [vmem:[#allocation2 + $0x5c0] sm:$0xff]  ;;  %v506_v14 = vld [vmem:[#allocation2 + $0x648] sm:$0xff]  ;;  %v400_v3 = vld [vmem:[#allocation2 + $0x2f8] sm:$0xff]  ;;  %v2683_v5 = vpack.c.bf16 %v367_v62, %v351_v60 }
  0x87   : > { %852 = vmatmul.mubr.f32.vlgmr.msra.gmra.mrb[2].mxu0 %v3218_v48  ;;  %v2603_v18 = vpack.c.bf16 %v489_v10, %v473_v9  ;;  %v383_v9 = vld [vmem:[#allocation2 + $0x270] sm:$0xff]  ;;  %v2685_v10 = vpack.c.bf16 %v400_v3, %v384_v2  ;;  %v478_v35 = vld [vmem:[#allocation2 + $0x568] sm:$0xff]  ;;  %v480_v37 = vld [vmem:[#allocation2 + $0x578] sm:$0xff] }
  0x88   : > { %923 = vmatmul.mubr.f32.vlgmr.msra.gmra.mrb[2].mxu1 %v3218_v48  ;;  %2584 = vmatpush1.bf16.msra.mxu0 %v2583_v20  ;;  %v2605_v20 = vpack.c.bf16 %v522_v15, %v506_v14  ;;  %v399_v11 = vld [vmem:[#allocation2 + $0x2f0] sm:$0xff]  ;;  %v416_v14 = vld [vmem:[#allocation2 + $0x378] sm:$0xff]  ;;  %v510_v47 = vld [vmem:[#allocation2 + $0x668] sm:$0xff] }
  0x89   : > { %2616 = vmatpush1.bf16.msra.mxu1 %v2615_v21  ;;  %2586 = vmatprep.subr.bf16.mxu0 %v2585_v22  ;;  %v505_v21 = vld [vmem:[#allocation2 + $0x640] sm:$0xff]  ;;  %v432_v15 = vld [vmem:[#allocation2 + $0x3f8] sm:$0xff]  ;;  %v2687_v17 = vpack.c.bf16 %v399_v11, %v383_v9  ;;  %v431_v23 = vld [vmem:[#allocation2 + $0x3f0] sm:$0xff] }
  0x8a   : > { %2618 = vmatprep.subr.bf16.mxu1 %v2617_v26  ;;  %993 = vmatprep.mubr.f32.mxu0 %v3078_v0  ;;  %v521_v22 = vld [vmem:[#allocation2 + $0x6c0] sm:$0xff]  ;;  %v538_v26 = vld [vmem:[#allocation2 + $0x748] sm:$0xff]  ;;  %v512_v50 = vld [vmem:[#allocation2 + $0x678] sm:$0xff] }
  0x8b   : > { %1064 = vmatprep.mubr.f32.mxu1 %v3078_v0  ;;  %v2607_v30 = vpack.c.bf16 %v521_v22, %v505_v21  ;;  %v415_v21 = vld [vmem:[#allocation2 + $0x370] sm:$0xff]  ;;  %v2689_v22 = vpack.c.bf16 %v432_v15, %v416_v14  ;;  %v542_v60 = vld [vmem:[#allocation2 + $0x768] sm:$0xff]  ;;  %v544_v62 = vld [vmem:[#allocation2 + $0x778] sm:$0xff] }
  0x8c   : > { %2588 = vmatpush1.bf16.msra.mxu0 %v2587_v32  ;;  %v2609_v32 = vpack.c.bf16 %v554_v27, %v538_v26  ;;  %v448_v26 = vld [vmem:[#allocation2 + $0x478] sm:$0xff]  ;;  %v1245_v9 = vld [vmem:[#allocation4 + $0x80] sm:$0xff] }
  0x8d   : > { %2620 = vmatpush1.bf16.msra.mxu1 %v2619_v33  ;;  %2590 = vmatprep.subr.bf16.mxu0 %v2589_v34  ;;  %v537_v33 = vld [vmem:[#allocation2 + $0x740] sm:$0xff]  ;;  %v464_v27 = vld [vmem:[#allocation2 + $0x4f8] sm:$0xff] }
  0x8e   : > { %2622 = vmatprep.subr.bf16.mxu1 %v2621_v38  ;;  %v553_v34 = vld [vmem:[#allocation2 + $0x7c0] sm:$0xff]  ;;  %v318_v38 = vld [vmem:[#allocation2 + $0x68] sm:$0xff] }
  0x8f   : > { %v2611_v42 = vpack.c.bf16 %v553_v34, %v537_v33  ;;  %v2693_v33 = vpack.c.bf16 %v464_v27, %v448_v26  ;;  %v463_v34 = vld [vmem:[#allocation2 + $0x4f0] sm:$0xff]  ;;  %v1277_v11 = vld [vmem:[#allocation4 + $0x180] sm:$0xff] }
  0x90   : > { %2592 = vmatpush1.bf16.msra.mxu0 %v2591_v44  ;;  %v2645_v44 = vpack.c.bf16 %v334_v39, %v318_v38  ;;  %v496_v38 = vld [vmem:[#allocation2 + $0x5f8] sm:$0xff] }
  0x91   : > { %2624 = vmatpush1.bf16.msra.mxu1 %v2623_v45  ;;  %2594 = vmatprep.subr.bf16.mxu0 %v2593_v46  ;;  %v317_v45 = vld [vmem:[#allocation2 + $0x60] sm:$0xff] }
  0x92   : > { %2626 = vmatprep.subr.bf16.mxu1 %v2625_v51  ;;  %v333_v46 = vld [vmem:[#allocation2 + $0xe0] sm:$0xff]  ;;  %v350_v51 = vld [vmem:[#allocation2 + $0x168] sm:$0xff] }
  0x93   : > { %v2647_v55 = vpack.c.bf16 %v333_v46, %v317_v45  ;;  %v2697_v45 = vpack.c.bf16 %v496_v38, %v480_v37  ;;  %v495_v46 = vld [vmem:[#allocation2 + $0x5f0] sm:$0xff] }
  0x94   : > { %2596 = vmatpush1.bf16.msra.mxu0 %v2595_v57  ;;  %v2649_v57 = vpack.c.bf16 %v366_v52, %v350_v51  ;;  %v528_v51 = vld [vmem:[#allocation2 + $0x6f8] sm:$0xff] }
  0x95   : > { %2628 = vmatpush1.bf16.msra.mxu1 %v2627_v58  ;;  %2598 = vmatprep.subr.bf16.mxu0 %v2597_v59  ;;  %v349_v58 = vld [vmem:[#allocation2 + $0x160] sm:$0xff] }
  0x96   : > { %2630 = vmatprep.subr.bf16.mxu1 %v2629_v63  ;;  %v365_v59 = vld [vmem:[#allocation2 + $0x1e0] sm:$0xff]  ;;  %v382_v63 = vld [vmem:[#allocation2 + $0x268] sm:$0xff] }
  0x97   : > { %v2651_v4 = vpack.c.bf16 %v365_v59, %v349_v58  ;;  %v2701_v58 = vpack.c.bf16 %v528_v51, %v512_v50  ;;  %v527_v59 = vld [vmem:[#allocation2 + $0x6f0] sm:$0xff] }
  0x98   : > { %2600 = vmatpush1.bf16.msra.mxu0 %v2599_v6  ;;  %v2653_v6 = vpack.c.bf16 %v398_v1, %v382_v63  ;;  %v560_v63 = vld [vmem:[#allocation2 + $0x7f8] sm:$0xff]  ;;  %v1235_v51 = vld [vmem:[#allocation4 + $0x30] sm:$0xff] }
  0x99   : > { %2632 = vmatpush1.bf16.msra.mxu1 %v2631_v7  ;;  %2602 = vmatprep.subr.bf16.mxu0 %v2601_v8  ;;  %v381_v7 = vld [vmem:[#allocation2 + $0x260] sm:$0xff] }
  0x9a   : > { %2634 = vmatprep.subr.bf16.mxu1 %v2633_v12  ;;  %v397_v8 = vld [vmem:[#allocation2 + $0x2e0] sm:$0xff]  ;;  %v414_v12 = vld [vmem:[#allocation2 + $0x368] sm:$0xff] }
  0x9b   : > { %v2655_v16 = vpack.c.bf16 %v397_v8, %v381_v7  ;;  %v2705_v7 = vpack.c.bf16 %v560_v63, %v544_v62  ;;  %v559_v8 = vld [vmem:[#allocation2 + $0x7f0] sm:$0xff]  ;;  %v1237_v63 = vld [vmem:[#allocation4 + $0x40] sm:$0xff] }
  0x9c   : > { %2604 = vmatpush1.bf16.msra.mxu0 %v2603_v18  ;;  %v2657_v18 = vpack.c.bf16 %v430_v13, %v414_v12  ;;  %v1278_v12 = vld [vmem:[#allocation4 + $0x188] sm:$0xff] }
  0x9d   : > { %2636 = vmatpush1.bf16.msra.mxu1 %v2635_v19  ;;  %2606 = vmatprep.subr.bf16.mxu0 %v2605_v20  ;;  %v413_v19 = vld [vmem:[#allocation2 + $0x360] sm:$0xff] }
  0x9e   : > { %2638 = vmatprep.subr.bf16.mxu1 %v2637_v24  ;;  %v429_v20 = vld [vmem:[#allocation2 + $0x3e0] sm:$0xff]  ;;  %v446_v24 = vld [vmem:[#allocation2 + $0x468] sm:$0xff] }
  0x9f   : > { %v2659_v28 = vpack.c.bf16 %v429_v20, %v413_v19  ;;  %v2661_v29 = vpack.c.bf16 %v462_v25, %v446_v24  ;;  %v2741_v19 = vpack.c.bf16 %v1278_v12, %v1277_v11  ;;  %v1262_v20 = vld [vmem:[#allocation4 + $0x108] sm:$0xff]  ;;  %v1280_v24 = vld [vmem:[#allocation4 + $0x198] sm:$0xff]  ;;  %v1239_v12 = vld [vmem:[#allocation4 + $0x50] sm:$0xff] }
  0xa0   : > { %2608 = vmatpush1.bf16.msra.mxu0 %v2607_v30  ;;  %v445_v30 = vld [vmem:[#allocation2 + $0x460] sm:$0xff] }
  0xa1   : > { %2640 = vmatpush1.bf16.msra.mxu1 %v2639_v31  ;;  %2610 = vmatprep.subr.bf16.mxu0 %v2609_v32  ;;  %v461_v31 = vld [vmem:[#allocation2 + $0x4e0] sm:$0xff]  ;;  %v447_v32 = vld [vmem:[#allocation2 + $0x470] sm:$0xff] }
  0xa2   : > { %2642 = vmatprep.subr.bf16.mxu1 %v2641_v36  ;;  %v494_v36 = vld [vmem:[#allocation2 + $0x5e8] sm:$0xff]  ;;  %v2663_v39 = vpack.c.bf16 %v461_v31, %v445_v30  ;;  %v2695_v40 = vpack.c.bf16 %v463_v34, %v447_v32  ;;  %v1264_v31 = vld [vmem:[#allocation4 + $0x118] sm:$0xff]  ;;  %v1249_v32 = vld [vmem:[#allocation4 + $0xa0] sm:$0xff] }
  0xa3   : > { %v2665_v41 = vpack.c.bf16 %v494_v36, %v478_v35  ;;  %v1281_v34 = vld [vmem:[#allocation4 + $0x1a0] sm:$0xff]  ;;  %v1282_v35 = vld [vmem:[#allocation4 + $0x1a8] sm:$0xff] }
  0xa4   : > { %2612 = vmatpush1.bf16.msra.mxu0 %v2611_v42  ;;  %v477_v42 = vld [vmem:[#allocation2 + $0x560] sm:$0xff] }
  0xa5   : > { %2644 = vmatpush1.bf16.msra.mxu1 %v2643_v43  ;;  %2646 = vmatprep.subr.bf16.mxu0 %v2645_v44  ;;  %v493_v43 = vld [vmem:[#allocation2 + $0x5e0] sm:$0xff]  ;;  %v479_v44 = vld [vmem:[#allocation2 + $0x570] sm:$0xff] }
  0xa6   : > { %2678 = vmatprep.subr.bf16.mxu1 %v2677_v49  ;;  %v526_v49 = vld [vmem:[#allocation2 + $0x6e8] sm:$0xff]  ;;  %v2667_v52 = vpack.c.bf16 %v493_v43, %v477_v42  ;;  %v2699_v53 = vpack.c.bf16 %v495_v46, %v479_v44  ;;  %v2749_v42 = vpack.c.bf16 %v1282_v35, %v1281_v34  ;;  %v1251_v44 = vld [vmem:[#allocation4 + $0xb0] sm:$0xff] }
  0xa7   : > { %994 = vmatmul.mubr.f32.vlgmr.msra.gmra.mrb[4].mxu0 %v3218_v48  ;;  %v2669_v54 = vpack.c.bf16 %v526_v49, %v510_v47  ;;  %v1266_v43 = vld [vmem:[#allocation4 + $0x128] sm:$0xff]  ;;  %v1283_v46 = vld [vmem:[#allocation4 + $0x1b0] sm:$0xff]  ;;  %v1284_v47 = vld [vmem:[#allocation4 + $0x1b8] sm:$0xff] }
  0xa8   : > { %1065 = vmatmul.mubr.f32.vlgmr.msra.gmra.mrb[4].mxu1 %v3218_v48  ;;  %2648 = vmatpush1.bf16.msra.mxu0 %v2647_v55  ;;  %v509_v55 = vld [vmem:[#allocation2 + $0x660] sm:$0xff]  ;;  %v1243_v35 = vld [vmem:[#allocation4 + $0x70] sm:$0xff] }
  0xa9   : > { %2680 = vmatpush1.bf16.msra.mxu1 %v2679_v56  ;;  %2650 = vmatprep.subr.bf16.mxu0 %v2649_v57  ;;  %v525_v56 = vld [vmem:[#allocation2 + $0x6e0] sm:$0xff]  ;;  %v511_v57 = vld [vmem:[#allocation2 + $0x670] sm:$0xff] }
  0xaa   : > { %2682 = vmatprep.subr.bf16.mxu1 %v2681_v61  ;;  %1135 = vmatprep.mubr.f32.mxu0 %v3078_v0  ;;  %v558_v61 = vld [vmem:[#allocation2 + $0x7e8] sm:$0xff]  ;;  %v2671_v1 = vpack.c.bf16 %v525_v56, %v509_v55  ;;  %v2703_v2 = vpack.c.bf16 %v527_v59, %v511_v57  ;;  %v1268_v55 = vld [vmem:[#allocation4 + $0x138] sm:$0xff]  ;;  %v1253_v56 = vld [vmem:[#allocation4 + $0xc0] sm:$0xff] }
  0xab   : > { %1206 = vmatprep.mubr.f32.mxu1 %v3078_v0  ;;  %v2691_v0 = vpack.c.bf16 %v431_v23, %v415_v21  ;;  %v2673_v3 = vpack.c.bf16 %v558_v61, %v542_v60  ;;  %v1247_v21 = vld [vmem:[#allocation4 + $0x90] sm:$0xff]  ;;  %v1254_v57 = vld [vmem:[#allocation4 + $0xc8] sm:$0xff] }
  0xac   : > { %2652 = vmatpush1.bf16.msra.mxu0 %v2651_v4  ;;  %v541_v4 = vld [vmem:[#allocation2 + $0x760] sm:$0xff]  ;;  %v1279_v23 = vld [vmem:[#allocation4 + $0x190] sm:$0xff]  ;;  %v1286_v59 = vld [vmem:[#allocation4 + $0x1c8] sm:$0xff]  ;;  %v2725_v62 = vpack.c.bf16 %v1254_v57, %v1253_v56 }
  0xad   : > { %2684 = vmatpush1.bf16.msra.mxu1 %v2683_v5  ;;  %2654 = vmatprep.subr.bf16.mxu0 %v2653_v6  ;;  %v557_v5 = vld [vmem:[#allocation2 + $0x7e0] sm:$0xff]  ;;  %v543_v6 = vld [vmem:[#allocation2 + $0x770] sm:$0xff]  ;;  %v2745_v30 = vpack.c.bf16 %v1280_v24, %v1279_v23 }
  0xae   : > { %2686 = vmatprep.subr.bf16.mxu1 %v2685_v10  ;;  %v1246_v10 = vld [vmem:[#allocation4 + $0x88] sm:$0xff]  ;;  %v2675_v13 = vpack.c.bf16 %v557_v5, %v541_v4  ;;  %v2707_v14 = vpack.c.bf16 %v559_v8, %v543_v6  ;;  %v1255_v5 = vld [vmem:[#allocation4 + $0xd0] sm:$0xff]  ;;  %v1256_v6 = vld [vmem:[#allocation4 + $0xd8] sm:$0xff] }
  0xaf   : > { %v2709_v15 = vpack.c.bf16 %v1246_v10, %v1245_v9  ;;  %v1270_v4 = vld [vmem:[#allocation4 + $0x148] sm:$0xff]  ;;  %v1288_v8 = vld [vmem:[#allocation4 + $0x1d8] sm:$0xff]  ;;  %v2729_v11 = vpack.c.bf16 %v1256_v6, %v1255_v5  ;;  %v1241_v24 = vld [vmem:[#allocation4 + $0x60] sm:$0xff] }
  0xb0   : > { %2656 = vmatpush1.bf16.msra.mxu0 %v2655_v16  ;;  %v1229_v16 = vld [vmem:[#allocation4] sm:$0xff]  ;;  %v1326_v6 = vld [vmem:[#allocation4 + $0x308] sm:$0xff] }
  0xb1   : > { %2688 = vmatpush1.bf16.msra.mxu1 %v2687_v17  ;;  %2658 = vmatprep.subr.bf16.mxu0 %v2657_v18  ;;  %v1230_v17 = vld [vmem:[#allocation4 + $0x8] sm:$0xff]  ;;  %v1261_v18 = vld [vmem:[#allocation4 + $0x100] sm:$0xff] }
  0xb2   : > { %2690 = vmatprep.subr.bf16.mxu1 %v2689_v22  ;;  %v1248_v22 = vld [vmem:[#allocation4 + $0x98] sm:$0xff]  ;;  %v2711_v25 = vpack.c.bf16 %v1230_v17, %v1229_v16  ;;  %v2743_v26 = vpack.c.bf16 %v1262_v20, %v1261_v18  ;;  %v1257_v17 = vld [vmem:[#allocation4 + $0xe0] sm:$0xff]  ;;  %v1258_v18 = vld [vmem:[#allocation4 + $0xe8] sm:$0xff] }
  0xb3   : > { %v2713_v27 = vpack.c.bf16 %v1248_v22, %v1247_v21  ;;  %v1272_v16 = vld [vmem:[#allocation4 + $0x158] sm:$0xff]  ;;  %v1290_v20 = vld [vmem:[#allocation4 + $0x1e8] sm:$0xff]  ;;  %v2733_v23 = vpack.c.bf16 %v1258_v18, %v1257_v17 }
  0xb4   : > { %2660 = vmatpush1.bf16.msra.mxu0 %v2659_v28  ;;  %v1231_v28 = vld [vmem:[#allocation4 + $0x10] sm:$0xff] }
  0xb5   : > { %2692 = vmatpush1.bf16.msra.mxu1 %v2691_v0  ;;  %2662 = vmatprep.subr.bf16.mxu0 %v2661_v29  ;;  %v1232_v0 = vld [vmem:[#allocation4 + $0x18] sm:$0xff]  ;;  %v1263_v29 = vld [vmem:[#allocation4 + $0x110] sm:$0xff] }
  0xb6   : > { %2694 = vmatprep.subr.bf16.mxu1 %v2693_v33  ;;  %v1250_v33 = vld [vmem:[#allocation4 + $0xa8] sm:$0xff]  ;;  %v2715_v36 = vpack.c.bf16 %v1232_v0, %v1231_v28  ;;  %v2747_v37 = vpack.c.bf16 %v1264_v31, %v1263_v29  ;;  %v1259_v0 = vld [vmem:[#allocation4 + $0xf0] sm:$0xff]  ;;  %v1260_v29 = vld [vmem:[#allocation4 + $0xf8] sm:$0xff] }
  0xb7   : > { %v2717_v38 = vpack.c.bf16 %v1250_v33, %v1249_v32  ;;  %v1274_v28 = vld [vmem:[#allocation4 + $0x168] sm:$0xff]  ;;  %v1292_v31 = vld [vmem:[#allocation4 + $0x1f8] sm:$0xff]  ;;  %v2737_v34 = vpack.c.bf16 %v1260_v29, %v1259_v0 }
  0xb8   : > { %2664 = vmatpush1.bf16.msra.mxu0 %v2663_v39  ;;  %v1233_v39 = vld [vmem:[#allocation4 + $0x20] sm:$0xff] }
  0xb9   : > { %2696 = vmatpush1.bf16.msra.mxu1 %v2695_v40  ;;  %2666 = vmatprep.subr.bf16.mxu0 %v2665_v41  ;;  %v1234_v40 = vld [vmem:[#allocation4 + $0x28] sm:$0xff]  ;;  %v1265_v41 = vld [vmem:[#allocation4 + $0x120] sm:$0xff] }
  0xba   : > { %2698 = vmatprep.subr.bf16.mxu1 %v2697_v45  ;;  %v1252_v45 = vld [vmem:[#allocation4 + $0xb8] sm:$0xff]  ;;  %v2719_v49 = vpack.c.bf16 %v1234_v40, %v1233_v39  ;;  %v1309_v40 = vld [vmem:[#allocation4 + $0x280] sm:$0xff] }
  0xbb   : > { %v2721_v50 = vpack.c.bf16 %v1252_v45, %v1251_v44  ;;  %v1276_v39 = vld [vmem:[#allocation4 + $0x178] sm:$0xff] }
  0xbc   : > { %2668 = vmatpush1.bf16.msra.mxu0 %v2667_v52  ;;  %v1236_v52 = vld [vmem:[#allocation4 + $0x38] sm:$0xff] }
  0xbd   : > { %2700 = vmatpush1.bf16.msra.mxu1 %v2699_v53  ;;  %2670 = vmatprep.subr.bf16.mxu0 %v2669_v54  ;;  %v1267_v53 = vld [vmem:[#allocation4 + $0x130] sm:$0xff]  ;;  %v2753_v54 = vpack.c.bf16 %v1284_v47, %v1283_v46  ;;  %v2723_v60 = vpack.c.bf16 %v1236_v52, %v1235_v51  ;;  %v3240_v51 = vld [vmem:[%s3322_s2] sm:$0xff] }
  0xbe   : > { %2702 = vmatprep.subr.bf16.mxu1 %v2701_v58  ;;  %v1285_v58 = vld [vmem:[#allocation4 + $0x1c0] sm:$0xff]  ;;  %v2755_v61 = vpack.c.bf16 %v1268_v55, %v1267_v53 }
  0xc0   : > { %2672 = vmatpush1.bf16.msra.mxu0 %v2671_v1  ;;  %v1238_v1 = vld [vmem:[#allocation4 + $0x48] sm:$0xff] }
  0xc1   : > { %2704 = vmatpush1.bf16.msra.mxu1 %v2703_v2  ;;  %2674 = vmatprep.subr.bf16.mxu0 %v2673_v3  ;;  %v1269_v2 = vld [vmem:[#allocation4 + $0x140] sm:$0xff]  ;;  %v2757_v3 = vpack.c.bf16 %v1286_v59, %v1285_v58  ;;  %v2727_v9 = vpack.c.bf16 %v1238_v1, %v1237_v63  ;;  %v1294_v1 = vld [vmem:[#allocation4 + $0x208] sm:$0xff] }
  0xc2   : > { %2706 = vmatprep.subr.bf16.mxu1 %v2705_v7  ;;  %v1287_v7 = vld [vmem:[#allocation4 + $0x1d0] sm:$0xff]  ;;  %v2759_v10 = vpack.c.bf16 %v1270_v4, %v1269_v2  ;;  %v1293_v63 = vld [vmem:[#allocation4 + $0x200] sm:$0xff] }
  0xc3   : > { %v1325_v2 = vld [vmem:[#allocation4 + $0x300] sm:$0xff] }
  0xc4   : > { %2676 = vmatpush1.bf16.msra.mxu0 %v2675_v13  ;;  %v1240_v13 = vld [vmem:[#allocation4 + $0x58] sm:$0xff]  ;;  %v2807_v17 = vpack.c.bf16 %v1326_v6, %v1325_v2  ;;  %v1319_v2 = vld [vmem:[#allocation4 + $0x2d0] sm:$0xff] }
  0xc5   : > { %2708 = vmatpush1.bf16.msra.mxu1 %v2707_v14  ;;  %2710 = vmatprep.subr.bf16.mxu0 %v2709_v15  ;;  %v1271_v14 = vld [vmem:[#allocation4 + $0x150] sm:$0xff]  ;;  %v2761_v15 = vpack.c.bf16 %v1288_v8, %v1287_v7  ;;  %v2731_v21 = vpack.c.bf16 %v1240_v13, %v1239_v12  ;;  %v1312_v8 = vld [vmem:[#allocation4 + $0x298] sm:$0xff] }
  0xc6   : > { %2742 = vmatprep.subr.bf16.mxu1 %v2741_v19  ;;  %v1289_v19 = vld [vmem:[#allocation4 + $0x1e0] sm:$0xff]  ;;  %v2763_v22 = vpack.c.bf16 %v1272_v16, %v1271_v14  ;;  %v1311_v7 = vld [vmem:[#allocation4 + $0x290] sm:$0xff]  ;;  %v1344_v12 = vld [vmem:[#allocation4 + $0x398] sm:$0xff] }
  0xc7   : > { %1136 = vmatmul.mubr.f32.vlgmr.msra.gmra.mrb[6].mxu0 %v3218_v48  ;;  %v2777_v18 = vpack.c.bf16 %v1312_v8, %v1311_v7 }
  0xc8   : > { %1207 = vmatmul.mubr.f32.vlgmr.msra.gmra.mrb[6].mxu1 %v3218_v48  ;;  %2712 = vmatpush3.bf16.msra.mxu0 %v2711_v25  ;;  %v2751_v48 = vpack.c.bf16 %v1266_v43, %v1265_v41  ;;  %v1242_v25 = vld [vmem:[#allocation4 + $0x68] sm:$0xff] }
  0xc9   : > { %2744 = vmatpush3.bf16.msra.mxu1 %v2743_v26  ;;  %2714 = vmatprep.subr.bf16.mxu0 %v2713_v27  ;;  %v1273_v26 = vld [vmem:[#allocation4 + $0x160] sm:$0xff]  ;;  %v2765_v27 = vpack.c.bf16 %v1290_v20, %v1289_v19  ;;  %v2735_v32 = vpack.c.bf16 %v1242_v25, %v1241_v24  ;;  %v1310_v41 = vld [vmem:[#allocation4 + $0x288] sm:$0xff]  ;;  %v1295_v19 = vld [vmem:[#allocation4 + $0x210] sm:$0xff] }
  0xca   : > { %2746 = vmatprep.subr.bf16.mxu1 %v2745_v30  ;;  %v1291_v30 = vld [vmem:[#allocation4 + $0x1f0] sm:$0xff]  ;;  %v2767_v33 = vpack.c.bf16 %v1274_v28, %v1273_v26  ;;  %v1342_v43 = vld [vmem:[#allocation4 + $0x388] sm:$0xff]  ;;  %v2773_v46 = vpack.c.bf16 %v1310_v41, %v1309_v40  ;;  %v1296_v20 = vld [vmem:[#allocation4 + $0x218] sm:$0xff] }
  0xcb   : > { %v1313_v24 = vld [vmem:[#allocation4 + $0x2a0] sm:$0xff]  ;;  %v1314_v25 = vld [vmem:[#allocation4 + $0x2a8] sm:$0xff]  ;;  %v2779_v28 = vpack.c.bf16 %v1296_v20, %v1295_v19 }
  0xcc   : > { %2716 = vmatpush3.bf16.msra.mxu0 %v2715_v36  ;;  %v1244_v36 = vld [vmem:[#allocation4 + $0x78] sm:$0xff]  ;;  %v1345_v26 = vld [vmem:[#allocation4 + $0x3a0] sm:$0xff]  ;;  %v2781_v29 = vpack.c.bf16 %v1314_v25, %v1313_v24 }
  0xcd   : > { %2748 = vmatpush3.bf16.msra.mxu1 %v2747_v37  ;;  %2718 = vmatprep.subr.bf16.mxu0 %v2717_v38  ;;  %v1275_v37 = vld [vmem:[#allocation4 + $0x170] sm:$0xff]  ;;  %v2769_v38 = vpack.c.bf16 %v1292_v31, %v1291_v30  ;;  %v2739_v44 = vpack.c.bf16 %v1244_v36, %v1243_v35  ;;  %v1297_v30 = vld [vmem:[#allocation4 + $0x220] sm:$0xff]  ;;  %v1298_v31 = vld [vmem:[#allocation4 + $0x228] sm:$0xff] }
  0xce   : > { %2750 = vmatprep.subr.bf16.mxu1 %v2749_v42  ;;  %v1341_v42 = vld [vmem:[#allocation4 + $0x380] sm:$0xff]  ;;  %v2771_v45 = vpack.c.bf16 %v1276_v39, %v1275_v37  ;;  %v1315_v35 = vld [vmem:[#allocation4 + $0x2b0] sm:$0xff]  ;;  %v1316_v36 = vld [vmem:[#allocation4 + $0x2b8] sm:$0xff]  ;;  %v2783_v39 = vpack.c.bf16 %v1298_v31, %v1297_v30 }
  0xcf   : > { %v2805_v47 = vpack.c.bf16 %v1342_v43, %v1341_v42  ;;  %v1347_v37 = vld [vmem:[#allocation4 + $0x3b0] sm:$0xff]  ;;  %v2785_v41 = vpack.c.bf16 %v1316_v36, %v1315_v35  ;;  %v1300_v43 = vld [vmem:[#allocation4 + $0x238] sm:$0xff]  ;;  %v1337_v24 = vld [vmem:[#allocation4 + $0x360] sm:$0xff] }
  0xd0   : > { %2720 = vmatpush3.bf16.msra.mxu0 %v2719_v49  ;;  %v565_v49 = vlaneseq  ;;  %v1299_v42 = vld [vmem:[#allocation4 + $0x230] sm:$0xff] }
  0xd1   : > { %2752 = vmatpush3.bf16.msra.mxu1 %v2751_v48  ;;  %2722 = vmatprep.subr.bf16.mxu0 %v2721_v50  ;;  %v1355_v31 = vld [vmem:[#allocation4 + $0x3f0] sm:$0xff] }
  0xd2   : > { %2754 = vmatprep.subr.bf16.mxu1 %v2753_v54  ;;  %v3234_v48 = vshrl.u32 %v565_v49, 7  ;;  %v1318_v49 = vld [vmem:[#allocation4 + $0x2c8] sm:$0xff] }
  0xd4   : > { %2724 = vmatpush3.bf16.msra.mxu0 %v2723_v60  ;;  %v567_v50 = vsub.s32 0, %v3234_v48  ;;  %v575_v52 = vsub.s32 2, %v3234_v48  ;;  %v571_v53 = vsub.s32 1, %v3234_v48  ;;  %v579_v54 = vsub.s32 3, %v3234_v48 }
  0xd5   : > { %2756 = vmatpush3.bf16.msra.mxu1 %v2755_v61  ;;  %2726 = vmatprep.subr.bf16.mxu0 %v2725_v62  ;;  %v595_v30 = vsub.s32 7, %v3234_v48 }
  0xd6   : > { %2758 = vmatprep.subr.bf16.mxu1 %v2757_v3  ;;  %v568_v55 = vrot.slane %v3240_v51, %v567_v50  ;;  %v576_v56 = vrot.slane %v3240_v51, %v575_v52  ;;  %v572_v57 = vrot.slane %v3240_v51, %v571_v53  ;;  %v580_v58 = vrot.slane %v3240_v51, %v579_v54 }
  0xd8   : > { %2728 = vmatpush3.bf16.msra.mxu0 %v2727_v9 }
  0xd9   : > { %2760 = vmatpush3.bf16.msra.mxu1 %v2759_v10  ;;  %2730 = vmatprep.subr.bf16.mxu0 %v2729_v11  ;;  %v1343_v11 = vld [vmem:[#allocation4 + $0x390] sm:$0xff] }
  0xda   : > { %2762 = vmatprep.subr.bf16.mxu1 %v2761_v15  ;;  %v2775_v15 = vpack.c.bf16 %v1294_v1, %v1293_v63  ;;  %v1334_v1 = vld [vmem:[#allocation4 + $0x348] sm:$0xff] }
  0xdc   : > { %2732 = vmatpush3.bf16.msra.mxu0 %v2731_v21  ;;  %v1327_v21 = vld [vmem:[#allocation4 + $0x310] sm:$0xff] }
  0xdd   : > { %2764 = vmatpush3.bf16.msra.mxu1 %v2763_v22  ;;  %2734 = vmatprep.subr.bf16.mxu0 %v2733_v23  ;;  %v2809_v22 = vpack.c.bf16 %v1344_v12, %v1343_v11  ;;  %v1328_v23 = vld [vmem:[#allocation4 + $0x318] sm:$0xff]  ;;  %v1335_v11 = vld [vmem:[#allocation4 + $0x350] sm:$0xff] }
  0xde   : > { %2766 = vmatprep.subr.bf16.mxu1 %v2765_v27  ;;  %v1346_v27 = vld [vmem:[#allocation4 + $0x3a8] sm:$0xff]  ;;  %v2811_v0 = vpack.c.bf16 %v1328_v23, %v1327_v21  ;;  %v583_v21 = vsub.s32 4, %v3234_v48 }
  0xdf   : > { %v1306_v23 = vld [vmem:[#allocation4 + $0x268] sm:$0xff] }
  0xe0   : > { %2736 = vmatpush3.bf16.msra.mxu0 %v2735_v32  ;;  %v1329_v32 = vld [vmem:[#allocation4 + $0x320] sm:$0xff] }
  0xe1   : > { %2768 = vmatpush3.bf16.msra.mxu1 %v2767_v33  ;;  %2738 = vmatprep.subr.bf16.mxu0 %v2737_v34  ;;  %v2813_v33 = vpack.c.bf16 %v1346_v27, %v1345_v26  ;;  %v1330_v34 = vld [vmem:[#allocation4 + $0x328] sm:$0xff]  ;;  %v591_v26 = vsub.s32 6, %v3234_v48 }
  0xe2   : > { %2770 = vmatprep.subr.bf16.mxu1 %v2769_v38  ;;  %v1348_v38 = vld [vmem:[#allocation4 + $0x3b8] sm:$0xff]  ;;  %v2815_v40 = vpack.c.bf16 %v1330_v34, %v1329_v32  ;;  %v1338_v27 = vld [vmem:[#allocation4 + $0x368] sm:$0xff]  ;;  %v584_v34 = vrot.slane %v3240_v51, %v583_v21 }
  0xe3   : > { %v1356_v32 = vld [vmem:[#allocation4 + $0x3f8] sm:$0xff]  ;;  %v2831_v35 = vpack.c.bf16 %v1338_v27, %v1337_v24  ;;  %v1377_v24 = vld [vmem:[#allocation4 + $0x4a0] sm:$0xff] }
  0xe4   : > { %2740 = vmatpush3.bf16.msra.mxu0 %v2739_v44  ;;  %v1331_v44 = vld [vmem:[#allocation4 + $0x330] sm:$0xff]  ;;  %v1409_v27 = vld [vmem:[#allocation4 + $0x5a0] sm:$0xff] }
  0xe5   : > { %2772 = vmatpush3.bf16.msra.mxu1 %v2771_v45  ;;  %2774 = vmatprep.subr.bf16.mxu0 %v2773_v46  ;;  %v2817_v45 = vpack.c.bf16 %v1348_v38, %v1347_v37  ;;  %v1332_v46 = vld [vmem:[#allocation4 + $0x338] sm:$0xff]  ;;  %v1307_v37 = vld [vmem:[#allocation4 + $0x270] sm:$0xff] }
  0xe6   : > { %2806 = vmatprep.subr.bf16.mxu1 %v2805_v47  ;;  %v1317_v47 = vld [vmem:[#allocation4 + $0x2c0] sm:$0xff]  ;;  %v1308_v38 = vld [vmem:[#allocation4 + $0x278] sm:$0xff] }
 0x13a   : > { %v711_v59 = vpop.f32.mrb[0].mxu0 }
 0x13b   : > { %v712_v60 = vadd.f32 %v711_v59, %v568_v55  ;;  %v782_v61 = vpop.f32.mrb[0].mxu1  ;;  %v713_v62 = vpop.f32.mrb[1].mxu0  ;;  %v1349_v55 = vld [vmem:[#allocation4 + $0x3c0] sm:$0xff]  ;;  %v2789_v59 = vpack.c.bf16 %v1318_v49, %v1317_v47  ;;  %v1406_v49 = vld [vmem:[#allocation4 + $0x588] sm:$0xff] }
 0x13c   : > { %v783_v3 = vadd.f32 %v782_v61, %v576_v56  ;;  %v714_v4 = vadd.f32 %v713_v62, %v572_v57  ;;  %v784_v5 = vpop.f32.mrb[1].mxu1  ;;  %v1350_v56 = vld [vmem:[#allocation4 + $0x3c8] sm:$0xff]  ;;  %v2787_v57 = vpack.c.bf16 %v1300_v43, %v1299_v42  ;;  %v1333_v62 = vld [vmem:[#allocation4 + $0x340] sm:$0xff]  ;;  %v2833_v42 = vpack.c.bf16 %v1356_v32, %v1355_v31  ;;  %v1340_v43 = vld [vmem:[#allocation4 + $0x378] sm:$0xff] }
 0x13d   : > { %v1213_v9 = vmax.f32 %v712_v60, 0.0  ;;  %v785_v10 = vadd.f32 %v784_v5, %v580_v58  ;;  %v2819_v58 = vpack.c.bf16 %v1332_v46, %v1331_v44  ;;  %v1301_v60 = vld [vmem:[#allocation4 + $0x240] sm:$0xff]  ;;  %v1302_v61 = vld [vmem:[#allocation4 + $0x248] sm:$0xff]  ;;  %v2821_v63 = vpack.c.bf16 %v1350_v56, %v1349_v55  ;;  %v1352_v5 = vld [vmem:[#allocation4 + $0x3d8] sm:$0xff] }
 0x13e   : > { %v1215_v13 = vmax.f32 %v783_v3, 0.0  ;;  %v1214_v14 = vmax.f32 %v714_v4, 0.0  ;;  %v1320_v3 = vld [vmem:[#allocation4 + $0x2d8] sm:$0xff]  ;;  %v1351_v4 = vld [vmem:[#allocation4 + $0x3d0] sm:$0xff]  ;;  %v2791_v6 = vpack.c.bf16 %v1302_v61, %v1301_v60  ;;  %v2823_v7 = vpack.c.bf16 %v1334_v1, %v1333_v62  ;;  %v1373_v44 = vld [vmem:[#allocation4 + $0x480] sm:$0xff] }
 0x13f   : > { %v1216_v16 = vmax.f32 %v785_v10, 0.0  ;;  %v2793_v8 = vpack.c.bf16 %v1320_v3, %v1319_v2  ;;  %v1304_v10 = vld [vmem:[#allocation4 + $0x258] sm:$0xff]  ;;  %v2825_v12 = vpack.c.bf16 %v1352_v5, %v1351_v4  ;;  %v596_v46 = vrot.slane %v3240_v51, %v595_v30  ;;  %v1405_v47 = vld [vmem:[#allocation4 + $0x580] sm:$0xff]  ;;  %v1390_v5 = vld [vmem:[#allocation4 + $0x508] sm:$0xff] }
 0x140   : > { %1556 = vmatprep.mubr.f32.mxu0 %v1214_v14  ;;  %v1321_v14 = vld [vmem:[#allocation4 + $0x2e0] sm:$0xff]  ;;  %v2803_v56 = vpack.c.bf16 %v1308_v38, %v1307_v37  ;;  %v1394_v37 = vld [vmem:[#allocation4 + $0x528] sm:$0xff]  ;;  %v1379_v38 = vld [vmem:[#allocation4 + $0x4b0] sm:$0xff] }
 0x141   : > { %1626 = vmatprep.mubr.f32.mxu1 %v1216_v16  ;;  %1557 = vmatmul.mubr.f32.vlgmr.msra.gmra.mrb[8].mxu0 %v1213_v9  ;;  %v1303_v9 = vld [vmem:[#allocation4 + $0x250] sm:$0xff]  ;;  %v1353_v16 = vld [vmem:[#allocation4 + $0x3e0] sm:$0xff] }
 0x142   : > { %1627 = vmatmul.mubr.f32.vlgmr.msra.gmra.mrb[8].mxu1 %v1215_v13  ;;  %2776 = vmatpush3.bf16.msra.mxu0 %v2775_v15  ;;  %v1336_v13 = vld [vmem:[#allocation4 + $0x358] sm:$0xff]  ;;  %v1322_v15 = vld [vmem:[#allocation4 + $0x2e8] sm:$0xff]  ;;  %v1357_v62 = vld [vmem:[#allocation4 + $0x400] sm:$0xff] }
 0x143   : > { %2808 = vmatpush3.bf16.msra.mxu1 %v2807_v17  ;;  %2778 = vmatprep.subr.bf16.mxu0 %v2777_v18  ;;  %v1354_v17 = vld [vmem:[#allocation4 + $0x3e8] sm:$0xff]  ;;  %v2795_v18 = vpack.c.bf16 %v1304_v10, %v1303_v9  ;;  %v2827_v19 = vpack.c.bf16 %v1336_v13, %v1335_v11  ;;  %v2797_v20 = vpack.c.bf16 %v1322_v15, %v1321_v14  ;;  %v1389_v1 = vld [vmem:[#allocation4 + $0x500] sm:$0xff]  ;;  %v1407_v10 = vld [vmem:[#allocation4 + $0x590] sm:$0xff] }
 0x144   : > { %2810 = vmatprep.subr.bf16.mxu1 %v2809_v22  ;;  %v1305_v22 = vld [vmem:[#allocation4 + $0x260] sm:$0xff]  ;;  %v2829_v25 = vpack.c.bf16 %v1354_v17, %v1353_v16  ;;  %v1408_v11 = vld [vmem:[#allocation4 + $0x598] sm:$0xff]  ;;  %v2871_v16 = vpack.c.bf16 %v1390_v5, %v1389_v1  ;;  %v1366_v1 = vld [vmem:[#allocation4 + $0x448] sm:$0xff] }
 0x145   : > { %v1384_v5 = vld [vmem:[#allocation4 + $0x4d8] sm:$0xff] }
 0x146   : > { %2780 = vmatpush3.bf16.msra.mxu0 %v2779_v28  ;;  %v587_v28 = vsub.s32 5, %v3234_v48 }
 0x147   : > { %2812 = vmatpush3.bf16.msra.mxu1 %v2811_v0  ;;  %2782 = vmatprep.subr.bf16.mxu0 %v2781_v29  ;;  %v1323_v0 = vld [vmem:[#allocation4 + $0x2f0] sm:$0xff]  ;;  %v1324_v29 = vld [vmem:[#allocation4 + $0x2f8] sm:$0xff] }
 0x148   : > { %2814 = vmatprep.subr.bf16.mxu1 %v2813_v33  ;;  %v2799_v33 = vpack.c.bf16 %v1306_v23, %v1305_v22  ;;  %v2801_v36 = vpack.c.bf16 %v1324_v29, %v1323_v0  ;;  %v2873_v22 = vpack.c.bf16 %v1408_v11, %v1407_v10  ;;  %v1392_v23 = vld [vmem:[#allocation4 + $0x518] sm:$0xff]  ;;  %v1410_v0 = vld [vmem:[#allocation4 + $0x5a8] sm:$0xff]  ;;  %v1367_v11 = vld [vmem:[#allocation4 + $0x450] sm:$0xff] }
 0x14a   : > { %2784 = vmatpush3.bf16.msra.mxu0 %v2783_v39  ;;  %v1339_v39 = vld [vmem:[#allocation4 + $0x370] sm:$0xff] }
 0x14b   : > { %2816 = vmatpush3.bf16.msra.mxu1 %v2815_v40  ;;  %2786 = vmatprep.subr.bf16.mxu0 %v2785_v41  ;;  %v592_v40 = vrot.slane %v3240_v51, %v591_v26  ;;  %v588_v41 = vrot.slane %v3240_v51, %v587_v28  ;;  %v2835_v60 = vpack.c.bf16 %v1340_v43, %v1339_v39  ;;  %v1380_v39 = vld [vmem:[#allocation4 + $0x4b8] sm:$0xff] }
 0x14c   : > { %2818 = vmatprep.subr.bf16.mxu1 %v2817_v45  ;;  %v1374_v45 = vld [vmem:[#allocation4 + $0x488] sm:$0xff]  ;;  %v2869_v51 = vpack.c.bf16 %v1406_v49, %v1405_v47  ;;  %v1395_v47 = vld [vmem:[#allocation4 + $0x530] sm:$0xff] }
 0x14d   : > { %v2837_v61 = vpack.c.bf16 %v1374_v45, %v1373_v44  ;;  %v2849_v44 = vpack.c.bf16 %v1380_v39, %v1379_v38  ;;  %v1363_v45 = vld [vmem:[#allocation4 + $0x430] sm:$0xff] }
 0x14e   : > { %2788 = vmatpush3.bf16.msra.mxu0 %v2787_v57 }
 0x14f   : > { %2820 = vmatpush3.bf16.msra.mxu1 %v2819_v58  ;;  %2790 = vmatprep.subr.bf16.mxu0 %v2789_v59 }
 0x150   : > { %2822 = vmatprep.subr.bf16.mxu1 %v2821_v63  ;;  %v1358_v63 = vld [vmem:[#allocation4 + $0x408] sm:$0xff] }
 0x151   : > { %v2839_v14 = vpack.c.bf16 %v1358_v63, %v1357_v62  ;;  %v1365_v63 = vld [vmem:[#allocation4 + $0x440] sm:$0xff] }
 0x152   : > { %2792 = vmatpush3.bf16.msra.mxu0 %v2791_v6  ;;  %v1375_v6 = vld [vmem:[#allocation4 + $0x490] sm:$0xff] }
 0x153   : > { %2824 = vmatpush3.bf16.msra.mxu1 %v2823_v7  ;;  %2794 = vmatprep.subr.bf16.mxu0 %v2793_v8  ;;  %v1376_v7 = vld [vmem:[#allocation4 + $0x498] sm:$0xff] }
 0x154   : > { %2826 = vmatprep.subr.bf16.mxu1 %v2825_v12  ;;  %v2841_v17 = vpack.c.bf16 %v1376_v7, %v1375_v6  ;;  %v1415_v6 = vld [vmem:[#allocation4 + $0x5d0] sm:$0xff]  ;;  %v1416_v7 = vld [vmem:[#allocation4 + $0x5d8] sm:$0xff] }
 0x156   : > { %2796 = vmatpush3.bf16.msra.mxu0 %v2795_v18  ;;  %v1359_v18 = vld [vmem:[#allocation4 + $0x410] sm:$0xff] }
 0x157   : > { %2828 = vmatpush3.bf16.msra.mxu1 %v2827_v19  ;;  %2798 = vmatprep.subr.bf16.mxu0 %v2797_v20  ;;  %v1360_v19 = vld [vmem:[#allocation4 + $0x418] sm:$0xff]  ;;  %v1391_v20 = vld [vmem:[#allocation4 + $0x510] sm:$0xff] }
 0x158   : > { %2830 = vmatprep.subr.bf16.mxu1 %v2829_v25  ;;  %v1378_v25 = vld [vmem:[#allocation4 + $0x4a8] sm:$0xff]  ;;  %v2843_v29 = vpack.c.bf16 %v1360_v19, %v1359_v18  ;;  %v2875_v31 = vpack.c.bf16 %v1392_v23, %v1391_v20  ;;  %v1417_v18 = vld [vmem:[#allocation4 + $0x5e0] sm:$0xff] }
 0x159   : > { %v2845_v32 = vpack.c.bf16 %v1378_v25, %v1377_v24  ;;  %v1418_v19 = vld [vmem:[#allocation4 + $0x5e8] sm:$0xff]  ;;  %v1369_v25 = vld [vmem:[#allocation4 + $0x460] sm:$0xff] }
 0x15a   : > { %v853_v55 = vpop.f32.mrb[2].mxu0  ;;  %2800 = vmatpush3.bf16.msra.mxu0 %v2799_v33  ;;  %v1361_v33 = vld [vmem:[#allocation4 + $0x420] sm:$0xff] }
 0x15b   : > { %v854_v57 = vadd.f32 %v853_v55, %v584_v34  ;;  %v924_v58 = vpop.f32.mrb[2].mxu1  ;;  %2832 = vmatpush3.bf16.msra.mxu1 %v2831_v35  ;;  %v855_v59 = vpop.f32.mrb[3].mxu0  ;;  %2802 = vmatprep.subr.bf16.mxu0 %v2801_v36  ;;  %v1362_v34 = vld [vmem:[#allocation4 + $0x428] sm:$0xff]  ;;  %v1393_v35 = vld [vmem:[#allocation4 + $0x520] sm:$0xff]  ;;  %v2877_v36 = vpack.c.bf16 %v1410_v0, %v1409_v27  ;;  %v1396_v55 = vld [vmem:[#allocation4 + $0x538] sm:$0xff] }
 0x15c   : > { %v925_v2 = vadd.f32 %v924_v58, %v592_v40  ;;  %v856_v3 = vadd.f32 %v855_v59, %v588_v41  ;;  %v926_v4 = vpop.f32.mrb[3].mxu1  ;;  %2834 = vmatprep.subr.bf16.mxu1 %v2833_v42  ;;  %v1411_v40 = vld [vmem:[#allocation4 + $0x5b0] sm:$0xff]  ;;  %v1412_v41 = vld [vmem:[#allocation4 + $0x5b8] sm:$0xff]  ;;  %v2847_v42 = vpack.c.bf16 %v1362_v34, %v1361_v33  ;;  %v2879_v43 = vpack.c.bf16 %v1394_v37, %v1393_v35  ;;  %v1413_v58 = vld [vmem:[#allocation4 + $0x5c0] sm:$0xff] }
 0x15d   : > { %v1217_v8 = vmax.f32 %v854_v57, 0.0  ;;  %v927_v9 = vadd.f32 %v926_v4, %v596_v46  ;;  %v1364_v46 = vld [vmem:[#allocation4 + $0x438] sm:$0xff]  ;;  %v2881_v49 = vpack.c.bf16 %v1412_v41, %v1411_v40  ;;  %v1382_v57 = vld [vmem:[#allocation4 + $0x4c8] sm:$0xff]  ;;  %v1401_v0 = vld [vmem:[#allocation4 + $0x560] sm:$0xff] }
 0x15e   : > { %v1219_v12 = vmax.f32 %v925_v2, 0.0  ;;  %v1218_v13 = vmax.f32 %v856_v3, 0.0  ;;  %2804 = vmatpush3.bf16.msra.mxu0 %v2803_v56  ;;  %v1381_v56 = vld [vmem:[#allocation4 + $0x4c0] sm:$0xff]  ;;  %v1414_v59 = vld [vmem:[#allocation4 + $0x5c8] sm:$0xff]  ;;  %v1388_v33 = vld [vmem:[#allocation4 + $0x4f8] sm:$0xff] }
 0x15f   : > { %v1220_v15 = vmax.f32 %v927_v9, 0.0  ;;  %2836 = vmatpush3.bf16.msra.mxu1 %v2835_v60  ;;  %2838 = vmatprep.subr.bf16.mxu0 %v2837_v61  ;;  %v2851_v60 = vpack.c.bf16 %v1364_v46, %v1363_v45  ;;  %v2883_v61 = vpack.c.bf16 %v1396_v55, %v1395_v47  ;;  %v2853_v62 = vpack.c.bf16 %v1382_v57, %v1381_v56  ;;  %v1397_v2 = vld [vmem:[#allocation4 + $0x540] sm:$0xff]  ;;  %v1398_v4 = vld [vmem:[#allocation4 + $0x548] sm:$0xff]  ;;  %v1419_v34 = vld [vmem:[#allocation4 + $0x5f0] sm:$0xff] }
 0x160   : > { %1696 = vmatprep.mubr.f32.mxu0 %v1218_v13  ;;  %2870 = vmatprep.subr.bf16.mxu1 %v2869_v51  ;;  %v2885_v3 = vpack.c.bf16 %v1414_v59, %v1413_v58  ;;  %v1383_v51 = vld [vmem:[#allocation4 + $0x4d0] sm:$0xff]  ;;  %v2887_v9 = vpack.c.bf16 %v1398_v4, %v1397_v2  ;;  %v1370_v27 = vld [vmem:[#allocation4 + $0x468] sm:$0xff]  ;;  %v1420_v35 = vld [vmem:[#allocation4 + $0x5f8] sm:$0xff] }
 0x161   : > { %1766 = vmatprep.mubr.f32.mxu1 %v1220_v15  ;;  %1697 = vmatmul.mubr.f32.vlgmr.msra.gmra.mrb[10].mxu0 %v1217_v8  ;;  %v2855_v8 = vpack.c.bf16 %v1366_v1, %v1365_v63  ;;  %v2857_v10 = vpack.c.bf16 %v1384_v5, %v1383_v51  ;;  %v1399_v13 = vld [vmem:[#allocation4 + $0x550] sm:$0xff]  ;;  %v1400_v15 = vld [vmem:[#allocation4 + $0x558] sm:$0xff]  ;;  %v2897_v45 = vpack.c.bf16 %v1420_v35, %v1419_v34  ;;  %v1437_v47 = vld [vmem:[#allocation4 + $0x680] sm:$0xff] }
 0x162   : > { %1767 = vmatmul.mubr.f32.vlgmr.msra.gmra.mrb[10].mxu1 %v1219_v12  ;;  %2840 = vmatpush3.bf16.msra.mxu0 %v2839_v14  ;;  %v1368_v12 = vld [vmem:[#allocation4 + $0x458] sm:$0xff]  ;;  %v2889_v14 = vpack.c.bf16 %v1416_v7, %v1415_v6  ;;  %v2891_v23 = vpack.c.bf16 %v1400_v15, %v1399_v13  ;;  %v1371_v40 = vld [vmem:[#allocation4 + $0x470] sm:$0xff]  ;;  %v1469_v55 = vld [vmem:[#allocation4 + $0x780] sm:$0xff] }
 0x163   : > { %2872 = vmatpush3.bf16.msra.mxu1 %v2871_v16  ;;  %2842 = vmatprep.subr.bf16.mxu0 %v2841_v17  ;;  %v1385_v16 = vld [vmem:[#allocation4 + $0x4e0] sm:$0xff]  ;;  %v1386_v17 = vld [vmem:[#allocation4 + $0x4e8] sm:$0xff]  ;;  %v2859_v20 = vpack.c.bf16 %v1368_v12, %v1367_v11  ;;  %v1372_v41 = vld [vmem:[#allocation4 + $0x478] sm:$0xff] }
 0x164   : > { %2874 = vmatprep.subr.bf16.mxu1 %v2873_v22  ;;  %v3276_v22 = vld [vmem:[%s3322_s2 + $0x8] sm:$0xff]  ;;  %v2861_v24 = vpack.c.bf16 %v1386_v17, %v1385_v16  ;;  %v1404_v46 = vld [vmem:[#allocation4 + $0x578] sm:$0xff]  ;;  %v2867_v58 = vpack.c.bf16 %v1372_v41, %v1371_v40  ;;  %v1453_v1 = vld [vmem:[#allocation4 + $0x700] sm:$0xff] }
 0x165   : > { %v600_v37 = vrot.slane %v3276_v22, %v567_v50  ;;  %v612_v50 = vrot.slane %v3276_v22, %v579_v54  ;;  %v1470_v56 = vld [vmem:[#allocation4 + $0x788] sm:$0xff]  ;;  %v1439_v5 = vld [vmem:[#allocation4 + $0x690] sm:$0xff]  ;;  %v1440_v6 = vld [vmem:[#allocation4 + $0x698] sm:$0xff] }
 0x166   : > { %2844 = vmatpush3.bf16.msra.mxu0 %v2843_v29  ;;  %v2893_v29 = vpack.c.bf16 %v1418_v19, %v1417_v18  ;;  %v1422_v63 = vld [vmem:[#allocation4 + $0x608] sm:$0xff]  ;;  %v2933_v54 = vpack.c.bf16 %v1470_v56, %v1469_v55  ;;  %v2905_v16 = vpack.c.bf16 %v1440_v6, %v1439_v5  ;;  %v1423_v17 = vld [vmem:[#allocation4 + $0x610] sm:$0xff]  ;;  %v1424_v18 = vld [vmem:[#allocation4 + $0x618] sm:$0xff] }
 0x167   : > { %2876 = vmatpush3.bf16.msra.mxu1 %v2875_v31  ;;  %2846 = vmatprep.subr.bf16.mxu0 %v2845_v32  ;;  %v1402_v31 = vld [vmem:[#allocation4 + $0x568] sm:$0xff]  ;;  %v1387_v32 = vld [vmem:[#allocation4 + $0x4f0] sm:$0xff]  ;;  %v1457_v35 = vld [vmem:[#allocation4 + $0x720] sm:$0xff] }
 0x168   : > { %2878 = vmatprep.subr.bf16.mxu1 %v2877_v36  ;;  %v2863_v36 = vpack.c.bf16 %v1370_v27, %v1369_v25  ;;  %v2895_v38 = vpack.c.bf16 %v1402_v31, %v1401_v0  ;;  %v2865_v39 = vpack.c.bf16 %v1388_v33, %v1387_v32  ;;  %v1454_v51 = vld [vmem:[#allocation4 + $0x708] sm:$0xff]  ;;  %v1455_v19 = vld [vmem:[#allocation4 + $0x710] sm:$0xff]  ;;  %v1473_v27 = vld [vmem:[#allocation4 + $0x7a0] sm:$0xff] }
 0x169   : > { %v2935_v15 = vpack.c.bf16 %v1454_v51, %v1453_v1  ;;  %v1442_v25 = vld [vmem:[#allocation4 + $0x6a8] sm:$0xff]  ;;  %v1425_v33 = vld [vmem:[#allocation4 + $0x620] sm:$0xff]  ;;  %v1475_v40 = vld [vmem:[#allocation4 + $0x7b0] sm:$0xff] }
 0x16a   : > { %2848 = vmatpush3.bf16.msra.mxu0 %v2847_v42  ;;  %v1403_v42 = vld [vmem:[#allocation4 + $0x570] sm:$0xff]  ;;  %v1474_v0 = vld [vmem:[#allocation4 + $0x7a8] sm:$0xff]  ;;  %v1476_v41 = vld [vmem:[#allocation4 + $0x7b8] sm:$0xff] }
 0x16b   : > { %2880 = vmatpush3.bf16.msra.mxu1 %v2879_v43  ;;  %2850 = vmatprep.subr.bf16.mxu0 %v2849_v44  ;;  %v608_v43 = vrot.slane %v3276_v22, %v575_v52  ;;  %v604_v44 = vrot.slane %v3276_v22, %v571_v53  ;;  %v1426_v34 = vld [vmem:[#allocation4 + $0x628] sm:$0xff]  ;;  %v1445_v55 = vld [vmem:[#allocation4 + $0x6c0] sm:$0xff] }
 0x16c   : > { %2882 = vmatprep.subr.bf16.mxu1 %v2881_v49  ;;  %v1438_v49 = vld [vmem:[#allocation4 + $0x688] sm:$0xff] }
 0x16d   : > { %v2901_v53 = vpack.c.bf16 %v1438_v49, %v1437_v47  ;;  %v1459_v47 = vld [vmem:[#allocation4 + $0x730] sm:$0xff]  ;;  %v2945_v49 = vpack.c.bf16 %v1476_v41, %v1475_v40  ;;  %v1446_v56 = vld [vmem:[#allocation4 + $0x6c8] sm:$0xff] }
 0x16e   : > { %2852 = vmatpush3.bf16.msra.mxu0 %v2851_v60  ;;  %v1462_v1 = vld [vmem:[#allocation4 + $0x748] sm:$0xff]  ;;  %v1467_v41 = vld [vmem:[#allocation4 + $0x770] sm:$0xff] }
 0x16f   : > { %2884 = vmatpush3.bf16.msra.mxu1 %v2883_v61  ;;  %2854 = vmatprep.subr.bf16.mxu0 %v2853_v62  ;;  %v2899_v61 = vpack.c.bf16 %v1404_v46, %v1403_v42  ;;  %v1421_v62 = vld [vmem:[#allocation4 + $0x600] sm:$0xff]  ;;  %v2911_v42 = vpack.c.bf16 %v1426_v34, %v1425_v33  ;;  %v1428_v46 = vld [vmem:[#allocation4 + $0x638] sm:$0xff]  ;;  %v616_v33 = vrot.slane %v3276_v22, %v583_v21 }
 0x170   : > { %2886 = vmatprep.subr.bf16.mxu1 %v2885_v3  ;;  %v2903_v13 = vpack.c.bf16 %v1422_v63, %v1421_v62  ;;  %v1461_v62 = vld [vmem:[#allocation4 + $0x740] sm:$0xff]  ;;  %v628_v21 = vrot.slane %v3276_v22, %v595_v30 }
 0x171   : > { %v2951_v5 = vpack.c.bf16 %v1462_v1, %v1461_v62 }
 0x172   : > { %2856 = vmatpush3.bf16.msra.mxu0 %v2855_v8 }
 0x173   : > { %2888 = vmatpush3.bf16.msra.mxu1 %v2887_v9  ;;  %2858 = vmatprep.subr.bf16.mxu0 %v2857_v10  ;;  %v1471_v9 = vld [vmem:[#allocation4 + $0x790] sm:$0xff]  ;;  %v1472_v10 = vld [vmem:[#allocation4 + $0x798] sm:$0xff] }
 0x174   : > { %2890 = vmatprep.subr.bf16.mxu1 %v2889_v14 }
 0x176   : > { %2860 = vmatpush3.bf16.msra.mxu0 %v2859_v20  ;;  %v2937_v20 = vpack.c.bf16 %v1472_v10, %v1471_v9  ;;  %v1463_v9 = vld [vmem:[#allocation4 + $0x750] sm:$0xff] }
 0x177   : > { %2892 = vmatpush3.bf16.msra.mxu1 %v2891_v23  ;;  %2862 = vmatprep.subr.bf16.mxu0 %v2861_v24  ;;  %v1456_v23 = vld [vmem:[#allocation4 + $0x718] sm:$0xff]  ;;  %v1441_v24 = vld [vmem:[#allocation4 + $0x6a0] sm:$0xff] }
 0x178   : > { %2894 = vmatprep.subr.bf16.mxu1 %v2893_v29  ;;  %v2907_v29 = vpack.c.bf16 %v1424_v18, %v1423_v17  ;;  %v2939_v31 = vpack.c.bf16 %v1456_v23, %v1455_v19  ;;  %v2909_v32 = vpack.c.bf16 %v1442_v25, %v1441_v24  ;;  %v1433_v19 = vld [vmem:[#allocation4 + $0x660] sm:$0xff]  ;;  %v1466_v25 = vld [vmem:[#allocation4 + $0x768] sm:$0xff] }
 0x179   : > { %v1465_v23 = vld [vmem:[#allocation4 + $0x760] sm:$0xff] }
 0x17a   : > { %v995_v57 = vpop.f32.mrb[4].mxu0  ;;  %2864 = vmatpush3.bf16.msra.mxu0 %v2863_v36  ;;  %v2941_v36 = vpack.c.bf16 %v1474_v0, %v1473_v27  ;;  %v1451_v27 = vld [vmem:[#allocation4 + $0x6f0] sm:$0xff]  ;;  %v1452_v0 = vld [vmem:[#allocation4 + $0x6f8] sm:$0xff]  ;;  %v2959_v34 = vpack.c.bf16 %v1466_v25, %v1465_v23  ;;  %v3000_v25 = vld [vmem:[%s3215_s14] sm:$0xff] }
 0x17b   : > { %v996_v59 = vadd.f32 %v995_v57, %v600_v37  ;;  %v1066_v60 = vpop.f32.mrb[4].mxu1  ;;  %2896 = vmatpush3.bf16.msra.mxu1 %v2895_v38  ;;  %v997_v52 = vpop.f32.mrb[5].mxu0  ;;  %2866 = vmatprep.subr.bf16.mxu0 %v2865_v39  ;;  %v1458_v37 = vld [vmem:[#allocation4 + $0x728] sm:$0xff]  ;;  %v1443_v38 = vld [vmem:[#allocation4 + $0x6b0] sm:$0xff]  ;;  %v1444_v39 = vld [vmem:[#allocation4 + $0x6b8] sm:$0xff] }
 0x17c   : > { %v1067_v2 = vadd.f32 %v1066_v60, %v608_v43  ;;  %v998_v3 = vadd.f32 %v997_v52, %v604_v44  ;;  %v1068_v4 = vpop.f32.mrb[5].mxu1  ;;  %2898 = vmatprep.subr.bf16.mxu1 %v2897_v45  ;;  %v2943_v43 = vpack.c.bf16 %v1458_v37, %v1457_v35  ;;  %v2913_v44 = vpack.c.bf16 %v1444_v39, %v1443_v38  ;;  %v1427_v45 = vld [vmem:[#allocation4 + $0x630] sm:$0xff]  ;;  %v1477_v57 = vld [vmem:[#allocation4 + $0x7c0] sm:$0xff]  ;;  %v1436_v37 = vld [vmem:[#allocation4 + $0x678] sm:$0xff] }
 0x17d   : > { %v1221_v7 = vmax.f32 %v996_v59, 0.0  ;;  %v1069_v8 = vadd.f32 %v1068_v4, %v612_v50  ;;  %v1460_v50 = vld [vmem:[#allocation4 + $0x738] sm:$0xff]  ;;  %v2915_v59 = vpack.c.bf16 %v1428_v46, %v1427_v45  ;;  %v2917_v52 = vpack.c.bf16 %v1446_v56, %v1445_v55  ;;  %v1479_v4 = vld [vmem:[#allocation4 + $0x7d0] sm:$0xff] }
 0x17e   : > { %v1223_v11 = vmax.f32 %v1067_v2, 0.0  ;;  %v1222_v12 = vmax.f32 %v998_v3, 0.0  ;;  %2868 = vmatpush3.bf16.msra.mxu0 %v2867_v58  ;;  %v1478_v58 = vld [vmem:[#allocation4 + $0x7c8] sm:$0xff]  ;;  %v2947_v60 = vpack.c.bf16 %v1460_v50, %v1459_v47  ;;  %v1447_v2 = vld [vmem:[#allocation4 + $0x6d0] sm:$0xff]  ;;  %v1448_v3 = vld [vmem:[#allocation4 + $0x6d8] sm:$0xff]  ;;  %v2929_v35 = vpack.c.bf16 %v1452_v0, %v1451_v27 }
 0x17f   : > { %v1224_v14 = vmax.f32 %v1069_v8, 0.0  ;;  %2900 = vmatpush3.bf16.msra.mxu1 %v2899_v61  ;;  %2902 = vmatprep.subr.bf16.mxu0 %v2901_v53  ;;  %v1429_v61 = vld [vmem:[#allocation4 + $0x640] sm:$0xff]  ;;  %v1430_v53 = vld [vmem:[#allocation4 + $0x648] sm:$0xff]  ;;  %v2949_v63 = vpack.c.bf16 %v1478_v58, %v1477_v57  ;;  %v2921_v6 = vpack.c.bf16 %v1448_v3, %v1447_v2  ;;  %v1432_v8 = vld [vmem:[#allocation4 + $0x658] sm:$0xff]  ;;  %v624_v38 = vrot.slane %v3276_v22, %v591_v26 }
 0x180   : > { %1836 = vmatprep.mubr.f32.mxu0 %v1222_v12  ;;  %2934 = vmatprep.subr.bf16.mxu1 %v2933_v54  ;;  %v1480_v54 = vld [vmem:[#allocation4 + $0x7d8] sm:$0xff]  ;;  %v2919_v51 = vpack.c.bf16 %v1430_v53, %v1429_v61  ;;  %v1449_v12 = vld [vmem:[#allocation4 + $0x6e0] sm:$0xff]  ;;  %v620_v39 = vrot.slane %v3276_v22, %v587_v28 }
 0x181   : > { %1906 = vmatprep.mubr.f32.mxu1 %v1224_v14  ;;  %1837 = vmatmul.mubr.f32.vlgmr.msra.gmra.mrb[12].mxu0 %v1221_v7  ;;  %v1431_v7 = vld [vmem:[#allocation4 + $0x650] sm:$0xff]  ;;  %v2953_v10 = vpack.c.bf16 %v1480_v54, %v1479_v4  ;;  %v1481_v14 = vld [vmem:[#allocation4 + $0x7e0] sm:$0xff] }
 0x182   : > { %1907 = vmatmul.mubr.f32.vlgmr.msra.gmra.mrb[12].mxu1 %v1223_v11  ;;  %2904 = vmatpush3.bf16.msra.mxu0 %v2903_v13  ;;  %v1464_v11 = vld [vmem:[#allocation4 + $0x758] sm:$0xff]  ;;  %v1450_v13 = vld [vmem:[#allocation4 + $0x6e8] sm:$0xff] }
 0x183   : > { %2936 = vmatpush3.bf16.msra.mxu1 %v2935_v15  ;;  %2906 = vmatprep.subr.bf16.mxu0 %v2905_v16  ;;  %v1482_v15 = vld [vmem:[#allocation4 + $0x7e8] sm:$0xff]  ;;  %v2923_v16 = vpack.c.bf16 %v1432_v8, %v1431_v7  ;;  %v2955_v17 = vpack.c.bf16 %v1464_v11, %v1463_v9  ;;  %v2925_v18 = vpack.c.bf16 %v1450_v13, %v1449_v12 }
 0x184   : > { %2938 = vmatprep.subr.bf16.mxu1 %v2937_v20  ;;  %v1434_v20 = vld [vmem:[#allocation4 + $0x668] sm:$0xff]  ;;  %v2957_v24 = vpack.c.bf16 %v1482_v15, %v1481_v14 }
 0x186   : > { %2908 = vmatpush3.bf16.msra.mxu0 %v2907_v29  ;;  %v1483_v29 = vld [vmem:[#allocation4 + $0x7f0] sm:$0xff] }
 0x187   : > { %2940 = vmatpush3.bf16.msra.mxu1 %v2939_v31  ;;  %2910 = vmatprep.subr.bf16.mxu0 %v2909_v32  ;;  %v1484_v31 = vld [vmem:[#allocation4 + $0x7f8] sm:$0xff]  ;;  %v2927_v32 = vpack.c.bf16 %v1434_v20, %v1433_v19 }
 0x188   : > { %2942 = vmatprep.subr.bf16.mxu1 %v2941_v36  ;;  %v1435_v36 = vld [vmem:[#allocation4 + $0x670] sm:$0xff]  ;;  %v2961_v40 = vpack.c.bf16 %v1484_v31, %v1483_v29 }
 0x18a   : > { %2912 = vmatpush3.bf16.msra.mxu0 %v2911_v42  ;;  %v1468_v42 = vld [vmem:[#allocation4 + $0x778] sm:$0xff] }
 0x18b   : > { %2944 = vmatpush3.bf16.msra.mxu1 %v2943_v43  ;;  %2914 = vmatprep.subr.bf16.mxu0 %v2913_v44  ;;  %v2931_v44 = vpack.c.bf16 %v1436_v37, %v1435_v36  ;;  %v2963_v26 = vpack.c.bf16 %v1468_v42, %v1467_v41  ;;  %v2169_v37 = vld [vmem:[%s3325_s5] ss:$0 sm:$0xff] }
 0x18c   : > { %2946 = vmatprep.subr.bf16.mxu1 %v2945_v49 }
 0x18e   : > { %2916 = vmatpush3.bf16.msra.mxu0 %v2915_v59  ;;  %v2168_v59 = vld [vmem:[%s3324_s4] ss:$0 sm:$0xff] }
 0x18f   : > { %2948 = vmatpush3.bf16.msra.mxu1 %v2947_v60  ;;  %2918 = vmatprep.subr.bf16.mxu0 %v2917_v52 }
 0x190   : > { %2950 = vmatprep.subr.bf16.mxu1 %v2949_v63 }
 0x192   : > { %2920 = vmatpush3.bf16.msra.mxu0 %v2919_v51 }
 0x193   : > { %2952 = vmatpush3.bf16.msra.mxu1 %v2951_v5  ;;  %2922 = vmatprep.subr.bf16.mxu0 %v2921_v6 }
 0x194   : > { %2954 = vmatprep.subr.bf16.mxu1 %v2953_v10 }
 0x196   : > { %2924 = vmatpush3.bf16.msra.mxu0 %v2923_v16 }
 0x197   : > { %2956 = vmatpush3.bf16.msra.mxu1 %v2955_v17  ;;  %2926 = vmatprep.subr.bf16.mxu0 %v2925_v18 }
 0x198   : > { %2958 = vmatprep.subr.bf16.mxu1 %v2957_v24 }
 0x19a   : > { %v1137_v43 = vpop.f32.mrb[6].mxu0  ;;  %2928 = vmatpush3.bf16.msra.mxu0 %v2927_v32 }
 0x19b   : > { %v1138_v45 = vadd.f32 %v1137_v43, %v616_v33  ;;  %v1208_v46 = vpop.f32.mrb[6].mxu1  ;;  %2960 = vmatpush3.bf16.msra.mxu1 %v2959_v34  ;;  %v1139_v47 = vpop.f32.mrb[7].mxu0  ;;  %2930 = vmatprep.subr.bf16.mxu0 %v2929_v35 }
 0x19c   : > { %v1209_v49 = vadd.f32 %v1208_v46, %v624_v38  ;;  %v1140_v50 = vadd.f32 %v1139_v47, %v620_v39  ;;  %v1210_v55 = vpop.f32.mrb[7].mxu1  ;;  %2962 = vmatprep.subr.bf16.mxu1 %v2961_v40  ;;  %v2170_v39 = vld [vmem:[%s3326_s6] ss:$0 sm:$0xff] }
 0x19d   : > { %v1211_v28 = vadd.f32 %v1210_v55, %v628_v21  ;;  %v1225_v48 = vmax.f32 %v1138_v45, 0.0 }
 0x19e   : > { %v1227_v56 = vmax.f32 %v1209_v49, 0.0  ;;  %v1226_v57 = vmax.f32 %v1140_v50, 0.0  ;;  %2932 = vmatpush3.bf16.msra.mxu0 %v2931_v44 }
 0x19f   : > { %v1228_v58 = vmax.f32 %v1211_v28, 0.0  ;;  %2964 = vmatpush3.bf16.msra.mxu1 %v2963_v26 }
 0x1a0   : > { %1976 = vmatprep.mubr.f32.mxu0 %v1226_v57 }
 0x1a1   : > { %2046 = vmatprep.mubr.f32.mxu1 %v1228_v58  ;;  %1977 = vmatmul.mubr.f32.vlgmr.msra.gmra.mrb[14].mxu0 %v1225_v48 }
 0x1a2   : > { %2047 = vmatmul.mubr.f32.vlgmr.msra.gmra.mrb[14].mxu1 %v1227_v56 }
 0x214   : > { %v2205_v30 = vpop.f32.mrb[8].mxu0 }
 0x215   : > { %v2240_v22 = vpop.f32.mrb[8].mxu1  ;;  %v2206_v60 = vpop.f32.mrb[9].mxu0 }
 0x216   : > { %v2207_v52 = vadd.f32 %v2206_v60, %v2205_v30  ;;  %v2241_v61 = vpop.f32.mrb[9].mxu1 }
 0x217   : > { %v2242_v53 = vadd.f32 %v2241_v61, %v2240_v22 }
 0x218   : > { %v1559_v62 = vadd.f32 %v2207_v52, %v2168_v59 }
 0x21a   : > { %v1629_v63 = vadd.f32 %v2242_v53, %v1559_v62 }
 0x234   : > { %v2275_v1 = vpop.f32.mrb[10].mxu0 }
 0x235   : > { %v2310_v2 = vpop.f32.mrb[10].mxu1  ;;  %v2276_v3 = vpop.f32.mrb[11].mxu0 }
 0x236   : > { %v2277_v4 = vadd.f32 %v2276_v3, %v2275_v1  ;;  %v2311_v54 = vpop.f32.mrb[11].mxu1 }
 0x237   : > { %v2312_v51 = vadd.f32 %v2311_v54, %v2310_v2 }
 0x238   : > { %v1699_v5 = vadd.f32 %v2277_v4, %v1629_v63 }
 0x23a   : > { %v1769_v6 = vadd.f32 %v2312_v51, %v1699_v5 }
 0x254   : > { %v2345_v7 = vpop.f32.mrb[12].mxu0 }
 0x255   : > { %v2380_v8 = vpop.f32.mrb[12].mxu1  ;;  %v2346_v9 = vpop.f32.mrb[13].mxu0 }
 0x256   : > { %v2347_v10 = vadd.f32 %v2346_v9, %v2345_v7  ;;  %v2381_v11 = vpop.f32.mrb[13].mxu1 }
 0x257   : > { %v2382_v12 = vadd.f32 %v2381_v11, %v2380_v8 }
 0x258   : > { %v1839_v13 = vadd.f32 %v2347_v10, %v1769_v6 }
 0x25a   : > { %v1909_v14 = vadd.f32 %v2382_v12, %v1839_v13 }
 0x274   : > { %v2415_v15 = vpop.f32.mrb[14].mxu0 }
 0x275   : > { %v2450_v16 = vpop.f32.mrb[14].mxu1  ;;  %v2416_v17 = vpop.f32.mrb[15].mxu0 }
 0x276   : > { %v2417_v18 = vadd.f32 %v2416_v17, %v2415_v15  ;;  %v2451_v19 = vpop.f32.mrb[15].mxu1 }
 0x277   : > { %v2452_v20 = vadd.f32 %v2451_v19, %v2450_v16 }
 0x278   : > { %v1979_v23 = vadd.f32 %v2417_v18, %v1909_v14 }
 0x27a   : > { %v2049_v24 = vadd.f32 %v2452_v20, %v1979_v23 }
 0x27c   : > { %v2052_v27 = vadd.f32 %v3000_v25, %v2049_v24 }
 0x27e   : > { %2053 = vadd.xlane.f32.xlu0 %v2052_v27 }
 0x30b   : > { %v2054_v0 = vpop.xlane.xlu0 %2053 }
 0x30c   : > { %v2056_v29 = vmul.f32 0.0078125, %v2054_v0 }
 0x30e   : > { %v2057_v31 = vsub.f32 %v2052_v27, %v2056_v29 }
 0x310   : > { %v2058_v32 = vmul.f32 %v2057_v31, %v2057_v31 }
 0x312   : > { %2059 = vadd.xlane.f32.xlu0 %v2058_v32 }
 0x39f   : > { %v2060_v33 = vpop.xlane.xlu0 %2059 }
 0x3a0   : > { %v2061_v34 = vmul.f32 0.0078125, %v2060_v33 }
 0x3a2   : > { %v2062_v35 = vadd.f32 1e-05, %v2061_v34 }
 0x3a4   : > { %2998 = vrsqrt.f32 %v2062_v35 }
 0x3ae   : > { %v2999_v36 = vpop.eup %2998 }
 0x3af   : > { %v2064_v38 = vmul.f32 %v2999_v36, %v2057_v31 }
 0x3b1   : > { %v2072_v40 = vmul.f32 %v2169_v37, %v2064_v38 }
 0x3b3   : > { %v2080_v41 = vadd.f32 %v2170_v39, %v2072_v40 }
 0x3b5   : > { %2081 = vst [vmem:[%s303_s10] sm:$0xff] %v2080_v41 }
 0x3b6 PF: > { %s19_s24 = sadd.s32 1, %s3071_s24  }
 0x3b7   : > { %p16_p9 = scmp.ge.s32.totalorder %s19_s24, 4  }
 0x3b9   :  { %18 = sbr.rel (!%p16_p9) target bundleno = 2 (0x2), region = 87 }
 0x3c0   :  { %2101 = vsyncpa [#allocation3], 1 }
 0x3c1   :  { %2103 = vsyncpa [#allocation3 + $0x1], 1 }
 0x3c2   :  { %2104 = vsyncpa [#allocation5], 1 }

// kernel: transformer_forward.21
= control target key start
LH: loop header
LB: loop body
LE: loop exit
PB: predicated region body
PF: predicated region fallthrough
CT: control target
= control target key end

     0   :  { %s442_s12 = smov 0   ;;  %s514_s0 = inlined_call_operand.vmem [shape: f32[16,128], index: 0, kind: input, shape index: {}]   ;;  %s515_s1 = inlined_call_operand.vmem [shape: f32[128,128], index: 1, kind: input, shape index: {}]   ;;  %s516_s2 = inlined_call_operand.vmem [shape: f32[1,128], index: 2, kind: input, shape index: {}]   ;;  %s517_s3 = inlined_call_operand.vmem [shape: f32[16,128], index: 3, kind: output, shape index: {}]  }
   0x1 LB: > { %s314_s13 = sadd.s32 4294967295, %s417_s12   ;;  %p318_p0 = scmp.ge.s32.totalorder %s417_s12, 1  ;;  %s417_s12 = sphi %s442_s12, %s13_s12  }
   0x2   : > { %p136_p1 = scmp.lt.s32.totalorder %s417_s12, 3 }
   0x4   : > { %p137_p2 = pnand %p318_p0, %p136_p1 }
   0x5   : > { %v167_v0 = vld [vmem:[%s515_s1] sm:$0xff] (!%p137_p2)  ;;  %v168_v1 = vld [vmem:[%s515_s1 + $0x8] sm:$0xff] (!%p137_p2)  ;;  %v169_v2 = vld [vmem:[%s515_s1 + $0x10] sm:$0xff] (!%p137_p2)  ;;  %v419_v3 = vmov (!%p137_p2), 0.0|0.0   ;;  %vm420_vm0 = vmmov (!%p137_p2), 0   ;;  %v421_v6 = vmov (!%p137_p2), 0.0  }
   0x6   : > { %140 = sbr.rel (%p137_p2) target bundleno = 254 (0xfe), region = 32  ;;  %376 = vmatprep.subr.bf16.mxu0 (!%p137_p2), %v419_v3  ;;  %v377_v4 = vpack.c.bf16 (!%p137_p2), %v168_v1, %v167_v0  ;;  %v170_v5 = vld [vmem:[%s515_s1 + $0x18] sm:$0xff] (!%p137_p2)  ;;  %373 = vmatprep.mubr.msk.f32.mxu0 (!%p137_p2), %vm420_vm0, %v421_v6  ;;  %v171_v8 = vld [vmem:[%s515_s1 + $0x20] sm:$0xff] (!%p137_p2)  ;;  %v172_v9 = vld [vmem:[%s515_s1 + $0x28] sm:$0xff] (!%p137_p2)  ;;  %p158_p3 = scmp.lt.s32.totalorder (!%p137_p2), %s314_s13, 1 }
   0x7   : > { %v380_v7 = vpack.c.bf16 (!%p137_p2), %v170_v5, %v169_v2  ;;  %v383_v10 = vpack.c.bf16 (!%p137_p2), %v172_v9, %v171_v8  ;;  %v173_v11 = vld [vmem:[%s515_s1 + $0x30] sm:$0xff] (!%p137_p2)  ;;  %v174_v12 = vld [vmem:[%s515_s1 + $0x38] sm:$0xff] (!%p137_p2)  ;;  %v175_v14 = vld [vmem:[%s515_s1 + $0x40] sm:$0xff] (!%p137_p2) }
   0x8   : > { %378 = vmatpush3.bf16.msra.mxu0 (!%p137_p2), %v377_v4  ;;  %v386_v13 = vpack.c.bf16 (!%p137_p2), %v174_v12, %v173_v11  ;;  %v176_v15 = vld [vmem:[%s515_s1 + $0x48] sm:$0xff] (!%p137_p2)  ;;  %v177_v17 = vld [vmem:[%s515_s1 + $0x50] sm:$0xff] (!%p137_p2)  ;;  %v178_v18 = vld [vmem:[%s515_s1 + $0x58] sm:$0xff] (!%p137_p2) }
   0x9   : > { %379 = vmatprep.subr.bf16.mxu0 (!%p137_p2), %v419_v3  ;;  %v389_v16 = vpack.c.bf16 (!%p137_p2), %v176_v15, %v175_v14  ;;  %v392_v19 = vpack.c.bf16 (!%p137_p2), %v178_v18, %v177_v17  ;;  %v179_v20 = vld [vmem:[%s515_s1 + $0x60] sm:$0xff] (!%p137_p2)  ;;  %v180_v21 = vld [vmem:[%s515_s1 + $0x68] sm:$0xff] (!%p137_p2)  ;;  %v181_v23 = vld [vmem:[%s515_s1 + $0x70] sm:$0xff] (!%p137_p2) }
   0xa   : > { %v395_v22 = vpack.c.bf16 (!%p137_p2), %v180_v21, %v179_v20  ;;  %v182_v24 = vld [vmem:[%s515_s1 + $0x78] sm:$0xff] (!%p137_p2)  ;;  %v321_v27 = vld [vmem:[%s516_s2] ss:$0 sm:$0xff] (!%p137_p2) }
   0xb   : > { %v398_v25 = vpack.c.bf16 (!%p137_p2), %v182_v24, %v181_v23 }
   0xc   : > { %381 = vmatpush3.bf16.msra.mxu0 (!%p137_p2), %v380_v7 }
   0xd   : > { %382 = vmatprep.subr.bf16.mxu0 %v419_v3  ;;  %s519_s13 = smov (!%p158_p3, %s314_s13), 1 }
   0xe   : > { %s319_s21 = sshll.u32 %s519_s13, 3 }
   0xf   : > { %s161_s24 = scalar_lea.vmem %s514_s0, %s319_s21  ;;  %s165_s29 = scalar_lea.vmem %s517_s3, %s319_s21 }
  0x10   : > { %384 = vmatpush3.bf16.msra.mxu0 %v383_v10  ;;  %v166_v26 = vld [vmem:[%s161_s24] sm:$0xff] }
  0x11   : > { %385 = vmatprep.subr.bf16.mxu0 %v419_v3 }
  0x14   : > { %387 = vmatpush3.bf16.msra.mxu0 %v386_v13 }
  0x15   : > { %388 = vmatprep.subr.bf16.mxu0 %v419_v3 }
  0x18   : > { %390 = vmatpush3.bf16.msra.mxu0 %v389_v16 }
  0x19   : > { %391 = vmatprep.subr.bf16.mxu0 %v419_v3 }
  0x1c   : > { %393 = vmatpush3.bf16.msra.mxu0 %v392_v19 }
  0x1d   : > { %394 = vmatprep.subr.bf16.mxu0 %v419_v3 }
  0x20   : > { %396 = vmatpush3.bf16.msra.mxu0 %v395_v22 }
  0x21   : > { %397 = vmatprep.subr.bf16.mxu0 %v419_v3 }
  0x24   : > { %399 = vmatpush3.bf16.msra.mxu0 %v398_v25 }
  0x27   : > { %374 = vmatmul.mubr.f32.vlgmr.msra.gmra.mrb[0].mxu0 %v166_v26 }
  0xfa   : > { %v256_v28 = vpop.f32.mrb[0].mxu0 }
  0xfb   : > { %v257_v29 = vadd.f32 %v321_v27, %v256_v28  ;;  %v375_v30 = vpop.f32.mrb[1].mxu0 }
  0xfd   : > { %260 = vst [vmem:[%s165_s29] sm:$0xff] %v257_v29 }
  0xfe PF: > { %s13_s12 = sadd.s32 1, %s417_s12  }
  0xff   : > { %p10_p4 = scmp.ge.s32.totalorder %s13_s12, 4  }
 0x101   :  { %12 = sbr.rel (!%p10_p4) target bundleno = 1 (0x1), region = 62 }

</bundles_post_ra>
